<compile_context>
chip_gen: v7x
topology: tpu7x:2x2x1
jax: 0.10.0
libtpu: 0.0.40
codegen_flags: <defaults>
</compile_context>

<pallas_src>
import functools
import numpy as np

import jax
import jax.numpy as jnp
from jax.experimental import pallas as pl
from jax.experimental.pallas import tpu as pltpu

IMG = 28
PATCH = 7
GRID_HW = IMG // PATCH               # 4
NUM_PATCHES = GRID_HW * GRID_HW      # 16
IN_CH = 3
PATCH_FEAT = IN_CH * PATCH * PATCH   # 147
PATCH_FEAT_PAD = 256                 # lane-aligned K for the patch embedding
DIM = 128
HEADS = 4
HEAD_DIM = DIM // HEADS              # 32
MOTION_IN = 64
LSTM_HID = 128
HEAD_HID_PAD = 128                   # fusion-head hidden (64) padded to a lane tile
LN_EPS = 1e-5
NEG_INF = -1e9

B_TILE_DEFAULT = 8                   # 128 token rows / appearance grid step
MOTION_B_TILE = 128                  # max batch rows per motion/head grid step


def _layer_norm(x, gamma, beta):
    mu = jnp.mean(x, axis=-1, keepdims=True)
    var = jnp.mean((x - mu) ** 2, axis=-1, keepdims=True)
    return (x - mu) * jax.lax.rsqrt(var + LN_EPS) * gamma + beta


# ----------------------------------------------------------------------------
# Appearance stream: B_TILE samples (= B_TILE*16 token rows) per grid step
# ----------------------------------------------------------------------------
def appearance_kernel(p3_ref, projwT_ref, projb_ref, saw_ref, sab_ref, pos_ref,
                      mask_ref, pool_ref,
                      wq_ref, wk_ref, wv_ref, bq_ref, bk_ref, bv_ref,
                      wout_ref, bout_ref, ln1g_ref, ln1b_ref,
                      mlpw1_ref, mlpb1_ref, mlpw2_ref, mlpb2_ref,
                      ln2g_ref, ln2b_ref, fcw_ref, fcb_ref,
                      out_ref):
    b_tile = p3_ref.shape[0]
    n_rows = b_tile * NUM_PATCHES

    # Patch embedding: Conv2d(3,128,k=7,s=7) == (rows, 256) @ (256, 128) (K padded).
    p2d = p3_ref[...].reshape(n_rows, PATCH_FEAT_PAD)
    tokens = (jnp.dot(p2d, projwT_ref[...], preferred_element_type=jnp.float32)
              + projb_ref[...])                                    # (rows, 128)
    tokens3 = tokens.reshape(b_tile, NUM_PATCHES, DIM)

    # SpatialAttention: Conv2d(128,1,k=7,pad=3) on the 4x4 token grid is an exact
    # dense linear map; evaluate it from the embedded tokens (no second patch DMA).
    logit = jnp.zeros((b_tile, NUM_PATCHES), jnp.float32)
    for p_idx in range(NUM_PATCHES):                               # static unroll (16)
        logit = logit + jnp.dot(tokens3[:, p_idx, :], saw_ref[p_idx],
                                preferred_element_type=jnp.float32)
    gate = jax.nn.sigmoid(logit + sab_ref[...])                    # (b_tile, 16)

    # Gate in the (b_tile, 16, 128) layout, return to token rows, add pos embed.
    x = (tokens3 * gate[:, :, None]).reshape(n_rows, DIM) + pos_ref[...]

    # MultiheadAttention(dim=128, heads=4): block-diagonal full-tile matmuls.
    scale = 1.0 / (HEAD_DIM ** 0.5)
    mask = mask_ref[...]                                           # (rows, rows) additive
    attn_acc = jnp.zeros((n_rows, DIM), jnp.float32)
    for h in range(HEADS):                                         # static unroll (4)
        qh = jnp.dot(x, wq_ref[h], preferred_element_type=jnp.float32) + bq_ref[h]
        kh = jnp.dot(x, wk_ref[h], preferred_element_type=jnp.float32) + bk_ref[h]
        vh = jnp.dot(x, wv_ref[h], preferred_element_type=jnp.float32) + bv_ref[h]
        s = (jnp.einsum('qd,kd->qk', qh, kh, preferred_element_type=jnp.float32)
             * scale + mask)                                       # (rows, rows)
        s = s - jnp.max(s, axis=-1, keepdims=True)
        e = jnp.exp(s)
        pattn = e * pl.reciprocal(jnp.sum(e, axis=-1, keepdims=True), approx=True)
        o = jnp.dot(pattn, vh, preferred_element_type=jnp.float32)       # (rows, 32)
        attn_acc = attn_acc + jnp.dot(o, wout_ref[h],
                                      preferred_element_type=jnp.float32)
    attn_out = attn_acc + bout_ref[...]

    x = _layer_norm(attn_out + x, ln1g_ref[...], ln1b_ref[...])
    h1 = jnp.maximum(jnp.dot(x, mlpw1_ref[...], preferred_element_type=jnp.float32)
                     + mlpb1_ref[...], 0.0)
    mlp_out = (jnp.dot(h1, mlpw2_ref[...], preferred_element_type=jnp.float32)
               + mlpb2_ref[...])
    x = _layer_norm(mlp_out + x, ln2g_ref[...], ln2b_ref[...])

    # Mean over each sample's 16 tokens as an MXU matmul with a host pooling matrix.
    feat = jnp.dot(pool_ref[...], x, preferred_element_type=jnp.float32)  # (b_tile,128)
    out_ref[...] = (jnp.dot(feat, fcw_ref[...], preferred_element_type=jnp.float32)
                    + fcb_ref[...])


def appearance_stream(x_img, p, b_tile):
    B = x_img.shape[0]
    assert B % b_tile == 0

    # im2col for the stride-7 patch conv: (B,3,28,28) -> (B,16,147), feature order
    # (c, kh, kw) matching Conv2d weights; zero-pad features 147 -> 256.
    xp = x_img.reshape(B, IN_CH, GRID_HW, PATCH, GRID_HW, PATCH)
    patches = xp.transpose(0, 2, 4, 1, 3, 5).reshape(B, NUM_PATCHES, PATCH_FEAT)
    patches = jnp.pad(patches, ((0, 0), (0, 0), (0, PATCH_FEAT_PAD - PATCH_FEAT)))

    # Host-precomputed constants (no in-kernel iota/where): tiled pos embed,
    # block-diagonal additive attention mask, per-sample mean-pool matrix.
    pos_tiled = jnp.tile(p['pos'], (b_tile, 1))                    # (rows, 128)
    blk = np.kron(np.eye(b_tile, dtype=np.float32),
                  np.ones((NUM_PATCHES, NUM_PATCHES), np.float32))
    attn_mask = ((1.0 - blk) * NEG_INF).astype(np.float32)         # (rows, rows)
    pool = np.kron(np.eye(b_tile, dtype=np.float32),
                   np.full((1, NUM_PATCHES), 1.0 / NUM_PATCHES, np.float32))

    ins = (patches,
           p['proj_wT'], p['proj_b'], p['saw'], p['sa_bias'], pos_tiled,
           attn_mask, pool,
           p['wq'], p['wk'], p['wv'], p['bq'], p['bk'], p['bv'],
           p['wout'], p['bout'], p['ln1_g'], p['ln1_b'],
           p['mlp_w1T'], p['mlp_b1'], p['mlp_w2T'], p['mlp_b2'],
           p['ln2_g'], p['ln2_b'], p['appfc_wT'], p['appfc_b'])

    def _const(a):
        nd = np.ndim(a)
        return pl.BlockSpec(tuple(np.shape(a)), lambda b, _n=nd: (0,) * _n)

    in_specs = [pl.BlockSpec((b_tile, NUM_PATCHES, PATCH_FEAT_PAD),
                             lambda b: (b, 0, 0))]
    in_specs += [_const(a) for a in ins[1:]]

    return pl.pallas_call(
        appearance_kernel,
        grid=(B // b_tile,),
        in_specs=in_specs,
        out_specs=pl.BlockSpec((b_tile, DIM), lambda b: (b, 0)),
        out_shape=jax.ShapeDtypeStruct((B, DIM), jnp.float32),
        compiler_params=pltpu.CompilerParams(dimension_semantics=("parallel",)),
    )(*ins)


# ----------------------------------------------------------------------------
# Motion stream + fusion head (one kernel, batch grid, parallel semantics)
# ----------------------------------------------------------------------------
def motion_head_kernel(x_ref, fa_ref, wih_T_ref, whh_T_ref, b_ref,
                       attn_w_ref, attn_b_ref,
                       w1a_ref, w1b_ref, b1_ref, w2_ref, b2_ref,
                       fm_ref, logits_ref, gx_ref, hs_ref):
    T, bm, _ = x_ref.shape

    # LSTM input projection hoisted out of the recurrence; result lives in VMEM
    # scratch and is sliced per timestep (bounds live ranges across the unroll).
    x2d = x_ref[...].reshape(T * bm, MOTION_IN)
    gx_ref[...] = (jnp.dot(x2d, wih_T_ref[...], preferred_element_type=jnp.float32)
                   + b_ref[...]).reshape(T, bm, 4 * LSTM_HID)

    whh_T = whh_T_ref[...]
    h = jnp.zeros((bm, LSTM_HID), jnp.float32)
    c = jnp.zeros((bm, LSTM_HID), jnp.float32)
    for t in range(T):                                             # static unroll over T
        g = gx_ref[t] + jnp.dot(h, whh_T, preferred_element_type=jnp.float32)
        i_g = jax.nn.sigmoid(g[:, 0:LSTM_HID])
        f_g = jax.nn.sigmoid(g[:, LSTM_HID:2 * LSTM_HID])
        g_g = jnp.tanh(g[:, 2 * LSTM_HID:3 * LSTM_HID])
        o_g = jax.nn.sigmoid(g[:, 3 * LSTM_HID:4 * LSTM_HID])
        c = f_g * c + i_g * g_g
        h = o_g * jnp.tanh(c)
        hs_ref[t] = h                                              # (bm, 128) -> scratch

    # TemporalAttention: Linear(128,1) score as VPU multiply + lane reduce,
    # softmax over T, weighted sum.
    hs = hs_ref[...]                                               # (T, bm, 128)
    sc = jnp.sum(hs * attn_w_ref[...], axis=-1, keepdims=True) + attn_b_ref[...]
    m = jnp.max(sc, axis=0, keepdims=True)
    e = jnp.exp(sc - m)
    wgt = e * pl.reciprocal(jnp.sum(e, axis=0, keepdims=True), approx=True)
    feat = jnp.sum(hs * wgt, axis=0)                               # (bm, 128)
    fm_ref[...] = feat

    # Fusion head: cat(fa, fm) -> Linear(256,64) -> ReLU -> Linear(64, C), with the
    # hidden dim padded to 128 and the output padded to 128 lanes (lane-dense).
    h1 = jnp.maximum(jnp.dot(fa_ref[...], w1a_ref[...], preferred_element_type=jnp.float32)
                     + jnp.dot(feat, w1b_ref[...], preferred_element_type=jnp.float32)
                     + b1_ref[...], 0.0)
    logits_ref[...] = (jnp.dot(h1, w2_ref[...], preferred_element_type=jnp.float32)
                       + b2_ref[...])


def motion_head_stream(x_motion, fa, p, mb):
    B, T, _ = x_motion.shape
    assert B % mb == 0
    x_tm = jnp.transpose(x_motion, (1, 0, 2))                      # (T, B, 64) time-major

    def _const(a):
        nd = np.ndim(a)
        return pl.BlockSpec(tuple(np.shape(a)), lambda i, _n=nd: (0,) * _n)

    weights = (p['wih_T'], p['whh_T'], p['lstm_b'], p['tattn_w'], p['tattn_b'],
               p['head_w1aT'], p['head_w1bT'], p['head_b1'], p['head_w2T'], p['head_b2'])

    return pl.pallas_call(
        motion_head_kernel,
        grid=(B // mb,),
        in_specs=[pl.BlockSpec((T, mb, MOTION_IN), lambda i: (0, i, 0)),
                  pl.BlockSpec((mb, DIM), lambda i: (i, 0))]
                 + [_const(a) for a in weights],
        out_specs=(pl.BlockSpec((mb, LSTM_HID), lambda i: (i, 0)),
                   pl.BlockSpec((mb, DIM), lambda i: (i, 0))),
        out_shape=(jax.ShapeDtypeStruct((B, LSTM_HID), jnp.float32),
                   jax.ShapeDtypeStruct((B, DIM), jnp.float32)),
        scratch_shapes=[pltpu.VMEM((T, mb, 4 * LSTM_HID), jnp.float32),
                        pltpu.VMEM((T, mb, LSTM_HID), jnp.float32)],
        compiler_params=pltpu.CompilerParams(dimension_semantics=("parallel",)),
    )(x_tm, fa, *weights)


# Head-only kernel (used when motion_input is None -> fm = zeros).
def head_kernel(fa_ref, fm_ref, w1a_ref, w1b_ref, b1_ref, w2_ref, b2_ref, out_ref):
    h1 = jnp.maximum(jnp.dot(fa_ref[...], w1a_ref[...], preferred_element_type=jnp.float32)
                     + jnp.dot(fm_ref[...], w1b_ref[...], preferred_element_type=jnp.float32)
                     + b1_ref[...], 0.0)
    out_ref[...] = (jnp.dot(h1, w2_ref[...], preferred_element_type=jnp.float32)
                    + b2_ref[...])


def head_only(fa, fm, p, mb):
    B = fa.shape[0]
    assert B % mb == 0

    def _const(a):
        nd = np.ndim(a)
        return pl.BlockSpec(tuple(np.shape(a)), lambda i, _n=nd: (0,) * _n)

    weights = (p['head_w1aT'], p['head_w1bT'], p['head_b1'], p['head_w2T'], p['head_b2'])
    return pl.pallas_call(
        head_kernel,
        grid=(B // mb,),
        in_specs=[pl.BlockSpec((mb, DIM), lambda i: (i, 0)),
                  pl.BlockSpec((mb, DIM), lambda i: (i, 0))]
                 + [_const(a) for a in weights],
        out_specs=pl.BlockSpec((mb, DIM), lambda i: (i, 0)),
        out_shape=jax.ShapeDtypeStruct((B, DIM), jnp.float32),
        compiler_params=pltpu.CompilerParams(dimension_semantics=("parallel",)),
    )(fa, fm, *weights)


# ----------------------------------------------------------------------------
# Full forward
# ----------------------------------------------------------------------------
def htnet_forward(params, num_classes, appearance_input, motion_input=None,
                  return_features=False, b_tile=B_TILE_DEFAULT):
    B = appearance_input.shape[0]
    # One padding granularity so both the appearance tile and motion/head tile divide.
    if B > MOTION_B_TILE:
        assert MOTION_B_TILE % b_tile == 0
        grain = MOTION_B_TILE
    else:
        grain = b_tile
    B_pad = ((B + grain - 1) // grain) * grain
    mb = min(B_pad, MOTION_B_TILE)

    if B_pad != B:
        appearance_input = jnp.pad(appearance_input,
                                   ((0, B_pad - B), (0, 0), (0, 0), (0, 0)))

    fa = appearance_stream(appearance_input, params, b_tile)       # (B_pad, 128)

    if motion_input is not None:
        if B_pad != B:
            motion_input = jnp.pad(motion_input, ((0, B_pad - B), (0, 0), (0, 0)))
        fm, logits_pad = motion_head_stream(motion_input, fa, params, mb)
    else:
        fm = jnp.zeros_like(fa)
        logits_pad = head_only(fa, fm, params, mb)

    if return_features:
        return jnp.concatenate([fa, fm], axis=1)[:B]
    return logits_pad[:B, :num_classes]


# ----------------------------------------------------------------------------
# Deterministic parameter construction (PyTorch layouts -> kernel layouts)
# ----------------------------------------------------------------------------
def init_params(key, num_classes):
    ks = jax.random.split(key, 25)

    def w(i, shape, scale=0.02):
        return (scale * jax.random.normal(ks[i], shape)).astype(jnp.float32)

    # AppearanceStream.proj : Conv2d(3, 128, k=7, s=7)
    proj_w = w(0, (DIM, IN_CH, PATCH, PATCH)); proj_b = w(1, (DIM,))
    # SpatialAttention.conv : Conv2d(128, 1, k=7, pad=3)
    sa_w = w(2, (1, DIM, PATCH, PATCH)); sa_b = w(3, (1,))
    pos = w(4, (1, NUM_PATCHES, DIM), scale=1.0)                   # torch.randn
    inproj_w = w(5, (3 * DIM, DIM)); inproj_b = w(6, (3 * DIM,))
    outproj_w = w(7, (DIM, DIM)); outproj_b = w(8, (DIM,))
    mlp_w1 = w(9, (DIM, DIM)); mlp_b1 = w(10, (DIM,))
    mlp_w2 = w(11, (DIM, DIM)); mlp_b2 = w(12, (DIM,))
    appfc_w = w(13, (DIM, DIM)); appfc_b = w(14, (DIM,))
    # MotionStream: LSTM(64 -> 128), gate order (i, f, g, o) like PyTorch.
    wih = w(15, (4 * LSTM_HID, MOTION_IN)); whh = w(16, (4 * LSTM_HID, LSTM_HID))
    bih = w(17, (4 * LSTM_HID,)); bhh = w(18, (4 * LSTM_HID,))
    tattn_w = w(19, (1, LSTM_HID)); tattn_b = w(20, (1,))
    # HTNet head: Linear(256, 64) -> ReLU -> Linear(64, num_classes)
    head_w1 = w(21, (64, 2 * DIM)); head_b1 = w(22, (64,))
    head_w2 = w(23, (num_classes, 64)); head_b2 = w(24, (num_classes,))

    # --- SpatialAttention conv (k=7, pad=3) on a 4x4 grid is an exact linear map;
    #     store it as saw[p_in, c, p_out] for per-patch matmuls on the tokens. ---
    saw_np = np.asarray(sa_w)
    saw = np.zeros((NUM_PATCHES, DIM, NUM_PATCHES), np.float32)
    for io in range(GRID_HW):
        for jo in range(GRID_HW):
            po = io * GRID_HW + jo
            for ii in range(GRID_HW):
                for ji in range(GRID_HW):
                    pi = ii * GRID_HW + ji
                    saw[pi, :, po] = saw_np[0, :, ii - io + PATCH // 2, ji - jo + PATCH // 2]
    sa_bias = np.full((1, NUM_PATCHES), float(np.asarray(sa_b)[0]), np.float32)

    # Patch-embedding weight, zero-padded along K (147 -> 256).
    proj_wT = np.asarray(proj_w).reshape(DIM, PATCH_FEAT).T.astype(np.float32)
    proj_wT_pad = np.zeros((PATCH_FEAT_PAD, DIM), np.float32)
    proj_wT_pad[:PATCH_FEAT] = proj_wT

    # Per-head MHA projections (avoid 32-lane slicing inside the kernel).
    inp = np.asarray(inproj_w); inb = np.asarray(inproj_b)
    Wq, Wk, Wv = inp[:DIM], inp[DIM:2 * DIM], inp[2 * DIM:]
    wq = np.stack([Wq[h * HEAD_DIM:(h + 1) * HEAD_DIM].T for h in range(HEADS)])
    wk = np.stack([Wk[h * HEAD_DIM:(h + 1) * HEAD_DIM].T for h in range(HEADS)])
    wv = np.stack([Wv[h * HEAD_DIM:(h + 1) * HEAD_DIM].T for h in range(HEADS)])
    bq = np.stack([inb[h * HEAD_DIM:(h + 1) * HEAD_DIM].reshape(1, HEAD_DIM)
                   for h in range(HEADS)])
    bk = np.stack([inb[DIM + h * HEAD_DIM:DIM + (h + 1) * HEAD_DIM].reshape(1, HEAD_DIM)
                   for h in range(HEADS)])
    bv = np.stack([inb[2 * DIM + h * HEAD_DIM:2 * DIM + (h + 1) * HEAD_DIM].reshape(1, HEAD_DIM)
                   for h in range(HEADS)])
    outp = np.asarray(outproj_w)
    wout = np.stack([outp[:, h * HEAD_DIM:(h + 1) * HEAD_DIM].T for h in range(HEADS)])

    # Fusion head: hidden 64 -> 128 pad and output num_classes -> 128 pad (lane-dense).
    h1w = np.asarray(head_w1)
    w1aT = np.zeros((DIM, HEAD_HID_PAD), np.float32); w1aT[:, :64] = h1w[:, :DIM].T
    w1bT = np.zeros((DIM, HEAD_HID_PAD), np.float32); w1bT[:, :64] = h1w[:, DIM:].T
    b1_pad = np.zeros((1, HEAD_HID_PAD), np.float32); b1_pad[0, :64] = np.asarray(head_b1)
    w2T_pad = np.zeros((HEAD_HID_PAD, DIM), np.float32)
    w2T_pad[:64, :num_classes] = np.asarray(head_w2).T
    b2_pad = np.zeros((1, DIM), np.float32); b2_pad[0, :num_classes] = np.asarray(head_b2)

    f32 = lambda a: jnp.asarray(a, jnp.float32)
    return dict(
        proj_wT=f32(proj_wT_pad), proj_b=f32(proj_b.reshape(1, DIM)),
        saw=f32(saw), sa_bias=f32(sa_bias),
        pos=f32(pos.reshape(NUM_PATCHES, DIM)),
        wq=f32(wq), wk=f32(wk), wv=f32(wv), bq=f32(bq), bk=f32(bk), bv=f32(bv),
        wout=f32(wout), bout=f32(outproj_b.reshape(1, DIM)),
        ln1_g=jnp.ones((1, DIM), jnp.float32), ln1_b=jnp.zeros((1, DIM), jnp.float32),
        mlp_w1T=f32(mlp_w1.T), mlp_b1=f32(mlp_b1.reshape(1, DIM)),
        mlp_w2T=f32(mlp_w2.T), mlp_b2=f32(mlp_b2.reshape(1, DIM)),
        ln2_g=jnp.ones((1, DIM), jnp.float32), ln2_b=jnp.zeros((1, DIM), jnp.float32),
        appfc_wT=f32(appfc_w.T), appfc_b=f32(appfc_b.reshape(1, DIM)),
        wih_T=f32(wih.T), whh_T=f32(whh.T),
        lstm_b=f32((bih + bhh).reshape(1, 4 * LSTM_HID)),
        tattn_w=f32(tattn_w.reshape(1, 1, LSTM_HID)),
        tattn_b=f32(tattn_b.reshape(1, 1, 1)),
        head_w1aT=f32(w1aT), head_w1bT=f32(w1bT), head_b1=f32(b1_pad),
        head_w2T=f32(w2T_pad), head_b2=f32(b2_pad),
    )


if __name__ == "__main__":
    num_classes = 5
    key = jax.random.PRNGKey(0)
    kp, ka, km = jax.random.split(key, 3)
    params = init_params(kp, num_classes)

    B, T = 2, 8
    # NOTE: the PyTorch docstring claims (B, 1, 224, 224) but AppearanceStream's
    # Conv2d requires 3 channels at 28x28; we follow the actual module code.
    appearance_input = jax.random.normal(ka, (B, IN_CH, IMG, IMG), jnp.float32)
    motion_input = jax.random.normal(km, (B, T, MOTION_IN), jnp.float32)

    fwd = jax.jit(functools.partial(htnet_forward, params, num_classes))
    logits = fwd(appearance_input, motion_input)
    jax.block_until_ready(logits)
    assert logits.shape == (B, num_classes)
    assert bool(jnp.all(jnp.isfinite(logits)))
    print("KERNEL_OK")
</pallas_src>

<mosaic_0001>
module attributes {stable_mosaic.version = 11 : i64} {
  func.func @appearance_kernel(%arg0: i32, %arg1: memref<8x16x256xf32, #tpu.memory_space<vmem>>, %arg2: memref<256x128xf32, #tpu.memory_space<vmem>>, %arg3: memref<1x128xf32, #tpu.memory_space<vmem>>, %arg4: memref<16x128x16xf32, #tpu.memory_space<vmem>>, %arg5: memref<1x16xf32, #tpu.memory_space<vmem>>, %arg6: memref<128x128xf32, #tpu.memory_space<vmem>>, %arg7: memref<128x128xf32, #tpu.memory_space<vmem>>, %arg8: memref<8x128xf32, #tpu.memory_space<vmem>>, %arg9: memref<4x128x32xf32, #tpu.memory_space<vmem>>, %arg10: memref<4x128x32xf32, #tpu.memory_space<vmem>>, %arg11: memref<4x128x32xf32, #tpu.memory_space<vmem>>, %arg12: memref<4x1x32xf32, #tpu.memory_space<vmem>>, %arg13: memref<4x1x32xf32, #tpu.memory_space<vmem>>, %arg14: memref<4x1x32xf32, #tpu.memory_space<vmem>>, %arg15: memref<4x32x128xf32, #tpu.memory_space<vmem>>, %arg16: memref<1x128xf32, #tpu.memory_space<vmem>>, %arg17: memref<1x128xf32, #tpu.memory_space<vmem>>, %arg18: memref<1x128xf32, #tpu.memory_space<vmem>>, %arg19: memref<128x128xf32, #tpu.memory_space<vmem>>, %arg20: memref<1x128xf32, #tpu.memory_space<vmem>>, %arg21: memref<128x128xf32, #tpu.memory_space<vmem>>, %arg22: memref<1x128xf32, #tpu.memory_space<vmem>>, %arg23: memref<1x128xf32, #tpu.memory_space<vmem>>, %arg24: memref<1x128xf32, #tpu.memory_space<vmem>>, %arg25: memref<128x128xf32, #tpu.memory_space<vmem>>, %arg26: memref<1x128xf32, #tpu.memory_space<vmem>>, %arg27: memref<8x128xf32, #tpu.memory_space<vmem>>) attributes {dimension_semantics = [#tpu.dimension_semantics<parallel>], iteration_bounds = array<i64: 1>, scalar_prefetch = 0 : i64, scratch_operands = 0 : i64, tpu.core_type = #tpu.core_type<tc>, window_params = [{transform_indices = @transform_0, window_bounds = array<i64: 8, 16, 256>}, {pipeline_mode = #tpu.pipeline_mode<synchronous>, transform_indices = @transform_1, window_bounds = array<i64: 256, 128>}, {pipeline_mode = #tpu.pipeline_mode<synchronous>, transform_indices = @transform_2, window_bounds = array<i64: 1, 128>}, {pipeline_mode = #tpu.pipeline_mode<synchronous>, transform_indices = @transform_3, window_bounds = array<i64: 16, 128, 16>}, {pipeline_mode = #tpu.pipeline_mode<synchronous>, transform_indices = @transform_4, window_bounds = array<i64: 1, 16>}, {pipeline_mode = #tpu.pipeline_mode<synchronous>, transform_indices = @transform_5, window_bounds = array<i64: 128, 128>}, {pipeline_mode = #tpu.pipeline_mode<synchronous>, transform_indices = @transform_6, window_bounds = array<i64: 128, 128>}, {pipeline_mode = #tpu.pipeline_mode<synchronous>, transform_indices = @transform_7, window_bounds = array<i64: 8, 128>}, {pipeline_mode = #tpu.pipeline_mode<synchronous>, transform_indices = @transform_8, window_bounds = array<i64: 4, 128, 32>}, {pipeline_mode = #tpu.pipeline_mode<synchronous>, transform_indices = @transform_9, window_bounds = array<i64: 4, 128, 32>}, {pipeline_mode = #tpu.pipeline_mode<synchronous>, transform_indices = @transform_10, window_bounds = array<i64: 4, 128, 32>}, {pipeline_mode = #tpu.pipeline_mode<synchronous>, transform_indices = @transform_11, window_bounds = array<i64: 4, 1, 32>}, {pipeline_mode = #tpu.pipeline_mode<synchronous>, transform_indices = @transform_12, window_bounds = array<i64: 4, 1, 32>}, {pipeline_mode = #tpu.pipeline_mode<synchronous>, transform_indices = @transform_13, window_bounds = array<i64: 4, 1, 32>}, {pipeline_mode = #tpu.pipeline_mode<synchronous>, transform_indices = @transform_14, window_bounds = array<i64: 4, 32, 128>}, {pipeline_mode = #tpu.pipeline_mode<synchronous>, transform_indices = @transform_15, window_bounds = array<i64: 1, 128>}, {pipeline_mode = #tpu.pipeline_mode<synchronous>, transform_indices = @transform_16, window_bounds = array<i64: 1, 128>}, {pipeline_mode = #tpu.pipeline_mode<synchronous>, transform_indices = @transform_17, window_bounds = array<i64: 1, 128>}, {pipeline_mode = #tpu.pipeline_mode<synchronous>, transform_indices = @transform_18, window_bounds = array<i64: 128, 128>}, {pipeline_mode = #tpu.pipeline_mode<synchronous>, transform_indices = @transform_19, window_bounds = array<i64: 1, 128>}, {pipeline_mode = #tpu.pipeline_mode<synchronous>, transform_indices = @transform_20, window_bounds = array<i64: 128, 128>}, {pipeline_mode = #tpu.pipeline_mode<synchronous>, transform_indices = @transform_21, window_bounds = array<i64: 1, 128>}, {pipeline_mode = #tpu.pipeline_mode<synchronous>, transform_indices = @transform_22, window_bounds = array<i64: 1, 128>}, {pipeline_mode = #tpu.pipeline_mode<synchronous>, transform_indices = @transform_23, window_bounds = array<i64: 1, 128>}, {pipeline_mode = #tpu.pipeline_mode<synchronous>, transform_indices = @transform_24, window_bounds = array<i64: 128, 128>}, {pipeline_mode = #tpu.pipeline_mode<synchronous>, transform_indices = @transform_25, window_bounds = array<i64: 1, 128>}, {transform_indices = @transform_26, window_bounds = array<i64: 8, 128>}]} {
    %c0 = arith.constant 0 : index
    %c0_0 = arith.constant 0 : index
    %c0_1 = arith.constant 0 : index
    %0 = vector.load %arg1[%c0, %c0_0, %c0_1] : memref<8x16x256xf32, #tpu.memory_space<vmem>>, vector<8x16x256xf32>
    %1 = vector.shape_cast %0 : vector<8x16x256xf32> to vector<128x256xf32>
    %c0_2 = arith.constant 0 : index
    %c0_3 = arith.constant 0 : index
    %2 = vector.load %arg2[%c0_2, %c0_3] : memref<256x128xf32, #tpu.memory_space<vmem>>, vector<256x128xf32>
    %cst = arith.constant dense<0.000000e+00> : vector<128x128xf32>
    %3 = tpu.matmul %1, %2, %cst {dimension_numbers = #tpu.dot_dimension_numbers<[1], [0], [0], [1], [0, 0, 1, 1], [], []>} : vector<128x256xf32>, vector<256x128xf32>, vector<128x128xf32> -> vector<128x128xf32>
    %c0_4 = arith.constant 0 : index
    %c0_5 = arith.constant 0 : index
    %4 = vector.load %arg3[%c0_4, %c0_5] : memref<1x128xf32, #tpu.memory_space<vmem>>, vector<1x128xf32>
    %5 = vector.broadcast %4 : vector<1x128xf32> to vector<128x128xf32>
    %6 = arith.addf %3, %5 : vector<128x128xf32>
    %7 = vector.shape_cast %6 : vector<128x128xf32> to vector<8x16x128xf32>
    %cst_6 = arith.constant 0.000000e+00 : f32
    %8 = vector.broadcast %cst_6 : f32 to vector<8x16xf32>
    %9 = vector.extract_strided_slice %7 {offsets = [0, 0, 0], sizes = [8, 1, 128], strides = [1, 1, 1]} : vector<8x16x128xf32> to vector<8x1x128xf32>
    %10 = vector.shape_cast %9 : vector<8x1x128xf32> to vector<8x128xf32>
    %c0_7 = arith.constant 0 : index
    %c0_8 = arith.constant 0 : index
    %c0_9 = arith.constant 0 : index
    %11 = vector.load %arg4[%c0_7, %c0_8, %c0_9] : memref<16x128x16xf32, #tpu.memory_space<vmem>>, vector<1x128x16xf32>
    %12 = vector.shape_cast %11 : vector<1x128x16xf32> to vector<128x16xf32>
    %cst_10 = arith.constant dense<0.000000e+00> : vector<8x16xf32>
    %13 = tpu.matmul %10, %12, %cst_10 {dimension_numbers = #tpu.dot_dimension_numbers<[1], [0], [0], [1], [0, 0, 1, 1], [], []>} : vector<8x128xf32>, vector<128x16xf32>, vector<8x16xf32> -> vector<8x16xf32>
    %14 = arith.addf %8, %13 : vector<8x16xf32>
    %15 = vector.extract_strided_slice %7 {offsets = [0, 1, 0], sizes = [8, 1, 128], strides = [1, 1, 1]} : vector<8x16x128xf32> to vector<8x1x128xf32>
    %16 = vector.shape_cast %15 : vector<8x1x128xf32> to vector<8x128xf32>
    %c1 = arith.constant 1 : index
    %c0_11 = arith.constant 0 : index
    %c0_12 = arith.constant 0 : index
    %17 = vector.load %arg4[%c1, %c0_11, %c0_12] : memref<16x128x16xf32, #tpu.memory_space<vmem>>, vector<1x128x16xf32>
    %18 = vector.shape_cast %17 : vector<1x128x16xf32> to vector<128x16xf32>
    %cst_13 = arith.constant dense<0.000000e+00> : vector<8x16xf32>
    %19 = tpu.matmul %16, %18, %cst_13 {dimension_numbers = #tpu.dot_dimension_numbers<[1], [0], [0], [1], [0, 0, 1, 1], [], []>} : vector<8x128xf32>, vector<128x16xf32>, vector<8x16xf32> -> vector<8x16xf32>
    %20 = arith.addf %14, %19 : vector<8x16xf32>
    %21 = vector.extract_strided_slice %7 {offsets = [0, 2, 0], sizes = [8, 1, 128], strides = [1, 1, 1]} : vector<8x16x128xf32> to vector<8x1x128xf32>
    %22 = vector.shape_cast %21 : vector<8x1x128xf32> to vector<8x128xf32>
    %c2 = arith.constant 2 : index
    %c0_14 = arith.constant 0 : index
    %c0_15 = arith.constant 0 : index
    %23 = vector.load %arg4[%c2, %c0_14, %c0_15] : memref<16x128x16xf32, #tpu.memory_space<vmem>>, vector<1x128x16xf32>
    %24 = vector.shape_cast %23 : vector<1x128x16xf32> to vector<128x16xf32>
    %cst_16 = arith.constant dense<0.000000e+00> : vector<8x16xf32>
    %25 = tpu.matmul %22, %24, %cst_16 {dimension_numbers = #tpu.dot_dimension_numbers<[1], [0], [0], [1], [0, 0, 1, 1], [], []>} : vector<8x128xf32>, vector<128x16xf32>, vector<8x16xf32> -> vector<8x16xf32>
    %26 = arith.addf %20, %25 : vector<8x16xf32>
    %27 = vector.extract_strided_slice %7 {offsets = [0, 3, 0], sizes = [8, 1, 128], strides = [1, 1, 1]} : vector<8x16x128xf32> to vector<8x1x128xf32>
    %28 = vector.shape_cast %27 : vector<8x1x128xf32> to vector<8x128xf32>
    %c3 = arith.constant 3 : index
    %c0_17 = arith.constant 0 : index
    %c0_18 = arith.constant 0 : index
    %29 = vector.load %arg4[%c3, %c0_17, %c0_18] : memref<16x128x16xf32, #tpu.memory_space<vmem>>, vector<1x128x16xf32>
    %30 = vector.shape_cast %29 : vector<1x128x16xf32> to vector<128x16xf32>
    %cst_19 = arith.constant dense<0.000000e+00> : vector<8x16xf32>
    %31 = tpu.matmul %28, %30, %cst_19 {dimension_numbers = #tpu.dot_dimension_numbers<[1], [0], [0], [1], [0, 0, 1, 1], [], []>} : vector<8x128xf32>, vector<128x16xf32>, vector<8x16xf32> -> vector<8x16xf32>
    %32 = arith.addf %26, %31 : vector<8x16xf32>
    %33 = vector.extract_strided_slice %7 {offsets = [0, 4, 0], sizes = [8, 1, 128], strides = [1, 1, 1]} : vector<8x16x128xf32> to vector<8x1x128xf32>
    %34 = vector.shape_cast %33 : vector<8x1x128xf32> to vector<8x128xf32>
    %c4 = arith.constant 4 : index
    %c0_20 = arith.constant 0 : index
    %c0_21 = arith.constant 0 : index
    %35 = vector.load %arg4[%c4, %c0_20, %c0_21] : memref<16x128x16xf32, #tpu.memory_space<vmem>>, vector<1x128x16xf32>
    %36 = vector.shape_cast %35 : vector<1x128x16xf32> to vector<128x16xf32>
    %cst_22 = arith.constant dense<0.000000e+00> : vector<8x16xf32>
    %37 = tpu.matmul %34, %36, %cst_22 {dimension_numbers = #tpu.dot_dimension_numbers<[1], [0], [0], [1], [0, 0, 1, 1], [], []>} : vector<8x128xf32>, vector<128x16xf32>, vector<8x16xf32> -> vector<8x16xf32>
    %38 = arith.addf %32, %37 : vector<8x16xf32>
    %39 = vector.extract_strided_slice %7 {offsets = [0, 5, 0], sizes = [8, 1, 128], strides = [1, 1, 1]} : vector<8x16x128xf32> to vector<8x1x128xf32>
    %40 = vector.shape_cast %39 : vector<8x1x128xf32> to vector<8x128xf32>
    %c5 = arith.constant 5 : index
    %c0_23 = arith.constant 0 : index
    %c0_24 = arith.constant 0 : index
    %41 = vector.load %arg4[%c5, %c0_23, %c0_24] : memref<16x128x16xf32, #tpu.memory_space<vmem>>, vector<1x128x16xf32>
    %42 = vector.shape_cast %41 : vector<1x128x16xf32> to vector<128x16xf32>
    %cst_25 = arith.constant dense<0.000000e+00> : vector<8x16xf32>
    %43 = tpu.matmul %40, %42, %cst_25 {dimension_numbers = #tpu.dot_dimension_numbers<[1], [0], [0], [1], [0, 0, 1, 1], [], []>} : vector<8x128xf32>, vector<128x16xf32>, vector<8x16xf32> -> vector<8x16xf32>
    %44 = arith.addf %38, %43 : vector<8x16xf32>
    %45 = vector.extract_strided_slice %7 {offsets = [0, 6, 0], sizes = [8, 1, 128], strides = [1, 1, 1]} : vector<8x16x128xf32> to vector<8x1x128xf32>
    %46 = vector.shape_cast %45 : vector<8x1x128xf32> to vector<8x128xf32>
    %c6 = arith.constant 6 : index
    %c0_26 = arith.constant 0 : index
    %c0_27 = arith.constant 0 : index
    %47 = vector.load %arg4[%c6, %c0_26, %c0_27] : memref<16x128x16xf32, #tpu.memory_space<vmem>>, vector<1x128x16xf32>
    %48 = vector.shape_cast %47 : vector<1x128x16xf32> to vector<128x16xf32>
    %cst_28 = arith.constant dense<0.000000e+00> : vector<8x16xf32>
    %49 = tpu.matmul %46, %48, %cst_28 {dimension_numbers = #tpu.dot_dimension_numbers<[1], [0], [0], [1], [0, 0, 1, 1], [], []>} : vector<8x128xf32>, vector<128x16xf32>, vector<8x16xf32> -> vector<8x16xf32>
    %50 = arith.addf %44, %49 : vector<8x16xf32>
    %51 = vector.extract_strided_slice %7 {offsets = [0, 7, 0], sizes = [8, 1, 128], strides = [1, 1, 1]} : vector<8x16x128xf32> to vector<8x1x128xf32>
    %52 = vector.shape_cast %51 : vector<8x1x128xf32> to vector<8x128xf32>
    %c7 = arith.constant 7 : index
    %c0_29 = arith.constant 0 : index
    %c0_30 = arith.constant 0 : index
    %53 = vector.load %arg4[%c7, %c0_29, %c0_30] : memref<16x128x16xf32, #tpu.memory_space<vmem>>, vector<1x128x16xf32>
    %54 = vector.shape_cast %53 : vector<1x128x16xf32> to vector<128x16xf32>
    %cst_31 = arith.constant dense<0.000000e+00> : vector<8x16xf32>
    %55 = tpu.matmul %52, %54, %cst_31 {dimension_numbers = #tpu.dot_dimension_numbers<[1], [0], [0], [1], [0, 0, 1, 1], [], []>} : vector<8x128xf32>, vector<128x16xf32>, vector<8x16xf32> -> vector<8x16xf32>
    %56 = arith.addf %50, %55 : vector<8x16xf32>
    %57 = vector.extract_strided_slice %7 {offsets = [0, 8, 0], sizes = [8, 1, 128], strides = [1, 1, 1]} : vector<8x16x128xf32> to vector<8x1x128xf32>
    %58 = vector.shape_cast %57 : vector<8x1x128xf32> to vector<8x128xf32>
    %c8 = arith.constant 8 : index
    %c0_32 = arith.constant 0 : index
    %c0_33 = arith.constant 0 : index
    %59 = vector.load %arg4[%c8, %c0_32, %c0_33] : memref<16x128x16xf32, #tpu.memory_space<vmem>>, vector<1x128x16xf32>
    %60 = vector.shape_cast %59 : vector<1x128x16xf32> to vector<128x16xf32>
    %cst_34 = arith.constant dense<0.000000e+00> : vector<8x16xf32>
    %61 = tpu.matmul %58, %60, %cst_34 {dimension_numbers = #tpu.dot_dimension_numbers<[1], [0], [0], [1], [0, 0, 1, 1], [], []>} : vector<8x128xf32>, vector<128x16xf32>, vector<8x16xf32> -> vector<8x16xf32>
    %62 = arith.addf %56, %61 : vector<8x16xf32>
    %63 = vector.extract_strided_slice %7 {offsets = [0, 9, 0], sizes = [8, 1, 128], strides = [1, 1, 1]} : vector<8x16x128xf32> to vector<8x1x128xf32>
    %64 = vector.shape_cast %63 : vector<8x1x128xf32> to vector<8x128xf32>
    %c9 = arith.constant 9 : index
    %c0_35 = arith.constant 0 : index
    %c0_36 = arith.constant 0 : index
    %65 = vector.load %arg4[%c9, %c0_35, %c0_36] : memref<16x128x16xf32, #tpu.memory_space<vmem>>, vector<1x128x16xf32>
    %66 = vector.shape_cast %65 : vector<1x128x16xf32> to vector<128x16xf32>
    %cst_37 = arith.constant dense<0.000000e+00> : vector<8x16xf32>
    %67 = tpu.matmul %64, %66, %cst_37 {dimension_numbers = #tpu.dot_dimension_numbers<[1], [0], [0], [1], [0, 0, 1, 1], [], []>} : vector<8x128xf32>, vector<128x16xf32>, vector<8x16xf32> -> vector<8x16xf32>
    %68 = arith.addf %62, %67 : vector<8x16xf32>
    %69 = vector.extract_strided_slice %7 {offsets = [0, 10, 0], sizes = [8, 1, 128], strides = [1, 1, 1]} : vector<8x16x128xf32> to vector<8x1x128xf32>
    %70 = vector.shape_cast %69 : vector<8x1x128xf32> to vector<8x128xf32>
    %c10 = arith.constant 10 : index
    %c0_38 = arith.constant 0 : index
    %c0_39 = arith.constant 0 : index
    %71 = vector.load %arg4[%c10, %c0_38, %c0_39] : memref<16x128x16xf32, #tpu.memory_space<vmem>>, vector<1x128x16xf32>
    %72 = vector.shape_cast %71 : vector<1x128x16xf32> to vector<128x16xf32>
    %cst_40 = arith.constant dense<0.000000e+00> : vector<8x16xf32>
    %73 = tpu.matmul %70, %72, %cst_40 {dimension_numbers = #tpu.dot_dimension_numbers<[1], [0], [0], [1], [0, 0, 1, 1], [], []>} : vector<8x128xf32>, vector<128x16xf32>, vector<8x16xf32> -> vector<8x16xf32>
    %74 = arith.addf %68, %73 : vector<8x16xf32>
    %75 = vector.extract_strided_slice %7 {offsets = [0, 11, 0], sizes = [8, 1, 128], strides = [1, 1, 1]} : vector<8x16x128xf32> to vector<8x1x128xf32>
    %76 = vector.shape_cast %75 : vector<8x1x128xf32> to vector<8x128xf32>
    %c11 = arith.constant 11 : index
    %c0_41 = arith.constant 0 : index
    %c0_42 = arith.constant 0 : index
    %77 = vector.load %arg4[%c11, %c0_41, %c0_42] : memref<16x128x16xf32, #tpu.memory_space<vmem>>, vector<1x128x16xf32>
    %78 = vector.shape_cast %77 : vector<1x128x16xf32> to vector<128x16xf32>
    %cst_43 = arith.constant dense<0.000000e+00> : vector<8x16xf32>
    %79 = tpu.matmul %76, %78, %cst_43 {dimension_numbers = #tpu.dot_dimension_numbers<[1], [0], [0], [1], [0, 0, 1, 1], [], []>} : vector<8x128xf32>, vector<128x16xf32>, vector<8x16xf32> -> vector<8x16xf32>
    %80 = arith.addf %74, %79 : vector<8x16xf32>
    %81 = vector.extract_strided_slice %7 {offsets = [0, 12, 0], sizes = [8, 1, 128], strides = [1, 1, 1]} : vector<8x16x128xf32> to vector<8x1x128xf32>
    %82 = vector.shape_cast %81 : vector<8x1x128xf32> to vector<8x128xf32>
    %c12 = arith.constant 12 : index
    %c0_44 = arith.constant 0 : index
    %c0_45 = arith.constant 0 : index
    %83 = vector.load %arg4[%c12, %c0_44, %c0_45] : memref<16x128x16xf32, #tpu.memory_space<vmem>>, vector<1x128x16xf32>
    %84 = vector.shape_cast %83 : vector<1x128x16xf32> to vector<128x16xf32>
    %cst_46 = arith.constant dense<0.000000e+00> : vector<8x16xf32>
    %85 = tpu.matmul %82, %84, %cst_46 {dimension_numbers = #tpu.dot_dimension_numbers<[1], [0], [0], [1], [0, 0, 1, 1], [], []>} : vector<8x128xf32>, vector<128x16xf32>, vector<8x16xf32> -> vector<8x16xf32>
    %86 = arith.addf %80, %85 : vector<8x16xf32>
    %87 = vector.extract_strided_slice %7 {offsets = [0, 13, 0], sizes = [8, 1, 128], strides = [1, 1, 1]} : vector<8x16x128xf32> to vector<8x1x128xf32>
    %88 = vector.shape_cast %87 : vector<8x1x128xf32> to vector<8x128xf32>
    %c13 = arith.constant 13 : index
    %c0_47 = arith.constant 0 : index
    %c0_48 = arith.constant 0 : index
    %89 = vector.load %arg4[%c13, %c0_47, %c0_48] : memref<16x128x16xf32, #tpu.memory_space<vmem>>, vector<1x128x16xf32>
    %90 = vector.shape_cast %89 : vector<1x128x16xf32> to vector<128x16xf32>
    %cst_49 = arith.constant dense<0.000000e+00> : vector<8x16xf32>
    %91 = tpu.matmul %88, %90, %cst_49 {dimension_numbers = #tpu.dot_dimension_numbers<[1], [0], [0], [1], [0, 0, 1, 1], [], []>} : vector<8x128xf32>, vector<128x16xf32>, vector<8x16xf32> -> vector<8x16xf32>
    %92 = arith.addf %86, %91 : vector<8x16xf32>
    %93 = vector.extract_strided_slice %7 {offsets = [0, 14, 0], sizes = [8, 1, 128], strides = [1, 1, 1]} : vector<8x16x128xf32> to vector<8x1x128xf32>
    %94 = vector.shape_cast %93 : vector<8x1x128xf32> to vector<8x128xf32>
    %c14 = arith.constant 14 : index
    %c0_50 = arith.constant 0 : index
    %c0_51 = arith.constant 0 : index
    %95 = vector.load %arg4[%c14, %c0_50, %c0_51] : memref<16x128x16xf32, #tpu.memory_space<vmem>>, vector<1x128x16xf32>
    %96 = vector.shape_cast %95 : vector<1x128x16xf32> to vector<128x16xf32>
    %cst_52 = arith.constant dense<0.000000e+00> : vector<8x16xf32>
    %97 = tpu.matmul %94, %96, %cst_52 {dimension_numbers = #tpu.dot_dimension_numbers<[1], [0], [0], [1], [0, 0, 1, 1], [], []>} : vector<8x128xf32>, vector<128x16xf32>, vector<8x16xf32> -> vector<8x16xf32>
    %98 = arith.addf %92, %97 : vector<8x16xf32>
    %99 = vector.extract_strided_slice %7 {offsets = [0, 15, 0], sizes = [8, 1, 128], strides = [1, 1, 1]} : vector<8x16x128xf32> to vector<8x1x128xf32>
    %100 = vector.shape_cast %99 : vector<8x1x128xf32> to vector<8x128xf32>
    %c15 = arith.constant 15 : index
    %c0_53 = arith.constant 0 : index
    %c0_54 = arith.constant 0 : index
    %101 = vector.load %arg4[%c15, %c0_53, %c0_54] : memref<16x128x16xf32, #tpu.memory_space<vmem>>, vector<1x128x16xf32>
    %102 = vector.shape_cast %101 : vector<1x128x16xf32> to vector<128x16xf32>
    %cst_55 = arith.constant dense<0.000000e+00> : vector<8x16xf32>
    %103 = tpu.matmul %100, %102, %cst_55 {dimension_numbers = #tpu.dot_dimension_numbers<[1], [0], [0], [1], [0, 0, 1, 1], [], []>} : vector<8x128xf32>, vector<128x16xf32>, vector<8x16xf32> -> vector<8x16xf32>
    %104 = arith.addf %98, %103 : vector<8x16xf32>
    %c0_56 = arith.constant 0 : index
    %c0_57 = arith.constant 0 : index
    %105 = vector.load %arg5[%c0_56, %c0_57] : memref<1x16xf32, #tpu.memory_space<vmem>>, vector<1x16xf32>
    %106 = vector.broadcast %105 : vector<1x16xf32> to vector<8x16xf32>
    %107 = arith.addf %104, %106 : vector<8x16xf32>
    %108 = arith.negf %107 : vector<8x16xf32>
    %109 = math.exp %108 : vector<8x16xf32>
    %cst_58 = arith.constant 1.000000e+00 : f32
    %110 = vector.broadcast %cst_58 : f32 to vector<8x16xf32>
    %111 = arith.addf %110, %109 : vector<8x16xf32>
    %112 = arith.divf %110, %111 : vector<8x16xf32>
    %113 = vector.shape_cast %112 : vector<8x16xf32> to vector<8x16x1xf32>
    %114 = vector.broadcast %113 : vector<8x16x1xf32> to vector<8x16x128xf32>
    %115 = arith.mulf %7, %114 : vector<8x16x128xf32>
    %116 = vector.shape_cast %115 : vector<8x16x128xf32> to vector<128x128xf32>
    %c0_59 = arith.constant 0 : index
    %c0_60 = arith.constant 0 : index
    %117 = vector.load %arg6[%c0_59, %c0_60] : memref<128x128xf32, #tpu.memory_space<vmem>>, vector<128x128xf32>
    %118 = arith.addf %116, %117 : vector<128x128xf32>
    %c0_61 = arith.constant 0 : index
    %c0_62 = arith.constant 0 : index
    %119 = vector.load %arg7[%c0_61, %c0_62] : memref<128x128xf32, #tpu.memory_space<vmem>>, vector<128x128xf32>
    %cst_63 = arith.constant 0.000000e+00 : f32
    %120 = vector.broadcast %cst_63 : f32 to vector<128x128xf32>
    %c0_64 = arith.constant 0 : index
    %c0_65 = arith.constant 0 : index
    %c0_66 = arith.constant 0 : index
    %121 = vector.load %arg9[%c0_64, %c0_65, %c0_66] : memref<4x128x32xf32, #tpu.memory_space<vmem>>, vector<1x128x32xf32>
    %122 = vector.shape_cast %121 : vector<1x128x32xf32> to vector<128x32xf32>
    %cst_67 = arith.constant dense<0.000000e+00> : vector<128x32xf32>
    %123 = tpu.matmul %118, %122, %cst_67 {dimension_numbers = #tpu.dot_dimension_numbers<[1], [0], [0], [1], [0, 0, 1, 1], [], []>} : vector<128x128xf32>, vector<128x32xf32>, vector<128x32xf32> -> vector<128x32xf32>
    %c0_68 = arith.constant 0 : index
    %c0_69 = arith.constant 0 : index
    %c0_70 = arith.constant 0 : index
    %124 = vector.load %arg12[%c0_68, %c0_69, %c0_70] : memref<4x1x32xf32, #tpu.memory_space<vmem>>, vector<1x1x32xf32>
    %125 = vector.shape_cast %124 : vector<1x1x32xf32> to vector<1x32xf32>
    %126 = vector.broadcast %125 : vector<1x32xf32> to vector<128x32xf32>
    %127 = arith.addf %123, %126 : vector<128x32xf32>
    %c0_71 = arith.constant 0 : index
    %c0_72 = arith.constant 0 : index
    %c0_73 = arith.constant 0 : index
    %128 = vector.load %arg10[%c0_71, %c0_72, %c0_73] : memref<4x128x32xf32, #tpu.memory_space<vmem>>, vector<1x128x32xf32>
    %129 = vector.shape_cast %128 : vector<1x128x32xf32> to vector<128x32xf32>
    %cst_74 = arith.constant dense<0.000000e+00> : vector<128x32xf32>
    %130 = tpu.matmul %118, %129, %cst_74 {dimension_numbers = #tpu.dot_dimension_numbers<[1], [0], [0], [1], [0, 0, 1, 1], [], []>} : vector<128x128xf32>, vector<128x32xf32>, vector<128x32xf32> -> vector<128x32xf32>
    %c0_75 = arith.constant 0 : index
    %c0_76 = arith.constant 0 : index
    %c0_77 = arith.constant 0 : index
    %131 = vector.load %arg13[%c0_75, %c0_76, %c0_77] : memref<4x1x32xf32, #tpu.memory_space<vmem>>, vector<1x1x32xf32>
    %132 = vector.shape_cast %131 : vector<1x1x32xf32> to vector<1x32xf32>
    %133 = vector.broadcast %132 : vector<1x32xf32> to vector<128x32xf32>
    %134 = arith.addf %130, %133 : vector<128x32xf32>
    %c0_78 = arith.constant 0 : index
    %c0_79 = arith.constant 0 : index
    %c0_80 = arith.constant 0 : index
    %135 = vector.load %arg11[%c0_78, %c0_79, %c0_80] : memref<4x128x32xf32, #tpu.memory_space<vmem>>, vector<1x128x32xf32>
    %136 = vector.shape_cast %135 : vector<1x128x32xf32> to vector<128x32xf32>
    %cst_81 = arith.constant dense<0.000000e+00> : vector<128x32xf32>
    %137 = tpu.matmul %118, %136, %cst_81 {dimension_numbers = #tpu.dot_dimension_numbers<[1], [0], [0], [1], [0, 0, 1, 1], [], []>} : vector<128x128xf32>, vector<128x32xf32>, vector<128x32xf32> -> vector<128x32xf32>
    %c0_82 = arith.constant 0 : index
    %c0_83 = arith.constant 0 : index
    %c0_84 = arith.constant 0 : index
    %138 = vector.load %arg14[%c0_82, %c0_83, %c0_84] : memref<4x1x32xf32, #tpu.memory_space<vmem>>, vector<1x1x32xf32>
    %139 = vector.shape_cast %138 : vector<1x1x32xf32> to vector<1x32xf32>
    %140 = vector.broadcast %139 : vector<1x32xf32> to vector<128x32xf32>
    %141 = arith.addf %137, %140 : vector<128x32xf32>
    "tpu.trace_start"() <{level = 10 : i32, message = "qd,kd->qk"}> : () -> ()
    %cst_85 = arith.constant dense<0.000000e+00> : vector<128x128xf32>
    %142 = tpu.matmul %127, %134, %cst_85 {dimension_numbers = #tpu.dot_dimension_numbers<[1], [1], [0], [0], [0, 0, 1, 0], [], []>} : vector<128x32xf32>, vector<128x32xf32>, vector<128x128xf32> -> vector<128x128xf32>
    "tpu.trace_stop"() : () -> ()
    %cst_86 = arith.constant 0.176776692 : f32
    %143 = vector.broadcast %cst_86 : f32 to vector<128x128xf32>
    %144 = arith.mulf %142, %143 : vector<128x128xf32>
    %145 = arith.addf %144, %119 : vector<128x128xf32>
    %cst_87 = arith.constant dense<0xFF800000> : vector<128xf32>
    %146 = vector.multi_reduction <maximumf>, %145, %cst_87 [1] : vector<128x128xf32> to vector<128xf32>
    %147 = vector.shape_cast %146 : vector<128xf32> to vector<128x1xf32>
    %148 = vector.broadcast %147 : vector<128x1xf32> to vector<128x128xf32>
    %149 = arith.subf %145, %148 : vector<128x128xf32>
    %150 = math.exp %149 : vector<128x128xf32>
    %cst_88 = arith.constant dense<0.000000e+00> : vector<128xf32>
    %151 = vector.multi_reduction <add>, %150, %cst_88 [1] : vector<128x128xf32> to vector<128xf32>
    %152 = vector.shape_cast %151 : vector<128xf32> to vector<128x1xf32>
    %153 = tpu.reciprocal %152 {approx = true} : vector<128x1xf32> -> vector<128x1xf32>
    %154 = vector.broadcast %153 : vector<128x1xf32> to vector<128x128xf32>
    %155 = arith.mulf %150, %154 : vector<128x128xf32>
    %cst_89 = arith.constant dense<0.000000e+00> : vector<128x32xf32>
    %156 = tpu.matmul %155, %141, %cst_89 {dimension_numbers = #tpu.dot_dimension_numbers<[1], [0], [0], [1], [0, 0, 1, 1], [], []>} : vector<128x128xf32>, vector<128x32xf32>, vector<128x32xf32> -> vector<128x32xf32>
    %c0_90 = arith.constant 0 : index
    %c0_91 = arith.constant 0 : index
    %c0_92 = arith.constant 0 : index
    %157 = vector.load %arg15[%c0_90, %c0_91, %c0_92] : memref<4x32x128xf32, #tpu.memory_space<vmem>>, vector<1x32x128xf32>
    %158 = vector.shape_cast %157 : vector<1x32x128xf32> to vector<32x128xf32>
    %cst_93 = arith.constant dense<0.000000e+00> : vector<128x128xf32>
    %159 = tpu.matmul %156, %158, %cst_93 {dimension_numbers = #tpu.dot_dimension_numbers<[1], [0], [0], [1], [0, 0, 1, 1], [], []>} : vector<128x32xf32>, vector<32x128xf32>, vector<128x128xf32> -> vector<128x128xf32>
    %160 = arith.addf %120, %159 : vector<128x128xf32>
    %c1_94 = arith.constant 1 : index
    %c0_95 = arith.constant 0 : index
    %c0_96 = arith.constant 0 : index
    %161 = vector.load %arg9[%c1_94, %c0_95, %c0_96] : memref<4x128x32xf32, #tpu.memory_space<vmem>>, vector<1x128x32xf32>
    %162 = vector.shape_cast %161 : vector<1x128x32xf32> to vector<128x32xf32>
    %cst_97 = arith.constant dense<0.000000e+00> : vector<128x32xf32>
    %163 = tpu.matmul %118, %162, %cst_97 {dimension_numbers = #tpu.dot_dimension_numbers<[1], [0], [0], [1], [0, 0, 1, 1], [], []>} : vector<128x128xf32>, vector<128x32xf32>, vector<128x32xf32> -> vector<128x32xf32>
    %c1_98 = arith.constant 1 : index
    %c0_99 = arith.constant 0 : index
    %c0_100 = arith.constant 0 : index
    %164 = vector.load %arg12[%c1_98, %c0_99, %c0_100] : memref<4x1x32xf32, #tpu.memory_space<vmem>>, vector<1x1x32xf32>
    %165 = vector.shape_cast %164 : vector<1x1x32xf32> to vector<1x32xf32>
    %166 = vector.broadcast %165 : vector<1x32xf32> to vector<128x32xf32>
    %167 = arith.addf %163, %166 : vector<128x32xf32>
    %c1_101 = arith.constant 1 : index
    %c0_102 = arith.constant 0 : index
    %c0_103 = arith.constant 0 : index
    %168 = vector.load %arg10[%c1_101, %c0_102, %c0_103] : memref<4x128x32xf32, #tpu.memory_space<vmem>>, vector<1x128x32xf32>
    %169 = vector.shape_cast %168 : vector<1x128x32xf32> to vector<128x32xf32>
    %cst_104 = arith.constant dense<0.000000e+00> : vector<128x32xf32>
    %170 = tpu.matmul %118, %169, %cst_104 {dimension_numbers = #tpu.dot_dimension_numbers<[1], [0], [0], [1], [0, 0, 1, 1], [], []>} : vector<128x128xf32>, vector<128x32xf32>, vector<128x32xf32> -> vector<128x32xf32>
    %c1_105 = arith.constant 1 : index
    %c0_106 = arith.constant 0 : index
    %c0_107 = arith.constant 0 : index
    %171 = vector.load %arg13[%c1_105, %c0_106, %c0_107] : memref<4x1x32xf32, #tpu.memory_space<vmem>>, vector<1x1x32xf32>
    %172 = vector.shape_cast %171 : vector<1x1x32xf32> to vector<1x32xf32>
    %173 = vector.broadcast %172 : vector<1x32xf32> to vector<128x32xf32>
    %174 = arith.addf %170, %173 : vector<128x32xf32>
    %c1_108 = arith.constant 1 : index
    %c0_109 = arith.constant 0 : index
    %c0_110 = arith.constant 0 : index
    %175 = vector.load %arg11[%c1_108, %c0_109, %c0_110] : memref<4x128x32xf32, #tpu.memory_space<vmem>>, vector<1x128x32xf32>
    %176 = vector.shape_cast %175 : vector<1x128x32xf32> to vector<128x32xf32>
    %cst_111 = arith.constant dense<0.000000e+00> : vector<128x32xf32>
    %177 = tpu.matmul %118, %176, %cst_111 {dimension_numbers = #tpu.dot_dimension_numbers<[1], [0], [0], [1], [0, 0, 1, 1], [], []>} : vector<128x128xf32>, vector<128x32xf32>, vector<128x32xf32> -> vector<128x32xf32>
    %c1_112 = arith.constant 1 : index
    %c0_113 = arith.constant 0 : index
    %c0_114 = arith.constant 0 : index
    %178 = vector.load %arg14[%c1_112, %c0_113, %c0_114] : memref<4x1x32xf32, #tpu.memory_space<vmem>>, vector<1x1x32xf32>
    %179 = vector.shape_cast %178 : vector<1x1x32xf32> to vector<1x32xf32>
    %180 = vector.broadcast %179 : vector<1x32xf32> to vector<128x32xf32>
    %181 = arith.addf %177, %180 : vector<128x32xf32>
    "tpu.trace_start"() <{level = 10 : i32, message = "qd,kd->qk"}> : () -> ()
    %cst_115 = arith.constant dense<0.000000e+00> : vector<128x128xf32>
    %182 = tpu.matmul %167, %174, %cst_115 {dimension_numbers = #tpu.dot_dimension_numbers<[1], [1], [0], [0], [0, 0, 1, 0], [], []>} : vector<128x32xf32>, vector<128x32xf32>, vector<128x128xf32> -> vector<128x128xf32>
    "tpu.trace_stop"() : () -> ()
    %cst_116 = arith.constant 0.176776692 : f32
    %183 = vector.broadcast %cst_116 : f32 to vector<128x128xf32>
    %184 = arith.mulf %182, %183 : vector<128x128xf32>
    %185 = arith.addf %184, %119 : vector<128x128xf32>
    %cst_117 = arith.constant dense<0xFF800000> : vector<128xf32>
    %186 = vector.multi_reduction <maximumf>, %185, %cst_117 [1] : vector<128x128xf32> to vector<128xf32>
    %187 = vector.shape_cast %186 : vector<128xf32> to vector<128x1xf32>
    %188 = vector.broadcast %187 : vector<128x1xf32> to vector<128x128xf32>
    %189 = arith.subf %185, %188 : vector<128x128xf32>
    %190 = math.exp %189 : vector<128x128xf32>
    %cst_118 = arith.constant dense<0.000000e+00> : vector<128xf32>
    %191 = vector.multi_reduction <add>, %190, %cst_118 [1] : vector<128x128xf32> to vector<128xf32>
    %192 = vector.shape_cast %191 : vector<128xf32> to vector<128x1xf32>
    %193 = tpu.reciprocal %192 {approx = true} : vector<128x1xf32> -> vector<128x1xf32>
    %194 = vector.broadcast %193 : vector<128x1xf32> to vector<128x128xf32>
    %195 = arith.mulf %190, %194 : vector<128x128xf32>
    %cst_119 = arith.constant dense<0.000000e+00> : vector<128x32xf32>
    %196 = tpu.matmul %195, %181, %cst_119 {dimension_numbers = #tpu.dot_dimension_numbers<[1], [0], [0], [1], [0, 0, 1, 1], [], []>} : vector<128x128xf32>, vector<128x32xf32>, vector<128x32xf32> -> vector<128x32xf32>
    %c1_120 = arith.constant 1 : index
    %c0_121 = arith.constant 0 : index
    %c0_122 = arith.constant 0 : index
    %197 = vector.load %arg15[%c1_120, %c0_121, %c0_122] : memref<4x32x128xf32, #tpu.memory_space<vmem>>, vector<1x32x128xf32>
    %198 = vector.shape_cast %197 : vector<1x32x128xf32> to vector<32x128xf32>
    %cst_123 = arith.constant dense<0.000000e+00> : vector<128x128xf32>
    %199 = tpu.matmul %196, %198, %cst_123 {dimension_numbers = #tpu.dot_dimension_numbers<[1], [0], [0], [1], [0, 0, 1, 1], [], []>} : vector<128x32xf32>, vector<32x128xf32>, vector<128x128xf32> -> vector<128x128xf32>
    %200 = arith.addf %160, %199 : vector<128x128xf32>
    %c2_124 = arith.constant 2 : index
    %c0_125 = arith.constant 0 : index
    %c0_126 = arith.constant 0 : index
    %201 = vector.load %arg9[%c2_124, %c0_125, %c0_126] : memref<4x128x32xf32, #tpu.memory_space<vmem>>, vector<1x128x32xf32>
    %202 = vector.shape_cast %201 : vector<1x128x32xf32> to vector<128x32xf32>
    %cst_127 = arith.constant dense<0.000000e+00> : vector<128x32xf32>
    %203 = tpu.matmul %118, %202, %cst_127 {dimension_numbers = #tpu.dot_dimension_numbers<[1], [0], [0], [1], [0, 0, 1, 1], [], []>} : vector<128x128xf32>, vector<128x32xf32>, vector<128x32xf32> -> vector<128x32xf32>
    %c2_128 = arith.constant 2 : index
    %c0_129 = arith.constant 0 : index
    %c0_130 = arith.constant 0 : index
    %204 = vector.load %arg12[%c2_128, %c0_129, %c0_130] : memref<4x1x32xf32, #tpu.memory_space<vmem>>, vector<1x1x32xf32>
    %205 = vector.shape_cast %204 : vector<1x1x32xf32> to vector<1x32xf32>
    %206 = vector.broadcast %205 : vector<1x32xf32> to vector<128x32xf32>
    %207 = arith.addf %203, %206 : vector<128x32xf32>
    %c2_131 = arith.constant 2 : index
    %c0_132 = arith.constant 0 : index
    %c0_133 = arith.constant 0 : index
    %208 = vector.load %arg10[%c2_131, %c0_132, %c0_133] : memref<4x128x32xf32, #tpu.memory_space<vmem>>, vector<1x128x32xf32>
    %209 = vector.shape_cast %208 : vector<1x128x32xf32> to vector<128x32xf32>
    %cst_134 = arith.constant dense<0.000000e+00> : vector<128x32xf32>
    %210 = tpu.matmul %118, %209, %cst_134 {dimension_numbers = #tpu.dot_dimension_numbers<[1], [0], [0], [1], [0, 0, 1, 1], [], []>} : vector<128x128xf32>, vector<128x32xf32>, vector<128x32xf32> -> vector<128x32xf32>
    %c2_135 = arith.constant 2 : index
    %c0_136 = arith.constant 0 : index
    %c0_137 = arith.constant 0 : index
    %211 = vector.load %arg13[%c2_135, %c0_136, %c0_137] : memref<4x1x32xf32, #tpu.memory_space<vmem>>, vector<1x1x32xf32>
    %212 = vector.shape_cast %211 : vector<1x1x32xf32> to vector<1x32xf32>
    %213 = vector.broadcast %212 : vector<1x32xf32> to vector<128x32xf32>
    %214 = arith.addf %210, %213 : vector<128x32xf32>
    %c2_138 = arith.constant 2 : index
    %c0_139 = arith.constant 0 : index
    %c0_140 = arith.constant 0 : index
    %215 = vector.load %arg11[%c2_138, %c0_139, %c0_140] : memref<4x128x32xf32, #tpu.memory_space<vmem>>, vector<1x128x32xf32>
    %216 = vector.shape_cast %215 : vector<1x128x32xf32> to vector<128x32xf32>
    %cst_141 = arith.constant dense<0.000000e+00> : vector<128x32xf32>
    %217 = tpu.matmul %118, %216, %cst_141 {dimension_numbers = #tpu.dot_dimension_numbers<[1], [0], [0], [1], [0, 0, 1, 1], [], []>} : vector<128x128xf32>, vector<128x32xf32>, vector<128x32xf32> -> vector<128x32xf32>
    %c2_142 = arith.constant 2 : index
    %c0_143 = arith.constant 0 : index
    %c0_144 = arith.constant 0 : index
    %218 = vector.load %arg14[%c2_142, %c0_143, %c0_144] : memref<4x1x32xf32, #tpu.memory_space<vmem>>, vector<1x1x32xf32>
    %219 = vector.shape_cast %218 : vector<1x1x32xf32> to vector<1x32xf32>
    %220 = vector.broadcast %219 : vector<1x32xf32> to vector<128x32xf32>
    %221 = arith.addf %217, %220 : vector<128x32xf32>
    "tpu.trace_start"() <{level = 10 : i32, message = "qd,kd->qk"}> : () -> ()
    %cst_145 = arith.constant dense<0.000000e+00> : vector<128x128xf32>
    %222 = tpu.matmul %207, %214, %cst_145 {dimension_numbers = #tpu.dot_dimension_numbers<[1], [1], [0], [0], [0, 0, 1, 0], [], []>} : vector<128x32xf32>, vector<128x32xf32>, vector<128x128xf32> -> vector<128x128xf32>
    "tpu.trace_stop"() : () -> ()
    %cst_146 = arith.constant 0.176776692 : f32
    %223 = vector.broadcast %cst_146 : f32 to vector<128x128xf32>
    %224 = arith.mulf %222, %223 : vector<128x128xf32>
    %225 = arith.addf %224, %119 : vector<128x128xf32>
    %cst_147 = arith.constant dense<0xFF800000> : vector<128xf32>
    %226 = vector.multi_reduction <maximumf>, %225, %cst_147 [1] : vector<128x128xf32> to vector<128xf32>
    %227 = vector.shape_cast %226 : vector<128xf32> to vector<128x1xf32>
    %228 = vector.broadcast %227 : vector<128x1xf32> to vector<128x128xf32>
    %229 = arith.subf %225, %228 : vector<128x128xf32>
    %230 = math.exp %229 : vector<128x128xf32>
    %cst_148 = arith.constant dense<0.000000e+00> : vector<128xf32>
    %231 = vector.multi_reduction <add>, %230, %cst_148 [1] : vector<128x128xf32> to vector<128xf32>
    %232 = vector.shape_cast %231 : vector<128xf32> to vector<128x1xf32>
    %233 = tpu.reciprocal %232 {approx = true} : vector<128x1xf32> -> vector<128x1xf32>
    %234 = vector.broadcast %233 : vector<128x1xf32> to vector<128x128xf32>
    %235 = arith.mulf %230, %234 : vector<128x128xf32>
    %cst_149 = arith.constant dense<0.000000e+00> : vector<128x32xf32>
    %236 = tpu.matmul %235, %221, %cst_149 {dimension_numbers = #tpu.dot_dimension_numbers<[1], [0], [0], [1], [0, 0, 1, 1], [], []>} : vector<128x128xf32>, vector<128x32xf32>, vector<128x32xf32> -> vector<128x32xf32>
    %c2_150 = arith.constant 2 : index
    %c0_151 = arith.constant 0 : index
    %c0_152 = arith.constant 0 : index
    %237 = vector.load %arg15[%c2_150, %c0_151, %c0_152] : memref<4x32x128xf32, #tpu.memory_space<vmem>>, vector<1x32x128xf32>
    %238 = vector.shape_cast %237 : vector<1x32x128xf32> to vector<32x128xf32>
    %cst_153 = arith.constant dense<0.000000e+00> : vector<128x128xf32>
    %239 = tpu.matmul %236, %238, %cst_153 {dimension_numbers = #tpu.dot_dimension_numbers<[1], [0], [0], [1], [0, 0, 1, 1], [], []>} : vector<128x32xf32>, vector<32x128xf32>, vector<128x128xf32> -> vector<128x128xf32>
    %240 = arith.addf %200, %239 : vector<128x128xf32>
    %c3_154 = arith.constant 3 : index
    %c0_155 = arith.constant 0 : index
    %c0_156 = arith.constant 0 : index
    %241 = vector.load %arg9[%c3_154, %c0_155, %c0_156] : memref<4x128x32xf32, #tpu.memory_space<vmem>>, vector<1x128x32xf32>
    %242 = vector.shape_cast %241 : vector<1x128x32xf32> to vector<128x32xf32>
    %cst_157 = arith.constant dense<0.000000e+00> : vector<128x32xf32>
    %243 = tpu.matmul %118, %242, %cst_157 {dimension_numbers = #tpu.dot_dimension_numbers<[1], [0], [0], [1], [0, 0, 1, 1], [], []>} : vector<128x128xf32>, vector<128x32xf32>, vector<128x32xf32> -> vector<128x32xf32>
    %c3_158 = arith.constant 3 : index
    %c0_159 = arith.constant 0 : index
    %c0_160 = arith.constant 0 : index
    %244 = vector.load %arg12[%c3_158, %c0_159, %c0_160] : memref<4x1x32xf32, #tpu.memory_space<vmem>>, vector<1x1x32xf32>
    %245 = vector.shape_cast %244 : vector<1x1x32xf32> to vector<1x32xf32>
    %246 = vector.broadcast %245 : vector<1x32xf32> to vector<128x32xf32>
    %247 = arith.addf %243, %246 : vector<128x32xf32>
    %c3_161 = arith.constant 3 : index
    %c0_162 = arith.constant 0 : index
    %c0_163 = arith.constant 0 : index
    %248 = vector.load %arg10[%c3_161, %c0_162, %c0_163] : memref<4x128x32xf32, #tpu.memory_space<vmem>>, vector<1x128x32xf32>
    %249 = vector.shape_cast %248 : vector<1x128x32xf32> to vector<128x32xf32>
    %cst_164 = arith.constant dense<0.000000e+00> : vector<128x32xf32>
    %250 = tpu.matmul %118, %249, %cst_164 {dimension_numbers = #tpu.dot_dimension_numbers<[1], [0], [0], [1], [0, 0, 1, 1], [], []>} : vector<128x128xf32>, vector<128x32xf32>, vector<128x32xf32> -> vector<128x32xf32>
    %c3_165 = arith.constant 3 : index
    %c0_166 = arith.constant 0 : index
    %c0_167 = arith.constant 0 : index
    %251 = vector.load %arg13[%c3_165, %c0_166, %c0_167] : memref<4x1x32xf32, #tpu.memory_space<vmem>>, vector<1x1x32xf32>
    %252 = vector.shape_cast %251 : vector<1x1x32xf32> to vector<1x32xf32>
    %253 = vector.broadcast %252 : vector<1x32xf32> to vector<128x32xf32>
    %254 = arith.addf %250, %253 : vector<128x32xf32>
    %c3_168 = arith.constant 3 : index
    %c0_169 = arith.constant 0 : index
    %c0_170 = arith.constant 0 : index
    %255 = vector.load %arg11[%c3_168, %c0_169, %c0_170] : memref<4x128x32xf32, #tpu.memory_space<vmem>>, vector<1x128x32xf32>
    %256 = vector.shape_cast %255 : vector<1x128x32xf32> to vector<128x32xf32>
    %cst_171 = arith.constant dense<0.000000e+00> : vector<128x32xf32>
    %257 = tpu.matmul %118, %256, %cst_171 {dimension_numbers = #tpu.dot_dimension_numbers<[1], [0], [0], [1], [0, 0, 1, 1], [], []>} : vector<128x128xf32>, vector<128x32xf32>, vector<128x32xf32> -> vector<128x32xf32>
    %c3_172 = arith.constant 3 : index
    %c0_173 = arith.constant 0 : index
    %c0_174 = arith.constant 0 : index
    %258 = vector.load %arg14[%c3_172, %c0_173, %c0_174] : memref<4x1x32xf32, #tpu.memory_space<vmem>>, vector<1x1x32xf32>
    %259 = vector.shape_cast %258 : vector<1x1x32xf32> to vector<1x32xf32>
    %260 = vector.broadcast %259 : vector<1x32xf32> to vector<128x32xf32>
    %261 = arith.addf %257, %260 : vector<128x32xf32>
    "tpu.trace_start"() <{level = 10 : i32, message = "qd,kd->qk"}> : () -> ()
    %cst_175 = arith.constant dense<0.000000e+00> : vector<128x128xf32>
    %262 = tpu.matmul %247, %254, %cst_175 {dimension_numbers = #tpu.dot_dimension_numbers<[1], [1], [0], [0], [0, 0, 1, 0], [], []>} : vector<128x32xf32>, vector<128x32xf32>, vector<128x128xf32> -> vector<128x128xf32>
    "tpu.trace_stop"() : () -> ()
    %cst_176 = arith.constant 0.176776692 : f32
    %263 = vector.broadcast %cst_176 : f32 to vector<128x128xf32>
    %264 = arith.mulf %262, %263 : vector<128x128xf32>
    %265 = arith.addf %264, %119 : vector<128x128xf32>
    %cst_177 = arith.constant dense<0xFF800000> : vector<128xf32>
    %266 = vector.multi_reduction <maximumf>, %265, %cst_177 [1] : vector<128x128xf32> to vector<128xf32>
    %267 = vector.shape_cast %266 : vector<128xf32> to vector<128x1xf32>
    %268 = vector.broadcast %267 : vector<128x1xf32> to vector<128x128xf32>
    %269 = arith.subf %265, %268 : vector<128x128xf32>
    %270 = math.exp %269 : vector<128x128xf32>
    %cst_178 = arith.constant dense<0.000000e+00> : vector<128xf32>
    %271 = vector.multi_reduction <add>, %270, %cst_178 [1] : vector<128x128xf32> to vector<128xf32>
    %272 = vector.shape_cast %271 : vector<128xf32> to vector<128x1xf32>
    %273 = tpu.reciprocal %272 {approx = true} : vector<128x1xf32> -> vector<128x1xf32>
    %274 = vector.broadcast %273 : vector<128x1xf32> to vector<128x128xf32>
    %275 = arith.mulf %270, %274 : vector<128x128xf32>
    %cst_179 = arith.constant dense<0.000000e+00> : vector<128x32xf32>
    %276 = tpu.matmul %275, %261, %cst_179 {dimension_numbers = #tpu.dot_dimension_numbers<[1], [0], [0], [1], [0, 0, 1, 1], [], []>} : vector<128x128xf32>, vector<128x32xf32>, vector<128x32xf32> -> vector<128x32xf32>
    %c3_180 = arith.constant 3 : index
    %c0_181 = arith.constant 0 : index
    %c0_182 = arith.constant 0 : index
    %277 = vector.load %arg15[%c3_180, %c0_181, %c0_182] : memref<4x32x128xf32, #tpu.memory_space<vmem>>, vector<1x32x128xf32>
    %278 = vector.shape_cast %277 : vector<1x32x128xf32> to vector<32x128xf32>
    %cst_183 = arith.constant dense<0.000000e+00> : vector<128x128xf32>
    %279 = tpu.matmul %276, %278, %cst_183 {dimension_numbers = #tpu.dot_dimension_numbers<[1], [0], [0], [1], [0, 0, 1, 1], [], []>} : vector<128x32xf32>, vector<32x128xf32>, vector<128x128xf32> -> vector<128x128xf32>
    %280 = arith.addf %240, %279 : vector<128x128xf32>
    %c0_184 = arith.constant 0 : index
    %c0_185 = arith.constant 0 : index
    %281 = vector.load %arg16[%c0_184, %c0_185] : memref<1x128xf32, #tpu.memory_space<vmem>>, vector<1x128xf32>
    %282 = vector.broadcast %281 : vector<1x128xf32> to vector<128x128xf32>
    %283 = arith.addf %280, %282 : vector<128x128xf32>
    %284 = arith.addf %283, %118 : vector<128x128xf32>
    %c0_186 = arith.constant 0 : index
    %c0_187 = arith.constant 0 : index
    %285 = vector.load %arg17[%c0_186, %c0_187] : memref<1x128xf32, #tpu.memory_space<vmem>>, vector<1x128xf32>
    %c0_188 = arith.constant 0 : index
    %c0_189 = arith.constant 0 : index
    %286 = vector.load %arg18[%c0_188, %c0_189] : memref<1x128xf32, #tpu.memory_space<vmem>>, vector<1x128xf32>
    %cst_190 = arith.constant dense<0.000000e+00> : vector<128xf32>
    %287 = vector.multi_reduction <add>, %284, %cst_190 [1] : vector<128x128xf32> to vector<128xf32>
    %288 = vector.shape_cast %287 : vector<128xf32> to vector<128x1xf32>
    %cst_191 = arith.constant 1.280000e+02 : f32
    %289 = vector.broadcast %cst_191 : f32 to vector<128x1xf32>
    %290 = arith.divf %288, %289 : vector<128x1xf32>
    %291 = vector.broadcast %290 : vector<128x1xf32> to vector<128x128xf32>
    %292 = arith.subf %284, %291 : vector<128x128xf32>
    %293 = arith.mulf %292, %292 : vector<128x128xf32>
    %cst_192 = arith.constant dense<0.000000e+00> : vector<128xf32>
    %294 = vector.multi_reduction <add>, %293, %cst_192 [1] : vector<128x128xf32> to vector<128xf32>
    %295 = vector.shape_cast %294 : vector<128xf32> to vector<128x1xf32>
    %cst_193 = arith.constant 1.280000e+02 : f32
    %296 = vector.broadcast %cst_193 : f32 to vector<128x1xf32>
    %297 = arith.divf %295, %296 : vector<128x1xf32>
    %298 = vector.broadcast %290 : vector<128x1xf32> to vector<128x128xf32>
    %299 = arith.subf %284, %298 : vector<128x128xf32>
    %cst_194 = arith.constant 9.99999974E-6 : f32
    %300 = vector.broadcast %cst_194 : f32 to vector<128x1xf32>
    %301 = arith.addf %297, %300 : vector<128x1xf32>
    %302 = math.rsqrt %301 : vector<128x1xf32>
    %303 = vector.broadcast %302 : vector<128x1xf32> to vector<128x128xf32>
    %304 = arith.mulf %299, %303 : vector<128x128xf32>
    %305 = vector.broadcast %285 : vector<1x128xf32> to vector<128x128xf32>
    %306 = arith.mulf %304, %305 : vector<128x128xf32>
    %307 = vector.broadcast %286 : vector<1x128xf32> to vector<128x128xf32>
    %308 = arith.addf %306, %307 : vector<128x128xf32>
    %c0_195 = arith.constant 0 : index
    %c0_196 = arith.constant 0 : index
    %309 = vector.load %arg19[%c0_195, %c0_196] : memref<128x128xf32, #tpu.memory_space<vmem>>, vector<128x128xf32>
    %cst_197 = arith.constant dense<0.000000e+00> : vector<128x128xf32>
    %310 = tpu.matmul %308, %309, %cst_197 {dimension_numbers = #tpu.dot_dimension_numbers<[1], [0], [0], [1], [0, 0, 1, 1], [], []>} : vector<128x128xf32>, vector<128x128xf32>, vector<128x128xf32> -> vector<128x128xf32>
    %c0_198 = arith.constant 0 : index
    %c0_199 = arith.constant 0 : index
    %311 = vector.load %arg20[%c0_198, %c0_199] : memref<1x128xf32, #tpu.memory_space<vmem>>, vector<1x128xf32>
    %312 = vector.broadcast %311 : vector<1x128xf32> to vector<128x128xf32>
    %313 = arith.addf %310, %312 : vector<128x128xf32>
    %cst_200 = arith.constant 0.000000e+00 : f32
    %314 = vector.broadcast %cst_200 : f32 to vector<128x128xf32>
    %315 = arith.maximumf %313, %314 : vector<128x128xf32>
    %c0_201 = arith.constant 0 : index
    %c0_202 = arith.constant 0 : index
    %316 = vector.load %arg21[%c0_201, %c0_202] : memref<128x128xf32, #tpu.memory_space<vmem>>, vector<128x128xf32>
    %cst_203 = arith.constant dense<0.000000e+00> : vector<128x128xf32>
    %317 = tpu.matmul %315, %316, %cst_203 {dimension_numbers = #tpu.dot_dimension_numbers<[1], [0], [0], [1], [0, 0, 1, 1], [], []>} : vector<128x128xf32>, vector<128x128xf32>, vector<128x128xf32> -> vector<128x128xf32>
    %c0_204 = arith.constant 0 : index
    %c0_205 = arith.constant 0 : index
    %318 = vector.load %arg22[%c0_204, %c0_205] : memref<1x128xf32, #tpu.memory_space<vmem>>, vector<1x128xf32>
    %319 = vector.broadcast %318 : vector<1x128xf32> to vector<128x128xf32>
    %320 = arith.addf %317, %319 : vector<128x128xf32>
    %321 = arith.addf %320, %308 : vector<128x128xf32>
    %c0_206 = arith.constant 0 : index
    %c0_207 = arith.constant 0 : index
    %322 = vector.load %arg23[%c0_206, %c0_207] : memref<1x128xf32, #tpu.memory_space<vmem>>, vector<1x128xf32>
    %c0_208 = arith.constant 0 : index
    %c0_209 = arith.constant 0 : index
    %323 = vector.load %arg24[%c0_208, %c0_209] : memref<1x128xf32, #tpu.memory_space<vmem>>, vector<1x128xf32>
    %cst_210 = arith.constant dense<0.000000e+00> : vector<128xf32>
    %324 = vector.multi_reduction <add>, %321, %cst_210 [1] : vector<128x128xf32> to vector<128xf32>
    %325 = vector.shape_cast %324 : vector<128xf32> to vector<128x1xf32>
    %cst_211 = arith.constant 1.280000e+02 : f32
    %326 = vector.broadcast %cst_211 : f32 to vector<128x1xf32>
    %327 = arith.divf %325, %326 : vector<128x1xf32>
    %328 = vector.broadcast %327 : vector<128x1xf32> to vector<128x128xf32>
    %329 = arith.subf %321, %328 : vector<128x128xf32>
    %330 = arith.mulf %329, %329 : vector<128x128xf32>
    %cst_212 = arith.constant dense<0.000000e+00> : vector<128xf32>
    %331 = vector.multi_reduction <add>, %330, %cst_212 [1] : vector<128x128xf32> to vector<128xf32>
    %332 = vector.shape_cast %331 : vector<128xf32> to vector<128x1xf32>
    %cst_213 = arith.constant 1.280000e+02 : f32
    %333 = vector.broadcast %cst_213 : f32 to vector<128x1xf32>
    %334 = arith.divf %332, %333 : vector<128x1xf32>
    %335 = vector.broadcast %327 : vector<128x1xf32> to vector<128x128xf32>
    %336 = arith.subf %321, %335 : vector<128x128xf32>
    %cst_214 = arith.constant 9.99999974E-6 : f32
    %337 = vector.broadcast %cst_214 : f32 to vector<128x1xf32>
    %338 = arith.addf %334, %337 : vector<128x1xf32>
    %339 = math.rsqrt %338 : vector<128x1xf32>
    %340 = vector.broadcast %339 : vector<128x1xf32> to vector<128x128xf32>
    %341 = arith.mulf %336, %340 : vector<128x128xf32>
    %342 = vector.broadcast %322 : vector<1x128xf32> to vector<128x128xf32>
    %343 = arith.mulf %341, %342 : vector<128x128xf32>
    %344 = vector.broadcast %323 : vector<1x128xf32> to vector<128x128xf32>
    %345 = arith.addf %343, %344 : vector<128x128xf32>
    %c0_215 = arith.constant 0 : index
    %c0_216 = arith.constant 0 : index
    %346 = vector.load %arg8[%c0_215, %c0_216] : memref<8x128xf32, #tpu.memory_space<vmem>>, vector<8x128xf32>
    %cst_217 = arith.constant dense<0.000000e+00> : vector<8x128xf32>
    %347 = tpu.matmul %346, %345, %cst_217 {dimension_numbers = #tpu.dot_dimension_numbers<[1], [0], [0], [1], [0, 0, 1, 1], [], []>} : vector<8x128xf32>, vector<128x128xf32>, vector<8x128xf32> -> vector<8x128xf32>
    %c0_218 = arith.constant 0 : index
    %c0_219 = arith.constant 0 : index
    %348 = vector.load %arg25[%c0_218, %c0_219] : memref<128x128xf32, #tpu.memory_space<vmem>>, vector<128x128xf32>
    %cst_220 = arith.constant dense<0.000000e+00> : vector<8x128xf32>
    %349 = tpu.matmul %347, %348, %cst_220 {dimension_numbers = #tpu.dot_dimension_numbers<[1], [0], [0], [1], [0, 0, 1, 1], [], []>} : vector<8x128xf32>, vector<128x128xf32>, vector<8x128xf32> -> vector<8x128xf32>
    %c0_221 = arith.constant 0 : index
    %c0_222 = arith.constant 0 : index
    %350 = vector.load %arg26[%c0_221, %c0_222] : memref<1x128xf32, #tpu.memory_space<vmem>>, vector<1x128xf32>
    %351 = vector.broadcast %350 : vector<1x128xf32> to vector<8x128xf32>
    %352 = arith.addf %349, %351 : vector<8x128xf32>
    %c0_223 = arith.constant 0 : index
    %c0_224 = arith.constant 0 : index
    %353 = vector.load %arg27[%c0_223, %c0_224] : memref<8x128xf32, #tpu.memory_space<vmem>>, vector<8x128xf32>
    tpu.vector_store %arg27[%c0_223, %c0_224], %352 {strides = array<i32>} : memref<8x128xf32, #tpu.memory_space<vmem>>, vector<8x128xf32>,
    return
  }
  func.func @transform_0(%arg0: i32) -> (i32, i32, i32) {
    %c0_i32 = arith.constant 0 : i32
    %c0_i32_0 = arith.constant 0 : i32
    %c0_i32_1 = arith.constant 0 : i32
    return %arg0, %c0_i32, %c0_i32_0 : i32, i32, i32
  }
  func.func @transform_1(%arg0: i32) -> (i32, i32) {
    %c0_i32 = arith.constant 0 : i32
    %c0_i32_0 = arith.constant 0 : i32
    %c0_i32_1 = arith.constant 0 : i32
    return %c0_i32, %c0_i32_0 : i32, i32
  }
  func.func @transform_2(%arg0: i32) -> (i32, i32) {
    %c0_i32 = arith.constant 0 : i32
    %c0_i32_0 = arith.constant 0 : i32
    %c0_i32_1 = arith.constant 0 : i32
    return %c0_i32, %c0_i32_0 : i32, i32
  }
  func.func @transform_3(%arg0: i32) -> (i32, i32, i32) {
    %c0_i32 = arith.constant 0 : i32
    %c0_i32_0 = arith.constant 0 : i32
    %c0_i32_1 = arith.constant 0 : i32
    %c0_i32_2 = arith.constant 0 : i32
    return %c0_i32, %c0_i32_0, %c0_i32_1 : i32, i32, i32
  }
  func.func @transform_4(%arg0: i32) -> (i32, i32) {
    %c0_i32 = arith.constant 0 : i32
    %c0_i32_0 = arith.constant 0 : i32
    %c0_i32_1 = arith.constant 0 : i32
    return %c0_i32, %c0_i32_0 : i32, i32
  }
  func.func @transform_5(%arg0: i32) -> (i32, i32) {
    %c0_i32 = arith.constant 0 : i32
    %c0_i32_0 = arith.constant 0 : i32
    %c0_i32_1 = arith.constant 0 : i32
    return %c0_i32, %c0_i32_0 : i32, i32
  }
  func.func @transform_6(%arg0: i32) -> (i32, i32) {
    %c0_i32 = arith.constant 0 : i32
    %c0_i32_0 = arith.constant 0 : i32
    %c0_i32_1 = arith.constant 0 : i32
    return %c0_i32, %c0_i32_0 : i32, i32
  }
  func.func @transform_7(%arg0: i32) -> (i32, i32) {
    %c0_i32 = arith.constant 0 : i32
    %c0_i32_0 = arith.constant 0 : i32
    %c0_i32_1 = arith.constant 0 : i32
    return %c0_i32, %c0_i32_0 : i32, i32
  }
  func.func @transform_8(%arg0: i32) -> (i32, i32, i32) {
    %c0_i32 = arith.constant 0 : i32
    %c0_i32_0 = arith.constant 0 : i32
    %c0_i32_1 = arith.constant 0 : i32
    %c0_i32_2 = arith.constant 0 : i32
    return %c0_i32, %c0_i32_0, %c0_i32_1 : i32, i32, i32
  }
  func.func @transform_9(%arg0: i32) -> (i32, i32, i32) {
    %c0_i32 = arith.constant 0 : i32
    %c0_i32_0 = arith.constant 0 : i32
    %c0_i32_1 = arith.constant 0 : i32
    %c0_i32_2 = arith.constant 0 : i32
    return %c0_i32, %c0_i32_0, %c0_i32_1 : i32, i32, i32
  }
  func.func @transform_10(%arg0: i32) -> (i32, i32, i32) {
    %c0_i32 = arith.constant 0 : i32
    %c0_i32_0 = arith.constant 0 : i32
    %c0_i32_1 = arith.constant 0 : i32
    %c0_i32_2 = arith.constant 0 : i32
    return %c0_i32, %c0_i32_0, %c0_i32_1 : i32, i32, i32
  }
  func.func @transform_11(%arg0: i32) -> (i32, i32, i32) {
    %c0_i32 = arith.constant 0 : i32
    %c0_i32_0 = arith.constant 0 : i32
    %c0_i32_1 = arith.constant 0 : i32
    %c0_i32_2 = arith.constant 0 : i32
    return %c0_i32, %c0_i32_0, %c0_i32_1 : i32, i32, i32
  }
  func.func @transform_12(%arg0: i32) -> (i32, i32, i32) {
    %c0_i32 = arith.constant 0 : i32
    %c0_i32_0 = arith.constant 0 : i32
    %c0_i32_1 = arith.constant 0 : i32
    %c0_i32_2 = arith.constant 0 : i32
    return %c0_i32, %c0_i32_0, %c0_i32_1 : i32, i32, i32
  }
  func.func @transform_13(%arg0: i32) -> (i32, i32, i32) {
    %c0_i32 = arith.constant 0 : i32
    %c0_i32_0 = arith.constant 0 : i32
    %c0_i32_1 = arith.constant 0 : i32
    %c0_i32_2 = arith.constant 0 : i32
    return %c0_i32, %c0_i32_0, %c0_i32_1 : i32, i32, i32
  }
  func.func @transform_14(%arg0: i32) -> (i32, i32, i32) {
    %c0_i32 = arith.constant 0 : i32
    %c0_i32_0 = arith.constant 0 : i32
    %c0_i32_1 = arith.constant 0 : i32
    %c0_i32_2 = arith.constant 0 : i32
    return %c0_i32, %c0_i32_0, %c0_i32_1 : i32, i32, i32
  }
  func.func @transform_15(%arg0: i32) -> (i32, i32) {
    %c0_i32 = arith.constant 0 : i32
    %c0_i32_0 = arith.constant 0 : i32
    %c0_i32_1 = arith.constant 0 : i32
    return %c0_i32, %c0_i32_0 : i32, i32
  }
  func.func @transform_16(%arg0: i32) -> (i32, i32) {
    %c0_i32 = arith.constant 0 : i32
    %c0_i32_0 = arith.constant 0 : i32
    %c0_i32_1 = arith.constant 0 : i32
    return %c0_i32, %c0_i32_0 : i32, i32
  }
  func.func @transform_17(%arg0: i32) -> (i32, i32) {
    %c0_i32 = arith.constant 0 : i32
    %c0_i32_0 = arith.constant 0 : i32
    %c0_i32_1 = arith.constant 0 : i32
    return %c0_i32, %c0_i32_0 : i32, i32
  }
  func.func @transform_18(%arg0: i32) -> (i32, i32) {
    %c0_i32 = arith.constant 0 : i32
    %c0_i32_0 = arith.constant 0 : i32
    %c0_i32_1 = arith.constant 0 : i32
    return %c0_i32, %c0_i32_0 : i32, i32
  }
  func.func @transform_19(%arg0: i32) -> (i32, i32) {
    %c0_i32 = arith.constant 0 : i32
    %c0_i32_0 = arith.constant 0 : i32
    %c0_i32_1 = arith.constant 0 : i32
    return %c0_i32, %c0_i32_0 : i32, i32
  }
  func.func @transform_20(%arg0: i32) -> (i32, i32) {
    %c0_i32 = arith.constant 0 : i32
    %c0_i32_0 = arith.constant 0 : i32
    %c0_i32_1 = arith.constant 0 : i32
    return %c0_i32, %c0_i32_0 : i32, i32
  }
  func.func @transform_21(%arg0: i32) -> (i32, i32) {
    %c0_i32 = arith.constant 0 : i32
    %c0_i32_0 = arith.constant 0 : i32
    %c0_i32_1 = arith.constant 0 : i32
    return %c0_i32, %c0_i32_0 : i32, i32
  }
  func.func @transform_22(%arg0: i32) -> (i32, i32) {
    %c0_i32 = arith.constant 0 : i32
    %c0_i32_0 = arith.constant 0 : i32
    %c0_i32_1 = arith.constant 0 : i32
    return %c0_i32, %c0_i32_0 : i32, i32
  }
  func.func @transform_23(%arg0: i32) -> (i32, i32) {
    %c0_i32 = arith.constant 0 : i32
    %c0_i32_0 = arith.constant 0 : i32
    %c0_i32_1 = arith.constant 0 : i32
    return %c0_i32, %c0_i32_0 : i32, i32
  }
  func.func @transform_24(%arg0: i32) -> (i32, i32) {
    %c0_i32 = arith.constant 0 : i32
    %c0_i32_0 = arith.constant 0 : i32
    %c0_i32_1 = arith.constant 0 : i32
    return %c0_i32, %c0_i32_0 : i32, i32
  }
  func.func @transform_25(%arg0: i32) -> (i32, i32) {
    %c0_i32 = arith.constant 0 : i32
    %c0_i32_0 = arith.constant 0 : i32
    %c0_i32_1 = arith.constant 0 : i32
    return %c0_i32, %c0_i32_0 : i32, i32
  }
  func.func @transform_26(%arg0: i32) -> (i32, i32) {
    %c0_i32 = arith.constant 0 : i32
    %c0_i32_0 = arith.constant 0 : i32
    return %arg0, %c0_i32 : i32, i32
  }
}

module attributes {stable_mosaic.version = 11 : i64} {
  func.func @motion_head_kernel(%arg0: i32, %arg1: memref<8x8x64xf32, #tpu.memory_space<vmem>>, %arg2: memref<8x128xf32, #tpu.memory_space<vmem>>, %arg3: memref<64x512xf32, #tpu.memory_space<vmem>>, %arg4: memref<128x512xf32, #tpu.memory_space<vmem>>, %arg5: memref<1x512xf32, #tpu.memory_space<vmem>>, %arg6: memref<1x1x128xf32, #tpu.memory_space<vmem>>, %arg7: memref<1x1x1xf32, #tpu.memory_space<vmem>>, %arg8: memref<128x128xf32, #tpu.memory_space<vmem>>, %arg9: memref<128x128xf32, #tpu.memory_space<vmem>>, %arg10: memref<1x128xf32, #tpu.memory_space<vmem>>, %arg11: memref<128x128xf32, #tpu.memory_space<vmem>>, %arg12: memref<1x128xf32, #tpu.memory_space<vmem>>, %arg13: memref<8x128xf32, #tpu.memory_space<vmem>>, %arg14: memref<8x128xf32, #tpu.memory_space<vmem>>, %arg15: memref<8x8x512xf32, #tpu.memory_space<vmem>>, %arg16: memref<8x8x128xf32, #tpu.memory_space<vmem>>) attributes {dimension_semantics = [#tpu.dimension_semantics<parallel>], iteration_bounds = array<i64: 1>, scalar_prefetch = 0 : i64, scratch_operands = 2 : i64, tpu.core_type = #tpu.core_type<tc>, window_params = [{transform_indices = @transform_0, window_bounds = array<i64: 8, 8, 64>}, {transform_indices = @transform_1, window_bounds = array<i64: 8, 128>}, {pipeline_mode = #tpu.pipeline_mode<synchronous>, transform_indices = @transform_2, window_bounds = array<i64: 64, 512>}, {pipeline_mode = #tpu.pipeline_mode<synchronous>, transform_indices = @transform_3, window_bounds = array<i64: 128, 512>}, {pipeline_mode = #tpu.pipeline_mode<synchronous>, transform_indices = @transform_4, window_bounds = array<i64: 1, 512>}, {pipeline_mode = #tpu.pipeline_mode<synchronous>, transform_indices = @transform_5, window_bounds = array<i64: 1, 1, 128>}, {pipeline_mode = #tpu.pipeline_mode<synchronous>, transform_indices = @transform_6, window_bounds = array<i64: 1, 1, 1>}, {pipeline_mode = #tpu.pipeline_mode<synchronous>, transform_indices = @transform_7, window_bounds = array<i64: 128, 128>}, {pipeline_mode = #tpu.pipeline_mode<synchronous>, transform_indices = @transform_8, window_bounds = array<i64: 128, 128>}, {pipeline_mode = #tpu.pipeline_mode<synchronous>, transform_indices = @transform_9, window_bounds = array<i64: 1, 128>}, {pipeline_mode = #tpu.pipeline_mode<synchronous>, transform_indices = @transform_10, window_bounds = array<i64: 128, 128>}, {pipeline_mode = #tpu.pipeline_mode<synchronous>, transform_indices = @transform_11, window_bounds = array<i64: 1, 128>}, {transform_indices = @transform_12, window_bounds = array<i64: 8, 128>}, {transform_indices = @transform_13, window_bounds = array<i64: 8, 128>}]} {
    %c0 = arith.constant 0 : index
    %c0_0 = arith.constant 0 : index
    %c0_1 = arith.constant 0 : index
    %0 = vector.load %arg1[%c0, %c0_0, %c0_1] : memref<8x8x64xf32, #tpu.memory_space<vmem>>, vector<8x8x64xf32>
    %1 = vector.shape_cast %0 : vector<8x8x64xf32> to vector<64x64xf32>
    %c0_2 = arith.constant 0 : index
    %c0_3 = arith.constant 0 : index
    %2 = vector.load %arg3[%c0_2, %c0_3] : memref<64x512xf32, #tpu.memory_space<vmem>>, vector<64x512xf32>
    %cst = arith.constant dense<0.000000e+00> : vector<64x512xf32>
    %3 = tpu.matmul %1, %2, %cst {dimension_numbers = #tpu.dot_dimension_numbers<[1], [0], [0], [1], [0, 0, 1, 1], [], []>} : vector<64x64xf32>, vector<64x512xf32>, vector<64x512xf32> -> vector<64x512xf32>
    %c0_4 = arith.constant 0 : index
    %c0_5 = arith.constant 0 : index
    %4 = vector.load %arg5[%c0_4, %c0_5] : memref<1x512xf32, #tpu.memory_space<vmem>>, vector<1x512xf32>
    %5 = vector.broadcast %4 : vector<1x512xf32> to vector<64x512xf32>
    %6 = arith.addf %3, %5 : vector<64x512xf32>
    %7 = vector.shape_cast %6 : vector<64x512xf32> to vector<8x8x512xf32>
    %c0_6 = arith.constant 0 : index
    %c0_7 = arith.constant 0 : index
    %c0_8 = arith.constant 0 : index
    %8 = vector.load %arg15[%c0_6, %c0_7, %c0_8] : memref<8x8x512xf32, #tpu.memory_space<vmem>>, vector<8x8x512xf32>
    tpu.vector_store %arg15[%c0_6, %c0_7, %c0_8], %7 {strides = array<i32>} : memref<8x8x512xf32, #tpu.memory_space<vmem>>, vector<8x8x512xf32>,
    %c0_9 = arith.constant 0 : index
    %c0_10 = arith.constant 0 : index
    %9 = vector.load %arg4[%c0_9, %c0_10] : memref<128x512xf32, #tpu.memory_space<vmem>>, vector<128x512xf32>
    %cst_11 = arith.constant 0.000000e+00 : f32
    %10 = vector.broadcast %cst_11 : f32 to vector<8x128xf32>
    %cst_12 = arith.constant 0.000000e+00 : f32
    %11 = vector.broadcast %cst_12 : f32 to vector<8x128xf32>
    %c0_13 = arith.constant 0 : index
    %c0_14 = arith.constant 0 : index
    %c0_15 = arith.constant 0 : index
    %12 = vector.load %arg15[%c0_13, %c0_14, %c0_15] : memref<8x8x512xf32, #tpu.memory_space<vmem>>, vector<1x8x512xf32>
    %13 = vector.shape_cast %12 : vector<1x8x512xf32> to vector<8x512xf32>
    %cst_16 = arith.constant dense<0.000000e+00> : vector<8x512xf32>
    %14 = tpu.matmul %10, %9, %cst_16 {dimension_numbers = #tpu.dot_dimension_numbers<[1], [0], [0], [1], [0, 0, 1, 1], [], []>} : vector<8x128xf32>, vector<128x512xf32>, vector<8x512xf32> -> vector<8x512xf32>
    %15 = arith.addf %13, %14 : vector<8x512xf32>
    %16 = vector.extract_strided_slice %15 {offsets = [0, 0], sizes = [8, 128], strides = [1, 1]} : vector<8x512xf32> to vector<8x128xf32>
    %17 = arith.negf %16 : vector<8x128xf32>
    %18 = math.exp %17 : vector<8x128xf32>
    %cst_17 = arith.constant 1.000000e+00 : f32
    %19 = vector.broadcast %cst_17 : f32 to vector<8x128xf32>
    %20 = arith.addf %19, %18 : vector<8x128xf32>
    %21 = arith.divf %19, %20 : vector<8x128xf32>
    %22 = vector.extract_strided_slice %15 {offsets = [0, 128], sizes = [8, 128], strides = [1, 1]} : vector<8x512xf32> to vector<8x128xf32>
    %23 = arith.negf %22 : vector<8x128xf32>
    %24 = math.exp %23 : vector<8x128xf32>
    %cst_18 = arith.constant 1.000000e+00 : f32
    %25 = vector.broadcast %cst_18 : f32 to vector<8x128xf32>
    %26 = arith.addf %25, %24 : vector<8x128xf32>
    %27 = arith.divf %25, %26 : vector<8x128xf32>
    %28 = vector.extract_strided_slice %15 {offsets = [0, 256], sizes = [8, 128], strides = [1, 1]} : vector<8x512xf32> to vector<8x128xf32>
    %29 = math.tanh %28 : vector<8x128xf32>
    %30 = vector.extract_strided_slice %15 {offsets = [0, 384], sizes = [8, 128], strides = [1, 1]} : vector<8x512xf32> to vector<8x128xf32>
    %31 = arith.negf %30 : vector<8x128xf32>
    %32 = math.exp %31 : vector<8x128xf32>
    %cst_19 = arith.constant 1.000000e+00 : f32
    %33 = vector.broadcast %cst_19 : f32 to vector<8x128xf32>
    %34 = arith.addf %33, %32 : vector<8x128xf32>
    %35 = arith.divf %33, %34 : vector<8x128xf32>
    %36 = arith.mulf %27, %11 : vector<8x128xf32>
    %37 = arith.mulf %21, %29 : vector<8x128xf32>
    %38 = arith.addf %36, %37 : vector<8x128xf32>
    %39 = math.tanh %38 : vector<8x128xf32>
    %40 = arith.mulf %35, %39 : vector<8x128xf32>
    %c0_20 = arith.constant 0 : index
    %c0_21 = arith.constant 0 : index
    %c0_22 = arith.constant 0 : index
    %41 = vector.load %arg16[%c0_20, %c0_21, %c0_22] : memref<8x8x128xf32, #tpu.memory_space<vmem>>, vector<1x8x128xf32>
    %42 = vector.shape_cast %41 : vector<1x8x128xf32> to vector<8x128xf32>
    %43 = vector.shape_cast %40 : vector<8x128xf32> to vector<1x8x128xf32>
    tpu.vector_store %arg16[%c0_20, %c0_21, %c0_22], %43 {strides = array<i32>} : memref<8x8x128xf32, #tpu.memory_space<vmem>>, vector<1x8x128xf32>,
    %c1 = arith.constant 1 : index
    %c0_23 = arith.constant 0 : index
    %c0_24 = arith.constant 0 : index
    %44 = vector.load %arg15[%c1, %c0_23, %c0_24] : memref<8x8x512xf32, #tpu.memory_space<vmem>>, vector<1x8x512xf32>
    %45 = vector.shape_cast %44 : vector<1x8x512xf32> to vector<8x512xf32>
    %cst_25 = arith.constant dense<0.000000e+00> : vector<8x512xf32>
    %46 = tpu.matmul %40, %9, %cst_25 {dimension_numbers = #tpu.dot_dimension_numbers<[1], [0], [0], [1], [0, 0, 1, 1], [], []>} : vector<8x128xf32>, vector<128x512xf32>, vector<8x512xf32> -> vector<8x512xf32>
    %47 = arith.addf %45, %46 : vector<8x512xf32>
    %48 = vector.extract_strided_slice %47 {offsets = [0, 0], sizes = [8, 128], strides = [1, 1]} : vector<8x512xf32> to vector<8x128xf32>
    %49 = arith.negf %48 : vector<8x128xf32>
    %50 = math.exp %49 : vector<8x128xf32>
    %cst_26 = arith.constant 1.000000e+00 : f32
    %51 = vector.broadcast %cst_26 : f32 to vector<8x128xf32>
    %52 = arith.addf %51, %50 : vector<8x128xf32>
    %53 = arith.divf %51, %52 : vector<8x128xf32>
    %54 = vector.extract_strided_slice %47 {offsets = [0, 128], sizes = [8, 128], strides = [1, 1]} : vector<8x512xf32> to vector<8x128xf32>
    %55 = arith.negf %54 : vector<8x128xf32>
    %56 = math.exp %55 : vector<8x128xf32>
    %cst_27 = arith.constant 1.000000e+00 : f32
    %57 = vector.broadcast %cst_27 : f32 to vector<8x128xf32>
    %58 = arith.addf %57, %56 : vector<8x128xf32>
    %59 = arith.divf %57, %58 : vector<8x128xf32>
    %60 = vector.extract_strided_slice %47 {offsets = [0, 256], sizes = [8, 128], strides = [1, 1]} : vector<8x512xf32> to vector<8x128xf32>
    %61 = math.tanh %60 : vector<8x128xf32>
    %62 = vector.extract_strided_slice %47 {offsets = [0, 384], sizes = [8, 128], strides = [1, 1]} : vector<8x512xf32> to vector<8x128xf32>
    %63 = arith.negf %62 : vector<8x128xf32>
    %64 = math.exp %63 : vector<8x128xf32>
    %cst_28 = arith.constant 1.000000e+00 : f32
    %65 = vector.broadcast %cst_28 : f32 to vector<8x128xf32>
    %66 = arith.addf %65, %64 : vector<8x128xf32>
    %67 = arith.divf %65, %66 : vector<8x128xf32>
    %68 = arith.mulf %59, %38 : vector<8x128xf32>
    %69 = arith.mulf %53, %61 : vector<8x128xf32>
    %70 = arith.addf %68, %69 : vector<8x128xf32>
    %71 = math.tanh %70 : vector<8x128xf32>
    %72 = arith.mulf %67, %71 : vector<8x128xf32>
    %c1_29 = arith.constant 1 : index
    %c0_30 = arith.constant 0 : index
    %c0_31 = arith.constant 0 : index
    %73 = vector.load %arg16[%c1_29, %c0_30, %c0_31] : memref<8x8x128xf32, #tpu.memory_space<vmem>>, vector<1x8x128xf32>
    %74 = vector.shape_cast %73 : vector<1x8x128xf32> to vector<8x128xf32>
    %75 = vector.shape_cast %72 : vector<8x128xf32> to vector<1x8x128xf32>
    tpu.vector_store %arg16[%c1_29, %c0_30, %c0_31], %75 {strides = array<i32>} : memref<8x8x128xf32, #tpu.memory_space<vmem>>, vector<1x8x128xf32>,
    %c2 = arith.constant 2 : index
    %c0_32 = arith.constant 0 : index
    %c0_33 = arith.constant 0 : index
    %76 = vector.load %arg15[%c2, %c0_32, %c0_33] : memref<8x8x512xf32, #tpu.memory_space<vmem>>, vector<1x8x512xf32>
    %77 = vector.shape_cast %76 : vector<1x8x512xf32> to vector<8x512xf32>
    %cst_34 = arith.constant dense<0.000000e+00> : vector<8x512xf32>
    %78 = tpu.matmul %72, %9, %cst_34 {dimension_numbers = #tpu.dot_dimension_numbers<[1], [0], [0], [1], [0, 0, 1, 1], [], []>} : vector<8x128xf32>, vector<128x512xf32>, vector<8x512xf32> -> vector<8x512xf32>
    %79 = arith.addf %77, %78 : vector<8x512xf32>
    %80 = vector.extract_strided_slice %79 {offsets = [0, 0], sizes = [8, 128], strides = [1, 1]} : vector<8x512xf32> to vector<8x128xf32>
    %81 = arith.negf %80 : vector<8x128xf32>
    %82 = math.exp %81 : vector<8x128xf32>
    %cst_35 = arith.constant 1.000000e+00 : f32
    %83 = vector.broadcast %cst_35 : f32 to vector<8x128xf32>
    %84 = arith.addf %83, %82 : vector<8x128xf32>
    %85 = arith.divf %83, %84 : vector<8x128xf32>
    %86 = vector.extract_strided_slice %79 {offsets = [0, 128], sizes = [8, 128], strides = [1, 1]} : vector<8x512xf32> to vector<8x128xf32>
    %87 = arith.negf %86 : vector<8x128xf32>
    %88 = math.exp %87 : vector<8x128xf32>
    %cst_36 = arith.constant 1.000000e+00 : f32
    %89 = vector.broadcast %cst_36 : f32 to vector<8x128xf32>
    %90 = arith.addf %89, %88 : vector<8x128xf32>
    %91 = arith.divf %89, %90 : vector<8x128xf32>
    %92 = vector.extract_strided_slice %79 {offsets = [0, 256], sizes = [8, 128], strides = [1, 1]} : vector<8x512xf32> to vector<8x128xf32>
    %93 = math.tanh %92 : vector<8x128xf32>
    %94 = vector.extract_strided_slice %79 {offsets = [0, 384], sizes = [8, 128], strides = [1, 1]} : vector<8x512xf32> to vector<8x128xf32>
    %95 = arith.negf %94 : vector<8x128xf32>
    %96 = math.exp %95 : vector<8x128xf32>
    %cst_37 = arith.constant 1.000000e+00 : f32
    %97 = vector.broadcast %cst_37 : f32 to vector<8x128xf32>
    %98 = arith.addf %97, %96 : vector<8x128xf32>
    %99 = arith.divf %97, %98 : vector<8x128xf32>
    %100 = arith.mulf %91, %70 : vector<8x128xf32>
    %101 = arith.mulf %85, %93 : vector<8x128xf32>
    %102 = arith.addf %100, %101 : vector<8x128xf32>
    %103 = math.tanh %102 : vector<8x128xf32>
    %104 = arith.mulf %99, %103 : vector<8x128xf32>
    %c2_38 = arith.constant 2 : index
    %c0_39 = arith.constant 0 : index
    %c0_40 = arith.constant 0 : index
    %105 = vector.load %arg16[%c2_38, %c0_39, %c0_40] : memref<8x8x128xf32, #tpu.memory_space<vmem>>, vector<1x8x128xf32>
    %106 = vector.shape_cast %105 : vector<1x8x128xf32> to vector<8x128xf32>
    %107 = vector.shape_cast %104 : vector<8x128xf32> to vector<1x8x128xf32>
    tpu.vector_store %arg16[%c2_38, %c0_39, %c0_40], %107 {strides = array<i32>} : memref<8x8x128xf32, #tpu.memory_space<vmem>>, vector<1x8x128xf32>,
    %c3 = arith.constant 3 : index
    %c0_41 = arith.constant 0 : index
    %c0_42 = arith.constant 0 : index
    %108 = vector.load %arg15[%c3, %c0_41, %c0_42] : memref<8x8x512xf32, #tpu.memory_space<vmem>>, vector<1x8x512xf32>
    %109 = vector.shape_cast %108 : vector<1x8x512xf32> to vector<8x512xf32>
    %cst_43 = arith.constant dense<0.000000e+00> : vector<8x512xf32>
    %110 = tpu.matmul %104, %9, %cst_43 {dimension_numbers = #tpu.dot_dimension_numbers<[1], [0], [0], [1], [0, 0, 1, 1], [], []>} : vector<8x128xf32>, vector<128x512xf32>, vector<8x512xf32> -> vector<8x512xf32>
    %111 = arith.addf %109, %110 : vector<8x512xf32>
    %112 = vector.extract_strided_slice %111 {offsets = [0, 0], sizes = [8, 128], strides = [1, 1]} : vector<8x512xf32> to vector<8x128xf32>
    %113 = arith.negf %112 : vector<8x128xf32>
    %114 = math.exp %113 : vector<8x128xf32>
    %cst_44 = arith.constant 1.000000e+00 : f32
    %115 = vector.broadcast %cst_44 : f32 to vector<8x128xf32>
    %116 = arith.addf %115, %114 : vector<8x128xf32>
    %117 = arith.divf %115, %116 : vector<8x128xf32>
    %118 = vector.extract_strided_slice %111 {offsets = [0, 128], sizes = [8, 128], strides = [1, 1]} : vector<8x512xf32> to vector<8x128xf32>
    %119 = arith.negf %118 : vector<8x128xf32>
    %120 = math.exp %119 : vector<8x128xf32>
    %cst_45 = arith.constant 1.000000e+00 : f32
    %121 = vector.broadcast %cst_45 : f32 to vector<8x128xf32>
    %122 = arith.addf %121, %120 : vector<8x128xf32>
    %123 = arith.divf %121, %122 : vector<8x128xf32>
    %124 = vector.extract_strided_slice %111 {offsets = [0, 256], sizes = [8, 128], strides = [1, 1]} : vector<8x512xf32> to vector<8x128xf32>
    %125 = math.tanh %124 : vector<8x128xf32>
    %126 = vector.extract_strided_slice %111 {offsets = [0, 384], sizes = [8, 128], strides = [1, 1]} : vector<8x512xf32> to vector<8x128xf32>
    %127 = arith.negf %126 : vector<8x128xf32>
    %128 = math.exp %127 : vector<8x128xf32>
    %cst_46 = arith.constant 1.000000e+00 : f32
    %129 = vector.broadcast %cst_46 : f32 to vector<8x128xf32>
    %130 = arith.addf %129, %128 : vector<8x128xf32>
    %131 = arith.divf %129, %130 : vector<8x128xf32>
    %132 = arith.mulf %123, %102 : vector<8x128xf32>
    %133 = arith.mulf %117, %125 : vector<8x128xf32>
    %134 = arith.addf %132, %133 : vector<8x128xf32>
    %135 = math.tanh %134 : vector<8x128xf32>
    %136 = arith.mulf %131, %135 : vector<8x128xf32>
    %c3_47 = arith.constant 3 : index
    %c0_48 = arith.constant 0 : index
    %c0_49 = arith.constant 0 : index
    %137 = vector.load %arg16[%c3_47, %c0_48, %c0_49] : memref<8x8x128xf32, #tpu.memory_space<vmem>>, vector<1x8x128xf32>
    %138 = vector.shape_cast %137 : vector<1x8x128xf32> to vector<8x128xf32>
    %139 = vector.shape_cast %136 : vector<8x128xf32> to vector<1x8x128xf32>
    tpu.vector_store %arg16[%c3_47, %c0_48, %c0_49], %139 {strides = array<i32>} : memref<8x8x128xf32, #tpu.memory_space<vmem>>, vector<1x8x128xf32>,
    %c4 = arith.constant 4 : index
    %c0_50 = arith.constant 0 : index
    %c0_51 = arith.constant 0 : index
    %140 = vector.load %arg15[%c4, %c0_50, %c0_51] : memref<8x8x512xf32, #tpu.memory_space<vmem>>, vector<1x8x512xf32>
    %141 = vector.shape_cast %140 : vector<1x8x512xf32> to vector<8x512xf32>
    %cst_52 = arith.constant dense<0.000000e+00> : vector<8x512xf32>
    %142 = tpu.matmul %136, %9, %cst_52 {dimension_numbers = #tpu.dot_dimension_numbers<[1], [0], [0], [1], [0, 0, 1, 1], [], []>} : vector<8x128xf32>, vector<128x512xf32>, vector<8x512xf32> -> vector<8x512xf32>
    %143 = arith.addf %141, %142 : vector<8x512xf32>
    %144 = vector.extract_strided_slice %143 {offsets = [0, 0], sizes = [8, 128], strides = [1, 1]} : vector<8x512xf32> to vector<8x128xf32>
    %145 = arith.negf %144 : vector<8x128xf32>
    %146 = math.exp %145 : vector<8x128xf32>
    %cst_53 = arith.constant 1.000000e+00 : f32
    %147 = vector.broadcast %cst_53 : f32 to vector<8x128xf32>
    %148 = arith.addf %147, %146 : vector<8x128xf32>
    %149 = arith.divf %147, %148 : vector<8x128xf32>
    %150 = vector.extract_strided_slice %143 {offsets = [0, 128], sizes = [8, 128], strides = [1, 1]} : vector<8x512xf32> to vector<8x128xf32>
    %151 = arith.negf %150 : vector<8x128xf32>
    %152 = math.exp %151 : vector<8x128xf32>
    %cst_54 = arith.constant 1.000000e+00 : f32
    %153 = vector.broadcast %cst_54 : f32 to vector<8x128xf32>
    %154 = arith.addf %153, %152 : vector<8x128xf32>
    %155 = arith.divf %153, %154 : vector<8x128xf32>
    %156 = vector.extract_strided_slice %143 {offsets = [0, 256], sizes = [8, 128], strides = [1, 1]} : vector<8x512xf32> to vector<8x128xf32>
    %157 = math.tanh %156 : vector<8x128xf32>
    %158 = vector.extract_strided_slice %143 {offsets = [0, 384], sizes = [8, 128], strides = [1, 1]} : vector<8x512xf32> to vector<8x128xf32>
    %159 = arith.negf %158 : vector<8x128xf32>
    %160 = math.exp %159 : vector<8x128xf32>
    %cst_55 = arith.constant 1.000000e+00 : f32
    %161 = vector.broadcast %cst_55 : f32 to vector<8x128xf32>
    %162 = arith.addf %161, %160 : vector<8x128xf32>
    %163 = arith.divf %161, %162 : vector<8x128xf32>
    %164 = arith.mulf %155, %134 : vector<8x128xf32>
    %165 = arith.mulf %149, %157 : vector<8x128xf32>
    %166 = arith.addf %164, %165 : vector<8x128xf32>
    %167 = math.tanh %166 : vector<8x128xf32>
    %168 = arith.mulf %163, %167 : vector<8x128xf32>
    %c4_56 = arith.constant 4 : index
    %c0_57 = arith.constant 0 : index
    %c0_58 = arith.constant 0 : index
    %169 = vector.load %arg16[%c4_56, %c0_57, %c0_58] : memref<8x8x128xf32, #tpu.memory_space<vmem>>, vector<1x8x128xf32>
    %170 = vector.shape_cast %169 : vector<1x8x128xf32> to vector<8x128xf32>
    %171 = vector.shape_cast %168 : vector<8x128xf32> to vector<1x8x128xf32>
    tpu.vector_store %arg16[%c4_56, %c0_57, %c0_58], %171 {strides = array<i32>} : memref<8x8x128xf32, #tpu.memory_space<vmem>>, vector<1x8x128xf32>,
    %c5 = arith.constant 5 : index
    %c0_59 = arith.constant 0 : index
    %c0_60 = arith.constant 0 : index
    %172 = vector.load %arg15[%c5, %c0_59, %c0_60] : memref<8x8x512xf32, #tpu.memory_space<vmem>>, vector<1x8x512xf32>
    %173 = vector.shape_cast %172 : vector<1x8x512xf32> to vector<8x512xf32>
    %cst_61 = arith.constant dense<0.000000e+00> : vector<8x512xf32>
    %174 = tpu.matmul %168, %9, %cst_61 {dimension_numbers = #tpu.dot_dimension_numbers<[1], [0], [0], [1], [0, 0, 1, 1], [], []>} : vector<8x128xf32>, vector<128x512xf32>, vector<8x512xf32> -> vector<8x512xf32>
    %175 = arith.addf %173, %174 : vector<8x512xf32>
    %176 = vector.extract_strided_slice %175 {offsets = [0, 0], sizes = [8, 128], strides = [1, 1]} : vector<8x512xf32> to vector<8x128xf32>
    %177 = arith.negf %176 : vector<8x128xf32>
    %178 = math.exp %177 : vector<8x128xf32>
    %cst_62 = arith.constant 1.000000e+00 : f32
    %179 = vector.broadcast %cst_62 : f32 to vector<8x128xf32>
    %180 = arith.addf %179, %178 : vector<8x128xf32>
    %181 = arith.divf %179, %180 : vector<8x128xf32>
    %182 = vector.extract_strided_slice %175 {offsets = [0, 128], sizes = [8, 128], strides = [1, 1]} : vector<8x512xf32> to vector<8x128xf32>
    %183 = arith.negf %182 : vector<8x128xf32>
    %184 = math.exp %183 : vector<8x128xf32>
    %cst_63 = arith.constant 1.000000e+00 : f32
    %185 = vector.broadcast %cst_63 : f32 to vector<8x128xf32>
    %186 = arith.addf %185, %184 : vector<8x128xf32>
    %187 = arith.divf %185, %186 : vector<8x128xf32>
    %188 = vector.extract_strided_slice %175 {offsets = [0, 256], sizes = [8, 128], strides = [1, 1]} : vector<8x512xf32> to vector<8x128xf32>
    %189 = math.tanh %188 : vector<8x128xf32>
    %190 = vector.extract_strided_slice %175 {offsets = [0, 384], sizes = [8, 128], strides = [1, 1]} : vector<8x512xf32> to vector<8x128xf32>
    %191 = arith.negf %190 : vector<8x128xf32>
    %192 = math.exp %191 : vector<8x128xf32>
    %cst_64 = arith.constant 1.000000e+00 : f32
    %193 = vector.broadcast %cst_64 : f32 to vector<8x128xf32>
    %194 = arith.addf %193, %192 : vector<8x128xf32>
    %195 = arith.divf %193, %194 : vector<8x128xf32>
    %196 = arith.mulf %187, %166 : vector<8x128xf32>
    %197 = arith.mulf %181, %189 : vector<8x128xf32>
    %198 = arith.addf %196, %197 : vector<8x128xf32>
    %199 = math.tanh %198 : vector<8x128xf32>
    %200 = arith.mulf %195, %199 : vector<8x128xf32>
    %c5_65 = arith.constant 5 : index
    %c0_66 = arith.constant 0 : index
    %c0_67 = arith.constant 0 : index
    %201 = vector.load %arg16[%c5_65, %c0_66, %c0_67] : memref<8x8x128xf32, #tpu.memory_space<vmem>>, vector<1x8x128xf32>
    %202 = vector.shape_cast %201 : vector<1x8x128xf32> to vector<8x128xf32>
    %203 = vector.shape_cast %200 : vector<8x128xf32> to vector<1x8x128xf32>
    tpu.vector_store %arg16[%c5_65, %c0_66, %c0_67], %203 {strides = array<i32>} : memref<8x8x128xf32, #tpu.memory_space<vmem>>, vector<1x8x128xf32>,
    %c6 = arith.constant 6 : index
    %c0_68 = arith.constant 0 : index
    %c0_69 = arith.constant 0 : index
    %204 = vector.load %arg15[%c6, %c0_68, %c0_69] : memref<8x8x512xf32, #tpu.memory_space<vmem>>, vector<1x8x512xf32>
    %205 = vector.shape_cast %204 : vector<1x8x512xf32> to vector<8x512xf32>
    %cst_70 = arith.constant dense<0.000000e+00> : vector<8x512xf32>
    %206 = tpu.matmul %200, %9, %cst_70 {dimension_numbers = #tpu.dot_dimension_numbers<[1], [0], [0], [1], [0, 0, 1, 1], [], []>} : vector<8x128xf32>, vector<128x512xf32>, vector<8x512xf32> -> vector<8x512xf32>
    %207 = arith.addf %205, %206 : vector<8x512xf32>
    %208 = vector.extract_strided_slice %207 {offsets = [0, 0], sizes = [8, 128], strides = [1, 1]} : vector<8x512xf32> to vector<8x128xf32>
    %209 = arith.negf %208 : vector<8x128xf32>
    %210 = math.exp %209 : vector<8x128xf32>
    %cst_71 = arith.constant 1.000000e+00 : f32
    %211 = vector.broadcast %cst_71 : f32 to vector<8x128xf32>
    %212 = arith.addf %211, %210 : vector<8x128xf32>
    %213 = arith.divf %211, %212 : vector<8x128xf32>
    %214 = vector.extract_strided_slice %207 {offsets = [0, 128], sizes = [8, 128], strides = [1, 1]} : vector<8x512xf32> to vector<8x128xf32>
    %215 = arith.negf %214 : vector<8x128xf32>
    %216 = math.exp %215 : vector<8x128xf32>
    %cst_72 = arith.constant 1.000000e+00 : f32
    %217 = vector.broadcast %cst_72 : f32 to vector<8x128xf32>
    %218 = arith.addf %217, %216 : vector<8x128xf32>
    %219 = arith.divf %217, %218 : vector<8x128xf32>
    %220 = vector.extract_strided_slice %207 {offsets = [0, 256], sizes = [8, 128], strides = [1, 1]} : vector<8x512xf32> to vector<8x128xf32>
    %221 = math.tanh %220 : vector<8x128xf32>
    %222 = vector.extract_strided_slice %207 {offsets = [0, 384], sizes = [8, 128], strides = [1, 1]} : vector<8x512xf32> to vector<8x128xf32>
    %223 = arith.negf %222 : vector<8x128xf32>
    %224 = math.exp %223 : vector<8x128xf32>
    %cst_73 = arith.constant 1.000000e+00 : f32
    %225 = vector.broadcast %cst_73 : f32 to vector<8x128xf32>
    %226 = arith.addf %225, %224 : vector<8x128xf32>
    %227 = arith.divf %225, %226 : vector<8x128xf32>
    %228 = arith.mulf %219, %198 : vector<8x128xf32>
    %229 = arith.mulf %213, %221 : vector<8x128xf32>
    %230 = arith.addf %228, %229 : vector<8x128xf32>
    %231 = math.tanh %230 : vector<8x128xf32>
    %232 = arith.mulf %227, %231 : vector<8x128xf32>
    %c6_74 = arith.constant 6 : index
    %c0_75 = arith.constant 0 : index
    %c0_76 = arith.constant 0 : index
    %233 = vector.load %arg16[%c6_74, %c0_75, %c0_76] : memref<8x8x128xf32, #tpu.memory_space<vmem>>, vector<1x8x128xf32>
    %234 = vector.shape_cast %233 : vector<1x8x128xf32> to vector<8x128xf32>
    %235 = vector.shape_cast %232 : vector<8x128xf32> to vector<1x8x128xf32>
    tpu.vector_store %arg16[%c6_74, %c0_75, %c0_76], %235 {strides = array<i32>} : memref<8x8x128xf32, #tpu.memory_space<vmem>>, vector<1x8x128xf32>,
    %c7 = arith.constant 7 : index
    %c0_77 = arith.constant 0 : index
    %c0_78 = arith.constant 0 : index
    %236 = vector.load %arg15[%c7, %c0_77, %c0_78] : memref<8x8x512xf32, #tpu.memory_space<vmem>>, vector<1x8x512xf32>
    %237 = vector.shape_cast %236 : vector<1x8x512xf32> to vector<8x512xf32>
    %cst_79 = arith.constant dense<0.000000e+00> : vector<8x512xf32>
    %238 = tpu.matmul %232, %9, %cst_79 {dimension_numbers = #tpu.dot_dimension_numbers<[1], [0], [0], [1], [0, 0, 1, 1], [], []>} : vector<8x128xf32>, vector<128x512xf32>, vector<8x512xf32> -> vector<8x512xf32>
    %239 = arith.addf %237, %238 : vector<8x512xf32>
    %240 = vector.extract_strided_slice %239 {offsets = [0, 0], sizes = [8, 128], strides = [1, 1]} : vector<8x512xf32> to vector<8x128xf32>
    %241 = arith.negf %240 : vector<8x128xf32>
    %242 = math.exp %241 : vector<8x128xf32>
    %cst_80 = arith.constant 1.000000e+00 : f32
    %243 = vector.broadcast %cst_80 : f32 to vector<8x128xf32>
    %244 = arith.addf %243, %242 : vector<8x128xf32>
    %245 = arith.divf %243, %244 : vector<8x128xf32>
    %246 = vector.extract_strided_slice %239 {offsets = [0, 128], sizes = [8, 128], strides = [1, 1]} : vector<8x512xf32> to vector<8x128xf32>
    %247 = arith.negf %246 : vector<8x128xf32>
    %248 = math.exp %247 : vector<8x128xf32>
    %cst_81 = arith.constant 1.000000e+00 : f32
    %249 = vector.broadcast %cst_81 : f32 to vector<8x128xf32>
    %250 = arith.addf %249, %248 : vector<8x128xf32>
    %251 = arith.divf %249, %250 : vector<8x128xf32>
    %252 = vector.extract_strided_slice %239 {offsets = [0, 256], sizes = [8, 128], strides = [1, 1]} : vector<8x512xf32> to vector<8x128xf32>
    %253 = math.tanh %252 : vector<8x128xf32>
    %254 = vector.extract_strided_slice %239 {offsets = [0, 384], sizes = [8, 128], strides = [1, 1]} : vector<8x512xf32> to vector<8x128xf32>
    %255 = arith.negf %254 : vector<8x128xf32>
    %256 = math.exp %255 : vector<8x128xf32>
    %cst_82 = arith.constant 1.000000e+00 : f32
    %257 = vector.broadcast %cst_82 : f32 to vector<8x128xf32>
    %258 = arith.addf %257, %256 : vector<8x128xf32>
    %259 = arith.divf %257, %258 : vector<8x128xf32>
    %260 = arith.mulf %251, %230 : vector<8x128xf32>
    %261 = arith.mulf %245, %253 : vector<8x128xf32>
    %262 = arith.addf %260, %261 : vector<8x128xf32>
    %263 = math.tanh %262 : vector<8x128xf32>
    %264 = arith.mulf %259, %263 : vector<8x128xf32>
    %c7_83 = arith.constant 7 : index
    %c0_84 = arith.constant 0 : index
    %c0_85 = arith.constant 0 : index
    %265 = vector.load %arg16[%c7_83, %c0_84, %c0_85] : memref<8x8x128xf32, #tpu.memory_space<vmem>>, vector<1x8x128xf32>
    %266 = vector.shape_cast %265 : vector<1x8x128xf32> to vector<8x128xf32>
    %267 = vector.shape_cast %264 : vector<8x128xf32> to vector<1x8x128xf32>
    tpu.vector_store %arg16[%c7_83, %c0_84, %c0_85], %267 {strides = array<i32>} : memref<8x8x128xf32, #tpu.memory_space<vmem>>, vector<1x8x128xf32>,
    %c0_86 = arith.constant 0 : index
    %c0_87 = arith.constant 0 : index
    %c0_88 = arith.constant 0 : index
    %268 = vector.load %arg16[%c0_86, %c0_87, %c0_88] : memref<8x8x128xf32, #tpu.memory_space<vmem>>, vector<8x8x128xf32>
    %c0_89 = arith.constant 0 : index
    %c0_90 = arith.constant 0 : index
    %c0_91 = arith.constant 0 : index
    %269 = vector.load %arg6[%c0_89, %c0_90, %c0_91] : memref<1x1x128xf32, #tpu.memory_space<vmem>>, vector<1x1x128xf32>
    %270 = vector.broadcast %269 : vector<1x1x128xf32> to vector<8x8x128xf32>
    %271 = arith.mulf %268, %270 : vector<8x8x128xf32>
    %cst_92 = arith.constant dense<0.000000e+00> : vector<8x8xf32>
    %272 = vector.multi_reduction <add>, %271, %cst_92 [2] : vector<8x8x128xf32> to vector<8x8xf32>
    %273 = vector.shape_cast %272 : vector<8x8xf32> to vector<8x8x1xf32>
    %c0_93 = arith.constant 0 : index
    %c0_94 = arith.constant 0 : index
    %c0_95 = arith.constant 0 : index
    %274 = vector.load %arg7[%c0_93, %c0_94, %c0_95] : memref<1x1x1xf32, #tpu.memory_space<vmem>>, vector<1x1x1xf32>
    %275 = vector.broadcast %274 : vector<1x1x1xf32> to vector<8x8x1xf32>
    %276 = arith.addf %273, %275 : vector<8x8x1xf32>
    %cst_96 = arith.constant dense<0xFF800000> : vector<8x1xf32>
    %277 = vector.multi_reduction <maximumf>, %276, %cst_96 [0] : vector<8x8x1xf32> to vector<8x1xf32>
    %278 = vector.shape_cast %277 : vector<8x1xf32> to vector<1x8x1xf32>
    %279 = vector.broadcast %278 : vector<1x8x1xf32> to vector<8x8x1xf32>
    %280 = arith.subf %276, %279 : vector<8x8x1xf32>
    %281 = math.exp %280 : vector<8x8x1xf32>
    %cst_97 = arith.constant dense<0.000000e+00> : vector<8x1xf32>
    %282 = vector.multi_reduction <add>, %281, %cst_97 [0] : vector<8x8x1xf32> to vector<8x1xf32>
    %283 = vector.shape_cast %282 : vector<8x1xf32> to vector<1x8x1xf32>
    %284 = tpu.reciprocal %283 {approx = true} : vector<1x8x1xf32> -> vector<1x8x1xf32>
    %285 = vector.broadcast %284 : vector<1x8x1xf32> to vector<8x8x1xf32>
    %286 = arith.mulf %281, %285 : vector<8x8x1xf32>
    %287 = vector.broadcast %286 : vector<8x8x1xf32> to vector<8x8x128xf32>
    %288 = arith.mulf %268, %287 : vector<8x8x128xf32>
    %cst_98 = arith.constant dense<0.000000e+00> : vector<8x128xf32>
    %289 = vector.multi_reduction <add>, %288, %cst_98 [0] : vector<8x8x128xf32> to vector<8x128xf32>
    %c0_99 = arith.constant 0 : index
    %c0_100 = arith.constant 0 : index
    %290 = vector.load %arg13[%c0_99, %c0_100] : memref<8x128xf32, #tpu.memory_space<vmem>>, vector<8x128xf32>
    tpu.vector_store %arg13[%c0_99, %c0_100], %289 {strides = array<i32>} : memref<8x128xf32, #tpu.memory_space<vmem>>, vector<8x128xf32>,
    %c0_101 = arith.constant 0 : index
    %c0_102 = arith.constant 0 : index
    %291 = vector.load %arg2[%c0_101, %c0_102] : memref<8x128xf32, #tpu.memory_space<vmem>>, vector<8x128xf32>
    %c0_103 = arith.constant 0 : index
    %c0_104 = arith.constant 0 : index
    %292 = vector.load %arg8[%c0_103, %c0_104] : memref<128x128xf32, #tpu.memory_space<vmem>>, vector<128x128xf32>
    %cst_105 = arith.constant dense<0.000000e+00> : vector<8x128xf32>
    %293 = tpu.matmul %291, %292, %cst_105 {dimension_numbers = #tpu.dot_dimension_numbers<[1], [0], [0], [1], [0, 0, 1, 1], [], []>} : vector<8x128xf32>, vector<128x128xf32>, vector<8x128xf32> -> vector<8x128xf32>
    %c0_106 = arith.constant 0 : index
    %c0_107 = arith.constant 0 : index
    %294 = vector.load %arg9[%c0_106, %c0_107] : memref<128x128xf32, #tpu.memory_space<vmem>>, vector<128x128xf32>
    %cst_108 = arith.constant dense<0.000000e+00> : vector<8x128xf32>
    %295 = tpu.matmul %289, %294, %cst_108 {dimension_numbers = #tpu.dot_dimension_numbers<[1], [0], [0], [1], [0, 0, 1, 1], [], []>} : vector<8x128xf32>, vector<128x128xf32>, vector<8x128xf32> -> vector<8x128xf32>
    %296 = arith.addf %293, %295 : vector<8x128xf32>
    %c0_109 = arith.constant 0 : index
    %c0_110 = arith.constant 0 : index
    %297 = vector.load %arg10[%c0_109, %c0_110] : memref<1x128xf32, #tpu.memory_space<vmem>>, vector<1x128xf32>
    %298 = vector.broadcast %297 : vector<1x128xf32> to vector<8x128xf32>
    %299 = arith.addf %296, %298 : vector<8x128xf32>
    %cst_111 = arith.constant 0.000000e+00 : f32
    %300 = vector.broadcast %cst_111 : f32 to vector<8x128xf32>
    %301 = arith.maximumf %299, %300 : vector<8x128xf32>
    %c0_112 = arith.constant 0 : index
    %c0_113 = arith.constant 0 : index
    %302 = vector.load %arg11[%c0_112, %c0_113] : memref<128x128xf32, #tpu.memory_space<vmem>>, vector<128x128xf32>
    %cst_114 = arith.constant dense<0.000000e+00> : vector<8x128xf32>
    %303 = tpu.matmul %301, %302, %cst_114 {dimension_numbers = #tpu.dot_dimension_numbers<[1], [0], [0], [1], [0, 0, 1, 1], [], []>} : vector<8x128xf32>, vector<128x128xf32>, vector<8x128xf32> -> vector<8x128xf32>
    %c0_115 = arith.constant 0 : index
    %c0_116 = arith.constant 0 : index
    %304 = vector.load %arg12[%c0_115, %c0_116] : memref<1x128xf32, #tpu.memory_space<vmem>>, vector<1x128xf32>
    %305 = vector.broadcast %304 : vector<1x128xf32> to vector<8x128xf32>
    %306 = arith.addf %303, %305 : vector<8x128xf32>
    %c0_117 = arith.constant 0 : index
    %c0_118 = arith.constant 0 : index
    %307 = vector.load %arg14[%c0_117, %c0_118] : memref<8x128xf32, #tpu.memory_space<vmem>>, vector<8x128xf32>
    tpu.vector_store %arg14[%c0_117, %c0_118], %306 {strides = array<i32>} : memref<8x128xf32, #tpu.memory_space<vmem>>, vector<8x128xf32>,
    return
  }
  func.func @transform_0(%arg0: i32) -> (i32, i32, i32) {
    %c0_i32 = arith.constant 0 : i32
    %c0_i32_0 = arith.constant 0 : i32
    %c0_i32_1 = arith.constant 0 : i32
    return %c0_i32, %arg0, %c0_i32_0 : i32, i32, i32
  }
  func.func @transform_1(%arg0: i32) -> (i32, i32) {
    %c0_i32 = arith.constant 0 : i32
    %c0_i32_0 = arith.constant 0 : i32
    return %arg0, %c0_i32 : i32, i32
  }
  func.func @transform_2(%arg0: i32) -> (i32, i32) {
    %c0_i32 = arith.constant 0 : i32
    %c0_i32_0 = arith.constant 0 : i32
    %c0_i32_1 = arith.constant 0 : i32
    return %c0_i32, %c0_i32_0 : i32, i32
  }
  func.func @transform_3(%arg0: i32) -> (i32, i32) {
    %c0_i32 = arith.constant 0 : i32
    %c0_i32_0 = arith.constant 0 : i32
    %c0_i32_1 = arith.constant 0 : i32
    return %c0_i32, %c0_i32_0 : i32, i32
  }
  func.func @transform_4(%arg0: i32) -> (i32, i32) {
    %c0_i32 = arith.constant 0 : i32
    %c0_i32_0 = arith.constant 0 : i32
    %c0_i32_1 = arith.constant 0 : i32
    return %c0_i32, %c0_i32_0 : i32, i32
  }
  func.func @transform_5(%arg0: i32) -> (i32, i32, i32) {
    %c0_i32 = arith.constant 0 : i32
    %c0_i32_0 = arith.constant 0 : i32
    %c0_i32_1 = arith.constant 0 : i32
    %c0_i32_2 = arith.constant 0 : i32
    return %c0_i32, %c0_i32_0, %c0_i32_1 : i32, i32, i32
  }
  func.func @transform_6(%arg0: i32) -> (i32, i32, i32) {
    %c0_i32 = arith.constant 0 : i32
    %c0_i32_0 = arith.constant 0 : i32
    %c0_i32_1 = arith.constant 0 : i32
    %c0_i32_2 = arith.constant 0 : i32
    return %c0_i32, %c0_i32_0, %c0_i32_1 : i32, i32, i32
  }
  func.func @transform_7(%arg0: i32) -> (i32, i32) {
    %c0_i32 = arith.constant 0 : i32
    %c0_i32_0 = arith.constant 0 : i32
    %c0_i32_1 = arith.constant 0 : i32
    return %c0_i32, %c0_i32_0 : i32, i32
  }
  func.func @transform_8(%arg0: i32) -> (i32, i32) {
    %c0_i32 = arith.constant 0 : i32
    %c0_i32_0 = arith.constant 0 : i32
    %c0_i32_1 = arith.constant 0 : i32
    return %c0_i32, %c0_i32_0 : i32, i32
  }
  func.func @transform_9(%arg0: i32) -> (i32, i32) {
    %c0_i32 = arith.constant 0 : i32
    %c0_i32_0 = arith.constant 0 : i32
    %c0_i32_1 = arith.constant 0 : i32
    return %c0_i32, %c0_i32_0 : i32, i32
  }
  func.func @transform_10(%arg0: i32) -> (i32, i32) {
    %c0_i32 = arith.constant 0 : i32
    %c0_i32_0 = arith.constant 0 : i32
    %c0_i32_1 = arith.constant 0 : i32
    return %c0_i32, %c0_i32_0 : i32, i32
  }
  func.func @transform_11(%arg0: i32) -> (i32, i32) {
    %c0_i32 = arith.constant 0 : i32
    %c0_i32_0 = arith.constant 0 : i32
    %c0_i32_1 = arith.constant 0 : i32
    return %c0_i32, %c0_i32_0 : i32, i32
  }
  func.func @transform_12(%arg0: i32) -> (i32, i32) {
    %c0_i32 = arith.constant 0 : i32
    %c0_i32_0 = arith.constant 0 : i32
    return %arg0, %c0_i32 : i32, i32
  }
  func.func @transform_13(%arg0: i32) -> (i32, i32) {
    %c0_i32 = arith.constant 0 : i32
    %c0_i32_0 = arith.constant 0 : i32
    return %arg0, %c0_i32 : i32, i32
  }
}

</mosaic_0001>

<bundles_post_ra>
// kernel: htnet_forward.3
= control target key start
LH: loop header
LB: loop body
LE: loop exit
PB: predicated region body
PF: predicated region fallthrough
CT: control target
= control target key end

     0   :  { %s4512_s0 = inlined_call_operand.vmem [shape: f32[8,8,64], index: 0, kind: input, shape index: {}]   ;;  %s4513_s1 = inlined_call_operand.vmem [shape: f32[8,128], index: 1, kind: input, shape index: {}]   ;;  %s4514_s2 = inlined_call_operand.vmem [shape: f32[64,512], index: 2, kind: input, shape index: {}]   ;;  %s4515_s3 = inlined_call_operand.vmem [shape: f32[128,512], index: 3, kind: input, shape index: {}]   ;;  %s4516_s4 = inlined_call_operand.vmem [shape: f32[1,512], index: 4, kind: input, shape index: {}]   ;;  %s4517_s5 = inlined_call_operand.vmem [shape: f32[1,1,128], index: 5, kind: input, shape index: {}]   ;;  %s4518_s6 = inlined_call_operand.<no memory space> [shape: f32[1,1,1], index: 6, kind: input, shape index: {}]   ;;  %s4519_s7 = inlined_call_operand.vmem [shape: f32[128,128], index: 7, kind: input, shape index: {}]   ;;  %s4520_s8 = inlined_call_operand.vmem [shape: f32[128,128], index: 8, kind: input, shape index: {}]   ;;  %s4521_s9 = inlined_call_operand.vmem [shape: f32[1,128], index: 9, kind: input, shape index: {}]   ;;  %s4522_s10 = inlined_call_operand.vmem [shape: f32[128,128], index: 10, kind: input, shape index: {}]   ;;  %s4523_s11 = inlined_call_operand.vmem [shape: f32[1,128], index: 11, kind: input, shape index: {}]   ;;  %s4524_s12 = inlined_call_operand.hbm [shape: f32[8,128], index: 12, kind: output, shape index: {0}]   ;;  %s4525_s13 = inlined_call_operand.vmem [shape: f32[8,128], index: 13, kind: output, shape index: {1}]  }
   0x1   :  { %v19_v0 = vstv %s4518_s6 }
   0x2   :  { %20 = vst [vmem:[#allocation4] sm:$0x1] %v19_v0 }
   0x3   :  { %v55_v1 = vld [vmem:[%s4514_s2 + $0x8] sm:$0xff]  ;;  %v57_v3 = vld [vmem:[%s4514_s2 + $0x18] sm:$0xff]  ;;  %v54_v6 = vld [vmem:[%s4514_s2] sm:$0xff]  ;;  %v3394_v8 = vmov 0.0   ;;  %vm108_vm0 = vcmask 523264  }
   0x4   :  { %v59_v2 = vld [vmem:[%s4514_s2 + $0x28] sm:$0xff]  ;;  %v61_v5 = vld [vmem:[%s4514_s2 + $0x38] sm:$0xff]  ;;  %v58_v7 = vld [vmem:[%s4514_s2 + $0x20] sm:$0xff]  ;;  %197 = vmatprep.mubr.f32.mxu0 %v3394_v8  ;;  %310 = vmatprep.mubr.f32.mxu1 %v3394_v8 }
   0x5   :  { %v2537_v4 = vpack.c.bf16 %v59_v2, %v55_v1  ;;  %v2553_v9 = vpack.c.bf16 %v61_v5, %v57_v3  ;;  %v2539_v10 = vpack.c.bf16 %v58_v7, %v54_v6  ;;  %v56_v11 = vld [vmem:[%s4514_s2 + $0x10] sm:$0xff]  ;;  %v63_v13 = vld [vmem:[%s4514_s2 + $0x48] sm:$0xff]  ;;  %v65_v16 = vld [vmem:[%s4514_s2 + $0x58] sm:$0xff] }
   0x6   :  { %v60_v12 = vld [vmem:[%s4514_s2 + $0x30] sm:$0xff]  ;;  %v67_v15 = vld [vmem:[%s4514_s2 + $0x68] sm:$0xff]  ;;  %v69_v17 = vld [vmem:[%s4514_s2 + $0x78] sm:$0xff] }
   0x7   :  { %2538 = vmatprep.subr.bf16.mxu0 %v2537_v4  ;;  %v2555_v14 = vpack.c.bf16 %v60_v12, %v56_v11  ;;  %2554 = vmatprep.subr.bf16.mxu1 %v2553_v9  ;;  %v2541_v18 = vpack.c.bf16 %v67_v15, %v63_v13  ;;  %v2557_v19 = vpack.c.bf16 %v69_v17, %v65_v16  ;;  %v62_v20 = vld [vmem:[%s4514_s2 + $0x40] sm:$0xff]  ;;  %v64_v22 = vld [vmem:[%s4514_s2 + $0x50] sm:$0xff]  ;;  %v71_v25 = vld [vmem:[%s4514_s2 + $0x88] sm:$0xff] }
   0x8   :  { %2540 = vmatpush1.bf16.msra.mxu0 %v2539_v10  ;;  %v66_v21 = vld [vmem:[%s4514_s2 + $0x60] sm:$0xff]  ;;  %v68_v24 = vld [vmem:[%s4514_s2 + $0x70] sm:$0xff]  ;;  %v75_v26 = vld [vmem:[%s4514_s2 + $0xa8] sm:$0xff] }
   0x9   :  { %2556 = vmatpush1.bf16.msra.mxu1 %v2555_v14  ;;  %v2543_v23 = vpack.c.bf16 %v66_v21, %v62_v20  ;;  %2542 = vmatprep.subr.bf16.mxu0 %v2541_v18  ;;  %v2559_v27 = vpack.c.bf16 %v68_v24, %v64_v22  ;;  %v2545_v28 = vpack.c.bf16 %v75_v26, %v71_v25  ;;  %v73_v29 = vld [vmem:[%s4514_s2 + $0x98] sm:$0xff]  ;;  %v70_v31 = vld [vmem:[%s4514_s2 + $0x80] sm:$0xff]  ;;  %v72_v34 = vld [vmem:[%s4514_s2 + $0x90] sm:$0xff] }
   0xa   :  { %2558 = vmatprep.subr.bf16.mxu1 %v2557_v19  ;;  %v77_v30 = vld [vmem:[%s4514_s2 + $0xb8] sm:$0xff]  ;;  %v74_v33 = vld [vmem:[%s4514_s2 + $0xa0] sm:$0xff]  ;;  %v76_v35 = vld [vmem:[%s4514_s2 + $0xb0] sm:$0xff] }
   0xb   :  { %v2561_v32 = vpack.c.bf16 %v77_v30, %v73_v29  ;;  %v2547_v36 = vpack.c.bf16 %v74_v33, %v70_v31  ;;  %v79_v37 = vld [vmem:[%s4514_s2 + $0xc8] sm:$0xff]  ;;  %v81_v39 = vld [vmem:[%s4514_s2 + $0xd8] sm:$0xff]  ;;  %v2563_v40 = vpack.c.bf16 %v76_v35, %v72_v34  ;;  %v78_v43 = vld [vmem:[%s4514_s2 + $0xc0] sm:$0xff] }
   0xc   :  { %2544 = vmatpush1.bf16.msra.mxu0 %v2543_v23  ;;  %v83_v38 = vld [vmem:[%s4514_s2 + $0xe8] sm:$0xff]  ;;  %v85_v42 = vld [vmem:[%s4514_s2 + $0xf8] sm:$0xff]  ;;  %v82_v44 = vld [vmem:[%s4514_s2 + $0xe0] sm:$0xff] }
   0xd   :  { %2560 = vmatpush1.bf16.msra.mxu1 %v2559_v27  ;;  %2546 = vmatprep.subr.bf16.mxu0 %v2545_v28  ;;  %v2549_v41 = vpack.c.bf16 %v83_v38, %v79_v37  ;;  %v2565_v45 = vpack.c.bf16 %v85_v42, %v81_v39  ;;  %v80_v46 = vld [vmem:[%s4514_s2 + $0xd0] sm:$0xff]  ;;  %v392_v48 = vld [vmem:[%s4515_s3 + $0x8] sm:$0xff]  ;;  %v394_v50 = vld [vmem:[%s4515_s3 + $0x18] sm:$0xff]  ;;  %v2551_v51 = vpack.c.bf16 %v82_v44, %v78_v43 }
   0xe   :  { %2562 = vmatprep.subr.bf16.mxu1 %v2561_v32  ;;  %v84_v47 = vld [vmem:[%s4514_s2 + $0xf0] sm:$0xff]  ;;  %v396_v49 = vld [vmem:[%s4515_s3 + $0x28] sm:$0xff]  ;;  %v398_v52 = vld [vmem:[%s4515_s3 + $0x38] sm:$0xff] }
   0xf   :  { %v2567_v53 = vpack.c.bf16 %v84_v47, %v80_v46  ;;  %v3582_v54 = vpack.c.bf16 %v396_v49, %v392_v48  ;;  %v391_v55 = vld [vmem:[%s4515_s3] sm:$0xff]  ;;  %v3590_v57 = vpack.c.bf16 %v398_v52, %v394_v50  ;;  %v393_v58 = vld [vmem:[%s4515_s3 + $0x10] sm:$0xff]  ;;  %v400_v60 = vld [vmem:[%s4515_s3 + $0x48] sm:$0xff] }
  0x10   :  { %2548 = vmatpush1.bf16.msra.mxu0 %v2547_v36  ;;  %v395_v56 = vld [vmem:[%s4515_s3 + $0x20] sm:$0xff]  ;;  %v397_v59 = vld [vmem:[%s4515_s3 + $0x30] sm:$0xff]  ;;  %v404_v61 = vld [vmem:[%s4515_s3 + $0x68] sm:$0xff] }
  0x11   :  { %2564 = vmatpush1.bf16.msra.mxu1 %v2563_v40  ;;  %2550 = vmatprep.subr.bf16.mxu0 %v2549_v41  ;;  %v46_v62 = vld [vmem:[%s4512_s0] sm:$0xff]  ;;  %v3607_v63 = vpack.c.bf16 %v395_v56, %v391_v55  ;;  %v402_v0 = vld [vmem:[%s4515_s3 + $0x58] sm:$0xff]  ;;  %v3616_v2 = vpack.c.bf16 %v397_v59, %v393_v58  ;;  %v3625_v5 = vpack.c.bf16 %v404_v61, %v400_v60  ;;  %v401_v6 = vld [vmem:[%s4515_s3 + $0x50] sm:$0xff] }
  0x12   :  { %2566 = vmatprep.subr.bf16.mxu1 %v2565_v45  ;;  %v406_v1 = vld [vmem:[%s4515_s3 + $0x78] sm:$0xff]  ;;  %v399_v3 = vld [vmem:[%s4515_s3 + $0x40] sm:$0xff]  ;;  %v405_v7 = vld [vmem:[%s4515_s3 + $0x70] sm:$0xff] }
  0x13   :  { %v403_v4 = vld [vmem:[%s4515_s3 + $0x60] sm:$0xff]  ;;  %v3634_v9 = vpack.c.bf16 %v406_v1, %v402_v0  ;;  %v408_v10 = vld [vmem:[%s4515_s3 + $0x88] sm:$0xff]  ;;  %v410_v14 = vld [vmem:[%s4515_s3 + $0x98] sm:$0xff]  ;;  %v3657_v16 = vpack.c.bf16 %v405_v7, %v401_v6 }
  0x14   :  { %2552 = vmatpush1.bf16.msra.mxu0 %v2551_v51  ;;  %v412_v11 = vld [vmem:[%s4515_s3 + $0xa8] sm:$0xff]  ;;  %v3647_v13 = vpack.c.bf16 %v403_v4, %v399_v3  ;;  %v414_v15 = vld [vmem:[%s4515_s3 + $0xb8] sm:$0xff]  ;;  %v407_v17 = vld [vmem:[%s4515_s3 + $0x80] sm:$0xff] }
  0x15   :  { %2568 = vmatpush1.bf16.msra.mxu1 %v2567_v53  ;;  %2570 = vmatprep.subr.bf16.mxu0 %v3582_v54  ;;  %v47_v12 = vld [vmem:[%s4512_s0 + $0x8] sm:$0xff]  ;;  %v411_v18 = vld [vmem:[%s4515_s3 + $0xa0] sm:$0xff]  ;;  %v3667_v19 = vpack.c.bf16 %v412_v11, %v408_v10  ;;  %v409_v20 = vld [vmem:[%s4515_s3 + $0x90] sm:$0xff]  ;;  %v3677_v22 = vpack.c.bf16 %v414_v15, %v410_v14 }
  0x16   :  { %2602 = vmatprep.subr.bf16.mxu1 %v3590_v57  ;;  %v413_v21 = vld [vmem:[%s4515_s3 + $0xb0] sm:$0xff]  ;;  %v416_v23 = vld [vmem:[%s4515_s3 + $0xc8] sm:$0xff]  ;;  %v3690_v26 = vpack.c.bf16 %v411_v18, %v407_v17  ;;  %v418_v27 = vld [vmem:[%s4515_s3 + $0xd8] sm:$0xff] }
  0x17   :  { %2337 = vmatmul.mubr.msk.f32.vlgmr.msra.gmra.mrb[0].mxu0 %vm108_vm0, %v46_v62  ;;  %v420_v24 = vld [vmem:[%s4515_s3 + $0xe8] sm:$0xff]  ;;  %v48_v25 = vld [vmem:[%s4512_s0 + $0x10] sm:$0xff]  ;;  %v422_v28 = vld [vmem:[%s4515_s3 + $0xf8] sm:$0xff]  ;;  %v3700_v29 = vpack.c.bf16 %v413_v21, %v409_v20 }
  0x18   :  { %2345 = vmatmul.mubr.msk.f32.vlgmr.msra.gmra.mrb[0].mxu1 %vm108_vm0, %v46_v62  ;;  %2572 = vmatpush1.bf16.msra.mxu0 %v3607_v63  ;;  %v415_v30 = vld [vmem:[%s4515_s3 + $0xc0] sm:$0xff]  ;;  %v3710_v32 = vpack.c.bf16 %v420_v24, %v416_v23  ;;  %v417_v33 = vld [vmem:[%s4515_s3 + $0xd0] sm:$0xff]  ;;  %v3720_v35 = vpack.c.bf16 %v422_v28, %v418_v27  ;;  %v424_v36 = vld [vmem:[%s4515_s3 + $0x108] sm:$0xff] }
  0x19   :  { %2604 = vmatpush1.bf16.msra.mxu1 %v3616_v2  ;;  %203 = vmatprep.mubr.f32.mxu0 %v3394_v8  ;;  %v419_v31 = vld [vmem:[%s4515_s3 + $0xe0] sm:$0xff]  ;;  %v421_v34 = vld [vmem:[%s4515_s3 + $0xf0] sm:$0xff]  ;;  %v428_v37 = vld [vmem:[%s4515_s3 + $0x128] sm:$0xff] }
  0x1a   :  { %316 = vmatprep.mubr.f32.mxu1 %v3394_v8  ;;  %2574 = vmatprep.subr.bf16.mxu0 %v3625_v5  ;;  %v49_v38 = vld [vmem:[%s4512_s0 + $0x18] sm:$0xff]  ;;  %v3733_v39 = vpack.c.bf16 %v419_v31, %v415_v30  ;;  %v3743_v42 = vpack.c.bf16 %v421_v34, %v417_v33  ;;  %v423_v43 = vld [vmem:[%s4515_s3 + $0x100] sm:$0xff]  ;;  %v3753_v45 = vpack.c.bf16 %v428_v37, %v424_v36  ;;  %v425_v46 = vld [vmem:[%s4515_s3 + $0x110] sm:$0xff] }
  0x1b   :  { %2338 = vmatmul.mubr.msk.f32.gmra.mrb[2].mxu0 %vm108_vm0, %v47_v12  ;;  %2606 = vmatprep.subr.bf16.mxu1 %v3634_v9  ;;  %v426_v40 = vld [vmem:[%s4515_s3 + $0x118] sm:$0xff]  ;;  %v427_v44 = vld [vmem:[%s4515_s3 + $0x120] sm:$0xff]  ;;  %v429_v47 = vld [vmem:[%s4515_s3 + $0x130] sm:$0xff] }
  0x1c   :  { %2346 = vmatmul.mubr.msk.f32.gmra.mrb[2].mxu1 %vm108_vm0, %v47_v12  ;;  %2576 = vmatpush1.bf16.msra.mxu0 %v3647_v13  ;;  %v430_v41 = vld [vmem:[%s4515_s3 + $0x138] sm:$0xff]  ;;  %v432_v49 = vld [vmem:[%s4515_s3 + $0x148] sm:$0xff]  ;;  %v50_v51 = vld [vmem:[%s4512_s0 + $0x20] sm:$0xff]  ;;  %v3776_v52 = vpack.c.bf16 %v427_v44, %v423_v43  ;;  %v3786_v56 = vpack.c.bf16 %v429_v47, %v425_v46 }
  0x1d   :  { %2608 = vmatpush1.bf16.msra.mxu1 %v3657_v16  ;;  %209 = vmatprep.mubr.f32.mxu0 %v3394_v8  ;;  %v3763_v48 = vpack.c.bf16 %v430_v41, %v426_v40  ;;  %v436_v50 = vld [vmem:[%s4515_s3 + $0x168] sm:$0xff]  ;;  %v434_v53 = vld [vmem:[%s4515_s3 + $0x158] sm:$0xff]  ;;  %v431_v58 = vld [vmem:[%s4515_s3 + $0x140] sm:$0xff] }
  0x1e   :  { %322 = vmatprep.mubr.f32.mxu1 %v3394_v8  ;;  %2578 = vmatprep.subr.bf16.mxu0 %v3667_v19  ;;  %v438_v55 = vld [vmem:[%s4515_s3 + $0x178] sm:$0xff]  ;;  %v435_v59 = vld [vmem:[%s4515_s3 + $0x160] sm:$0xff]  ;;  %v3796_v60 = vpack.c.bf16 %v436_v50, %v432_v49  ;;  %v433_v61 = vld [vmem:[%s4515_s3 + $0x150] sm:$0xff] }
  0x1f   :  { %2339 = vmatmul.mubr.msk.f32.gmra.mrb[4].mxu0 %vm108_vm0, %v48_v25  ;;  %2610 = vmatprep.subr.bf16.mxu1 %v3677_v22  ;;  %v437_v62 = vld [vmem:[%s4515_s3 + $0x170] sm:$0xff]  ;;  %v3806_v0 = vpack.c.bf16 %v438_v55, %v434_v53  ;;  %v440_v1 = vld [vmem:[%s4515_s3 + $0x188] sm:$0xff] }
  0x20   :  { %2347 = vmatmul.mubr.msk.f32.gmra.mrb[4].mxu1 %vm108_vm0, %v48_v25  ;;  %2580 = vmatpush1.bf16.msra.mxu0 %v3690_v26  ;;  %v444_v3 = vld [vmem:[%s4515_s3 + $0x1a8] sm:$0xff] }
  0x21   :  { %2612 = vmatpush1.bf16.msra.mxu1 %v3700_v29  ;;  %215 = vmatprep.mubr.f32.mxu0 %v3394_v8 }
  0x22   :  { %328 = vmatprep.mubr.f32.mxu1 %v3394_v8  ;;  %2582 = vmatprep.subr.bf16.mxu0 %v3710_v32 }
  0x23   :  { %2340 = vmatmul.mubr.msk.f32.gmra.mrb[6].mxu0 %vm108_vm0, %v49_v38  ;;  %2614 = vmatprep.subr.bf16.mxu1 %v3720_v35 }
  0x24   :  { %2348 = vmatmul.mubr.msk.f32.gmra.mrb[6].mxu1 %vm108_vm0, %v49_v38  ;;  %2584 = vmatpush1.bf16.msra.mxu0 %v3733_v39 }
  0x25   :  { %2616 = vmatpush1.bf16.msra.mxu1 %v3743_v42  ;;  %221 = vmatprep.mubr.f32.mxu0 %v3394_v8 }
  0x26   :  { %334 = vmatprep.mubr.f32.mxu1 %v3394_v8  ;;  %2586 = vmatprep.subr.bf16.mxu0 %v3753_v45 }
  0x27   :  { %2341 = vmatmul.mubr.msk.f32.gmra.mrb[8].mxu0 %vm108_vm0, %v50_v51  ;;  %2618 = vmatprep.subr.bf16.mxu1 %v3763_v48 }
  0x28   :  { %21 = vsyncpa [#allocation6], 0  ;;  %2349 = vmatmul.mubr.msk.f32.gmra.mrb[8].mxu1 %vm108_vm0, %v50_v51  ;;  %2588 = vmatpush1.bf16.msra.mxu0 %v3776_v52  ;;  %v51_v4 = vld [vmem:[%s4512_s0 + $0x28] sm:$0xff]  ;;  %v3819_v6 = vpack.c.bf16 %v435_v59, %v431_v58  ;;  %v442_v7 = vld [vmem:[%s4515_s3 + $0x198] sm:$0xff]  ;;  %v3829_v11 = vpack.c.bf16 %v437_v62, %v433_v61  ;;  %v3839_v15 = vpack.c.bf16 %v444_v3, %v440_v1  ;;  %v88_v44 = vlaneseq  ;;  %s3398_s14 = smov [#allocation5]  }
  0x29   :  { %v446_v10 = vld [vmem:[%s4515_s3 + $0x1b8] sm:$0xff]  ;;  %2620 = vmatpush1.bf16.msra.mxu1 %v3786_v56  ;;  %227 = vmatprep.mubr.f32.mxu0 %v3394_v8  ;;  %v439_v12 = vld [vmem:[%s4515_s3 + $0x180] sm:$0xff]  ;;  %v441_v17 = vld [vmem:[%s4515_s3 + $0x190] sm:$0xff]  ;;  %vm1923_vm1 = vcmask 7168   ;;  %vm3397_vm2 = vmmov 0   ;;  %s2325_s15 = sshll.u32 %s3398_s14, 4  ;;  %s2326_s15 = int_to_ptr.vmem [resolvable:$true] %s2325_s15 }
  0x2a   :  { %v443_v14 = vld [vmem:[%s4515_s3 + $0x1a0] sm:$0xff]  ;;  %340 = vmatprep.mubr.f32.mxu1 %v3394_v8  ;;  %2590 = vmatprep.subr.bf16.mxu0 %v3796_v60  ;;  %v445_v18 = vld [vmem:[%s4515_s3 + $0x1b0] sm:$0xff]  ;;  %v3849_v20 = vpack.c.bf16 %v446_v10, %v442_v7  ;;  %v448_v21 = vld [vmem:[%s4515_s3 + $0x1c8] sm:$0xff]  ;;  %v89_v46 = vshrl.u32 %v88_v44, 7  ;;  %s3370_s16 = scalar_lea.vmem %s2326_s15, 128  ;;  %p3375_p1 = scmp.lt.s32.totalorder %s2326_s15, %s2326_s15 }
  0x2b   :  { %2342 = vmatmul.mubr.msk.f32.gmra.mrb[10].mxu0 %vm108_vm0, %v51_v4  ;;  %2622 = vmatprep.subr.bf16.mxu1 %v3806_v0  ;;  %v452_v23 = vld [vmem:[%s4515_s3 + $0x1e8] sm:$0xff]  ;;  %v52_v24 = vld [vmem:[%s4512_s0 + $0x30] sm:$0xff]  ;;  %v3862_v25 = vpack.c.bf16 %v443_v14, %v439_v12  ;;  %v450_v27 = vld [vmem:[%s4515_s3 + $0x1d8] sm:$0xff]  ;;  %v3872_v30 = vpack.c.bf16 %v445_v18, %v441_v17  ;;  %p3371_p0 = scmp.ne.s32.totalorder %s2326_s15, %s3370_s16  ;;  %p3376_p2 = scmp.lt.s32.totalorder %s3370_s16, %s3370_s16 }
  0x2c   :  { %2350 = vmatmul.mubr.msk.f32.gmra.mrb[10].mxu1 %vm108_vm0, %v51_v4  ;;  %2592 = vmatpush1.bf16.msra.mxu0 %v3819_v6  ;;  %v454_v28 = vld [vmem:[%s4515_s3 + $0x1f8] sm:$0xff]  ;;  %v447_v31 = vld [vmem:[%s4515_s3 + $0x1c0] sm:$0xff]  ;;  %v3882_v34 = vpack.c.bf16 %v452_v23, %v448_v21  ;;  %v449_v36 = vld [vmem:[%s4515_s3 + $0x1d0] sm:$0xff]  ;;  %v90_v47 = vsub.s32 0, %v89_v46  ;;  %v94_v50 = vsub.s32 1, %v89_v46  ;;  %v102_v58 = vsub.s32 3, %v89_v46 }
  0x2d   :  { %2624 = vmatpush1.bf16.msra.mxu1 %v3829_v11  ;;  %233 = vmatprep.mubr.f32.mxu0 %v3394_v8  ;;  %v451_v33 = vld [vmem:[%s4515_s3 + $0x1e0] sm:$0xff]  ;;  %v453_v37 = vld [vmem:[%s4515_s3 + $0x1f0] sm:$0xff]  ;;  %v3892_v38 = vpack.c.bf16 %v454_v28, %v450_v27  ;;  %v53_v40 = vld [vmem:[%s4512_s0 + $0x38] sm:$0xff]  ;;  %v98_v12 = vsub.s32 2, %v89_v46  ;;  %p3377_p3 = por %p3376_p2, %p3375_p1 }
  0x2e   :  { %346 = vmatprep.mubr.f32.mxu1 %v3394_v8  ;;  %2594 = vmatprep.subr.bf16.mxu0 %v3839_v15  ;;  %v3899_v41 = vpack.c.bf16 %v451_v33, %v447_v31  ;;  %v3903_v43 = vpack.c.bf16 %v453_v37, %v449_v36  ;;  %v86_v49 = vld [vmem:[%s4516_s4] sm:$0xf] }
  0x2f   :  { %2343 = vmatmul.mubr.msk.f32.gmra.mrb[12].mxu0 %vm108_vm0, %v52_v24  ;;  %2626 = vmatprep.subr.bf16.mxu1 %v3849_v20  ;;  %v3955_v51 = vrot.slane %v86_v49, %v90_v47  ;;  %v3957_v53 = vrot.slane %v86_v49, %v94_v50  ;;  %v3961_v10 = vrot.slane %v86_v49, %v102_v58  ;;  %p3378_p4 = pnand %p3377_p3, %p3371_p0 }
  0x30   :  { %2351 = vmatmul.mubr.msk.f32.gmra.mrb[12].mxu1 %vm108_vm0, %v52_v24  ;;  %2596 = vmatpush1.bf16.msra.mxu0 %v3862_v25  ;;  %v3964_v17 = vrot.slane %v86_v49, %v98_v12 }
  0x31   :  { %2628 = vmatpush1.bf16.msra.mxu1 %v3872_v30  ;;  %239 = vmatprep.mubr.f32.mxu0 %v3394_v8 }
  0x32   :  { %352 = vmatprep.mubr.f32.mxu1 %v3394_v8  ;;  %2598 = vmatprep.subr.bf16.mxu0 %v3882_v34 }
  0x33   :  { %2344 = vmatmul.mubr.msk.f32.gmra.mrb[14].mxu0 %vm108_vm0, %v53_v40  ;;  %2630 = vmatprep.subr.bf16.mxu1 %v3892_v38 }
  0x34   :  { %2352 = vmatmul.mubr.msk.f32.gmra.mrb[14].mxu1 %vm108_vm0, %v53_v40  ;;  %2600 = vmatpush1.bf16.msra.mxu0 %v3899_v41 }
  0x35   :  { %2632 = vmatpush1.bf16.msra.mxu1 %v3903_v43  ;;  %523 = vmatprep.mubr.f32.mxu0 %v3394_v8 }
  0x36   :  { %594 = vmatprep.mubr.f32.mxu1 %v3394_v8  ;;  %2634 = vmatprep.subr.bf16.mxu0 %v3582_v54 }
  0x37   :  { %524 = vmatmul.mubr.f32.vlgmr.msra.gmra.mrb[0].mxu0 %v3394_v8  ;;  %2666 = vmatprep.subr.bf16.mxu1 %v3590_v57 }
  0x38   :  { %595 = vmatmul.mubr.f32.vlgmr.msra.gmra.mrb[0].mxu1 %v3394_v8  ;;  %2636 = vmatpush1.bf16.msra.mxu0 %v3607_v63 }
  0x39   :  { %2668 = vmatpush1.bf16.msra.mxu1 %v3616_v2  ;;  %2638 = vmatprep.subr.bf16.mxu0 %v3625_v5 }
  0x3a   :  { %2670 = vmatprep.subr.bf16.mxu1 %v3634_v9  ;;  %699 = vmatprep.mubr.f32.mxu0 %v3394_v8 }
  0x3b   :  { %770 = vmatprep.mubr.f32.mxu1 %v3394_v8 }
  0x3c   :  { %2640 = vmatpush1.bf16.msra.mxu0 %v3647_v13 }
  0x3d   :  { %2672 = vmatpush1.bf16.msra.mxu1 %v3657_v16  ;;  %2642 = vmatprep.subr.bf16.mxu0 %v3667_v19 }
  0x3e   :  { %2674 = vmatprep.subr.bf16.mxu1 %v3677_v22 }
  0x40   :  { %2644 = vmatpush1.bf16.msra.mxu0 %v3690_v26 }
  0x41   :  { %2676 = vmatpush1.bf16.msra.mxu1 %v3700_v29  ;;  %2646 = vmatprep.subr.bf16.mxu0 %v3710_v32 }
  0x42   :  { %2678 = vmatprep.subr.bf16.mxu1 %v3720_v35 }
  0x44   :  { %2648 = vmatpush1.bf16.msra.mxu0 %v3733_v39 }
  0x45   :  { %2680 = vmatpush1.bf16.msra.mxu1 %v3743_v42  ;;  %2650 = vmatprep.subr.bf16.mxu0 %v3753_v45 }
  0x46   :  { %2682 = vmatprep.subr.bf16.mxu1 %v3763_v48 }
  0x48   :  { %2652 = vmatpush1.bf16.msra.mxu0 %v3776_v52 }
  0x49   :  { %2684 = vmatpush1.bf16.msra.mxu1 %v3786_v56  ;;  %2654 = vmatprep.subr.bf16.mxu0 %v3796_v60 }
  0x4a   :  { %2686 = vmatprep.subr.bf16.mxu1 %v3806_v0 }
  0x4c   :  { %2656 = vmatpush1.bf16.msra.mxu0 %v3819_v6 }
  0x4d   :  { %2688 = vmatpush1.bf16.msra.mxu1 %v3829_v11  ;;  %2658 = vmatprep.subr.bf16.mxu0 %v3839_v15 }
  0x4e   :  { %2690 = vmatprep.subr.bf16.mxu1 %v3849_v20 }
  0x50   :  { %2660 = vmatpush1.bf16.msra.mxu0 %v3862_v25 }
  0x51   :  { %2692 = vmatpush1.bf16.msra.mxu1 %v3872_v30  ;;  %2662 = vmatprep.subr.bf16.mxu0 %v3882_v34 }
  0x52   :  { %2694 = vmatprep.subr.bf16.mxu1 %v3892_v38 }
  0x54   :  { %2664 = vmatpush1.bf16.msra.mxu0 %v3899_v41 }
  0x55   :  { %2696 = vmatpush1.bf16.msra.mxu1 %v3903_v43  ;;  %2698 = vmatprep.subr.bf16.mxu0 %v3582_v54 }
  0x56   :  { %2730 = vmatprep.subr.bf16.mxu1 %v3590_v57 }
 0x10a   :  { %v525_v55 = vpop.f32.mrb[0].mxu0 }
 0x10b   :  { %v3153_v59 = vadd.f32 %v525_v55, %v3955_v51  ;;  %v596_v61 = vpop.f32.mrb[0].mxu1  ;;  %v527_v62 = vpop.f32.mrb[1].mxu0  ;;  %v3973_v55 = vld [vmem:[%s4517_s5] ss:$0 sm:$0xff] }
 0x10c   :  { %v3154_v1 = vadd.f32 %v527_v62, %v3957_v53  ;;  %v598_v3 = vpop.f32.mrb[1].mxu1  ;;  %v3169_v21 = vadd.f32 %v596_v61, %v3964_v17 }
 0x10d   :  { %v2353_v4 = vmul.f32 -1.442695, %v3153_v59  ;;  %v3170_v14 = vadd.f32 %v598_v3, %v3961_v10 }
 0x10e   :  { %v2354_v7 = vmul.f32 -1.442695, %v3154_v1 }
 0x10f   :  { %3224 = vpow2.f32 %v2353_v4  ;;  %v2355_v18 = vmul.f32 -1.442695, %v3170_v14 }
 0x110   :  { %3226 = vpow2.f32 %v2354_v7 }
 0x111   :  { %3228 = vpow2.f32 %v2355_v18 }
 0x112   :  { %3230 = vtanh.f32 %v3169_v21 }
 0x119   :  { %v3225_v23 = vpop.eup %3224 }
 0x11a   :  { %v3227_v24 = vpop.eup %3226  ;;  %v608_v27 = vadd.f32 1.0, %v3225_v23 }
 0x11b   :  { %v614_v28 = vadd.f32 1.0, %v3227_v24  ;;  %v3229_v31 = vpop.eup %3228 }
 0x11c   :  { %3232 = vrcp.f32 %v608_v27  ;;  %v3231_v33 = vpop.eup %3230  ;;  %v621_v44 = vadd.f32 1.0, %v3229_v31 }
 0x11d   :  { %3234 = vrcp.f32 %v614_v28 }
 0x11e   :  { %3236 = vrcp.f32 %v621_v44 }
 0x126   :  { %v3233_v36 = vpop.eup %3232 }
 0x127   :  { %v3235_v37 = vpop.eup %3234  ;;  %v625_v40 = vmul.f32 %v3233_v36, %v3231_v33 }
 0x128   :  { %v624_v46 = vmul.f32 0.0, %v3235_v37  ;;  %v3237_v49 = vpop.eup %3236 }
 0x12a   :  { %v3967_v47 = vadd.f32 %v625_v40, %v624_v46 }
 0x12c   :  { %3238 = vtanh.f32 %v3967_v47 }
 0x136   :  { %v3239_v50 = vpop.eup %3238 }
 0x137   :  { %v3975_v58 = vmul.f32 %v3239_v50, %v3237_v49 }
 0x139   :  { %700 = vmatmul.mubr.f32.vlgmr.msra.gmra.mrb[2].mxu0 %v3975_v58  ;;  %771 = vmatmul.mubr.f32.vlgmr.msra.gmra.mrb[2].mxu1 %v3975_v58  ;;  %v1884_v59 = vmul.f32 %v3973_v55, %v3975_v58 }
 0x13a   :  { %2700 = vmatpush1.bf16.msra.mxu0 %v3607_v63  ;;  %2732 = vmatpush1.bf16.msra.mxu1 %v3616_v2 }
 0x13b   :  { %1892 = vadd.xlane.f32.xlu0 %v1884_v59  ;;  %2702 = vmatprep.subr.bf16.mxu0 %v3625_v5 }
 0x13c   :  { %2734 = vmatprep.subr.bf16.mxu1 %v3634_v9  ;;  %876 = vmatprep.mubr.f32.mxu0 %v3394_v8 }
 0x13d   :  { %947 = vmatprep.mubr.f32.mxu1 %v3394_v8 }
 0x13e   :  { %2704 = vmatpush1.bf16.msra.mxu0 %v3647_v13  ;;  %2736 = vmatpush1.bf16.msra.mxu1 %v3657_v16 }
 0x13f   :  { %2706 = vmatprep.subr.bf16.mxu0 %v3667_v19  ;;  %2738 = vmatprep.subr.bf16.mxu1 %v3677_v22 }
 0x142   :  { %2708 = vmatpush1.bf16.msra.mxu0 %v3690_v26  ;;  %2740 = vmatpush1.bf16.msra.mxu1 %v3700_v29 }
 0x143   :  { %2710 = vmatprep.subr.bf16.mxu0 %v3710_v32  ;;  %2742 = vmatprep.subr.bf16.mxu1 %v3720_v35 }
 0x146   :  { %2712 = vmatpush1.bf16.msra.mxu0 %v3733_v39  ;;  %2744 = vmatpush1.bf16.msra.mxu1 %v3743_v42 }
 0x147   :  { %2714 = vmatprep.subr.bf16.mxu0 %v3753_v45  ;;  %2746 = vmatprep.subr.bf16.mxu1 %v3763_v48 }
 0x14a   :  { %2716 = vmatpush1.bf16.msra.mxu0 %v3776_v52  ;;  %2748 = vmatpush1.bf16.msra.mxu1 %v3786_v56 }
 0x14b   :  { %2718 = vmatprep.subr.bf16.mxu0 %v3796_v60  ;;  %2750 = vmatprep.subr.bf16.mxu1 %v3806_v0 }
 0x14e   :  { %2720 = vmatpush1.bf16.msra.mxu0 %v3819_v6  ;;  %2752 = vmatpush1.bf16.msra.mxu1 %v3829_v11 }
 0x14f   :  { %2722 = vmatprep.subr.bf16.mxu0 %v3839_v15  ;;  %2754 = vmatprep.subr.bf16.mxu1 %v3849_v20 }
 0x152   :  { %2724 = vmatpush1.bf16.msra.mxu0 %v3862_v25  ;;  %2756 = vmatpush1.bf16.msra.mxu1 %v3872_v30 }
 0x153   :  { %2726 = vmatprep.subr.bf16.mxu0 %v3882_v34  ;;  %2758 = vmatprep.subr.bf16.mxu1 %v3892_v38 }
 0x156   :  { %2728 = vmatpush1.bf16.msra.mxu0 %v3899_v41  ;;  %2760 = vmatpush1.bf16.msra.mxu1 %v3903_v43 }
 0x157   :  { %2762 = vmatprep.subr.bf16.mxu0 %v3582_v54  ;;  %2794 = vmatprep.subr.bf16.mxu1 %v3590_v57 }
 0x20c   :  { %v701_v61 = vpop.f32.mrb[2].mxu0  ;;  %v772_v62 = vpop.f32.mrb[2].mxu1 }
 0x20d   :  { %v3155_v1 = vadd.f32 %v701_v61, %v3955_v51  ;;  %v703_v3 = vpop.f32.mrb[3].mxu0  ;;  %v774_v4 = vpop.f32.mrb[3].mxu1  ;;  %v3171_v23 = vadd.f32 %v772_v62, %v3964_v17 }
 0x20e   :  { %v3156_v7 = vadd.f32 %v703_v3, %v3957_v53  ;;  %v3172_v18 = vadd.f32 %v774_v4, %v3961_v10 }
 0x20f   :  { %v2356_v12 = vmul.f32 -1.442695, %v3155_v1 }
 0x210   :  { %v2357_v14 = vmul.f32 -1.442695, %v3156_v7  ;;  %v2358_v21 = vmul.f32 -1.442695, %v3172_v18 }
 0x211   :  { %3240 = vpow2.f32 %v2356_v12 }
 0x212   :  { %3242 = vpow2.f32 %v2357_v14 }
 0x213   :  { %3244 = vpow2.f32 %v2358_v21 }
 0x214   :  { %3246 = vtanh.f32 %v3171_v23 }
 0x21b   :  { %v3241_v24 = vpop.eup %3240 }
 0x21c   :  { %v3243_v27 = vpop.eup %3242  ;;  %v784_v28 = vadd.f32 1.0, %v3241_v24 }
 0x21d   :  { %v790_v31 = vadd.f32 1.0, %v3243_v27  ;;  %v3245_v33 = vpop.eup %3244 }
 0x21e   :  { %3248 = vrcp.f32 %v784_v28  ;;  %v3247_v36 = vpop.eup %3246  ;;  %v797_v46 = vadd.f32 1.0, %v3245_v33 }
 0x21f   :  { %3250 = vrcp.f32 %v790_v31 }
 0x220   :  { %3252 = vrcp.f32 %v797_v46 }
 0x228   :  { %v3249_v37 = vpop.eup %3248 }
 0x229   :  { %v3251_v40 = vpop.eup %3250  ;;  %v801_v44 = vmul.f32 %v3249_v37, %v3247_v36 }
 0x22a   :  { %v800_v49 = vmul.f32 %v3251_v40, %v3967_v47  ;;  %v3253_v59 = vpop.eup %3252 }
 0x22c   :  { %v4020_v50 = vadd.f32 %v801_v44, %v800_v49 }
 0x22e   :  { %3254 = vtanh.f32 %v4020_v50 }
 0x238   :  { %v3255_v61 = vpop.eup %3254 }
 0x239   :  { %v4023_v62 = vmul.f32 %v3255_v61, %v3253_v59 }
 0x23b   :  { %877 = vmatmul.mubr.f32.vlgmr.msra.gmra.mrb[4].mxu0 %v4023_v62  ;;  %948 = vmatmul.mubr.f32.vlgmr.msra.gmra.mrb[4].mxu1 %v4023_v62  ;;  %v1885_v1 = vmul.f32 %v3973_v55, %v4023_v62 }
 0x23c   :  { %2764 = vmatpush1.bf16.msra.mxu0 %v3607_v63  ;;  %2796 = vmatpush1.bf16.msra.mxu1 %v3616_v2 }
 0x23d   :  { %1894 = vadd.xlane.f32.xlu0 %v1885_v1  ;;  %2766 = vmatprep.subr.bf16.mxu0 %v3625_v5 }
 0x23e   :  { %2798 = vmatprep.subr.bf16.mxu1 %v3634_v9  ;;  %1053 = vmatprep.mubr.f32.mxu0 %v3394_v8 }
 0x23f   :  { %1124 = vmatprep.mubr.f32.mxu1 %v3394_v8 }
 0x240   :  { %2768 = vmatpush1.bf16.msra.mxu0 %v3647_v13  ;;  %2800 = vmatpush1.bf16.msra.mxu1 %v3657_v16 }
 0x241   :  { %2770 = vmatprep.subr.bf16.mxu0 %v3667_v19  ;;  %2802 = vmatprep.subr.bf16.mxu1 %v3677_v22 }
 0x244   :  { %2772 = vmatpush1.bf16.msra.mxu0 %v3690_v26  ;;  %2804 = vmatpush1.bf16.msra.mxu1 %v3700_v29 }
 0x245   :  { %2774 = vmatprep.subr.bf16.mxu0 %v3710_v32  ;;  %2806 = vmatprep.subr.bf16.mxu1 %v3720_v35 }
 0x248   :  { %2776 = vmatpush1.bf16.msra.mxu0 %v3733_v39  ;;  %2808 = vmatpush1.bf16.msra.mxu1 %v3743_v42 }
 0x249   :  { %2778 = vmatprep.subr.bf16.mxu0 %v3753_v45  ;;  %2810 = vmatprep.subr.bf16.mxu1 %v3763_v48 }
 0x24c   :  { %2780 = vmatpush1.bf16.msra.mxu0 %v3776_v52  ;;  %2812 = vmatpush1.bf16.msra.mxu1 %v3786_v56 }
 0x24d   :  { %2782 = vmatprep.subr.bf16.mxu0 %v3796_v60  ;;  %2814 = vmatprep.subr.bf16.mxu1 %v3806_v0 }
 0x250   :  { %2784 = vmatpush1.bf16.msra.mxu0 %v3819_v6  ;;  %2816 = vmatpush1.bf16.msra.mxu1 %v3829_v11 }
 0x251   :  { %2786 = vmatprep.subr.bf16.mxu0 %v3839_v15  ;;  %2818 = vmatprep.subr.bf16.mxu1 %v3849_v20 }
 0x254   :  { %2788 = vmatpush1.bf16.msra.mxu0 %v3862_v25  ;;  %2820 = vmatpush1.bf16.msra.mxu1 %v3872_v30 }
 0x255   :  { %2790 = vmatprep.subr.bf16.mxu0 %v3882_v34  ;;  %2822 = vmatprep.subr.bf16.mxu1 %v3892_v38 }
 0x258   :  { %2792 = vmatpush1.bf16.msra.mxu0 %v3899_v41  ;;  %2824 = vmatpush1.bf16.msra.mxu1 %v3903_v43 }
 0x259   :  { %2826 = vmatprep.subr.bf16.mxu0 %v3582_v54  ;;  %2858 = vmatprep.subr.bf16.mxu1 %v3590_v57 }
 0x30e   :  { %v878_v47 = vpop.f32.mrb[4].mxu0  ;;  %v949_v3 = vpop.f32.mrb[4].mxu1 }
 0x30f   :  { %v3157_v4 = vadd.f32 %v878_v47, %v3955_v51  ;;  %v880_v7 = vpop.f32.mrb[5].mxu0  ;;  %v951_v12 = vpop.f32.mrb[5].mxu1  ;;  %v3173_v27 = vadd.f32 %v949_v3, %v3964_v17 }
 0x310   :  { %v3158_v14 = vadd.f32 %v880_v7, %v3957_v53  ;;  %v3174_v23 = vadd.f32 %v951_v12, %v3961_v10 }
 0x311   :  { %v2359_v18 = vmul.f32 -1.442695, %v3157_v4 }
 0x312   :  { %v2360_v21 = vmul.f32 -1.442695, %v3158_v14  ;;  %v2361_v24 = vmul.f32 -1.442695, %v3174_v23 }
 0x313   :  { %3256 = vpow2.f32 %v2359_v18 }
 0x314   :  { %3258 = vpow2.f32 %v2360_v21 }
 0x315   :  { %3260 = vpow2.f32 %v2361_v24 }
 0x316   :  { %3262 = vtanh.f32 %v3173_v27 }
 0x31d   :  { %v3257_v28 = vpop.eup %3256 }
 0x31e   :  { %v3259_v31 = vpop.eup %3258  ;;  %v961_v33 = vadd.f32 1.0, %v3257_v28 }
 0x31f   :  { %v967_v36 = vadd.f32 1.0, %v3259_v31  ;;  %v3261_v37 = vpop.eup %3260 }
 0x320   :  { %3264 = vrcp.f32 %v961_v33  ;;  %v3263_v40 = vpop.eup %3262  ;;  %v974_v59 = vadd.f32 1.0, %v3261_v37 }
 0x321   :  { %3266 = vrcp.f32 %v967_v36 }
 0x322   :  { %3268 = vrcp.f32 %v974_v59 }
 0x32a   :  { %v3265_v44 = vpop.eup %3264 }
 0x32b   :  { %v3267_v46 = vpop.eup %3266  ;;  %v978_v49 = vmul.f32 %v3265_v44, %v3263_v40 }
 0x32c   :  { %v977_v61 = vmul.f32 %v3267_v46, %v4020_v50  ;;  %v3269_v47 = vpop.eup %3268 }
 0x32e   :  { %v4068_v1 = vadd.f32 %v978_v49, %v977_v61 }
 0x330   :  { %3270 = vtanh.f32 %v4068_v1 }
 0x33a   :  { %v3271_v3 = vpop.eup %3270 }
 0x33b   :  { %v4071_v4 = vmul.f32 %v3271_v3, %v3269_v47 }
 0x33d   :  { %1054 = vmatmul.mubr.f32.vlgmr.msra.gmra.mrb[6].mxu0 %v4071_v4  ;;  %1125 = vmatmul.mubr.f32.vlgmr.msra.gmra.mrb[6].mxu1 %v4071_v4  ;;  %v1886_v7 = vmul.f32 %v3973_v55, %v4071_v4 }
 0x33e   :  { %2828 = vmatpush1.bf16.msra.mxu0 %v3607_v63  ;;  %2860 = vmatpush1.bf16.msra.mxu1 %v3616_v2 }
 0x33f   :  { %1896 = vadd.xlane.f32.xlu1 %v1886_v7  ;;  %2830 = vmatprep.subr.bf16.mxu0 %v3625_v5 }
 0x340   :  { %2862 = vmatprep.subr.bf16.mxu1 %v3634_v9  ;;  %1230 = vmatprep.mubr.f32.mxu0 %v3394_v8 }
 0x341   :  { %1301 = vmatprep.mubr.f32.mxu1 %v3394_v8 }
 0x342   :  { %2832 = vmatpush1.bf16.msra.mxu0 %v3647_v13  ;;  %2864 = vmatpush1.bf16.msra.mxu1 %v3657_v16 }
 0x343   :  { %2834 = vmatprep.subr.bf16.mxu0 %v3667_v19  ;;  %2866 = vmatprep.subr.bf16.mxu1 %v3677_v22 }
 0x346   :  { %2836 = vmatpush1.bf16.msra.mxu0 %v3690_v26  ;;  %2868 = vmatpush1.bf16.msra.mxu1 %v3700_v29 }
 0x347   :  { %2838 = vmatprep.subr.bf16.mxu0 %v3710_v32  ;;  %2870 = vmatprep.subr.bf16.mxu1 %v3720_v35 }
 0x34a   :  { %2840 = vmatpush1.bf16.msra.mxu0 %v3733_v39  ;;  %2872 = vmatpush1.bf16.msra.mxu1 %v3743_v42 }
 0x34b   :  { %2842 = vmatprep.subr.bf16.mxu0 %v3753_v45  ;;  %2874 = vmatprep.subr.bf16.mxu1 %v3763_v48 }
 0x34e   :  { %2844 = vmatpush1.bf16.msra.mxu0 %v3776_v52  ;;  %2876 = vmatpush1.bf16.msra.mxu1 %v3786_v56 }
 0x34f   :  { %2846 = vmatprep.subr.bf16.mxu0 %v3796_v60  ;;  %2878 = vmatprep.subr.bf16.mxu1 %v3806_v0 }
 0x352   :  { %2848 = vmatpush1.bf16.msra.mxu0 %v3819_v6  ;;  %2880 = vmatpush1.bf16.msra.mxu1 %v3829_v11 }
 0x353   :  { %2850 = vmatprep.subr.bf16.mxu0 %v3839_v15  ;;  %2882 = vmatprep.subr.bf16.mxu1 %v3849_v20 }
 0x356   :  { %2852 = vmatpush1.bf16.msra.mxu0 %v3862_v25  ;;  %2884 = vmatpush1.bf16.msra.mxu1 %v3872_v30 }
 0x357   :  { %2854 = vmatprep.subr.bf16.mxu0 %v3882_v34  ;;  %2886 = vmatprep.subr.bf16.mxu1 %v3892_v38 }
 0x35a   :  { %2856 = vmatpush1.bf16.msra.mxu0 %v3899_v41  ;;  %2888 = vmatpush1.bf16.msra.mxu1 %v3903_v43 }
 0x35b   :  { %2890 = vmatprep.subr.bf16.mxu0 %v3582_v54  ;;  %2922 = vmatprep.subr.bf16.mxu1 %v3590_v57 }
 0x410   :  { %v1055_v50 = vpop.f32.mrb[6].mxu0  ;;  %v1126_v12 = vpop.f32.mrb[6].mxu1 }
 0x411   :  { %v3159_v14 = vadd.f32 %v1055_v50, %v3955_v51  ;;  %v1057_v18 = vpop.f32.mrb[7].mxu0  ;;  %v1128_v21 = vpop.f32.mrb[7].mxu1  ;;  %v3175_v33 = vadd.f32 %v1126_v12, %v3964_v17 }
 0x412   :  { %v3160_v23 = vadd.f32 %v1057_v18, %v3957_v53  ;;  %v3176_v28 = vadd.f32 %v1128_v21, %v3961_v10 }
 0x413   :  { %v2362_v24 = vmul.f32 -1.442695, %v3159_v14 }
 0x414   :  { %v2363_v27 = vmul.f32 -1.442695, %v3160_v23  ;;  %v2364_v31 = vmul.f32 -1.442695, %v3176_v28 }
 0x415   :  { %3272 = vpow2.f32 %v2362_v24 }
 0x416   :  { %3274 = vpow2.f32 %v2363_v27 }
 0x417   :  { %3276 = vpow2.f32 %v2364_v31 }
 0x418   :  { %3278 = vtanh.f32 %v3175_v33 }
 0x41f   :  { %v3273_v36 = vpop.eup %3272 }
 0x420   :  { %v3275_v37 = vpop.eup %3274  ;;  %v1138_v40 = vadd.f32 1.0, %v3273_v36 }
 0x421   :  { %v1144_v44 = vadd.f32 1.0, %v3275_v37  ;;  %v3277_v46 = vpop.eup %3276 }
 0x422   :  { %3280 = vrcp.f32 %v1138_v40  ;;  %v3279_v49 = vpop.eup %3278  ;;  %v1151_v3 = vadd.f32 1.0, %v3277_v46 }
 0x423   :  { %3282 = vrcp.f32 %v1144_v44 }
 0x424   :  { %3284 = vrcp.f32 %v1151_v3 }
 0x42c   :  { %v3281_v59 = vpop.eup %3280 }
 0x42d   :  { %v3283_v61 = vpop.eup %3282  ;;  %v1155_v47 = vmul.f32 %v3281_v59, %v3279_v49 }
 0x42e   :  { %v1154_v7 = vmul.f32 %v3283_v61, %v4068_v1  ;;  %v3285_v12 = vpop.eup %3284 }
 0x430   :  { %v4116_v50 = vadd.f32 %v1155_v47, %v1154_v7 }
 0x432   :  { %3286 = vtanh.f32 %v4116_v50 }
 0x43c   :  { %v3287_v14 = vpop.eup %3286 }
 0x43d   :  { %v4119_v18 = vmul.f32 %v3287_v14, %v3285_v12 }
 0x43f   :  { %1231 = vmatmul.mubr.f32.vlgmr.msra.gmra.mrb[8].mxu0 %v4119_v18  ;;  %1302 = vmatmul.mubr.f32.vlgmr.msra.gmra.mrb[8].mxu1 %v4119_v18  ;;  %v1887_v21 = vmul.f32 %v3973_v55, %v4119_v18 }
 0x440   :  { %2892 = vmatpush1.bf16.msra.mxu0 %v3607_v63  ;;  %2924 = vmatpush1.bf16.msra.mxu1 %v3616_v2 }
 0x441   :  { %1898 = vadd.xlane.f32.xlu1 %v1887_v21  ;;  %2894 = vmatprep.subr.bf16.mxu0 %v3625_v5 }
 0x442   :  { %2926 = vmatprep.subr.bf16.mxu1 %v3634_v9  ;;  %1407 = vmatprep.mubr.f32.mxu0 %v3394_v8 }
 0x443   :  { %1478 = vmatprep.mubr.f32.mxu1 %v3394_v8 }
 0x444   :  { %2896 = vmatpush1.bf16.msra.mxu0 %v3647_v13  ;;  %2928 = vmatpush1.bf16.msra.mxu1 %v3657_v16 }
 0x445   :  { %2898 = vmatprep.subr.bf16.mxu0 %v3667_v19  ;;  %2930 = vmatprep.subr.bf16.mxu1 %v3677_v22 }
 0x448   :  { %2900 = vmatpush1.bf16.msra.mxu0 %v3690_v26  ;;  %2932 = vmatpush1.bf16.msra.mxu1 %v3700_v29 }
 0x449   :  { %2902 = vmatprep.subr.bf16.mxu0 %v3710_v32  ;;  %2934 = vmatprep.subr.bf16.mxu1 %v3720_v35 }
 0x44c   :  { %2904 = vmatpush1.bf16.msra.mxu0 %v3733_v39  ;;  %2936 = vmatpush1.bf16.msra.mxu1 %v3743_v42 }
 0x44d   :  { %2906 = vmatprep.subr.bf16.mxu0 %v3753_v45  ;;  %2938 = vmatprep.subr.bf16.mxu1 %v3763_v48 }
 0x450   :  { %2908 = vmatpush1.bf16.msra.mxu0 %v3776_v52  ;;  %2940 = vmatpush1.bf16.msra.mxu1 %v3786_v56 }
 0x451   :  { %2910 = vmatprep.subr.bf16.mxu0 %v3796_v60  ;;  %2942 = vmatprep.subr.bf16.mxu1 %v3806_v0 }
 0x454   :  { %2912 = vmatpush1.bf16.msra.mxu0 %v3819_v6  ;;  %2944 = vmatpush1.bf16.msra.mxu1 %v3829_v11 }
 0x455   :  { %2914 = vmatprep.subr.bf16.mxu0 %v3839_v15  ;;  %2946 = vmatprep.subr.bf16.mxu1 %v3849_v20 }
 0x458   :  { %2916 = vmatpush1.bf16.msra.mxu0 %v3862_v25  ;;  %2948 = vmatpush1.bf16.msra.mxu1 %v3872_v30 }
 0x459   :  { %2918 = vmatprep.subr.bf16.mxu0 %v3882_v34  ;;  %2950 = vmatprep.subr.bf16.mxu1 %v3892_v38 }
 0x45c   :  { %2920 = vmatpush1.bf16.msra.mxu0 %v3899_v41  ;;  %2952 = vmatpush1.bf16.msra.mxu1 %v3903_v43 }
 0x45d   :  { %2954 = vmatprep.subr.bf16.mxu0 %v3582_v54  ;;  %2986 = vmatprep.subr.bf16.mxu1 %v3590_v57 }
 0x512   :  { %v1232_v1 = vpop.f32.mrb[8].mxu0  ;;  %v1303_v23 = vpop.f32.mrb[8].mxu1 }
 0x513   :  { %v3161_v24 = vadd.f32 %v1232_v1, %v3955_v51  ;;  %v1234_v27 = vpop.f32.mrb[9].mxu0  ;;  %v1305_v28 = vpop.f32.mrb[9].mxu1  ;;  %v3177_v44 = vadd.f32 %v1303_v23, %v3964_v17 }
 0x514   :  { %v3162_v31 = vadd.f32 %v1234_v27, %v3957_v53  ;;  %v3178_v37 = vadd.f32 %v1305_v28, %v3961_v10 }
 0x515   :  { %v2365_v33 = vmul.f32 -1.442695, %v3161_v24 }
 0x516   :  { %v2366_v36 = vmul.f32 -1.442695, %v3162_v31  ;;  %v2367_v40 = vmul.f32 -1.442695, %v3178_v37 }
 0x517   :  { %3288 = vpow2.f32 %v2365_v33 }
 0x518   :  { %3290 = vpow2.f32 %v2366_v36 }
 0x519   :  { %3292 = vpow2.f32 %v2367_v40 }
 0x51a   :  { %3294 = vtanh.f32 %v3177_v44 }
 0x521   :  { %v3289_v46 = vpop.eup %3288 }
 0x522   :  { %v3291_v49 = vpop.eup %3290  ;;  %v1315_v59 = vadd.f32 1.0, %v3289_v46 }
 0x523   :  { %v1321_v61 = vadd.f32 1.0, %v3291_v49  ;;  %v3293_v47 = vpop.eup %3292 }
 0x524   :  { %3296 = vrcp.f32 %v1315_v59  ;;  %v3295_v3 = vpop.eup %3294  ;;  %v1328_v21 = vadd.f32 1.0, %v3293_v47 }
 0x525   :  { %3298 = vrcp.f32 %v1321_v61 }
 0x526   :  { %3300 = vrcp.f32 %v1328_v21 }
 0x52e   :  { %v3297_v7 = vpop.eup %3296 }
 0x52f   :  { %v3299_v12 = vpop.eup %3298  ;;  %v1332_v14 = vmul.f32 %v3297_v7, %v3295_v3 }
 0x530   :  { %v1331_v1 = vmul.f32 %v3299_v12, %v4116_v50  ;;  %v3301_v23 = vpop.eup %3300 }
 0x532   :  { %v4164_v24 = vadd.f32 %v1332_v14, %v1331_v1 }
 0x534   :  { %3302 = vtanh.f32 %v4164_v24 }
 0x53e   :  { %v3303_v27 = vpop.eup %3302 }
 0x53f   :  { %v4167_v28 = vmul.f32 %v3303_v27, %v3301_v23 }
 0x541   :  { %1408 = vmatmul.mubr.f32.vlgmr.msra.gmra.mrb[10].mxu0 %v4167_v28  ;;  %1479 = vmatmul.mubr.f32.vlgmr.msra.gmra.mrb[10].mxu1 %v4167_v28  ;;  %v1888_v31 = vmul.f32 %v3973_v55, %v4167_v28 }
 0x542   :  { %2956 = vmatpush1.bf16.msra.mxu0 %v3607_v63  ;;  %2988 = vmatpush1.bf16.msra.mxu1 %v3616_v2 }
 0x543   :  { %1900 = vadd.xlane.f32.xlu0 %v1888_v31  ;;  %2958 = vmatprep.subr.bf16.mxu0 %v3625_v5 }
 0x544   :  { %2990 = vmatprep.subr.bf16.mxu1 %v3634_v9  ;;  %1584 = vmatprep.mubr.f32.mxu0 %v3394_v8 }
 0x545   :  { %1655 = vmatprep.mubr.f32.mxu1 %v3394_v8 }
 0x546   :  { %2960 = vmatpush1.bf16.msra.mxu0 %v3647_v13  ;;  %2992 = vmatpush1.bf16.msra.mxu1 %v3657_v16 }
 0x547   :  { %2962 = vmatprep.subr.bf16.mxu0 %v3667_v19  ;;  %2994 = vmatprep.subr.bf16.mxu1 %v3677_v22 }
 0x54a   :  { %2964 = vmatpush1.bf16.msra.mxu0 %v3690_v26  ;;  %2996 = vmatpush1.bf16.msra.mxu1 %v3700_v29 }
 0x54b   :  { %2966 = vmatprep.subr.bf16.mxu0 %v3710_v32  ;;  %2998 = vmatprep.subr.bf16.mxu1 %v3720_v35 }
 0x54e   :  { %2968 = vmatpush1.bf16.msra.mxu0 %v3733_v39  ;;  %3000 = vmatpush1.bf16.msra.mxu1 %v3743_v42 }
 0x54f   :  { %2970 = vmatprep.subr.bf16.mxu0 %v3753_v45  ;;  %3002 = vmatprep.subr.bf16.mxu1 %v3763_v48 }
 0x552   :  { %2972 = vmatpush1.bf16.msra.mxu0 %v3776_v52  ;;  %3004 = vmatpush1.bf16.msra.mxu1 %v3786_v56 }
 0x553   :  { %2974 = vmatprep.subr.bf16.mxu0 %v3796_v60  ;;  %3006 = vmatprep.subr.bf16.mxu1 %v3806_v0 }
 0x556   :  { %2976 = vmatpush1.bf16.msra.mxu0 %v3819_v6  ;;  %3008 = vmatpush1.bf16.msra.mxu1 %v3829_v11 }
 0x557   :  { %2978 = vmatprep.subr.bf16.mxu0 %v3839_v15  ;;  %3010 = vmatprep.subr.bf16.mxu1 %v3849_v20 }
 0x55a   :  { %2980 = vmatpush1.bf16.msra.mxu0 %v3862_v25  ;;  %3012 = vmatpush1.bf16.msra.mxu1 %v3872_v30 }
 0x55b   :  { %2982 = vmatprep.subr.bf16.mxu0 %v3882_v34  ;;  %3014 = vmatprep.subr.bf16.mxu1 %v3892_v38 }
 0x55e   :  { %2984 = vmatpush1.bf16.msra.mxu0 %v3899_v41  ;;  %3016 = vmatpush1.bf16.msra.mxu1 %v3903_v43 }
 0x55f   :  { %3018 = vmatprep.subr.bf16.mxu0 %v3582_v54  ;;  %3050 = vmatprep.subr.bf16.mxu1 %v3590_v57 }
 0x614   :  { %v1409_v50 = vpop.f32.mrb[10].mxu0  ;;  %v1480_v33 = vpop.f32.mrb[10].mxu1 }
 0x615   :  { %v3163_v36 = vadd.f32 %v1409_v50, %v3955_v51  ;;  %v1411_v37 = vpop.f32.mrb[11].mxu0  ;;  %v1482_v40 = vpop.f32.mrb[11].mxu1  ;;  %v3179_v47 = vadd.f32 %v1480_v33, %v3964_v17 }
 0x616   :  { %v3164_v44 = vadd.f32 %v1411_v37, %v3957_v53  ;;  %v3180_v59 = vadd.f32 %v1482_v40, %v3961_v10 }
 0x617   :  { %v2368_v46 = vmul.f32 -1.442695, %v3163_v36 }
 0x618   :  { %v2369_v49 = vmul.f32 -1.442695, %v3164_v44  ;;  %v2370_v61 = vmul.f32 -1.442695, %v3180_v59 }
 0x619   :  { %3304 = vpow2.f32 %v2368_v46 }
 0x61a   :  { %3306 = vpow2.f32 %v2369_v49 }
 0x61b   :  { %3308 = vpow2.f32 %v2370_v61 }
 0x61c   :  { %3310 = vtanh.f32 %v3179_v47 }
 0x623   :  { %v3305_v54 = vpop.eup %3304 }
 0x624   :  { %v3307_v3 = vpop.eup %3306  ;;  %v1492_v57 = vadd.f32 1.0, %v3305_v54 }
 0x625   :  { %v1498_v7 = vadd.f32 1.0, %v3307_v3  ;;  %v3309_v12 = vpop.eup %3308 }
 0x626   :  { %3312 = vrcp.f32 %v1492_v57  ;;  %v3311_v14 = vpop.eup %3310  ;;  %v1505_v27 = vadd.f32 1.0, %v3309_v12 }
 0x627   :  { %3314 = vrcp.f32 %v1498_v7 }
 0x628   :  { %3316 = vrcp.f32 %v1505_v27 }
 0x630   :  { %v3313_v21 = vpop.eup %3312 }
 0x631   :  { %v3315_v1 = vpop.eup %3314  ;;  %v1509_v23 = vmul.f32 %v3313_v21, %v3311_v14 }
 0x632   :  { %v1508_v31 = vmul.f32 %v3315_v1, %v4164_v24  ;;  %v3317_v33 = vpop.eup %3316 }
 0x634   :  { %v4212_v50 = vadd.f32 %v1509_v23, %v1508_v31 }
 0x636   :  { %3318 = vtanh.f32 %v4212_v50 }
 0x640   :  { %v3319_v36 = vpop.eup %3318 }
 0x641   :  { %v4215_v37 = vmul.f32 %v3319_v36, %v3317_v33  ;;  %v3395_v36 = vmov 0  }
 0x642   :  { %3223 = vset.pattern.permute.xlu1 %v3395_v36  ;;  %3222 = vset.pattern.permute.xlu0 %v3395_v36 }
 0x643   :  { %1585 = vmatmul.mubr.f32.vlgmr.msra.gmra.mrb[12].mxu0 %v4215_v37  ;;  %1656 = vmatmul.mubr.f32.vlgmr.msra.gmra.mrb[12].mxu1 %v4215_v37  ;;  %v1889_v40 = vmul.f32 %v3973_v55, %v4215_v37 }
 0x644   :  { %3020 = vmatpush1.bf16.msra.mxu0 %v3607_v63  ;;  %3052 = vmatpush1.bf16.msra.mxu1 %v3616_v2 }
 0x645   :  { %1902 = vadd.xlane.f32.xlu1 %v1889_v40  ;;  %3022 = vmatprep.subr.bf16.mxu0 %v3625_v5  ;;  %v2060_v40 = vld [vmem:[%s4520_s8] sm:$0xff] }
 0x646   :  { %3054 = vmatprep.subr.bf16.mxu1 %v3634_v9  ;;  %1761 = vmatprep.mubr.f32.mxu0 %v3394_v8 }
 0x647   :  { %1832 = vmatprep.mubr.f32.mxu1 %v3394_v8 }
 0x648   :  { %3024 = vmatpush1.bf16.msra.mxu0 %v3647_v13  ;;  %3056 = vmatpush1.bf16.msra.mxu1 %v3657_v16 }
 0x649   :  { %3026 = vmatprep.subr.bf16.mxu0 %v3667_v19  ;;  %3058 = vmatprep.subr.bf16.mxu1 %v3677_v22 }
 0x64c   :  { %3028 = vmatpush1.bf16.msra.mxu0 %v3690_v26  ;;  %3060 = vmatpush1.bf16.msra.mxu1 %v3700_v29 }
 0x64d   :  { %3030 = vmatprep.subr.bf16.mxu0 %v3710_v32  ;;  %3062 = vmatprep.subr.bf16.mxu1 %v3720_v35 }
 0x650   :  { %3032 = vmatpush1.bf16.msra.mxu0 %v3733_v39  ;;  %3064 = vmatpush1.bf16.msra.mxu1 %v3743_v42 }
 0x651   :  { %3034 = vmatprep.subr.bf16.mxu0 %v3753_v45  ;;  %3066 = vmatprep.subr.bf16.mxu1 %v3763_v48 }
 0x654   :  { %3036 = vmatpush1.bf16.msra.mxu0 %v3776_v52  ;;  %3068 = vmatpush1.bf16.msra.mxu1 %v3786_v56 }
 0x655   :  { %3038 = vmatprep.subr.bf16.mxu0 %v3796_v60  ;;  %3070 = vmatprep.subr.bf16.mxu1 %v3806_v0 }
 0x658   :  { %3040 = vmatpush1.bf16.msra.mxu0 %v3819_v6  ;;  %3072 = vmatpush1.bf16.msra.mxu1 %v3829_v11 }
 0x659   :  { %3042 = vmatprep.subr.bf16.mxu0 %v3839_v15  ;;  %3074 = vmatprep.subr.bf16.mxu1 %v3849_v20 }
 0x65c   :  { %3044 = vmatpush1.bf16.msra.mxu0 %v3862_v25  ;;  %3076 = vmatpush1.bf16.msra.mxu1 %v3872_v30 }
 0x65d   :  { %3046 = vmatprep.subr.bf16.mxu0 %v3882_v34  ;;  %3078 = vmatprep.subr.bf16.mxu1 %v3892_v38 }
 0x660   :  { %3048 = vmatpush1.bf16.msra.mxu0 %v3899_v41  ;;  %3080 = vmatpush1.bf16.msra.mxu1 %v3903_v43 }
 0x716   :  { %v1586_v63 = vpop.f32.mrb[12].mxu0  ;;  %v1657_v2 = vpop.f32.mrb[12].mxu1 }
 0x717   :  { %v3165_v5 = vadd.f32 %v1586_v63, %v3955_v51  ;;  %v1588_v9 = vpop.f32.mrb[13].mxu0  ;;  %v1659_v13 = vpop.f32.mrb[13].mxu1  ;;  %v3181_v32 = vadd.f32 %v1657_v2, %v3964_v17  ;;  %v2061_v63 = vld [vmem:[%s4520_s8 + $0x8] sm:$0xff]  ;;  %v2044_v2 = vld [vmem:[%s4519_s7] sm:$0xff] }
 0x718   :  { %v3166_v16 = vadd.f32 %v1588_v9, %v3957_v53  ;;  %v3182_v26 = vadd.f32 %v1659_v13, %v3961_v10  ;;  %v2045_v9 = vld [vmem:[%s4519_s7 + $0x8] sm:$0xff] }
 0x719   :  { %v2371_v19 = vmul.f32 -1.442695, %v3165_v5  ;;  %v3396_v5 = vmov 0.0|0.0   ;;  %v3106_v13 = vpack.c.bf16 %v2045_v9, %v2044_v2 }
 0x71a   :  { %v2372_v22 = vmul.f32 -1.442695, %v3166_v16  ;;  %v2373_v29 = vmul.f32 -1.442695, %v3182_v26  ;;  %3081 = vmatprep.subr.bf16.mxu0 %v3396_v5  ;;  %3105 = vmatprep.subr.bf16.mxu1 %v3396_v5  ;;  %v1893_v16 = vpop.xlane.xlu0 %1892 }
 0x71b   :  { %3320 = vpow2.f32 %v2371_v19  ;;  %v1897_v19 = vpop.xlane.xlu1 %1896 }
 0x71c   :  { %3322 = vpow2.f32 %v2372_v22 }
 0x71d   :  { %3324 = vpow2.f32 %v2373_v29 }
 0x71e   :  { %3326 = vtanh.f32 %v3181_v32  ;;  %v1895_v22 = vpop.xlane.xlu0 %1894 }
 0x71f   :  { %v1899_v26 = vpop.xlane.xlu1 %1898 }
 0x722   :  { %v1901_v29 = vpop.xlane.xlu0 %1900 }
 0x723   :  { %v1903_v32 = vpop.xlane.xlu1 %1902 }
 0x725   :  { %v3321_v35 = vpop.eup %3320 }
 0x726   :  { %v3323_v39 = vpop.eup %3322  ;;  %v1669_v42 = vadd.f32 1.0, %v3321_v35  ;;  %v2378_v35 = vld [vmem:[#allocation4] ss:$0 sm:$0xff] }
 0x727   :  { %v1675_v45 = vadd.f32 1.0, %v3323_v39  ;;  %v3325_v48 = vpop.eup %3324 }
 0x728   :  { %3328 = vrcp.f32 %v1669_v42  ;;  %v3327_v52 = vpop.eup %3326  ;;  %v1682_v6 = vadd.f32 1.0, %v3325_v48  ;;  %v1920_v42 = vadd.f32 %v2378_v35, %v1903_v32  ;;  %v1919_v48 = vadd.f32 %v2378_v35, %v1901_v29 }
 0x729   :  { %3330 = vrcp.f32 %v1675_v45  ;;  %v1916_v45 = vadd.f32 %v2378_v35, %v1895_v22 }
 0x72a   :  { %3332 = vrcp.f32 %v1682_v6  ;;  %v1930_v6 = vsel %vm1923_vm1, %v1920_v42, -inf }
 0x732   :  { %v3329_v56 = vpop.eup %3328 }
 0x733   :  { %v3331_v60 = vpop.eup %3330  ;;  %v1686_v0 = vmul.f32 %v3329_v56, %v3327_v52  ;;  %v1915_v56 = vadd.f32 %v2378_v35, %v1893_v16 }
 0x734   :  { %v1685_v11 = vmul.f32 %v3331_v60, %v4212_v50  ;;  %v3333_v20 = vpop.eup %3332  ;;  %v1917_v60 = vadd.f32 %v2378_v35, %v1897_v19 }
 0x736   :  { %v1687_v15 = vadd.f32 %v1686_v0, %v1685_v11  ;;  %v1918_v0 = vadd.f32 %v2378_v35, %v1899_v26 }
 0x738   :  { %3334 = vtanh.f32 %v1687_v15 }
 0x742   :  { %v3335_v25 = vpop.eup %3334 }
 0x743   :  { %v4258_v30 = vmul.f32 %v3335_v25, %v3333_v20  ;;  %v1928_v20 = vsel %vm1923_vm1, %v1919_v48, -inf }
 0x745   :  { %1762 = vmatmul.mubr.f32.vlgmr.msra.gmra.mrb[14].mxu0 %v4258_v30  ;;  %1833 = vmatmul.mubr.f32.vlgmr.msra.gmra.mrb[14].mxu1 %v4258_v30  ;;  %v1890_v34 = vmul.f32 %v3973_v55, %v4258_v30 }
 0x746   :  { %3107 = vmatpush3.bf16.msra.mxu1 %v3106_v13  ;;  %2464 = vmatprep.mubr.msk.f32.mxu0 %vm3397_vm2, %v3394_v8 }
 0x747   :  { %1904 = vadd.xlane.f32.xlu0 %v1890_v34  ;;  %3108 = vmatprep.subr.bf16.mxu1 %v3396_v5 }
 0x748   :  { %2499 = vmatprep.mubr.msk.f32.mxu1 %vm3397_vm2, %v3394_v8 }
 0x7d4   :  { %v1905_v39 = vpop.xlane.xlu0 %1904 }
 0x7d5   :  { %v1921_v52 = vadd.f32 %v2378_v35, %v1905_v39 }
 0x7d7   :  { %v1932_v25 = vsel %vm1923_vm1, %v1921_v52, -inf }
 0x818   :  { %v1763_v38 = vpop.f32.mrb[14].mxu0  ;;  %v1834_v41 = vpop.f32.mrb[14].mxu1 }
 0x819   :  { %v3167_v43 = vadd.f32 %v1763_v38, %v3955_v51  ;;  %v1765_v24 = vpop.f32.mrb[15].mxu0  ;;  %v1836_v44 = vpop.f32.mrb[15].mxu1  ;;  %v3183_v54 = vadd.f32 %v1834_v41, %v3964_v17  ;;  %v1924_v41 = vsel %vm1923_vm1, %v1915_v56, -inf }
 0x81a   :  { %v3168_v46 = vadd.f32 %v1765_v24, %v3957_v53  ;;  %v3184_v61 = vadd.f32 %v1836_v44, %v3961_v10  ;;  %v1927_v24 = vsel %vm1923_vm1, %v1918_v0, -inf }
 0x81b   :  { %v2374_v49 = vmul.f32 -1.442695, %v3167_v43  ;;  %v1926_v43 = vsel %vm1923_vm1, %v1917_v60, -inf }
 0x81c   :  { %v2375_v59 = vmul.f32 -1.442695, %v3168_v46  ;;  %v2376_v47 = vmul.f32 -1.442695, %v3184_v61  ;;  %v1929_v46 = vmax.f32 %v1924_v41, %v1928_v20  ;;  %v2062_v41 = vld [vmem:[%s4520_s8 + $0x10] sm:$0xff] }
 0x81d   :  { %3336 = vpow2.f32 %v2374_v49  ;;  %v1933_v49 = vmax.f32 %v1926_v43, %v1932_v25  ;;  %v2063_v43 = vld [vmem:[%s4520_s8 + $0x18] sm:$0xff] }
 0x81e   :  { %3338 = vpow2.f32 %v2375_v59 }
 0x81f   :  { %3340 = vpow2.f32 %v2376_v47 }
 0x820   :  { %3342 = vtanh.f32 %v3183_v54 }
 0x827   :  { %v3337_v3 = vpop.eup %3336 }
 0x828   :  { %v3339_v57 = vpop.eup %3338  ;;  %v1846_v7 = vadd.f32 1.0, %v3337_v3 }
 0x829   :  { %v1852_v12 = vadd.f32 1.0, %v3339_v57  ;;  %v3341_v51 = vpop.eup %3340 }
 0x82a   :  { %3344 = vrcp.f32 %v1846_v7  ;;  %v3343_v14 = vpop.eup %3342  ;;  %v1859_v23 = vadd.f32 1.0, %v3341_v51 }
 0x82b   :  { %3346 = vrcp.f32 %v1852_v12 }
 0x82c   :  { %3348 = vrcp.f32 %v1859_v23 }
 0x834   :  { %v3345_v53 = vpop.eup %3344 }
 0x835   :  { %v3347_v21 = vpop.eup %3346  ;;  %v1863_v1 = vmul.f32 %v3345_v53, %v3343_v14 }
 0x836   :  { %v1862_v27 = vmul.f32 %v3347_v21, %v1687_v15  ;;  %v3349_v10 = vpop.eup %3348  ;;  %v1925_v15 = vsel %vm1923_vm1, %v1916_v45, -inf }
 0x837   :  { %v1931_v38 = vmax.f32 %v1925_v15, %v1930_v6 }
 0x838   :  { %v1864_v31 = vadd.f32 %v1863_v1, %v1862_v27 }
 0x839   :  { %v1936_v61 = vmax.f32 %v1929_v46, %v1931_v38  ;;  %v2047_v38 = vld [vmem:[%s4519_s7 + $0x18] sm:$0xff] }
 0x83a   :  { %3350 = vtanh.f32 %v1864_v31 }
 0x844   :  { %v3351_v17 = vpop.eup %3350 }
 0x845   :  { %v4268_v50 = vmul.f32 %v3351_v17, %v3349_v10 }
 0x847   :  { %v1891_v33 = vmul.f32 %v3973_v55, %v4268_v50  ;;  %v3082_v55 = vpack.c.bf16 %v2061_v63, %v2060_v40 }
 0x849   :  { %1906 = vadd.xlane.f32.xlu1 %v1891_v33  ;;  %3083 = vmatpush3.bf16.msra.mxu0 %v3082_v55 }
 0x84a   :  { %3084 = vmatprep.subr.bf16.mxu0 %v3396_v5 }
 0x8d6   :  { %v1907_v11 = vpop.xlane.xlu1 %1906 }
 0x8d7   :  { %v1922_v34 = vadd.f32 %v2378_v35, %v1907_v11 }
 0x8d9   :  { %v1934_v44 = vsel %vm1923_vm1, %v1922_v34, -inf }
 0x8da   :  { %v1935_v59 = vmax.f32 %v1927_v24, %v1934_v44  ;;  %v3085_v24 = vpack.c.bf16 %v2063_v43, %v2062_v41 }
 0x8dc   :  { %v1937_v47 = vmax.f32 %v1933_v49, %v1935_v59  ;;  %3086 = vmatpush3.bf16.msra.mxu0 %v3085_v24  ;;  %v2048_v49 = vld [vmem:[%s4519_s7 + $0x20] sm:$0xff]  ;;  %v2049_v59 = vld [vmem:[%s4519_s7 + $0x28] sm:$0xff] }
 0x8dd   :  { %3087 = vmatprep.subr.bf16.mxu0 %v3396_v5 }
 0x8de   :  { %v1938_v54 = vmax.f32 %v1936_v61, %v1937_v47  ;;  %v2064_v61 = vld [vmem:[%s4520_s8 + $0x20] sm:$0xff]  ;;  %v2065_v47 = vld [vmem:[%s4520_s8 + $0x28] sm:$0xff] }
 0x8e0   :  { %v1941_v3 = vsub.f32 %v1917_v60, %v1938_v54  ;;  %v1939_v57 = vsub.f32 %v1915_v56, %v1938_v54  ;;  %v1940_v7 = vsub.f32 %v1916_v45, %v1938_v54  ;;  %v1942_v12 = vsub.f32 %v1918_v0, %v1938_v54 }
 0x8e1   :  { %v1943_v53 = vsub.f32 %v1919_v48, %v1938_v54  ;;  %v1944_v1 = vsub.f32 %v1920_v42, %v1938_v54  ;;  %v1945_v27 = vsub.f32 %v1921_v52, %v1938_v54  ;;  %v1946_v10 = vsub.f32 %v1922_v34, %v1938_v54  ;;  %v2046_v34 = vld [vmem:[%s4519_s7 + $0x10] sm:$0xff] }
 0x8e2   :  { %v1951_v51 = vmul.f32 1.442695, %v1941_v3  ;;  %v1947_v14 = vmul.f32 1.442695, %v1939_v57  ;;  %v1949_v21 = vmul.f32 1.442695, %v1940_v7  ;;  %v3109_v44 = vpack.c.bf16 %v2047_v38, %v2046_v34 }
 0x8e3   :  { %v1953_v23 = vmul.f32 1.442695, %v1942_v12  ;;  %v1955_v31 = vmul.f32 1.442695, %v1943_v53  ;;  %v1957_v17 = vmul.f32 1.442695, %v1944_v1  ;;  %v3112_v54 = vpack.c.bf16 %v2049_v59, %v2048_v49 }
 0x8e4   :  { %3352 = vpow2.f32 %v1951_v51  ;;  %v1959_v33 = vmul.f32 1.442695, %v1945_v27  ;;  %v1961_v36 = vmul.f32 1.442695, %v1946_v10  ;;  %3110 = vmatpush3.bf16.msra.mxu1 %v3109_v44  ;;  %v3088_v3 = vpack.c.bf16 %v2065_v47, %v2064_v61  ;;  %v2050_v7 = vld [vmem:[%s4519_s7 + $0x30] sm:$0xff]  ;;  %v2051_v12 = vld [vmem:[%s4519_s7 + $0x38] sm:$0xff] }
 0x8e5   :  { %3354 = vpow2.f32 %v1947_v14  ;;  %3111 = vmatprep.subr.bf16.mxu1 %v3396_v5  ;;  %v2066_v51 = vld [vmem:[%s4520_s8 + $0x30] sm:$0xff]  ;;  %v2067_v14 = vld [vmem:[%s4520_s8 + $0x38] sm:$0xff]  ;;  %v3115_v53 = vpack.c.bf16 %v2051_v12, %v2050_v7  ;;  %v2053_v27 = vld [vmem:[%s4519_s7 + $0x48] sm:$0xff] }
 0x8e6   :  { %3356 = vpow2.f32 %v1949_v21  ;;  %3089 = vmatpush3.bf16.msra.mxu0 %v3088_v3  ;;  %v3091_v21 = vpack.c.bf16 %v2067_v14, %v2066_v51  ;;  %v2069_v10 = vld [vmem:[%s4520_s8 + $0x48] sm:$0xff] }
 0x8e7   :  { %3358 = vpow2.f32 %v1953_v23  ;;  %3090 = vmatprep.subr.bf16.mxu0 %v3396_v5  ;;  %v2052_v23 = vld [vmem:[%s4519_s7 + $0x40] sm:$0xff]  ;;  %v2230_v14 = vld [vmem:[%s4522_s10 + $0x28] sm:$0xff] }
 0x8e8   :  { %3360 = vpow2.f32 %v1955_v31  ;;  %3113 = vmatpush3.bf16.msra.mxu1 %v3112_v54  ;;  %v2068_v31 = vld [vmem:[%s4520_s8 + $0x40] sm:$0xff] }
 0x8e9   :  { %3362 = vpow2.f32 %v1957_v17  ;;  %3114 = vmatprep.subr.bf16.mxu1 %v3396_v5  ;;  %v3118_v17 = vpack.c.bf16 %v2053_v27, %v2052_v23  ;;  %v2233_v23 = vld [vmem:[%s4522_s10 + $0x40] sm:$0xff]  ;;  %v2234_v27 = vld [vmem:[%s4522_s10 + $0x48] sm:$0xff] }
 0x8ea   :  { %3364 = vpow2.f32 %v1959_v33  ;;  %3092 = vmatpush3.bf16.msra.mxu0 %v3091_v21  ;;  %v3094_v33 = vpack.c.bf16 %v2069_v10, %v2068_v31  ;;  %v2231_v21 = vld [vmem:[%s4522_s10 + $0x30] sm:$0xff]  ;;  %v3142_v31 = vpack.c.bf16 %v2234_v27, %v2233_v23 }
 0x8eb   :  { %3366 = vpow2.f32 %v1961_v36  ;;  %3093 = vmatprep.subr.bf16.mxu0 %v3396_v5  ;;  %v2235_v10 = vld [vmem:[%s4522_s10 + $0x50] sm:$0xff] }
 0x8ec   :  { %3116 = vmatpush3.bf16.msra.mxu1 %v3115_v53 }
 0x8ed   :  { %3117 = vmatprep.subr.bf16.mxu1 %v3396_v5 }
 0x8ee   :  { %v3353_v40 = vpop.eup %3352  ;;  %3095 = vmatpush3.bf16.msra.mxu0 %v3094_v33 }
 0x8ef   :  { %v3355_v63 = vpop.eup %3354  ;;  %v1966_v19 = vsel %vm1923_vm1, %v3353_v40, 0.0  ;;  %3096 = vmatprep.subr.bf16.mxu0 %v3396_v5 }
 0x8f0   :  { %v3357_v2 = vpop.eup %3356  ;;  %v1963_v55 = vsel %vm1923_vm1, %v3355_v63, 0.0  ;;  %3119 = vmatpush3.bf16.msra.mxu1 %v3118_v17  ;;  %v2236_v17 = vld [vmem:[%s4522_s10 + $0x58] sm:$0xff] }
 0x8f1   :  { %v1964_v9 = vsel %vm1923_vm1, %v3357_v2, 0.0  ;;  %v3359_v13 = vpop.eup %3358  ;;  %3120 = vmatprep.subr.bf16.mxu1 %v3396_v5  ;;  %v3145_v33 = vpack.c.bf16 %v2236_v17, %v2235_v10 }
 0x8f2   :  { %v1965_v16 = vadd.f32 %v1964_v9, %v1963_v55  ;;  %v3361_v22 = vpop.eup %3360  ;;  %v1968_v29 = vsel %vm1923_vm1, %v3359_v13, 0.0  ;;  %v2071_v55 = vld [vmem:[%s4520_s8 + $0x58] sm:$0xff] }
 0x8f3   :  { %v3363_v32 = vpop.eup %3362  ;;  %v1970_v39 = vsel %vm1923_vm1, %v3361_v22, 0.0 }
 0x8f4   :  { %v1967_v26 = vadd.f32 %v1966_v19, %v1965_v16  ;;  %v4301_v42 = vpop.eup %3364  ;;  %v1972_v48 = vsel %vm1923_vm1, %v3363_v32, 0.0  ;;  %v2056_v19 = vld [vmem:[%s4519_s7 + $0x60] sm:$0xff] }
 0x8f5   :  { %v4304_v52 = vpop.eup %3366  ;;  %v1974_v60 = vsel %vm1923_vm1, %v4301_v42, 0.0 }
 0x8f6   :  { %v1969_v35 = vadd.f32 %v1968_v29, %v1967_v26  ;;  %v1976_v6 = vsel %vm1923_vm1, %v4304_v52, 0.0  ;;  %v2072_v26 = vld [vmem:[%s4520_s8 + $0x60] sm:$0xff]  ;;  %v2073_v29 = vld [vmem:[%s4520_s8 + $0x68] sm:$0xff] }
 0x8f8   :  { %v1971_v45 = vadd.f32 %v1970_v39, %v1969_v35  ;;  %v3100_v35 = vpack.c.bf16 %v2073_v29, %v2072_v26 }
 0x8fa   :  { %v1973_v56 = vadd.f32 %v1972_v48, %v1971_v45  ;;  %v2059_v45 = vld [vmem:[%s4519_s7 + $0x78] sm:$0xff]  ;;  %v2074_v48 = vld [vmem:[%s4520_s8 + $0x70] sm:$0xff] }
 0x8fc   :  { %v1975_v0 = vadd.f32 %v1974_v60, %v1973_v56 }
 0x8fe   :  { %v1977_v11 = vadd.f32 %v1976_v6, %v1975_v0  ;;  %v2043_v0 = vld [vmem:[%s4513_s1] sm:$0xff] }
 0x900   :  { %3368 = vrcp.f32 %v1977_v11 }
 0x90a   :  { %v4310_v15 = vpop.eup %3368 }
 0x90b   :  { %v1980_v20 = vmul.f32 %v4310_v15, %v3357_v2  ;;  %v1979_v25 = vmul.f32 %v4310_v15, %v3355_v63  ;;  %v1981_v46 = vmul.f32 %v4310_v15, %v3353_v40  ;;  %v1982_v57 = vmul.f32 %v4310_v15, %v3359_v13  ;;  %v2054_v40 = vld [vmem:[%s4519_s7 + $0x50] sm:$0xff]  ;;  %v2055_v63 = vld [vmem:[%s4519_s7 + $0x58] sm:$0xff] }
 0x90c   :  { %v1983_v1 = vmul.f32 %v4310_v15, %v3361_v22  ;;  %v1984_v36 = vmul.f32 %v4310_v15, %v3363_v32  ;;  %v2070_v2 = vld [vmem:[%s4520_s8 + $0x50] sm:$0xff]  ;;  %v3121_v9 = vpack.c.bf16 %v2055_v63, %v2054_v40  ;;  %v1985_v16 = vmul.f32 %v4310_v15, %v4301_v42  ;;  %v2057_v22 = vld [vmem:[%s4519_s7 + $0x68] sm:$0xff] }
 0x90d   :  { %1994 = vperm.xlu1 %3223, %v1980_v20   ;;  %1989 = vperm.xlu0 %3222, %v1979_v25   ;;  %v3097_v13 = vpack.c.bf16 %v2071_v55, %v2070_v2  ;;  %v3124_v32 = vpack.c.bf16 %v2057_v22, %v2056_v19  ;;  %v1986_v39 = vmul.f32 %v4310_v15, %v4304_v52  ;;  %v2058_v42 = vld [vmem:[%s4519_s7 + $0x70] sm:$0xff]  ;;  %v2075_v52 = vld [vmem:[%s4520_s8 + $0x78] sm:$0xff]  ;;  %v2238_v40 = vld [vmem:[%s4522_s10 + $0x68] sm:$0xff] }
 0x90e   :  { %3122 = vmatpush3.bf16.msra.mxu1 %v3121_v9  ;;  %v3127_v56 = vpack.c.bf16 %v2059_v45, %v2058_v42  ;;  %v3103_v60 = vpack.c.bf16 %v2075_v52, %v2074_v48  ;;  %v2239_v9 = vld [vmem:[%s4522_s10 + $0x70] sm:$0xff]  ;;  %v2379_v22 = vld [vmem:[%s4521_s9] ss:$0 sm:$0xff] }
 0x90f   :  { %3098 = vmatpush3.bf16.msra.mxu0 %v3097_v13  ;;  %3123 = vmatprep.subr.bf16.mxu1 %v3396_v5  ;;  %v2240_v13 = vld [vmem:[%s4522_s10 + $0x78] sm:$0xff] }
 0x910   :  { %3099 = vmatprep.subr.bf16.mxu0 %v3396_v5 }
 0x911   :  { %1999 = vperm.xlu1 %3223, %v1981_v46  }
 0x912   :  { %3125 = vmatpush3.bf16.msra.mxu1 %v3124_v32 }
 0x913   :  { %3101 = vmatpush3.bf16.msra.mxu0 %v3100_v35  ;;  %3126 = vmatprep.subr.bf16.mxu1 %v3396_v5 }
 0x914   :  { %3102 = vmatprep.subr.bf16.mxu0 %v3396_v5 }
 0x915   :  { %2004 = vperm.xlu1 %3223, %v1982_v57  }
 0x916   :  { %3128 = vmatpush3.bf16.msra.mxu1 %v3127_v56 }
 0x917   :  { %3104 = vmatpush3.bf16.msra.mxu0 %v3103_v60 }
 0x918   :  { %3129 = vmatprep.subr.bf16.mxu0 %v3396_v5 }
 0x919   :  { %2009 = vperm.xlu1 %3223, %v1983_v1   ;;  %2500 = vmatmul.mubr.f32.vlgmr.msra.gmra.mrb[16].mxu1 %v2043_v0 }
 0x91d   :  { %2014 = vperm.xlu1 %3223, %v1984_v36   ;;  %v2237_v36 = vld [vmem:[%s4522_s10 + $0x60] sm:$0xff] }
 0x91e   :  { %v3148_v63 = vpack.c.bf16 %v2238_v40, %v2237_v36 }
 0x921   :  { %2019 = vperm.xlu1 %3223, %v1985_v16   ;;  %v3151_v16 = vpack.c.bf16 %v2240_v13, %v2239_v9 }
 0x925   :  { %2024 = vperm.xlu1 %3223, %v1986_v39  }
 0x98c   :  { %v1995_v6 = vpop.permute.xlu1 %1994  ;;  %v1990_v15 = vpop.permute.xlu0 %1989 }
 0x98d   :  { %v2028_v25 = vmul.f32 %v1995_v6, %v4023_v62  ;;  %v2027_v34 = vmul.f32 %v1990_v15, %v3975_v58  ;;  %v2225_v58 = vld [vmem:[%s4522_s10] sm:$0xff] }
 0x98f   :  { %v2035_v43 = vadd.f32 %v2028_v25, %v2027_v34 }
 0x990   :  { %v2000_v11 = vpop.permute.xlu1 %1999 }
 0x991   :  { %v2029_v41 = vmul.f32 %v2000_v11, %v4071_v4  ;;  %v2226_v4 = vld [vmem:[%s4522_s10 + $0x8] sm:$0xff] }
 0x992   :  { %v3130_v7 = vpack.c.bf16 %v2226_v4, %v2225_v58 }
 0x993   :  { %v2036_v46 = vadd.f32 %v2035_v43, %v2029_v41 }
 0x994   :  { %v2005_v20 = vpop.permute.xlu1 %2004 }
 0x995   :  { %v2030_v24 = vmul.f32 %v2005_v20, %v4119_v18 }
 0x997   :  { %v2037_v59 = vadd.f32 %v2036_v46, %v2030_v24 }
 0x998   :  { %v2010_v38 = vpop.permute.xlu1 %2009 }
 0x999   :  { %v2031_v49 = vmul.f32 %v2010_v38, %v4167_v28 }
 0x99b   :  { %v2038_v54 = vadd.f32 %v2037_v59, %v2031_v49 }
 0x99c   :  { %v2015_v44 = vpop.permute.xlu1 %2014 }
 0x99d   :  { %v2032_v61 = vmul.f32 %v2015_v44, %v4215_v37  ;;  %v2227_v37 = vld [vmem:[%s4522_s10 + $0x10] sm:$0xff] }
 0x99f   :  { %v2039_v62 = vadd.f32 %v2038_v54, %v2032_v61 }
 0x9a0   :  { %v2020_v47 = vpop.permute.xlu1 %2019 }
 0x9a1   :  { %v2033_v3 = vmul.f32 %v2020_v47, %v4258_v30  ;;  %v2228_v30 = vld [vmem:[%s4522_s10 + $0x18] sm:$0xff] }
 0x9a2   :  { %v3133_v51 = vpack.c.bf16 %v2228_v30, %v2227_v37 }
 0x9a3   :  { %v2040_v57 = vadd.f32 %v2039_v62, %v2033_v3 }
 0x9a4   :  { %v2025_v18 = vpop.permute.xlu1 %2024 }
 0x9a5   :  { %v2034_v28 = vmul.f32 %v2025_v18, %v4268_v50  ;;  %v2229_v50 = vld [vmem:[%s4522_s10 + $0x20] sm:$0xff] }
 0x9a6   :  { %v3136_v53 = vpack.c.bf16 %v2230_v14, %v2229_v50 }
 0x9a7   :  { %v2041_v12 = vadd.f32 %v2040_v57, %v2034_v28 }
 0x9a9   :  { %2042 = vst [vmem:[#allocation5] sm:$0xff] %v2041_v12  ;;  %2465 = vmatmul.mubr.f32.vlgmr.msra.gmra.mrb[16].mxu0 %v2041_v12 }
 0x9aa   :  { %3131 = vmatpush3.bf16.msra.mxu0 %v3130_v7  ;;  %2534 = vmatprep.mubr.msk.f32.mxu0 %vm3397_vm2, %v3394_v8  ;;  %v2232_v8 = vld [vmem:[%s4522_s10 + $0x38] sm:$0xff] }
 0x9ab   :  { %3132 = vmatprep.subr.bf16.mxu0 %v3396_v5  ;;  %v3139_v1 = vpack.c.bf16 %v2232_v8, %v2231_v21 }
 0x9ae   :  { %3134 = vmatpush3.bf16.msra.mxu0 %v3133_v51 }
 0x9af   :  { %3135 = vmatprep.subr.bf16.mxu0 %v3396_v5 }
 0x9b2   :  { %3137 = vmatpush3.bf16.msra.mxu0 %v3136_v53 }
 0x9b3   :  { %3138 = vmatprep.subr.bf16.mxu0 %v3396_v5 }
 0x9b6   :  { %3140 = vmatpush3.bf16.msra.mxu0 %v3139_v1 }
 0x9b7   :  { %3141 = vmatprep.subr.bf16.mxu0 %v3396_v5 }
 0x9ba   :  { %3143 = vmatpush3.bf16.msra.mxu0 %v3142_v31 }
 0x9bb   :  { %3144 = vmatprep.subr.bf16.mxu0 %v3396_v5 }
 0x9be   :  { %3146 = vmatpush3.bf16.msra.mxu0 %v3145_v33 }
 0x9bf   :  { %3147 = vmatprep.subr.bf16.mxu0 %v3396_v5 }
 0x9c2   :  { %3149 = vmatpush3.bf16.msra.mxu0 %v3148_v63 }
 0x9c3   :  { %3150 = vmatprep.subr.bf16.mxu0 %v3396_v5 }
 0x9c6   :  { %3152 = vmatpush3.bf16.msra.mxu0 %v3151_v16 }
 0x9ec   :  { %v2212_v2 = vpop.f32.mrb[16].mxu1 }
 0x9ed   :  { %v2501_v55 = vpop.f32.mrb[17].mxu1 }
 0xa7c   :  { %v2142_v19 = vpop.f32.mrb[16].mxu0 }
 0xa7d   :  { %v2213_v26 = vadd.f32 %v2212_v2, %v2142_v19  ;;  %v2466_v29 = vpop.f32.mrb[17].mxu0 }
 0xa7f   :  { %v2223_v32 = vadd.f32 %v2379_v22, %v2213_v26 }
 0xa81   :  { %v2224_v35 = vmax.f32 %v2223_v32, 0.0 }
 0xa83   :  { %2535 = vmatmul.mubr.f32.vlgmr.msra.gmra.mrb[18].mxu0 %v2224_v35 }
 0xa84   :  { %3381 = shalt.err (!%p3378_p4)
}
 0xa85   :  { %s3382_s18 = scalar_lea.hbm %s4524_s12, 128 }
 0xa86   :  { %p3383_p5 = scmp.ne.s32.totalorder %s4524_s12, %s3382_s18  ;;  %p3386_p6 = scmp.lt.u32.totalorder %s3382_s18, %s4524_s12 }
 0xa88   :  { %p3388_p7 = pnand %p3386_p6, %p3383_p5 }
 0xa8a   :  { %3391 = shalt.err (!%p3388_p7)
}
 0xa8b   :  { %2328 = dma.vmem_to_hbm [thread:$0]  %s2326_s15, 128, %s4524_s12, [#allocation6]   ;;  %v2380_v5 = vld [vmem:[%s4523_s11] ss:$0 sm:$0xff] }
 0xb56   :  { %v2314_v39 = vpop.f32.mrb[18].mxu0 }
 0xb57   :  { %v2315_v42 = vadd.f32 %v2380_v5, %v2314_v39  ;;  %v2536_v45 = vpop.f32.mrb[19].mxu0 }
 0xb59   :  { %2318 = vst [vmem:[%s4525_s13] sm:$0xff] %v2315_v42 }
 0xb5a   :  { %3392 = dma.done.wait [#allocation6], 128  }
 0xb5b   :  { %3393 = vsyncadd [#allocation6], 4294967168 }
 0xb5c   :  { %2336 = vsyncpa [#allocation6], 1 }

// kernel: htnet_forward.2
= control target key start
LH: loop header
LB: loop body
LE: loop exit
PB: predicated region body
PF: predicated region fallthrough
CT: control target
= control target key end

     0   :  { %vm13713_vm0 = vmmov 0   ;;  %vm341_vm1 = vcmask 1041409   ;;  %vm344_vm2 = vcmask 1042434   ;;  %vm347_vm3 = vcmask 1043459   ;;  %s18232_s1 = inlined_call_operand.vmem [shape: f32[256,128], index: 1, kind: input, shape index: {}]   ;;  %s18233_s0 = inlined_call_operand.vmem [shape: f32[8,16,256], index: 0, kind: input, shape index: {}]   ;;  %s18234_s3 = inlined_call_operand.vmem [shape: f32[16,128,16], index: 3, kind: input, shape index: {}]   ;;  %s18235_s2 = inlined_call_operand.vmem [shape: f32[1,128], index: 2, kind: input, shape index: {}]   ;;  %s18236_s8 = inlined_call_operand.vmem [shape: f32[4,128,32], index: 8, kind: input, shape index: {}]   ;;  %s18237_s9 = inlined_call_operand.vmem [shape: f32[4,128,32], index: 9, kind: input, shape index: {}]   ;;  %s18238_s4 = inlined_call_operand.vmem [shape: f32[1,16], index: 4, kind: input, shape index: {}]   ;;  %s18239_s10 = inlined_call_operand.vmem [shape: f32[4,128,32], index: 10, kind: input, shape index: {}]   ;;  %s18240_s5 = inlined_call_operand.vmem [shape: f32[128,128], index: 5, kind: input, shape index: {}]   ;;  %s18241_s11 = inlined_call_operand.vmem [shape: f32[4,1,32], index: 11, kind: input, shape index: {}]   ;;  %s18242_s12 = inlined_call_operand.vmem [shape: f32[4,1,32], index: 12, kind: input, shape index: {}]   ;;  %s18243_s13 = inlined_call_operand.vmem [shape: f32[4,1,32], index: 13, kind: input, shape index: {}]   ;;  %s18244_s6 = inlined_call_operand.vmem [shape: f32[128,128], index: 6, kind: input, shape index: {}]   ;;  %s18245_s14 = inlined_call_operand.vmem [shape: f32[4,32,128], index: 14, kind: input, shape index: {}]   ;;  %s18246_s15 = inlined_call_operand.vmem [shape: f32[1,128], index: 15, kind: input, shape index: {}]   ;;  %s18247_s18 = inlined_call_operand.vmem [shape: f32[128,128], index: 18, kind: input, shape index: {}]   ;;  %s18248_s20 = inlined_call_operand.vmem [shape: f32[128,128], index: 20, kind: input, shape index: {}]   ;;  %s18249_s16 = inlined_call_operand.vmem [shape: f32[1,128], index: 16, kind: input, shape index: {}, may-alias: {16,22}]   ;;  %s18250_s17 = inlined_call_operand.vmem [shape: f32[1,128], index: 17, kind: input, shape index: {}, may-alias: {17,23}]   ;;  %s18251_s19 = inlined_call_operand.vmem [shape: f32[1,128], index: 19, kind: input, shape index: {}]   ;;  %s18252_s21 = inlined_call_operand.vmem [shape: f32[1,128], index: 21, kind: input, shape index: {}]   ;;  %s18253_s24 = inlined_call_operand.vmem [shape: f32[128,128], index: 24, kind: input, shape index: {}]   ;;  %s18254_s22 = inlined_call_operand.vmem [shape: f32[1,128], index: 22, kind: input, shape index: {}, may-alias: {16,22}]   ;;  %s18255_s23 = inlined_call_operand.vmem [shape: f32[1,128], index: 23, kind: input, shape index: {}, may-alias: {17,23}]   ;;  %s18256_s7 = inlined_call_operand.vmem [shape: f32[8,128], index: 7, kind: input, shape index: {}]   ;;  %s18257_s25 = inlined_call_operand.vmem [shape: f32[1,128], index: 25, kind: input, shape index: {}]   ;;  %s18258_s26 = inlined_call_operand.vmem [shape: f32[8,128], index: 26, kind: output, shape index: {}]  }
   0x1   :  { %18294 = sst [smem:[#allocation37_spill]] %s18232_s1  ;;  %vm350_vm4 = vcmask 1044484   ;;  %vm353_vm5 = vcmask 1045509   ;;  %vm356_vm6 = vcmask 1046534   ;;  %vm359_vm7 = vcmask 1047559  }
   0x2   :  { %18295 = sst [smem:[#allocation38_spill]] %s18233_s0  ;;  %vm2637_vm8 = vcmask 261120  }
   0x3   :  { %18296 = sst [smem:[#allocation39_spill]] %s18234_s3  ;;  %vm15683_vm9 = vmpackc.low %vm2637_vm8, %vm2637_vm8 }
   0x4   :  { %18297 = sst [smem:[#allocation40_spill]] %s18235_s2  ;;  %s18307_s1 = sld [smem:[#allocation39_spill]] }
   0x5   :  { %18298 = sst [smem:[#allocation41_spill]] %s18236_s8  ;;  %s18308_s2 = sld [smem:[#allocation40_spill]] }
   0x6   :  { %18299 = sst [smem:[#allocation42_spill]] %s18237_s9  ;;  %s18306_s9 = sld [smem:[#allocation38_spill]] }
   0x7   :  { %18300 = sst [smem:[#allocation43_spill]] %s18238_s4  ;;  %s18311_s30 = sld [smem:[#allocation42_spill]] }
   0x8   :  { %18301 = sst [smem:[#allocation44_spill]] %s18239_s10  ;;  %s18305_s10 = sld [smem:[#allocation37_spill]] }
   0x9   :  { %18302 = sst [smem:[#allocation45_spill]] %s18240_s5  ;;  %s18310_s5 = sld [smem:[#allocation41_spill]] }
   0xa   :  { %18303 = sst [smem:[#allocation46_spill]] %s18241_s11  ;;  %s18312_s27 = sld [smem:[#allocation43_spill]] }
   0xb   :  { %18304 = sst [smem:[#allocation47_spill]] %s18242_s12  ;;  %s18314_s0 = sld [smem:[#allocation45_spill]] }
   0xc   :  { %v84_v25 = vld [vmem:[%s18306_s9 + $0x8] sm:$0xff]  ;;  %v83_v49 = vld [vmem:[%s18306_s9] sm:$0xff]  ;;  %v86_v50 = vld [vmem:[%s18306_s9 + $0x18] sm:$0xff]  ;;  %s18318_s28 = sld [smem:[#allocation46_spill]]  ;;  %s18319_s11 = sld [smem:[#allocation47_spill]] }
   0xd   :  { %218 = vmatprep.mubr.f32.mxu0 %v84_v25  ;;  %v85_v51 = vld [vmem:[%s18306_s9 + $0x10] sm:$0xff]  ;;  %v88_v52 = vld [vmem:[%s18306_s9 + $0x28] sm:$0xff]  ;;  %v87_v53 = vld [vmem:[%s18306_s9 + $0x20] sm:$0xff] }
   0xe   :  { %v131_v0 = vld [vmem:[%s18305_s10 + $0x80] sm:$0xff]  ;;  %v132_v1 = vld [vmem:[%s18305_s10 + $0x88] sm:$0xff]  ;;  %v133_v5 = vld [vmem:[%s18305_s10 + $0x90] sm:$0xff] }
   0xf   :  { %v115_v2 = vld [vmem:[%s18305_s10] sm:$0xff]  ;;  %v12040_v3 = vpack.c.bf16 %v132_v1, %v131_v0  ;;  %v116_v4 = vld [vmem:[%s18305_s10 + $0x8] sm:$0xff]  ;;  %v134_v6 = vld [vmem:[%s18305_s10 + $0x98] sm:$0xff] }
  0x10   :  { %v12042_v7 = vpack.c.bf16 %v116_v4, %v115_v2  ;;  %v12044_v8 = vpack.c.bf16 %v134_v6, %v133_v5  ;;  %v117_v9 = vld [vmem:[%s18305_s10 + $0x10] sm:$0xff]  ;;  %v118_v10 = vld [vmem:[%s18305_s10 + $0x18] sm:$0xff]  ;;  %v135_v11 = vld [vmem:[%s18305_s10 + $0xa0] sm:$0xff] }
  0x11   :  { %12041 = vmatprep.subr.bf16.mxu0 %v12040_v3  ;;  %v136_v12 = vld [vmem:[%s18305_s10 + $0xa8] sm:$0xff]  ;;  %v12046_v13 = vpack.c.bf16 %v118_v10, %v117_v9  ;;  %v119_v15 = vld [vmem:[%s18305_s10 + $0x20] sm:$0xff]  ;;  %v137_v17 = vld [vmem:[%s18305_s10 + $0xb0] sm:$0xff] }
  0x12   :  { %12043 = vmatpush3.bf16.msra.mxu0 %v12042_v7  ;;  %v12048_v14 = vpack.c.bf16 %v136_v12, %v135_v11  ;;  %v120_v16 = vld [vmem:[%s18305_s10 + $0x28] sm:$0xff]  ;;  %v138_v18 = vld [vmem:[%s18305_s10 + $0xb8] sm:$0xff]  ;;  %v121_v21 = vld [vmem:[%s18305_s10 + $0x30] sm:$0xff] }
  0x13   :  { %12045 = vmatprep.subr.bf16.mxu0 %v12044_v8  ;;  %v12050_v19 = vpack.c.bf16 %v120_v16, %v119_v15  ;;  %v12052_v20 = vpack.c.bf16 %v138_v18, %v137_v17  ;;  %v122_v22 = vld [vmem:[%s18305_s10 + $0x38] sm:$0xff]  ;;  %v139_v23 = vld [vmem:[%s18305_s10 + $0xc0] sm:$0xff]  ;;  %v140_v24 = vld [vmem:[%s18305_s10 + $0xc8] sm:$0xff] }
  0x14   :  { %v12054_v26 = vpack.c.bf16 %v122_v22, %v121_v21  ;;  %v12056_v27 = vpack.c.bf16 %v140_v24, %v139_v23  ;;  %v123_v28 = vld [vmem:[%s18305_s10 + $0x40] sm:$0xff]  ;;  %v124_v29 = vld [vmem:[%s18305_s10 + $0x48] sm:$0xff]  ;;  %v141_v30 = vld [vmem:[%s18305_s10 + $0xd0] sm:$0xff]  ;;  %v18270_v21 = vmov 0.0|0.0  }
  0x15   :  { %v142_v31 = vld [vmem:[%s18305_s10 + $0xd8] sm:$0xff]  ;;  %v12058_v32 = vpack.c.bf16 %v124_v29, %v123_v28  ;;  %v125_v34 = vld [vmem:[%s18305_s10 + $0x50] sm:$0xff]  ;;  %v143_v36 = vld [vmem:[%s18305_s10 + $0xe0] sm:$0xff]  ;;  %12072 = vmatprep.subr.bf16.mxu1 %v18270_v21 }
  0x16   :  { %12047 = vmatpush3.bf16.msra.mxu0 %v12046_v13  ;;  %v12060_v33 = vpack.c.bf16 %v142_v31, %v141_v30  ;;  %v126_v35 = vld [vmem:[%s18305_s10 + $0x58] sm:$0xff]  ;;  %v144_v37 = vld [vmem:[%s18305_s10 + $0xe8] sm:$0xff]  ;;  %v127_v40 = vld [vmem:[%s18305_s10 + $0x60] sm:$0xff] }
  0x17   :  { %12049 = vmatprep.subr.bf16.mxu0 %v12048_v14  ;;  %v12062_v38 = vpack.c.bf16 %v126_v35, %v125_v34  ;;  %v12064_v39 = vpack.c.bf16 %v144_v37, %v143_v36  ;;  %v128_v41 = vld [vmem:[%s18305_s10 + $0x68] sm:$0xff]  ;;  %v145_v42 = vld [vmem:[%s18305_s10 + $0xf0] sm:$0xff]  ;;  %v146_v43 = vld [vmem:[%s18305_s10 + $0xf8] sm:$0xff] }
  0x18   :  { %v12066_v44 = vpack.c.bf16 %v128_v41, %v127_v40  ;;  %v12068_v45 = vpack.c.bf16 %v146_v43, %v145_v42  ;;  %v129_v46 = vld [vmem:[%s18305_s10 + $0x70] sm:$0xff]  ;;  %v130_v47 = vld [vmem:[%s18305_s10 + $0x78] sm:$0xff]  ;;  %v92_v56 = vld [vmem:[%s18306_s9 + $0x48] sm:$0xff]  ;;  %s18313_s10 = sld [smem:[#allocation44_spill]] }
  0x19   :  { %v12070_v48 = vpack.c.bf16 %v130_v47, %v129_v46  ;;  %v90_v54 = vld [vmem:[%s18306_s9 + $0x38] sm:$0xff]  ;;  %v89_v55 = vld [vmem:[%s18306_s9 + $0x30] sm:$0xff]  ;;  %v91_v57 = vld [vmem:[%s18306_s9 + $0x40] sm:$0xff] }
  0x1a   :  { %12051 = vmatpush3.bf16.msra.mxu0 %v12050_v19  ;;  %v94_v58 = vld [vmem:[%s18306_s9 + $0x58] sm:$0xff]  ;;  %v93_v59 = vld [vmem:[%s18306_s9 + $0x50] sm:$0xff]  ;;  %v96_v60 = vld [vmem:[%s18306_s9 + $0x68] sm:$0xff] }
  0x1b   :  { %12053 = vmatprep.subr.bf16.mxu0 %v12052_v20  ;;  %v95_v61 = vld [vmem:[%s18306_s9 + $0x60] sm:$0xff]  ;;  %v98_v62 = vld [vmem:[%s18306_s9 + $0x78] sm:$0xff]  ;;  %v97_v63 = vld [vmem:[%s18306_s9 + $0x70] sm:$0xff] }
  0x1c   :  { %v100_v0 = vld [vmem:[%s18306_s9 + $0x88] sm:$0xff]  ;;  %v99_v1 = vld [vmem:[%s18306_s9 + $0x80] sm:$0xff]  ;;  %v102_v2 = vld [vmem:[%s18306_s9 + $0x98] sm:$0xff] }
  0x1d   :  { %v101_v3 = vld [vmem:[%s18306_s9 + $0x90] sm:$0xff]  ;;  %v104_v4 = vld [vmem:[%s18306_s9 + $0xa8] sm:$0xff]  ;;  %v103_v5 = vld [vmem:[%s18306_s9 + $0xa0] sm:$0xff] }
  0x1e   :  { %12055 = vmatpush3.bf16.msra.mxu0 %v12054_v26  ;;  %v106_v6 = vld [vmem:[%s18306_s9 + $0xb8] sm:$0xff]  ;;  %v105_v7 = vld [vmem:[%s18306_s9 + $0xb0] sm:$0xff]  ;;  %v108_v8 = vld [vmem:[%s18306_s9 + $0xc8] sm:$0xff] }
  0x1f   :  { %12057 = vmatprep.subr.bf16.mxu0 %v12056_v27  ;;  %v107_v9 = vld [vmem:[%s18306_s9 + $0xc0] sm:$0xff]  ;;  %v110_v10 = vld [vmem:[%s18306_s9 + $0xd8] sm:$0xff]  ;;  %v109_v11 = vld [vmem:[%s18306_s9 + $0xd0] sm:$0xff] }
  0x20   :  { %v112_v12 = vld [vmem:[%s18306_s9 + $0xe8] sm:$0xff]  ;;  %v111_v13 = vld [vmem:[%s18306_s9 + $0xe0] sm:$0xff]  ;;  %v114_v14 = vld [vmem:[%s18306_s9 + $0xf8] sm:$0xff] }
  0x21   :  { %v113_v15 = vld [vmem:[%s18306_s9 + $0xf0] sm:$0xff]  ;;  %v8261_v16 = vld [vmem:[%s18307_s1 + $0x80] sm:$0xff]  ;;  %v8262_v17 = vld [vmem:[%s18307_s1 + $0x88] sm:$0xff] }
  0x22   :  { %12059 = vmatpush3.bf16.msra.mxu0 %v12058_v32  ;;  %v8277_v18 = vld [vmem:[%s18307_s1 + $0x100] sm:$0xff]  ;;  %v12073_v19 = vpack.c.bf16 %v8262_v17, %v8261_v16  ;;  %v8278_v20 = vld [vmem:[%s18307_s1 + $0x108] sm:$0xff]  ;;  %v8263_v23 = vld [vmem:[%s18307_s1 + $0x90] sm:$0xff] }
  0x23   :  { %12061 = vmatprep.subr.bf16.mxu0 %v12060_v33  ;;  %v12121_v22 = vpack.c.bf16 %v8278_v20, %v8277_v18  ;;  %v8264_v24 = vld [vmem:[%s18307_s1 + $0x98] sm:$0xff]  ;;  %v8279_v25 = vld [vmem:[%s18307_s1 + $0x110] sm:$0xff]  ;;  %v8265_v29 = vld [vmem:[%s18307_s1 + $0xa0] sm:$0xff] }
  0x24   :  { %12074 = vmatpush3.bf16.msra.mxu1 %v12073_v19  ;;  %v12076_v26 = vpack.c.bf16 %v8264_v24, %v8263_v23  ;;  %v8280_v27 = vld [vmem:[%s18307_s1 + $0x118] sm:$0xff]  ;;  %v8266_v30 = vld [vmem:[%s18307_s1 + $0xa8] sm:$0xff]  ;;  %v8281_v31 = vld [vmem:[%s18307_s1 + $0x120] sm:$0xff] }
  0x25   :  { %12075 = vmatprep.subr.bf16.mxu1 %v18270_v21  ;;  %v12124_v28 = vpack.c.bf16 %v8280_v27, %v8279_v25  ;;  %v12079_v32 = vpack.c.bf16 %v8266_v30, %v8265_v29  ;;  %v8282_v33 = vld [vmem:[%s18307_s1 + $0x128] sm:$0xff]  ;;  %v8267_v35 = vld [vmem:[%s18307_s1 + $0xb0] sm:$0xff]  ;;  %v8268_v36 = vld [vmem:[%s18307_s1 + $0xb8] sm:$0xff] }
  0x26   :  { %12063 = vmatpush3.bf16.msra.mxu0 %v12062_v38  ;;  %v12127_v34 = vpack.c.bf16 %v8282_v33, %v8281_v31  ;;  %v8283_v37 = vld [vmem:[%s18307_s1 + $0x130] sm:$0xff]  ;;  %v12082_v38 = vpack.c.bf16 %v8268_v36, %v8267_v35  ;;  %v8269_v41 = vld [vmem:[%s18307_s1 + $0xc0] sm:$0xff]  ;;  %v8270_v42 = vld [vmem:[%s18307_s1 + $0xc8] sm:$0xff] }
  0x27   :  { %12065 = vmatprep.subr.bf16.mxu0 %v12064_v39  ;;  %v8284_v39 = vld [vmem:[%s18307_s1 + $0x138] sm:$0xff]  ;;  %v8285_v43 = vld [vmem:[%s18307_s1 + $0x140] sm:$0xff]  ;;  %v8271_v47 = vld [vmem:[%s18307_s1 + $0xd0] sm:$0xff] }
  0x28   :  { %12077 = vmatpush3.bf16.msra.mxu1 %v12076_v26  ;;  %v12130_v40 = vpack.c.bf16 %v8284_v39, %v8283_v37 }
  0x29   :  { %12078 = vmatprep.subr.bf16.mxu1 %v18270_v21 }
  0x2a   :  { %12067 = vmatpush3.bf16.msra.mxu0 %v12066_v44  ;;  %v12085_v44 = vpack.c.bf16 %v8270_v42, %v8269_v41 }
  0x2b   :  { %12069 = vmatprep.subr.bf16.mxu0 %v12068_v45  ;;  %v8286_v45 = vld [vmem:[%s18307_s1 + $0x148] sm:$0xff] }
  0x2c   :  { %12080 = vmatpush3.bf16.msra.mxu1 %v12079_v32  ;;  %v12133_v46 = vpack.c.bf16 %v8286_v45, %v8285_v43 }
  0x2d   :  { %12081 = vmatprep.subr.bf16.mxu1 %v18270_v21 }
  0x2e   :  { %12071 = vmatpush3.bf16.msra.mxu0 %v12070_v48  ;;  %v8272_v48 = vld [vmem:[%s18307_s1 + $0xd8] sm:$0xff] }
  0x2f   :  { %12120 = vmatprep.subr.bf16.mxu0 %v18270_v21 }
  0x30   :  { %12083 = vmatpush3.bf16.msra.mxu1 %v12082_v38 }
  0x31   :  { %219 = vmatmul.mubr.f32.vlgmr.msra.gmra.mrb[0].mxu0 %v83_v49  ;;  %12084 = vmatprep.subr.bf16.mxu1 %v18270_v21  ;;  %v8287_v49 = vld [vmem:[%s18307_s1 + $0x150] sm:$0xff] }
  0x32   :  { %223 = vmatprep.mubr.f32.mxu0 %v86_v50  ;;  %12122 = vmatpush3.bf16.msra.mxu0 %v12121_v22  ;;  %v12088_v50 = vpack.c.bf16 %v8272_v48, %v8271_v47 }
  0x33   :  { %12123 = vmatprep.subr.bf16.mxu0 %v18270_v21 }
  0x34   :  { %12086 = vmatpush3.bf16.msra.mxu1 %v12085_v44 }
  0x35   :  { %224 = vmatmul.mubr.f32.gmra.mrb[2].mxu0 %v85_v51  ;;  %12087 = vmatprep.subr.bf16.mxu1 %v18270_v21  ;;  %v8288_v51 = vld [vmem:[%s18307_s1 + $0x158] sm:$0xff] }
  0x36   :  { %228 = vmatprep.mubr.f32.mxu0 %v88_v52  ;;  %12125 = vmatpush3.bf16.msra.mxu0 %v12124_v28  ;;  %v12136_v52 = vpack.c.bf16 %v8288_v51, %v8287_v49 }
  0x37   :  { %12126 = vmatprep.subr.bf16.mxu0 %v18270_v21 }
  0x38   :  { %12089 = vmatpush3.bf16.msra.mxu1 %v12088_v50 }
  0x39   :  { %229 = vmatmul.mubr.f32.gmra.mrb[4].mxu0 %v87_v53  ;;  %12090 = vmatprep.subr.bf16.mxu1 %v18270_v21  ;;  %v8273_v53 = vld [vmem:[%s18307_s1 + $0xe0] sm:$0xff] }
  0x3a   :  { %233 = vmatprep.mubr.f32.mxu0 %v90_v54  ;;  %12128 = vmatpush3.bf16.msra.mxu0 %v12127_v34  ;;  %v8274_v54 = vld [vmem:[%s18307_s1 + $0xe8] sm:$0xff] }
  0x3b   :  { %12129 = vmatprep.subr.bf16.mxu0 %v18270_v21 }
  0x3d   :  { %234 = vmatmul.mubr.f32.gmra.mrb[6].mxu0 %v89_v55  ;;  %v8289_v55 = vld [vmem:[%s18307_s1 + $0x160] sm:$0xff] }
  0x3e   :  { %238 = vmatprep.mubr.f32.mxu0 %v92_v56  ;;  %12131 = vmatpush3.bf16.msra.mxu0 %v12130_v40  ;;  %v12091_v56 = vpack.c.bf16 %v8274_v54, %v8273_v53 }
  0x3f   :  { %12132 = vmatprep.subr.bf16.mxu0 %v18270_v21 }
  0x40   :  { %12092 = vmatpush3.bf16.msra.mxu1 %v12091_v56 }
  0x41   :  { %239 = vmatmul.mubr.f32.gmra.mrb[8].mxu0 %v91_v57  ;;  %v8290_v57 = vld [vmem:[%s18307_s1 + $0x168] sm:$0xff]  ;;  %12093 = vmatprep.subr.bf16.mxu1 %v18270_v21 }
  0x42   :  { %243 = vmatprep.mubr.f32.mxu0 %v94_v58  ;;  %12134 = vmatpush3.bf16.msra.mxu0 %v12133_v46  ;;  %v12139_v58 = vpack.c.bf16 %v8290_v57, %v8289_v55 }
  0x43   :  { %12135 = vmatprep.subr.bf16.mxu0 %v18270_v21 }
  0x45   :  { %244 = vmatmul.mubr.f32.gmra.mrb[10].mxu0 %v93_v59  ;;  %v8275_v59 = vld [vmem:[%s18307_s1 + $0xf0] sm:$0xff] }
  0x46   :  { %248 = vmatprep.mubr.f32.mxu0 %v96_v60  ;;  %12137 = vmatpush3.bf16.msra.mxu0 %v12136_v52  ;;  %v8276_v60 = vld [vmem:[%s18307_s1 + $0xf8] sm:$0xff] }
  0x47   :  { %12138 = vmatprep.subr.bf16.mxu0 %v18270_v21 }
  0x49   :  { %249 = vmatmul.mubr.f32.gmra.mrb[12].mxu0 %v95_v61  ;;  %v8291_v61 = vld [vmem:[%s18307_s1 + $0x170] sm:$0xff] }
  0x4a   :  { %253 = vmatprep.mubr.f32.mxu0 %v98_v62  ;;  %12140 = vmatpush3.bf16.msra.mxu0 %v12139_v58  ;;  %v12094_v62 = vpack.c.bf16 %v8276_v60, %v8275_v59 }
  0x4b   :  { %12141 = vmatprep.subr.bf16.mxu0 %v18270_v21 }
  0x4c   :  { %12095 = vmatpush3.bf16.msra.mxu1 %v12094_v62 }
  0x4d   :  { %254 = vmatmul.mubr.f32.gmra.mrb[14].mxu0 %v97_v63  ;;  %v8292_v63 = vld [vmem:[%s18307_s1 + $0x178] sm:$0xff]  ;;  %12096 = vmatprep.subr.bf16.mxu1 %v18270_v21 }
  0x4e   :  { %258 = vmatprep.mubr.f32.mxu0 %v100_v0  ;;  %v12142_v0 = vpack.c.bf16 %v8292_v63, %v8291_v61 }
  0x50   :  { %12143 = vmatpush3.bf16.msra.mxu0 %v12142_v0 }
  0x51   :  { %259 = vmatmul.mubr.f32.gmra.mrb[16].mxu0 %v99_v1  ;;  %12168 = vmatprep.subr.bf16.mxu0 %v18270_v21  ;;  %v18268_v1 = vmov 0.0  }
  0x52   :  { %263 = vmatprep.mubr.f32.mxu0 %v102_v2  ;;  %10082 = vmatprep.mubr.msk.f32.mxu1 %vm13713_vm0, %v18268_v1 }
  0x55   :  { %264 = vmatmul.mubr.f32.gmra.mrb[18].mxu0 %v101_v3 }
  0x56   :  { %268 = vmatprep.mubr.f32.mxu0 %v104_v4 }
  0x59   :  { %269 = vmatmul.mubr.f32.gmra.mrb[20].mxu0 %v103_v5 }
  0x5a   :  { %273 = vmatprep.mubr.f32.mxu0 %v106_v6 }
  0x5d   :  { %274 = vmatmul.mubr.f32.gmra.mrb[22].mxu0 %v105_v7 }
  0x5e   :  { %278 = vmatprep.mubr.f32.mxu0 %v108_v8  ;;  %v14163_v8 = vld [vmem:[%s18308_s2] ss:$0 sm:$0xff] }
  0x61   :  { %279 = vmatmul.mubr.f32.gmra.mrb[24].mxu0 %v107_v9 }
  0x62   :  { %283 = vmatprep.mubr.f32.mxu0 %v110_v10 }
  0x65   :  { %284 = vmatmul.mubr.f32.gmra.mrb[26].mxu0 %v109_v11 }
  0x66   :  { %288 = vmatprep.mubr.f32.mxu0 %v112_v12 }
  0x69   :  { %289 = vmatmul.mubr.f32.gmra.mrb[28].mxu0 %v111_v13 }
  0x6a   :  { %293 = vmatprep.mubr.f32.mxu0 %v114_v14 }
  0x6d   :  { %294 = vmatmul.mubr.f32.gmra.mrb[30].mxu0 %v113_v15 }
  0x6e   :  { %10152 = vmatprep.mubr.msk.f32.mxu0 %vm13713_vm0, %v18268_v1 }
 0x104   :  { %v8912_v2 = vpop.f32.mrb[0].mxu0 }
 0x105   :  { %v8913_v3 = vpop.f32.mrb[1].mxu0 }
 0x106   :  { %v8914_v4 = vadd.f32 %v8913_v3, %v8912_v2 }
 0x108   :  { %v8915_v5 = vpop.f32.mrb[2].mxu0  ;;  %v14172_v17 = vadd.f32 %v8914_v4, %v14163_v8 }
 0x109   :  { %v8916_v6 = vpop.f32.mrb[3].mxu0 }
 0x10a   :  { %v8917_v7 = vadd.f32 %v8916_v6, %v8915_v5  ;;  %v637_v24 = vrot.slane %v14172_v17, 3  ;;  %v946_v28 = vrot.slane %v14172_v17, 6  ;;  %v843_v29 = vrot.slane %v14172_v17, 5 }
 0x10b   :  { %v1049_v33 = vrot.slane %v14172_v17, 7 }
 0x10c   :  { %v14166_v9 = vadd.f32 %v8917_v7, %v14163_v8  ;;  %v8918_v10 = vpop.f32.mrb[4].mxu0 }
 0x10d   :  { %v8919_v11 = vpop.f32.mrb[5].mxu0 }
 0x10e   :  { %v8920_v12 = vadd.f32 %v8919_v11, %v8918_v10  ;;  %v1366_v34 = vrot.slane %v14166_v9, 2  ;;  %v1263_v38 = vrot.slane %v14166_v9, 1  ;;  %v1572_v39 = vrot.slane %v14166_v9, 4 }
 0x110   :  { %v8921_v13 = vpop.f32.mrb[6].mxu0  ;;  %v14169_v15 = vadd.f32 %v8920_v12, %v14163_v8 }
 0x111   :  { %v8922_v14 = vpop.f32.mrb[7].mxu0 }
 0x112   :  { %v8923_v16 = vadd.f32 %v8922_v14, %v8921_v13  ;;  %v638_v23 = vrot.slane %v14169_v15, 2  ;;  %v947_v25 = vrot.slane %v14169_v15, 5  ;;  %v844_v30 = vrot.slane %v14169_v15, 4 }
 0x113   :  { %v1050_v43 = vrot.slane %v14169_v15, 6 }
 0x114   :  { %v14175_v18 = vadd.f32 %v8923_v16, %v14163_v8  ;;  %v8924_v19 = vpop.f32.mrb[8].mxu0  ;;  %v639_v37 = vsel %vm341_vm1, %v638_v23, %v637_v24  ;;  %v948_v41 = vsel %vm341_vm1, %v947_v25, %v946_v28  ;;  %v845_v46 = vsel %vm341_vm1, %v844_v30, %v843_v29 }
 0x115   :  { %v8925_v20 = vpop.f32.mrb[9].mxu0  ;;  %v1051_v58 = vsel %vm341_vm1, %v1050_v43, %v1049_v33  ;;  %v1469_v30 = vrot.slane %v14166_v9, 3 }
 0x116   :  { %v8926_v22 = vadd.f32 %v8925_v20, %v8924_v19  ;;  %v1160_v32 = vrot.slane %v14175_v18, 7  ;;  %v1367_v35 = vrot.slane %v14175_v18, 1  ;;  %v1264_v47 = vsel %vm341_vm1, %v14175_v18, %v1263_v38 }
 0x117   :  { %v1573_v48 = vrot.slane %v14175_v18, 3  ;;  %v1470_v19 = vrot.slane %v14175_v18, 2 }
 0x118   :  { %v14181_v26 = vadd.f32 %v8926_v22, %v14163_v8  ;;  %v8927_v27 = vpop.f32.mrb[10].mxu0  ;;  %v1161_v52 = vsel %vm341_vm1, %v1160_v32, %v14166_v9  ;;  %v1368_v53 = vsel %vm341_vm1, %v1367_v35, %v1366_v34 }
 0x119   :  { %v8928_v31 = vpop.f32.mrb[11].mxu0  ;;  %v1574_v3 = vsel %vm341_vm1, %v1573_v48, %v1572_v39  ;;  %v1471_v38 = vsel %vm341_vm1, %v1470_v19, %v1469_v30 }
 0x11a   :  { %v8929_v36 = vadd.f32 %v8928_v31, %v8927_v27  ;;  %v640_v40 = vrot.slane %v14181_v26, 1  ;;  %v949_v42 = vrot.slane %v14181_v26, 4  ;;  %v846_v55 = vrot.slane %v14181_v26, 3 }
 0x11b   :  { %v1052_v57 = vrot.slane %v14181_v26, 5 }
 0x11c   :  { %v14198_v44 = vadd.f32 %v8929_v36, %v14163_v8  ;;  %v8930_v45 = vpop.f32.mrb[12].mxu0  ;;  %v641_v50 = vsel %vm344_vm2, %v640_v40, %v639_v37  ;;  %v950_v51 = vsel %vm344_vm2, %v949_v42, %v948_v41  ;;  %v847_v0 = vsel %vm344_vm2, %v846_v55, %v845_v46 }
 0x11d   :  { %v8931_v49 = vpop.f32.mrb[13].mxu0  ;;  %v1053_v5 = vsel %vm344_vm2, %v1052_v57, %v1051_v58  ;;  %v14275_v57 = vld [vmem:[%s18307_s1 + $0x200] sm:$0xff]  ;;  %v14280_v58 = vld [vmem:[%s18307_s1 + $0x208] sm:$0xff] }
 0x11e   :  { %v8932_v54 = vadd.f32 %v8931_v49, %v8930_v45  ;;  %v1162_v56 = vrot.slane %v14198_v44, 6  ;;  %v1369_v59 = vsel %vm344_vm2, %v14198_v44, %v1368_v53  ;;  %v1265_v60 = vrot.slane %v14198_v44, 7 }
 0x11f   :  { %v1575_v61 = vrot.slane %v14198_v44, 2  ;;  %v1472_v25 = vrot.slane %v14198_v44, 1  ;;  %v12169_v19 = vpack.c.bf16 %v14280_v58, %v14275_v57  ;;  %v14489_v57 = vld [vmem:[%s18307_s1 + $0x48] sm:$0xff] }
 0x120   :  { %v14218_v62 = vadd.f32 %v8932_v54, %v14163_v8  ;;  %v8933_v63 = vpop.f32.mrb[14].mxu0  ;;  %v1163_v2 = vsel %vm344_vm2, %v1162_v56, %v1161_v52  ;;  %v1266_v6 = vsel %vm344_vm2, %v1265_v60, %v1264_v47 }
 0x121   :  { %v8934_v4 = vpop.f32.mrb[15].mxu0  ;;  %v1576_v7 = vsel %vm344_vm2, %v1575_v61, %v1574_v3  ;;  %v1473_v42 = vsel %vm344_vm2, %v1472_v25, %v1471_v38  ;;  %v340_v25 = vrot.slane %v14172_v17, 1 }
 0x122   :  { %v8935_v10 = vadd.f32 %v8934_v4, %v8933_v63  ;;  %v642_v11 = vsel %vm347_vm3, %v14218_v62, %v641_v50  ;;  %v951_v12 = vrot.slane %v14218_v62, 3  ;;  %v848_v13 = vrot.slane %v14218_v62, 2  ;;  %v14262_v50 = vld [vmem:[%s18307_s1] sm:$0xff]  ;;  %v14289_v63 = vld [vmem:[%s18307_s1 + $0x10] sm:$0xff] }
 0x123   :  { %v1054_v24 = vrot.slane %v14218_v62, 4 }
 0x124   :  { %v14231_v14 = vadd.f32 %v8935_v10, %v14163_v8  ;;  %v8936_v16 = vpop.f32.mrb[16].mxu0  ;;  %v952_v22 = vsel %vm347_vm3, %v951_v12, %v950_v51  ;;  %v849_v23 = vsel %vm347_vm3, %v848_v13, %v847_v0  ;;  %v14267_v51 = vld [vmem:[%s18307_s1 + $0x8] sm:$0xff]  ;;  %v14294_v0 = vld [vmem:[%s18307_s1 + $0x18] sm:$0xff]  ;;  %v14307_v10 = vld [vmem:[%s18307_s1 + $0x210] sm:$0xff] }
 0x125   :  { %v8937_v20 = vpop.f32.mrb[17].mxu0  ;;  %v1055_v31 = vsel %vm347_vm3, %v1054_v24, %v1053_v5  ;;  %v12097_v61 = vpack.c.bf16 %v14267_v51, %v14262_v50  ;;  %v14484_v51 = vld [vmem:[%s18307_s1 + $0x40] sm:$0xff] }
 0x126   :  { %v8938_v27 = vadd.f32 %v8937_v20, %v8936_v16  ;;  %v1164_v28 = vrot.slane %v14231_v14, 5  ;;  %v1370_v29 = vrot.slane %v14231_v14, 7  ;;  %v1267_v32 = vrot.slane %v14231_v14, 6 }
 0x127   :  { %v1577_v33 = vrot.slane %v14231_v14, 1 }
 0x128   :  { %v14245_v34 = vadd.f32 %v8938_v27, %v14163_v8  ;;  %v8939_v35 = vpop.f32.mrb[18].mxu0  ;;  %v1165_v36 = vsel %vm347_vm3, %v1164_v28, %v1163_v2  ;;  %v1371_v37 = vsel %vm347_vm3, %v1370_v29, %v1369_v59  ;;  %v1268_v40 = vsel %vm347_vm3, %v1267_v32, %v1266_v6 }
 0x129   :  { %v8940_v39 = vpop.f32.mrb[19].mxu0  ;;  %v1578_v41 = vsel %vm347_vm3, %v1577_v33, %v1576_v7  ;;  %v535_v7 = vrot.slane %v14169_v15, 1  ;;  %v534_v27 = vrot.slane %v14172_v17, 2  ;;  %v12100_v28 = vpack.c.bf16 %v14294_v0, %v14289_v63  ;;  %v8317_v63 = vld [vmem:[%s18307_s1 + $0x240] sm:$0xff]  ;;  %v8318_v0 = vld [vmem:[%s18307_s1 + $0x248] sm:$0xff] }
 0x12a   :  { %v8941_v43 = vadd.f32 %v8940_v39, %v8939_v35  ;;  %v643_v45 = vrot.slane %v14245_v34, 7  ;;  %v953_v46 = vrot.slane %v14245_v34, 2  ;;  %v850_v47 = vrot.slane %v14245_v34, 1 }
 0x12b   :  { %v1056_v60 = vrot.slane %v14245_v34, 3  ;;  %v536_v38 = vsel %vm341_vm1, %v535_v7, %v534_v27 }
 0x12c   :  { %v14257_v48 = vadd.f32 %v8941_v43, %v14163_v8  ;;  %v8942_v49 = vpop.f32.mrb[20].mxu0  ;;  %v644_v53 = vsel %vm350_vm4, %v643_v45, %v642_v11  ;;  %v954_v54 = vsel %vm350_vm4, %v953_v46, %v952_v22  ;;  %v851_v55 = vsel %vm350_vm4, %v850_v47, %v849_v23  ;;  %v14312_v11 = vld [vmem:[%s18307_s1 + $0x218] sm:$0xff] }
 0x12d   :  { %v8943_v52 = vpop.f32.mrb[21].mxu0  ;;  %v1057_v13 = vsel %vm350_vm4, %v1056_v60, %v1055_v31  ;;  %v1474_v23 = vsel %vm347_vm3, %v14231_v14, %v1473_v42  ;;  %v12172_v29 = vpack.c.bf16 %v14312_v11, %v14307_v10  ;;  %v538_v46 = vrot.slane %v14218_v62, 7 }
 0x12e   :  { %v8944_v56 = vadd.f32 %v8943_v52, %v8942_v49  ;;  %v1166_v59 = vrot.slane %v14257_v48, 4  ;;  %v1372_v2 = vrot.slane %v14257_v48, 6  ;;  %v1269_v3 = vrot.slane %v14257_v48, 5 }
 0x12f   :  { %v1579_v4 = vsel %vm350_vm4, %v14257_v48, %v1578_v41  ;;  %v1475_v43 = vrot.slane %v14257_v48, 7  ;;  %v349_v52 = vrot.slane %v14245_v34, 5 }
 0x130   :  { %v14301_v5 = vadd.f32 %v8944_v56, %v14163_v8  ;;  %v8945_v6 = vpop.f32.mrb[22].mxu0  ;;  %v1167_v12 = vsel %vm350_vm4, %v1166_v59, %v1165_v36  ;;  %v1373_v20 = vsel %vm350_vm4, %v1372_v2, %v1371_v37  ;;  %v1270_v22 = vsel %vm350_vm4, %v1269_v3, %v1268_v40 }
 0x131   :  { %v8946_v16 = vpop.f32.mrb[23].mxu0  ;;  %v342_v36 = vsel %vm341_vm1, %v14169_v15, %v340_v25  ;;  %v343_v37 = vrot.slane %v14181_v26, 7  ;;  %v346_v40 = vrot.slane %v14218_v62, 6  ;;  %v540_v3 = vrot.slane %v14245_v34, 6 }
 0x132   :  { %v8947_v24 = vadd.f32 %v8946_v16, %v8945_v6  ;;  %v645_v30 = vrot.slane %v14301_v5, 6  ;;  %v955_v31 = vrot.slane %v14301_v5, 1  ;;  %v852_v32 = vsel %vm353_vm5, %v14301_v5, %v851_v55  ;;  %v14350_v55 = vld [vmem:[%s18307_s1 + $0x20] sm:$0xff] }
 0x133   :  { %v1058_v49 = vrot.slane %v14301_v5, 2 }
 0x134   :  { %v14333_v33 = vadd.f32 %v8947_v24, %v14163_v8  ;;  %v8948_v35 = vpop.f32.mrb[24].mxu0  ;;  %v646_v41 = vsel %vm353_vm5, %v645_v30, %v644_v53  ;;  %v956_v42 = vsel %vm353_vm5, %v955_v31, %v954_v54  ;;  %v14355_v53 = vld [vmem:[%s18307_s1 + $0x28] sm:$0xff]  ;;  %v14370_v30 = vsel %vm350_vm4, %v1475_v43, %v1474_v23 }
 0x135   :  { %v8949_v39 = vpop.f32.mrb[25].mxu0  ;;  %v1059_v7 = vsel %vm353_vm5, %v1058_v49, %v1057_v13 }
 0x136   :  { %v8950_v45 = vadd.f32 %v8949_v39, %v8948_v35  ;;  %v1168_v47 = vrot.slane %v14333_v33, 3  ;;  %v1374_v54 = vrot.slane %v14333_v33, 5  ;;  %v1271_v56 = vrot.slane %v14333_v33, 4 }
 0x137   :  { %v1580_v59 = vrot.slane %v14333_v33, 7  ;;  %v345_v35 = vsel %vm344_vm2, %v343_v37, %v342_v36  ;;  %v537_v39 = vsel %vm344_vm2, %v14181_v26, %v536_v38  ;;  %v352_v38 = vrot.slane %v14301_v5, 4 }
 0x138   :  { %v14361_v60 = vadd.f32 %v8950_v45, %v14163_v8  ;;  %v8951_v2 = vpop.f32.mrb[26].mxu0  ;;  %v1169_v6 = vsel %vm353_vm5, %v1168_v47, %v1167_v12  ;;  %v1375_v24 = vsel %vm353_vm5, %v1374_v54, %v1373_v20  ;;  %v1272_v25 = vsel %vm353_vm5, %v1271_v56, %v1270_v22 }
 0x139   :  { %v8952_v16 = vpop.f32.mrb[27].mxu0  ;;  %v1581_v27 = vsel %vm353_vm5, %v1580_v59, %v1579_v4  ;;  %v348_v13 = vsel %vm347_vm3, %v346_v40, %v345_v35  ;;  %v539_v43 = vsel %vm347_vm3, %v538_v46, %v537_v39  ;;  %v542_v47 = vrot.slane %v14301_v5, 5 }
 0x13a   :  { %v8953_v31 = vadd.f32 %v8952_v16, %v8951_v2  ;;  %v647_v20 = vrot.slane %v14361_v60, 5  ;;  %v957_v4 = vsel %vm356_vm6, %v14361_v60, %v956_v42  ;;  %v853_v22 = vrot.slane %v14361_v60, 7 }
 0x13b   :  { %v351_v37 = vsel %vm350_vm4, %v349_v52, %v348_v13  ;;  %v541_v40 = vsel %vm350_vm4, %v540_v3, %v539_v43  ;;  %v355_v56 = vrot.slane %v14361_v60, 3  ;;  %v1060_v52 = vrot.slane %v14361_v60, 1 }
 0x13c   :  { %v14383_v23 = vadd.f32 %v8953_v31, %v14163_v8  ;;  %v8954_v36 = vpop.f32.mrb[28].mxu0  ;;  %v648_v49 = vsel %vm356_vm6, %v647_v20, %v646_v41  ;;  %v854_v42 = vsel %vm356_vm6, %v853_v22, %v852_v32  ;;  %v544_v2 = vrot.slane %v14361_v60, 4 }
 0x13d   :  { %v8955_v45 = vpop.f32.mrb[29].mxu0  ;;  %v354_v32 = vsel %vm353_vm5, %v352_v38, %v351_v37  ;;  %v1061_v39 = vsel %vm356_vm6, %v1060_v52, %v1059_v7  ;;  %v543_v20 = vsel %vm353_vm5, %v542_v47, %v541_v40  ;;  %v14420_v7 = vld [vmem:[%s18307_s1 + $0x228] sm:$0xff] }
 0x13e   :  { %v8956_v54 = vadd.f32 %v8955_v45, %v8954_v36  ;;  %v1170_v59 = vrot.slane %v14383_v23, 2  ;;  %v1376_v46 = vrot.slane %v14383_v23, 4  ;;  %v1273_v16 = vrot.slane %v14383_v23, 3 }
 0x13f   :  { %v1582_v3 = vrot.slane %v14383_v23, 6 }
 0x140   :  { %v14400_v31 = vadd.f32 %v8956_v54, %v14163_v8  ;;  %v8957_v41 = vpop.f32.mrb[30].mxu0  ;;  %v1171_v35 = vsel %vm356_vm6, %v1170_v59, %v1169_v6  ;;  %v1377_v22 = vsel %vm356_vm6, %v1376_v46, %v1375_v24  ;;  %v1274_v36 = vsel %vm356_vm6, %v1273_v16, %v1272_v25  ;;  %v14415_v6 = vld [vmem:[%s18307_s1 + $0x220] sm:$0xff]  ;;  %v14426_v25 = vld [vmem:[%s18307_s1 + $0x30] sm:$0xff]  ;;  %v14449_v46 = vld [vmem:[%s18307_s1 + $0x238] sm:$0xff] }
 0x141   :  { %v8958_v13 = vpop.f32.mrb[31].mxu0  ;;  %v1583_v43 = vsel %vm356_vm6, %v1582_v3, %v1581_v27  ;;  %v357_v54 = vsel %vm356_vm6, %v355_v56, %v354_v32  ;;  %v545_v24 = vsel %vm356_vm6, %v544_v2, %v543_v20  ;;  %v14431_v27 = vld [vmem:[%s18307_s1 + $0x38] sm:$0xff]  ;;  %v14444_v2 = vld [vmem:[%s18307_s1 + $0x230] sm:$0xff]  ;;  %v1477_v16 = vrot.slane %v14333_v33, 6 }
 0x142   :  { %v8959_v45 = vadd.f32 %v8958_v13, %v8957_v41  ;;  %v358_v12 = vrot.slane %v14400_v31, 2  ;;  %v546_v37 = vrot.slane %v14400_v31, 3  ;;  %v649_v38 = vrot.slane %v14400_v31, 4 }
 0x143   :  { %v958_v40 = vrot.slane %v14400_v31, 7  ;;  %v855_v47 = vrot.slane %v14400_v31, 6  ;;  %v1479_v41 = vrot.slane %v14383_v23, 5  ;;  %v12106_v32 = vpack.c.bf16 %v14431_v27, %v14426_v25  ;;  %v310_v25 = vld [vmem:[%s18307_s1 + $0x58] sm:$0xff]  ;;  %v8319_v27 = vld [vmem:[%s18307_s1 + $0x250] sm:$0xff] }
 0x144   :  { %v14437_v56 = vadd.f32 %v8959_v45, %v14163_v8  ;;  %v360_v59 = vsel %vm359_vm7, %v358_v12, %v357_v54  ;;  %v547_v52 = vsel %vm359_vm7, %v546_v37, %v545_v24  ;;  %v12175_v8 = vpack.c.bf16 %v14420_v7, %v14415_v6 }
 0x145   :  { %10083 = vmatmul.mubr.f32.vlgmr.msra.gmra.mrb[0].mxu1 %v360_v59  ;;  %10153 = vmatmul.mubr.f32.vlgmr.msra.gmra.mrb[32].mxu0 %v547_v52  ;;  %v14455_v12 = vsel %vm359_vm7, %v649_v38, %v648_v49  ;;  %v14458_v3 = vsel %vm359_vm7, %v958_v40, %v957_v4  ;;  %v14470_v13 = vsel %vm359_vm7, %v855_v47, %v854_v42  ;;  %v1778_v45 = vrot.slane %v14166_v9, 6 }
 0x146   :  { %12098 = vmatpush3.bf16.msra.mxu1 %v12097_v61  ;;  %12170 = vmatpush3.bf16.msra.mxu0 %v12169_v19  ;;  %v1172_v49 = vrot.slane %v14437_v56, 1  ;;  %v14475_v4 = vsel %vm359_vm7, %v14400_v31, %v1061_v39  ;;  %v12178_v50 = vpack.c.bf16 %v14449_v46, %v14444_v2  ;;  %v1378_v58 = vrot.slane %v14437_v56, 3 }
 0x147   :  { %12099 = vmatprep.subr.bf16.mxu1 %v18270_v21  ;;  %12171 = vmatprep.subr.bf16.mxu0 %v18270_v21  ;;  %v1275_v61 = vrot.slane %v14437_v56, 2  ;;  %v1779_v19 = vrot.slane %v14175_v18, 5  ;;  %v1584_v39 = vrot.slane %v14437_v56, 5  ;;  %v1478_v20 = vsel %vm353_vm5, %v1477_v16, %v14370_v30 }
 0x148   :  { %10117 = vmatprep.mubr.msk.f32.mxu1 %vm13713_vm0, %v18268_v1  ;;  %10222 = vmatprep.mubr.msk.f32.mxu0 %vm13713_vm0, %v18268_v1  ;;  %v14499_v42 = vsel %vm359_vm7, %v1172_v49, %v1171_v35  ;;  %v14506_v54 = vsel %vm359_vm7, %v1378_v58, %v1377_v22  ;;  %v1480_v6 = vsel %vm356_vm6, %v1479_v41, %v1478_v20  ;;  %v1481_v7 = vrot.slane %v14437_v56, 4 }
 0x149   :  { %v14509_v37 = vsel %vm359_vm7, %v1275_v61, %v1274_v36  ;;  %v12109_v30 = vpack.c.bf16 %v14489_v57, %v14484_v51  ;;  %v14522_v35 = vsel %vm359_vm7, %v1584_v39, %v1583_v43  ;;  %v1781_v22 = vrot.slane %v14198_v44, 4 }
 0x14a   :  { %12101 = vmatpush3.bf16.msra.mxu1 %v12100_v28  ;;  %12173 = vmatpush3.bf16.msra.mxu0 %v12172_v29  ;;  %v1783_v36 = vrot.slane %v14231_v14, 3  ;;  %v14535_v10 = vsel %vm359_vm7, %v1481_v7, %v1480_v6  ;;  %v1780_v11 = vsel %vm341_vm1, %v1779_v19, %v1778_v45  ;;  %v1785_v28 = vrot.slane %v14257_v48, 2 }
 0x14b   :  { %12102 = vmatprep.subr.bf16.mxu1 %v18270_v21  ;;  %12174 = vmatprep.subr.bf16.mxu0 %v18270_v21  ;;  %v1787_v29 = vrot.slane %v14333_v33, 1  ;;  %v1782_v43 = vsel %vm344_vm2, %v1781_v22, %v1780_v11  ;;  %v1790_v24 = vrot.slane %v14437_v56, 7  ;;  %v1675_v38 = vrot.slane %v14166_v9, 5  ;;  %v309_v22 = vld [vmem:[%s18307_s1 + $0x50] sm:$0xff] }
 0x14c   :  { %v1676_v40 = vrot.slane %v14175_v18, 4  ;;  %v1784_v47 = vsel %vm347_vm3, %v1783_v36, %v1782_v43  ;;  %v1678_v59 = vrot.slane %v14198_v44, 3  ;;  %v1680_v52 = vrot.slane %v14231_v14, 2 }
 0x14d   :  { %v1682_v2 = vrot.slane %v14257_v48, 1  ;;  %v18309_v46 = vpack.c.bf16 %v14355_v53, %v14350_v55  ;;  %v12181_v16 = vpack.c.bf16 %v8318_v0, %v8317_v63  ;;  %v1786_v41 = vsel %vm350_vm4, %v1785_v28, %v1784_v47 }
 0x14e   :  { %12176 = vmatpush3.bf16.msra.mxu0 %v12175_v8  ;;  %v1677_v49 = vsel %vm341_vm1, %v1676_v40, %v1675_v38  ;;  %v1881_v51 = vrot.slane %v14166_v9, 7  ;;  %v1788_v57 = vsel %vm353_vm5, %v1787_v29, %v1786_v41  ;;  %v1685_v61 = vrot.slane %v14383_v23, 7  ;;  %v313_v41 = vld [vmem:[%s18307_s1 + $0x70] sm:$0xff] }
 0x14f   :  { %12104 = vmatpush3.bf16.msra.mxu1 %v18309_v46  ;;  %12177 = vmatprep.subr.bf16.mxu0 %v18270_v21  ;;  %v1679_v58 = vsel %vm344_vm2, %v1678_v59, %v1677_v49  ;;  %v1882_v55 = vrot.slane %v14175_v18, 6  ;;  %v1789_v53 = vsel %vm356_vm6, %v14383_v23, %v1788_v57  ;;  %v1687_v19 = vrot.slane %v14437_v56, 6  ;;  %v311_v59 = vld [vmem:[%s18307_s1 + $0x60] sm:$0xff]  ;;  %v8322_v46 = vld [vmem:[%s18307_s1 + $0x268] sm:$0xff]  ;;  %v314_v57 = vld [vmem:[%s18307_s1 + $0x78] sm:$0xff] }
 0x150   :  { %12105 = vmatprep.subr.bf16.mxu1 %v18270_v21  ;;  %v1681_v8 = vsel %vm347_vm3, %v1680_v52, %v1679_v58  ;;  %v1884_v39 = vrot.slane %v14198_v44, 5  ;;  %v14566_v20 = vsel %vm359_vm7, %v1790_v24, %v1789_v53  ;;  %v1886_v7 = vrot.slane %v14231_v14, 4  ;;  %v8323_v58 = vld [vmem:[%s18307_s1 + $0x270] sm:$0xff] }
 0x151   :  { %v1683_v45 = vsel %vm350_vm4, %v1682_v2, %v1681_v8  ;;  %v1883_v6 = vsel %vm341_vm1, %v1882_v55, %v1881_v51  ;;  %v1888_v0 = vrot.slane %v14257_v48, 3  ;;  %v1890_v11 = vrot.slane %v14333_v33, 2  ;;  %v312_v2 = vld [vmem:[%s18307_s1 + $0x68] sm:$0xff] }
 0x152   :  { %12179 = vmatpush3.bf16.msra.mxu0 %v12178_v50  ;;  %v1684_v36 = vsel %vm353_vm5, %v14333_v33, %v1683_v45  ;;  %v1885_v63 = vsel %vm344_vm2, %v1884_v39, %v1883_v6  ;;  %v1892_v29 = vrot.slane %v14383_v23, 1  ;;  %v12112_v40 = vpack.c.bf16 %v310_v25, %v309_v22 }
 0x153   :  { %12107 = vmatpush3.bf16.msra.mxu1 %v12106_v32  ;;  %12180 = vmatprep.subr.bf16.mxu0 %v18270_v21  ;;  %v8320_v32 = vld [vmem:[%s18307_s1 + $0x258] sm:$0xff]  ;;  %v1686_v50 = vsel %vm356_vm6, %v1685_v61, %v1684_v36  ;;  %v1887_v28 = vsel %vm347_vm3, %v1886_v7, %v1885_v63  ;;  %v12115_v49 = vpack.c.bf16 %v312_v2, %v311_v59  ;;  %v432_v55 = vrot.slane %v14169_v15, 7 }
 0x154   :  { %12108 = vmatprep.subr.bf16.mxu1 %v18270_v21  ;;  %v14597_v43 = vsel %vm359_vm7, %v1687_v19, %v1686_v50  ;;  %v1889_v24 = vsel %vm350_vm4, %v1888_v0, %v1887_v28  ;;  %v12184_v47 = vpack.c.bf16 %v8320_v32, %v8319_v27  ;;  %v8324_v61 = vld [vmem:[%s18307_s1 + $0x278] sm:$0xff]  ;;  %v741_v53 = vrot.slane %v14169_v15, 3  ;;  %v8293_v27 = vld [vmem:[%s18307_s1 + $0x180] sm:$0xff]  ;;  %v8294_v32 = vld [vmem:[%s18307_s1 + $0x188] sm:$0xff] }
 0x155   :  { %v1891_v38 = vsel %vm353_vm5, %v1890_v11, %v1889_v24  ;;  %v434_v8 = vrot.slane %v14181_v26, 6  ;;  %v743_v19 = vrot.slane %v14181_v26, 2  ;;  %v436_v39 = vrot.slane %v14218_v62, 5 }
 0x156   :  { %12182 = vmatpush3.bf16.msra.mxu0 %v12181_v16  ;;  %v1893_v52 = vsel %vm356_vm6, %v1892_v29, %v1891_v38  ;;  %v740_v45 = vrot.slane %v14172_v17, 4  ;;  %v745_v6 = vrot.slane %v14218_v62, 1  ;;  %v12118_v7 = vpack.c.bf16 %v314_v57, %v313_v41  ;;  %v8341_v38 = vld [vmem:[%s18307_s1 + $0x300] sm:$0xff] }
 0x157   :  { %12110 = vmatpush3.bf16.msra.mxu1 %v12109_v30  ;;  %12183 = vmatprep.subr.bf16.mxu0 %v18270_v21  ;;  %v8321_v30 = vld [vmem:[%s18307_s1 + $0x260] sm:$0xff]  ;;  %v14618_v16 = vsel %vm359_vm7, %v14437_v56, %v1893_v52  ;;  %v12190_v22 = vpack.c.bf16 %v8324_v61, %v8323_v58  ;;  %v438_v36 = vrot.slane %v14245_v34, 4  ;;  %v433_v63 = vsel %vm341_vm1, %v432_v55, %v14172_v17  ;;  %v8295_v58 = vld [vmem:[%s18307_s1 + $0x190] sm:$0xff] }
 0x158   :  { %12111 = vmatprep.subr.bf16.mxu1 %v18270_v21  ;;  %v12187_v51 = vpack.c.bf16 %v8322_v46, %v8321_v30  ;;  %v440_v0 = vrot.slane %v14301_v5, 3  ;;  %v742_v11 = vsel %vm341_vm1, %v741_v53, %v740_v45  ;;  %v748_v25 = vrot.slane %v14301_v5, 7  ;;  %v8296_v53 = vld [vmem:[%s18307_s1 + $0x198] sm:$0xff] }
 0x159   :  { %v435_v50 = vsel %vm344_vm2, %v434_v8, %v433_v63  ;;  %v442_v28 = vrot.slane %v14361_v60, 2  ;;  %v744_v29 = vsel %vm344_vm2, %v743_v19, %v742_v11  ;;  %v750_v24 = vrot.slane %v14361_v60, 6  ;;  %v8343_v8 = vld [vmem:[%s18307_s1 + $0x310] sm:$0xff]  ;;  %v8344_v19 = vld [vmem:[%s18307_s1 + $0x318] sm:$0xff]  ;;  %v8345_v63 = vld [vmem:[%s18307_s1 + $0x320] sm:$0xff] }
 0x15a   :  { %12185 = vmatpush3.bf16.msra.mxu0 %v12184_v47  ;;  %v437_v47 = vsel %vm347_vm3, %v436_v39, %v435_v50  ;;  %v444_v59 = vrot.slane %v14400_v31, 1  ;;  %v746_v52 = vsel %vm347_vm3, %v745_v6, %v744_v29  ;;  %v752_v2 = vrot.slane %v14400_v31, 5  ;;  %v8347_v50 = vld [vmem:[%s18307_s1 + $0x330] sm:$0xff] }
 0x15b   :  { %12113 = vmatpush3.bf16.msra.mxu1 %v12112_v40  ;;  %12186 = vmatprep.subr.bf16.mxu0 %v18270_v21  ;;  %v8342_v40 = vld [vmem:[%s18307_s1 + $0x308] sm:$0xff]  ;;  %v439_v30 = vsel %vm350_vm4, %v438_v36, %v437_v47  ;;  %v747_v46 = vsel %vm350_vm4, %v14245_v34, %v746_v52  ;;  %v12145_v41 = vpack.c.bf16 %v8294_v32, %v8293_v27  ;;  %v8299_v27 = vld [vmem:[%s18307_s1 + $0x1b0] sm:$0xff]  ;;  %v8300_v32 = vld [vmem:[%s18307_s1 + $0x1b8] sm:$0xff] }
 0x15c   :  { %12114 = vmatprep.subr.bf16.mxu1 %v18270_v21  ;;  %v12217_v57 = vpack.c.bf16 %v8342_v40, %v8341_v38  ;;  %v12148_v6 = vpack.c.bf16 %v8296_v53, %v8295_v58  ;;  %v8298_v36 = vld [vmem:[%s18307_s1 + $0x1a8] sm:$0xff]  ;;  %v12154_v29 = vpack.c.bf16 %v8300_v32, %v8299_v27  ;;  %v8301_v38 = vld [vmem:[%s18307_s1 + $0x1c0] sm:$0xff] }
 0x15d   :  { %v8302_v40 = vld [vmem:[%s18307_s1 + $0x1c8] sm:$0xff]  ;;  %v8349_v47 = vld [vmem:[%s18307_s1 + $0x340] sm:$0xff] }
 0x15e   :  { %12188 = vmatpush3.bf16.msra.mxu0 %v12187_v51  ;;  %v749_v51 = vsel %vm353_vm5, %v748_v25, %v747_v46  ;;  %v12157_v52 = vpack.c.bf16 %v8302_v40, %v8301_v38  ;;  %v8304_v46 = vld [vmem:[%s18307_s1 + $0x1d8] sm:$0xff]  ;;  %v8305_v58 = vld [vmem:[%s18307_s1 + $0x1e0] sm:$0xff]  ;;  %v8354_v53 = vld [vmem:[%s18307_s1 + $0x368] sm:$0xff] }
 0x15f   :  { %12116 = vmatpush3.bf16.msra.mxu1 %v12115_v49  ;;  %12189 = vmatprep.subr.bf16.mxu0 %v18270_v21  ;;  %v441_v49 = vsel %vm353_vm5, %v440_v0, %v439_v30  ;;  %v751_v55 = vsel %vm356_vm6, %v750_v24, %v749_v51  ;;  %v8346_v0 = vld [vmem:[%s18307_s1 + $0x328] sm:$0xff]  ;;  %v8303_v30 = vld [vmem:[%s18307_s1 + $0x1d0] sm:$0xff] }
 0x160   :  { %12117 = vmatprep.subr.bf16.mxu1 %v18270_v21  ;;  %v443_v61 = vsel %vm356_vm6, %v442_v28, %v441_v49  ;;  %v753_v45 = vsel %vm359_vm7, %v752_v2, %v751_v55  ;;  %v12223_v25 = vpack.c.bf16 %v8346_v0, %v8345_v63  ;;  %v8348_v28 = vld [vmem:[%s18307_s1 + $0x338] sm:$0xff]  ;;  %v12160_v51 = vpack.c.bf16 %v8304_v46, %v8303_v30  ;;  %v8353_v55 = vld [vmem:[%s18307_s1 + $0x360] sm:$0xff]  ;;  %v8326_v0 = vld [vmem:[%s18307_s1 + $0x288] sm:$0xff] }
 0x161   :  { %v445_v39 = vsel %vm359_vm7, %v444_v59, %v443_v61  ;;  %v12226_v24 = vpack.c.bf16 %v8348_v28, %v8347_v50  ;;  %v8350_v59 = vld [vmem:[%s18307_s1 + $0x348] sm:$0xff]  ;;  %v8352_v49 = vld [vmem:[%s18307_s1 + $0x358] sm:$0xff]  ;;  %v8325_v63 = vld [vmem:[%s18307_s1 + $0x280] sm:$0xff] }
 0x162   :  { %12191 = vmatpush3.bf16.msra.mxu0 %v12190_v22  ;;  %v8297_v22 = vld [vmem:[%s18307_s1 + $0x1a0] sm:$0xff]  ;;  %v12229_v2 = vpack.c.bf16 %v8350_v59, %v8349_v47  ;;  %v8306_v61 = vld [vmem:[%s18307_s1 + $0x1e8] sm:$0xff]  ;;  %v12193_v27 = vpack.c.bf16 %v8326_v0, %v8325_v63  ;;  %v8327_v50 = vld [vmem:[%s18307_s1 + $0x290] sm:$0xff] }
 0x163   :  { %12119 = vmatpush3.bf16.msra.mxu1 %v12118_v7  ;;  %12216 = vmatprep.subr.bf16.mxu0 %v18270_v21  ;;  %v12220_v7 = vpack.c.bf16 %v8344_v19, %v8343_v8  ;;  %v12151_v11 = vpack.c.bf16 %v8298_v36, %v8297_v22  ;;  %v12163_v8 = vpack.c.bf16 %v8306_v61, %v8305_v58  ;;  %v8328_v28 = vld [vmem:[%s18307_s1 + $0x298] sm:$0xff]  ;;  %v8329_v47 = vld [vmem:[%s18307_s1 + $0x2a0] sm:$0xff]  ;;  %v8330_v59 = vld [vmem:[%s18307_s1 + $0x2a8] sm:$0xff] }
 0x164   :  { %12144 = vmatprep.subr.bf16.mxu1 %v18270_v21  ;;  %v12235_v19 = vpack.c.bf16 %v8354_v53, %v8353_v55  ;;  %v12196_v38 = vpack.c.bf16 %v8328_v28, %v8327_v50  ;;  %v8331_v30 = vld [vmem:[%s18307_s1 + $0x2b0] sm:$0xff]  ;;  %v8332_v46 = vld [vmem:[%s18307_s1 + $0x2b8] sm:$0xff]  ;;  %v8333_v58 = vld [vmem:[%s18307_s1 + $0x2c0] sm:$0xff] }
 0x165   :  { %10223 = vmatmul.mubr.f32.vlgmr.msra.gmra.mrb[34].mxu0 %v753_v45  ;;  %v8308_v45 = vld [vmem:[%s18307_s1 + $0x1f8] sm:$0xff]  ;;  %v8334_v61 = vld [vmem:[%s18307_s1 + $0x2c8] sm:$0xff]  ;;  %v8381_v55 = vld [vmem:[%s18307_s1 + $0x440] sm:$0xff] }
 0x166   :  { %10118 = vmatmul.mubr.f32.vlgmr.msra.gmra.mrb[2].mxu1 %v445_v39  ;;  %12218 = vmatpush3.bf16.msra.mxu0 %v12217_v57  ;;  %v8307_v39 = vld [vmem:[%s18307_s1 + $0x1f0] sm:$0xff]  ;;  %v8382_v53 = vld [vmem:[%s18307_s1 + $0x448] sm:$0xff]  ;;  %v8337_v63 = vld [vmem:[%s18307_s1 + $0x2e0] sm:$0xff] }
 0x167   :  { %12146 = vmatpush3.bf16.msra.mxu1 %v12145_v41  ;;  %12219 = vmatprep.subr.bf16.mxu0 %v18270_v21  ;;  %v8351_v41 = vld [vmem:[%s18307_s1 + $0x350] sm:$0xff]  ;;  %v12166_v22 = vpack.c.bf16 %v8308_v45, %v8307_v39  ;;  %v8336_v45 = vld [vmem:[%s18307_s1 + $0x2d8] sm:$0xff]  ;;  %v8338_v0 = vld [vmem:[%s18307_s1 + $0x2e8] sm:$0xff] }
 0x168   :  { %12147 = vmatprep.subr.bf16.mxu1 %v18270_v21  ;;  %10187 = vmatprep.mubr.msk.f32.mxu1 %vm13713_vm0, %v18268_v1  ;;  %v12232_v57 = vpack.c.bf16 %v8352_v49, %v8351_v41  ;;  %v8379_v41 = vld [vmem:[%s18307_s1 + $0x430] sm:$0xff]  ;;  %v8380_v49 = vld [vmem:[%s18307_s1 + $0x438] sm:$0xff] }
 0x169   :  { %10292 = vmatprep.mubr.msk.f32.mxu0 %vm13713_vm0, %v18268_v1  ;;  %v8335_v39 = vld [vmem:[%s18307_s1 + $0x2d0] sm:$0xff]  ;;  %v8340_v28 = vld [vmem:[%s18307_s1 + $0x2f8] sm:$0xff] }
 0x16a   :  { %12221 = vmatpush3.bf16.msra.mxu0 %v12220_v7  ;;  %v8356_v7 = vld [vmem:[%s18307_s1 + $0x378] sm:$0xff]  ;;  %v8339_v50 = vld [vmem:[%s18307_s1 + $0x2f0] sm:$0xff] }
 0x16b   :  { %12149 = vmatpush3.bf16.msra.mxu1 %v12148_v6  ;;  %12222 = vmatprep.subr.bf16.mxu0 %v18270_v21  ;;  %v8355_v6 = vld [vmem:[%s18307_s1 + $0x370] sm:$0xff] }
 0x16c   :  { %12150 = vmatprep.subr.bf16.mxu1 %v18270_v21  ;;  %v12238_v36 = vpack.c.bf16 %v8356_v7, %v8355_v6  ;;  %v8383_v6 = vld [vmem:[%s18307_s1 + $0x450] sm:$0xff]  ;;  %v8384_v7 = vld [vmem:[%s18307_s1 + $0x458] sm:$0xff] }
 0x16e   :  { %12224 = vmatpush3.bf16.msra.mxu0 %v12223_v25  ;;  %v8374_v25 = vld [vmem:[%s18307_s1 + $0x408] sm:$0xff] }
 0x16f   :  { %12152 = vmatpush3.bf16.msra.mxu1 %v12151_v11  ;;  %12225 = vmatprep.subr.bf16.mxu0 %v18270_v21  ;;  %v8373_v11 = vld [vmem:[%s18307_s1 + $0x400] sm:$0xff] }
 0x170   :  { %12153 = vmatprep.subr.bf16.mxu1 %v18270_v21  ;;  %v12265_v32 = vpack.c.bf16 %v8374_v25, %v8373_v11  ;;  %v8385_v11 = vld [vmem:[%s18307_s1 + $0x460] sm:$0xff]  ;;  %v8386_v25 = vld [vmem:[%s18307_s1 + $0x468] sm:$0xff] }
 0x172   :  { %12227 = vmatpush3.bf16.msra.mxu0 %v12226_v24  ;;  %v8376_v24 = vld [vmem:[%s18307_s1 + $0x418] sm:$0xff] }
 0x173   :  { %12155 = vmatpush3.bf16.msra.mxu1 %v12154_v29  ;;  %12228 = vmatprep.subr.bf16.mxu0 %v18270_v21  ;;  %v8375_v29 = vld [vmem:[%s18307_s1 + $0x410] sm:$0xff] }
 0x174   :  { %12156 = vmatprep.subr.bf16.mxu1 %v18270_v21  ;;  %v12268_v40 = vpack.c.bf16 %v8376_v24, %v8375_v29  ;;  %v8387_v29 = vld [vmem:[%s18307_s1 + $0x470] sm:$0xff]  ;;  %v8388_v24 = vld [vmem:[%s18307_s1 + $0x478] sm:$0xff] }
 0x176   :  { %12230 = vmatpush3.bf16.msra.mxu0 %v12229_v2 }
 0x177   :  { %12158 = vmatpush3.bf16.msra.mxu1 %v12157_v52  ;;  %12231 = vmatprep.subr.bf16.mxu0 %v18270_v21  ;;  %v12199_v52 = vpack.c.bf16 %v8330_v59, %v8329_v47  ;;  %v8357_v47 = vld [vmem:[%s18307_s1 + $0x380] sm:$0xff]  ;;  %v8358_v59 = vld [vmem:[%s18307_s1 + $0x388] sm:$0xff] }
 0x178   :  { %12159 = vmatprep.subr.bf16.mxu1 %v18270_v21 }
 0x17a   :  { %12233 = vmatpush3.bf16.msra.mxu0 %v12232_v57  ;;  %v12274_v57 = vpack.c.bf16 %v8380_v49, %v8379_v41  ;;  %v8407_v41 = vld [vmem:[%s18307_s1 + $0x510] sm:$0xff]  ;;  %v8408_v49 = vld [vmem:[%s18307_s1 + $0x518] sm:$0xff] }
 0x17b   :  { %12161 = vmatpush3.bf16.msra.mxu1 %v12160_v51  ;;  %12234 = vmatprep.subr.bf16.mxu0 %v18270_v21  ;;  %v12202_v51 = vpack.c.bf16 %v8332_v46, %v8331_v30  ;;  %v8359_v30 = vld [vmem:[%s18307_s1 + $0x390] sm:$0xff]  ;;  %v8360_v46 = vld [vmem:[%s18307_s1 + $0x398] sm:$0xff] }
 0x17c   :  { %12162 = vmatprep.subr.bf16.mxu1 %v18270_v21 }
 0x17e   :  { %12236 = vmatpush3.bf16.msra.mxu0 %v12235_v19  ;;  %v12277_v19 = vpack.c.bf16 %v8382_v53, %v8381_v55 }
 0x17f   :  { %12164 = vmatpush3.bf16.msra.mxu1 %v12163_v8  ;;  %12237 = vmatprep.subr.bf16.mxu0 %v18270_v21  ;;  %v12205_v8 = vpack.c.bf16 %v8334_v61, %v8333_v58  ;;  %v8361_v58 = vld [vmem:[%s18307_s1 + $0x3a0] sm:$0xff]  ;;  %v8362_v61 = vld [vmem:[%s18307_s1 + $0x3a8] sm:$0xff] }
 0x180   :  { %12165 = vmatprep.subr.bf16.mxu1 %v18270_v21  ;;  %v12247_v55 = vpack.c.bf16 %v8362_v61, %v8361_v58  ;;  %v8437_v58 = vld [vmem:[%s18307_s1 + $0x600] sm:$0xff]  ;;  %v8438_v61 = vld [vmem:[%s18307_s1 + $0x608] sm:$0xff] }
 0x182   :  { %12239 = vmatpush3.bf16.msra.mxu0 %v12238_v36  ;;  %v12280_v36 = vpack.c.bf16 %v8384_v7, %v8383_v6 }
 0x183   :  { %12167 = vmatpush3.bf16.msra.mxu1 %v12166_v22  ;;  %12264 = vmatprep.subr.bf16.mxu0 %v18270_v21  ;;  %v12208_v22 = vpack.c.bf16 %v8336_v45, %v8335_v39  ;;  %v8411_v39 = vld [vmem:[%s18307_s1 + $0x530] sm:$0xff]  ;;  %v8412_v45 = vld [vmem:[%s18307_s1 + $0x538] sm:$0xff] }
 0x184   :  { %12192 = vmatprep.subr.bf16.mxu1 %v18270_v21  ;;  %v12322_v7 = vpack.c.bf16 %v8412_v45, %v8411_v39 }
 0x185   :  { %10293 = vmatmul.mubr.f32.vlgmr.msra.gmra.mrb[36].mxu0 %v14458_v3  ;;  %v8378_v3 = vld [vmem:[%s18307_s1 + $0x428] sm:$0xff] }
 0x186   :  { %10188 = vmatmul.mubr.f32.vlgmr.msra.gmra.mrb[4].mxu1 %v14455_v12  ;;  %12266 = vmatpush3.bf16.msra.mxu0 %v12265_v32  ;;  %v8377_v12 = vld [vmem:[%s18307_s1 + $0x420] sm:$0xff]  ;;  %v12283_v32 = vpack.c.bf16 %v8386_v25, %v8385_v11 }
 0x187   :  { %12194 = vmatpush3.bf16.msra.mxu1 %v12193_v27  ;;  %12267 = vmatprep.subr.bf16.mxu0 %v18270_v21  ;;  %v12271_v2 = vpack.c.bf16 %v8378_v3, %v8377_v12  ;;  %v12211_v27 = vpack.c.bf16 %v8338_v0, %v8337_v63  ;;  %v8405_v12 = vld [vmem:[%s18307_s1 + $0x500] sm:$0xff]  ;;  %v8406_v3 = vld [vmem:[%s18307_s1 + $0x508] sm:$0xff] }
 0x188   :  { %12195 = vmatprep.subr.bf16.mxu1 %v18270_v21  ;;  %10257 = vmatprep.mubr.msk.f32.mxu1 %vm13713_vm0, %v18268_v1  ;;  %v8413_v63 = vld [vmem:[%s18307_s1 + $0x540] sm:$0xff]  ;;  %v8414_v0 = vld [vmem:[%s18307_s1 + $0x548] sm:$0xff] }
 0x189   :  { %10362 = vmatprep.mubr.msk.f32.mxu0 %vm13713_vm0, %v18268_v1  ;;  %v12325_v25 = vpack.c.bf16 %v8414_v0, %v8413_v63  ;;  %v8395_v63 = vld [vmem:[%s18307_s1 + $0x4b0] sm:$0xff]  ;;  %v8396_v0 = vld [vmem:[%s18307_s1 + $0x4b8] sm:$0xff] }
 0x18a   :  { %12269 = vmatpush3.bf16.msra.mxu0 %v12268_v40  ;;  %v12286_v40 = vpack.c.bf16 %v8388_v24, %v8387_v29 }
 0x18b   :  { %12197 = vmatpush3.bf16.msra.mxu1 %v12196_v38  ;;  %12270 = vmatprep.subr.bf16.mxu0 %v18270_v21  ;;  %v12214_v38 = vpack.c.bf16 %v8340_v28, %v8339_v50  ;;  %v8415_v50 = vld [vmem:[%s18307_s1 + $0x550] sm:$0xff]  ;;  %v8416_v28 = vld [vmem:[%s18307_s1 + $0x558] sm:$0xff] }
 0x18c   :  { %12198 = vmatprep.subr.bf16.mxu1 %v18270_v21  ;;  %v12328_v24 = vpack.c.bf16 %v8416_v28, %v8415_v50  ;;  %v8397_v50 = vld [vmem:[%s18307_s1 + $0x4c0] sm:$0xff]  ;;  %v8398_v28 = vld [vmem:[%s18307_s1 + $0x4c8] sm:$0xff] }
 0x18e   :  { %12272 = vmatpush3.bf16.msra.mxu0 %v12271_v2  ;;  %v12313_v2 = vpack.c.bf16 %v8406_v3, %v8405_v12 }
 0x18f   :  { %12200 = vmatpush3.bf16.msra.mxu1 %v12199_v52  ;;  %12273 = vmatprep.subr.bf16.mxu0 %v18270_v21  ;;  %v12241_v52 = vpack.c.bf16 %v8358_v59, %v8357_v47  ;;  %v8417_v47 = vld [vmem:[%s18307_s1 + $0x560] sm:$0xff]  ;;  %v8418_v59 = vld [vmem:[%s18307_s1 + $0x568] sm:$0xff] }
 0x190   :  { %12201 = vmatprep.subr.bf16.mxu1 %v18270_v21  ;;  %v12331_v3 = vpack.c.bf16 %v8418_v59, %v8417_v47  ;;  %v8399_v47 = vld [vmem:[%s18307_s1 + $0x4d0] sm:$0xff]  ;;  %v8400_v59 = vld [vmem:[%s18307_s1 + $0x4d8] sm:$0xff] }
 0x192   :  { %12275 = vmatpush3.bf16.msra.mxu0 %v12274_v57  ;;  %v12316_v57 = vpack.c.bf16 %v8408_v49, %v8407_v41 }
 0x193   :  { %12203 = vmatpush3.bf16.msra.mxu1 %v12202_v51  ;;  %12276 = vmatprep.subr.bf16.mxu0 %v18270_v21  ;;  %v12244_v51 = vpack.c.bf16 %v8360_v46, %v8359_v30  ;;  %v8419_v30 = vld [vmem:[%s18307_s1 + $0x570] sm:$0xff]  ;;  %v8420_v46 = vld [vmem:[%s18307_s1 + $0x578] sm:$0xff] }
 0x194   :  { %12204 = vmatprep.subr.bf16.mxu1 %v18270_v21  ;;  %v12334_v49 = vpack.c.bf16 %v8420_v46, %v8419_v30  ;;  %v8401_v30 = vld [vmem:[%s18307_s1 + $0x4e0] sm:$0xff]  ;;  %v8402_v46 = vld [vmem:[%s18307_s1 + $0x4e8] sm:$0xff] }
 0x196   :  { %12278 = vmatpush3.bf16.msra.mxu0 %v12277_v19  ;;  %v8364_v19 = vld [vmem:[%s18307_s1 + $0x3b8] sm:$0xff] }
 0x197   :  { %12206 = vmatpush3.bf16.msra.mxu1 %v12205_v8  ;;  %12279 = vmatprep.subr.bf16.mxu0 %v18270_v21  ;;  %v8363_v8 = vld [vmem:[%s18307_s1 + $0x3b0] sm:$0xff] }
 0x198   :  { %12207 = vmatprep.subr.bf16.mxu1 %v18270_v21  ;;  %v12250_v6 = vpack.c.bf16 %v8364_v19, %v8363_v8  ;;  %v8439_v8 = vld [vmem:[%s18307_s1 + $0x610] sm:$0xff]  ;;  %v8440_v19 = vld [vmem:[%s18307_s1 + $0x618] sm:$0xff] }
 0x199   :  { %v12364_v45 = vpack.c.bf16 %v8440_v19, %v8439_v8  ;;  %v8421_v8 = vld [vmem:[%s18307_s1 + $0x580] sm:$0xff]  ;;  %v8422_v19 = vld [vmem:[%s18307_s1 + $0x588] sm:$0xff] }
 0x19a   :  { %12281 = vmatpush3.bf16.msra.mxu0 %v12280_v36  ;;  %v8366_v36 = vld [vmem:[%s18307_s1 + $0x3c8] sm:$0xff] }
 0x19b   :  { %12209 = vmatpush3.bf16.msra.mxu1 %v12208_v22  ;;  %12282 = vmatprep.subr.bf16.mxu0 %v18270_v21  ;;  %v8365_v22 = vld [vmem:[%s18307_s1 + $0x3c0] sm:$0xff] }
 0x19c   :  { %12210 = vmatprep.subr.bf16.mxu1 %v18270_v21  ;;  %v12253_v11 = vpack.c.bf16 %v8366_v36, %v8365_v22 }
 0x19e   :  { %12284 = vmatpush3.bf16.msra.mxu0 %v12283_v32  ;;  %v8368_v32 = vld [vmem:[%s18307_s1 + $0x3d8] sm:$0xff] }
 0x19f   :  { %12212 = vmatpush3.bf16.msra.mxu1 %v12211_v27  ;;  %12285 = vmatprep.subr.bf16.mxu0 %v18270_v21  ;;  %v8367_v27 = vld [vmem:[%s18307_s1 + $0x3d0] sm:$0xff] }
 0x1a0   :  { %12213 = vmatprep.subr.bf16.mxu1 %v18270_v21  ;;  %v12256_v29 = vpack.c.bf16 %v8368_v32, %v8367_v27  ;;  %v12298_v27 = vpack.c.bf16 %v8396_v0, %v8395_v63 }
 0x1a2   :  { %12287 = vmatpush3.bf16.msra.mxu0 %v12286_v40  ;;  %v8370_v40 = vld [vmem:[%s18307_s1 + $0x3e8] sm:$0xff] }
 0x1a3   :  { %12215 = vmatpush3.bf16.msra.mxu1 %v12214_v38  ;;  %12312 = vmatprep.subr.bf16.mxu0 %v18270_v21  ;;  %v8369_v38 = vld [vmem:[%s18307_s1 + $0x3e0] sm:$0xff] }
 0x1a4   :  { %12240 = vmatprep.subr.bf16.mxu1 %v18270_v21  ;;  %v12259_v12 = vpack.c.bf16 %v8370_v40, %v8369_v38  ;;  %v12301_v38 = vpack.c.bf16 %v8398_v28, %v8397_v50  ;;  %v8427_v50 = vld [vmem:[%s18307_s1 + $0x5b0] sm:$0xff]  ;;  %v8428_v28 = vld [vmem:[%s18307_s1 + $0x5b8] sm:$0xff] }
 0x1a5   :  { %10363 = vmatmul.mubr.f32.vlgmr.msra.gmra.mrb[38].mxu0 %v14499_v42  ;;  %v8410_v42 = vld [vmem:[%s18307_s1 + $0x528] sm:$0xff] }
 0x1a6   :  { %10258 = vmatmul.mubr.f32.vlgmr.msra.gmra.mrb[6].mxu1 %v14470_v13  ;;  %12314 = vmatpush3.bf16.msra.mxu0 %v12313_v2  ;;  %v8409_v13 = vld [vmem:[%s18307_s1 + $0x520] sm:$0xff]  ;;  %v8372_v2 = vld [vmem:[%s18307_s1 + $0x3f8] sm:$0xff] }
 0x1a7   :  { %12242 = vmatpush3.bf16.msra.mxu1 %v12241_v52  ;;  %12315 = vmatprep.subr.bf16.mxu0 %v18270_v21  ;;  %v12319_v53 = vpack.c.bf16 %v8410_v42, %v8409_v13  ;;  %v8371_v52 = vld [vmem:[%s18307_s1 + $0x3f0] sm:$0xff]  ;;  %v12361_v42 = vpack.c.bf16 %v8438_v61, %v8437_v58  ;;  %v8404_v61 = vld [vmem:[%s18307_s1 + $0x4f8] sm:$0xff] }
 0x1a8   :  { %12243 = vmatprep.subr.bf16.mxu1 %v18270_v21  ;;  %10327 = vmatprep.mubr.msk.f32.mxu1 %vm13713_vm0, %v18268_v1  ;;  %v12262_v41 = vpack.c.bf16 %v8372_v2, %v8371_v52  ;;  %v12304_v52 = vpack.c.bf16 %v8400_v59, %v8399_v47  ;;  %v8403_v58 = vld [vmem:[%s18307_s1 + $0x4f0] sm:$0xff]  ;;  %v8429_v47 = vld [vmem:[%s18307_s1 + $0x5c0] sm:$0xff]  ;;  %v8430_v59 = vld [vmem:[%s18307_s1 + $0x5c8] sm:$0xff] }
 0x1a9   :  { %10432 = vmatprep.mubr.msk.f32.mxu0 %vm13713_vm0, %v18268_v1 }
 0x1aa   :  { %12317 = vmatpush3.bf16.msra.mxu0 %v12316_v57  ;;  %v8390_v57 = vld [vmem:[%s18307_s1 + $0x488] sm:$0xff] }
 0x1ab   :  { %12245 = vmatpush3.bf16.msra.mxu1 %v12244_v51  ;;  %12318 = vmatprep.subr.bf16.mxu0 %v18270_v21  ;;  %v8389_v51 = vld [vmem:[%s18307_s1 + $0x480] sm:$0xff] }
 0x1ac   :  { %12246 = vmatprep.subr.bf16.mxu1 %v18270_v21  ;;  %v12289_v13 = vpack.c.bf16 %v8390_v57, %v8389_v51  ;;  %v12307_v51 = vpack.c.bf16 %v8402_v46, %v8401_v30  ;;  %v8431_v30 = vld [vmem:[%s18307_s1 + $0x5d0] sm:$0xff]  ;;  %v8432_v46 = vld [vmem:[%s18307_s1 + $0x5d8] sm:$0xff] }
 0x1ae   :  { %12320 = vmatpush3.bf16.msra.mxu0 %v12319_v53  ;;  %v8392_v53 = vld [vmem:[%s18307_s1 + $0x498] sm:$0xff] }
 0x1af   :  { %12248 = vmatpush3.bf16.msra.mxu1 %v12247_v55  ;;  %12321 = vmatprep.subr.bf16.mxu0 %v18270_v21  ;;  %v8391_v55 = vld [vmem:[%s18307_s1 + $0x490] sm:$0xff] }
 0x1b0   :  { %12249 = vmatprep.subr.bf16.mxu1 %v18270_v21  ;;  %v12292_v39 = vpack.c.bf16 %v8392_v53, %v8391_v55  ;;  %v12310_v55 = vpack.c.bf16 %v8404_v61, %v8403_v58  ;;  %v8433_v58 = vld [vmem:[%s18307_s1 + $0x5e0] sm:$0xff]  ;;  %v8434_v61 = vld [vmem:[%s18307_s1 + $0x5e8] sm:$0xff] }
 0x1b2   :  { %12323 = vmatpush3.bf16.msra.mxu0 %v12322_v7  ;;  %v8394_v7 = vld [vmem:[%s18307_s1 + $0x4a8] sm:$0xff] }
 0x1b3   :  { %12251 = vmatpush3.bf16.msra.mxu1 %v12250_v6  ;;  %12324 = vmatprep.subr.bf16.mxu0 %v18270_v21  ;;  %v8393_v6 = vld [vmem:[%s18307_s1 + $0x4a0] sm:$0xff] }
 0x1b4   :  { %12252 = vmatprep.subr.bf16.mxu1 %v18270_v21  ;;  %v12295_v22 = vpack.c.bf16 %v8394_v7, %v8393_v6  ;;  %v12337_v6 = vpack.c.bf16 %v8422_v19, %v8421_v8  ;;  %v8435_v8 = vld [vmem:[%s18307_s1 + $0x5f0] sm:$0xff]  ;;  %v8436_v19 = vld [vmem:[%s18307_s1 + $0x5f8] sm:$0xff] }
 0x1b6   :  { %12326 = vmatpush3.bf16.msra.mxu0 %v12325_v25  ;;  %v8444_v25 = vld [vmem:[%s18307_s1 + $0x638] sm:$0xff] }
 0x1b7   :  { %12254 = vmatpush3.bf16.msra.mxu1 %v12253_v11  ;;  %12327 = vmatprep.subr.bf16.mxu0 %v18270_v21  ;;  %v8443_v11 = vld [vmem:[%s18307_s1 + $0x630] sm:$0xff] }
 0x1b8   :  { %12255 = vmatprep.subr.bf16.mxu1 %v18270_v21  ;;  %v12370_v32 = vpack.c.bf16 %v8444_v25, %v8443_v11  ;;  %v8425_v11 = vld [vmem:[%s18307_s1 + $0x5a0] sm:$0xff]  ;;  %v8426_v25 = vld [vmem:[%s18307_s1 + $0x5a8] sm:$0xff] }
 0x1ba   :  { %12329 = vmatpush3.bf16.msra.mxu0 %v12328_v24  ;;  %v8446_v24 = vld [vmem:[%s18307_s1 + $0x648] sm:$0xff] }
 0x1bb   :  { %12257 = vmatpush3.bf16.msra.mxu1 %v12256_v29  ;;  %12330 = vmatprep.subr.bf16.mxu0 %v18270_v21  ;;  %v8445_v29 = vld [vmem:[%s18307_s1 + $0x640] sm:$0xff] }
 0x1bc   :  { %12258 = vmatprep.subr.bf16.mxu1 %v18270_v21  ;;  %v12373_v40 = vpack.c.bf16 %v8446_v24, %v8445_v29  ;;  %v8475_v29 = vld [vmem:[%s18307_s1 + $0x730] sm:$0xff]  ;;  %v8476_v24 = vld [vmem:[%s18307_s1 + $0x738] sm:$0xff] }
 0x1be   :  { %12332 = vmatpush3.bf16.msra.mxu0 %v12331_v3  ;;  %v8448_v3 = vld [vmem:[%s18307_s1 + $0x658] sm:$0xff] }
 0x1bf   :  { %12260 = vmatpush3.bf16.msra.mxu1 %v12259_v12  ;;  %12333 = vmatprep.subr.bf16.mxu0 %v18270_v21  ;;  %v8447_v12 = vld [vmem:[%s18307_s1 + $0x650] sm:$0xff] }
 0x1c0   :  { %12261 = vmatprep.subr.bf16.mxu1 %v18270_v21  ;;  %v12376_v2 = vpack.c.bf16 %v8448_v3, %v8447_v12  ;;  %v8477_v12 = vld [vmem:[%s18307_s1 + $0x740] sm:$0xff]  ;;  %v8478_v3 = vld [vmem:[%s18307_s1 + $0x748] sm:$0xff] }
 0x1c2   :  { %12335 = vmatpush3.bf16.msra.mxu0 %v12334_v49  ;;  %v8450_v49 = vld [vmem:[%s18307_s1 + $0x668] sm:$0xff] }
 0x1c3   :  { %12263 = vmatpush3.bf16.msra.mxu1 %v12262_v41  ;;  %12360 = vmatprep.subr.bf16.mxu0 %v18270_v21  ;;  %v8449_v41 = vld [vmem:[%s18307_s1 + $0x660] sm:$0xff] }
 0x1c4   :  { %12288 = vmatprep.subr.bf16.mxu1 %v18270_v21  ;;  %v12379_v57 = vpack.c.bf16 %v8450_v49, %v8449_v41  ;;  %v8479_v41 = vld [vmem:[%s18307_s1 + $0x750] sm:$0xff]  ;;  %v8480_v49 = vld [vmem:[%s18307_s1 + $0x758] sm:$0xff] }
 0x1c5   :  { %10433 = vmatmul.mubr.f32.vlgmr.msra.gmra.mrb[40].mxu0 %v14506_v54  ;;  %v8442_v54 = vld [vmem:[%s18307_s1 + $0x628] sm:$0xff] }
 0x1c6   :  { %10328 = vmatmul.mubr.f32.vlgmr.msra.gmra.mrb[8].mxu1 %v14475_v4  ;;  %12362 = vmatpush3.bf16.msra.mxu0 %v12361_v42  ;;  %v8441_v4 = vld [vmem:[%s18307_s1 + $0x620] sm:$0xff]  ;;  %v8452_v42 = vld [vmem:[%s18307_s1 + $0x678] sm:$0xff] }
 0x1c7   :  { %12290 = vmatpush3.bf16.msra.mxu1 %v12289_v13  ;;  %12363 = vmatprep.subr.bf16.mxu0 %v18270_v21  ;;  %v12367_v36 = vpack.c.bf16 %v8442_v54, %v8441_v4  ;;  %v8451_v13 = vld [vmem:[%s18307_s1 + $0x670] sm:$0xff]  ;;  %v8424_v54 = vld [vmem:[%s18307_s1 + $0x598] sm:$0xff] }
 0x1c8   :  { %12291 = vmatprep.subr.bf16.mxu1 %v18270_v21  ;;  %10397 = vmatprep.mubr.msk.f32.mxu1 %vm13713_vm0, %v18268_v1  ;;  %v12382_v53 = vpack.c.bf16 %v8452_v42, %v8451_v13  ;;  %v8423_v4 = vld [vmem:[%s18307_s1 + $0x590] sm:$0xff]  ;;  %v8481_v13 = vld [vmem:[%s18307_s1 + $0x760] sm:$0xff]  ;;  %v8482_v42 = vld [vmem:[%s18307_s1 + $0x768] sm:$0xff] }
 0x1c9   :  { %10502 = vmatprep.mubr.msk.f32.mxu0 %vm13713_vm0, %v18268_v1  ;;  %v12340_v63 = vpack.c.bf16 %v8424_v54, %v8423_v4  ;;  %v8453_v4 = vld [vmem:[%s18307_s1 + $0x680] sm:$0xff]  ;;  %v8454_v54 = vld [vmem:[%s18307_s1 + $0x688] sm:$0xff] }
 0x1ca   :  { %12365 = vmatpush3.bf16.msra.mxu0 %v12364_v45  ;;  %v8470_v45 = vld [vmem:[%s18307_s1 + $0x708] sm:$0xff] }
 0x1cb   :  { %12293 = vmatpush3.bf16.msra.mxu1 %v12292_v39  ;;  %12366 = vmatprep.subr.bf16.mxu0 %v18270_v21  ;;  %v8469_v39 = vld [vmem:[%s18307_s1 + $0x700] sm:$0xff] }
 0x1cc   :  { %12294 = vmatprep.subr.bf16.mxu1 %v18270_v21  ;;  %v12409_v7 = vpack.c.bf16 %v8470_v45, %v8469_v39  ;;  %v8483_v39 = vld [vmem:[%s18307_s1 + $0x770] sm:$0xff]  ;;  %v8484_v45 = vld [vmem:[%s18307_s1 + $0x778] sm:$0xff] }
 0x1ce   :  { %12368 = vmatpush3.bf16.msra.mxu0 %v12367_v36  ;;  %v8472_v36 = vld [vmem:[%s18307_s1 + $0x718] sm:$0xff] }
 0x1cf   :  { %12296 = vmatpush3.bf16.msra.mxu1 %v12295_v22  ;;  %12369 = vmatprep.subr.bf16.mxu0 %v18270_v21  ;;  %v8471_v22 = vld [vmem:[%s18307_s1 + $0x710] sm:$0xff] }
 0x1d0   :  { %12297 = vmatprep.subr.bf16.mxu1 %v18270_v21  ;;  %v12412_v0 = vpack.c.bf16 %v8472_v36, %v8471_v22  ;;  %v12385_v22 = vpack.c.bf16 %v8454_v54, %v8453_v4  ;;  %v8455_v36 = vld [vmem:[%s18307_s1 + $0x690] sm:$0xff]  ;;  %v8497_v54 = vld [vmem:[%s18307_s1 + $0x7e0] sm:$0xff] }
 0x1d2   :  { %12371 = vmatpush3.bf16.msra.mxu0 %v12370_v32 }
 0x1d3   :  { %12299 = vmatpush3.bf16.msra.mxu1 %v12298_v27  ;;  %12372 = vmatprep.subr.bf16.mxu0 %v18270_v21  ;;  %v12343_v27 = vpack.c.bf16 %v8426_v25, %v8425_v11  ;;  %v8457_v11 = vld [vmem:[%s18307_s1 + $0x6a0] sm:$0xff]  ;;  %v8458_v25 = vld [vmem:[%s18307_s1 + $0x6a8] sm:$0xff] }
 0x1d4   :  { %12300 = vmatprep.subr.bf16.mxu1 %v18270_v21 }
 0x1d6   :  { %12374 = vmatpush3.bf16.msra.mxu0 %v12373_v40  ;;  %v12418_v40 = vpack.c.bf16 %v8476_v24, %v8475_v29  ;;  %v8464_v29 = vld [vmem:[%s18307_s1 + $0x6d8] sm:$0xff] }
 0x1d7   :  { %12302 = vmatpush3.bf16.msra.mxu1 %v12301_v38  ;;  %12375 = vmatprep.subr.bf16.mxu0 %v18270_v21  ;;  %v12346_v38 = vpack.c.bf16 %v8428_v28, %v8427_v50  ;;  %v8463_v28 = vld [vmem:[%s18307_s1 + $0x6d0] sm:$0xff] }
 0x1d8   :  { %12303 = vmatprep.subr.bf16.mxu1 %v18270_v21  ;;  %v12400_v24 = vpack.c.bf16 %v8464_v29, %v8463_v28 }
 0x1da   :  { %12377 = vmatpush3.bf16.msra.mxu0 %v12376_v2  ;;  %v12421_v2 = vpack.c.bf16 %v8478_v3, %v8477_v12 }
 0x1db   :  { %12305 = vmatpush3.bf16.msra.mxu1 %v12304_v52  ;;  %12378 = vmatprep.subr.bf16.mxu0 %v18270_v21  ;;  %v12349_v52 = vpack.c.bf16 %v8430_v59, %v8429_v47 }
 0x1dc   :  { %12306 = vmatprep.subr.bf16.mxu1 %v18270_v21 }
 0x1de   :  { %12380 = vmatpush3.bf16.msra.mxu0 %v12379_v57  ;;  %v12424_v57 = vpack.c.bf16 %v8480_v49, %v8479_v41  ;;  %v8485_v41 = vld [vmem:[%s18307_s1 + $0x780] sm:$0xff]  ;;  %v8486_v49 = vld [vmem:[%s18307_s1 + $0x788] sm:$0xff] }
 0x1df   :  { %12308 = vmatpush3.bf16.msra.mxu1 %v12307_v51  ;;  %12381 = vmatprep.subr.bf16.mxu0 %v18270_v21  ;;  %v12352_v51 = vpack.c.bf16 %v8432_v46, %v8431_v30  ;;  %v8468_v30 = vld [vmem:[%s18307_s1 + $0x6f8] sm:$0xff] }
 0x1e0   :  { %12309 = vmatprep.subr.bf16.mxu1 %v18270_v21 }
 0x1e2   :  { %12383 = vmatpush3.bf16.msra.mxu0 %v12382_v53  ;;  %v12427_v53 = vpack.c.bf16 %v8482_v42, %v8481_v13  ;;  %v8489_v13 = vld [vmem:[%s18307_s1 + $0x7a0] sm:$0xff]  ;;  %v8490_v42 = vld [vmem:[%s18307_s1 + $0x7a8] sm:$0xff] }
 0x1e3   :  { %12311 = vmatpush3.bf16.msra.mxu1 %v12310_v55  ;;  %12408 = vmatprep.subr.bf16.mxu0 %v18270_v21  ;;  %v12355_v55 = vpack.c.bf16 %v8434_v61, %v8433_v58  ;;  %v8488_v58 = vld [vmem:[%s18307_s1 + $0x798] sm:$0xff] }
 0x1e4   :  { %12336 = vmatprep.subr.bf16.mxu1 %v18270_v21 }
 0x1e5   :  { %10503 = vmatmul.mubr.f32.vlgmr.msra.gmra.mrb[42].mxu0 %v14522_v35  ;;  %v8474_v35 = vld [vmem:[%s18307_s1 + $0x728] sm:$0xff] }
 0x1e6   :  { %10398 = vmatmul.mubr.f32.vlgmr.msra.gmra.mrb[10].mxu1 %v14509_v37  ;;  %12410 = vmatpush3.bf16.msra.mxu0 %v12409_v7  ;;  %v8473_v37 = vld [vmem:[%s18307_s1 + $0x720] sm:$0xff]  ;;  %v12430_v7 = vpack.c.bf16 %v8484_v45, %v8483_v39  ;;  %v8494_v39 = vld [vmem:[%s18307_s1 + $0x7c8] sm:$0xff] }
 0x1e7   :  { %12338 = vmatpush3.bf16.msra.mxu1 %v12337_v6  ;;  %12411 = vmatprep.subr.bf16.mxu0 %v18270_v21  ;;  %v12415_v32 = vpack.c.bf16 %v8474_v35, %v8473_v37  ;;  %v12358_v6 = vpack.c.bf16 %v8436_v19, %v8435_v8  ;;  %v12391_v37 = vpack.c.bf16 %v8458_v25, %v8457_v11  ;;  %v8493_v19 = vld [vmem:[%s18307_s1 + $0x7c0] sm:$0xff] }
 0x1e8   :  { %12339 = vmatprep.subr.bf16.mxu1 %v18270_v21  ;;  %10467 = vmatprep.mubr.msk.f32.mxu1 %vm13713_vm0, %v18268_v1  ;;  %v12445_v45 = vpack.c.bf16 %v8494_v39, %v8493_v19  ;;  %v2302_v19 = vld [vmem:[%s18311_s30 + $0x8] sm:$0xff]  ;;  %v2135_v39 = vld [vmem:[%s18310_s5 + $0x10] sm:$0xff] }
 0x1e9   :  { %10572 = vmatprep.mubr.msk.f32.mxu0 %vm13713_vm0, %v18268_v1 }
 0x1ea   :  { %12413 = vmatpush3.bf16.msra.mxu0 %v12412_v0 }
 0x1eb   :  { %12341 = vmatpush3.bf16.msra.mxu1 %v12340_v63  ;;  %12414 = vmatprep.subr.bf16.mxu0 %v18270_v21  ;;  %v8456_v63 = vld [vmem:[%s18307_s1 + $0x698] sm:$0xff] }
 0x1ec   :  { %12342 = vmatprep.subr.bf16.mxu1 %v18270_v21  ;;  %v12388_v0 = vpack.c.bf16 %v8456_v63, %v8455_v36 }
 0x1ee   :  { %12416 = vmatpush3.bf16.msra.mxu0 %v12415_v32  ;;  %v8462_v32 = vld [vmem:[%s18307_s1 + $0x6c8] sm:$0xff] }
 0x1ef   :  { %12344 = vmatpush3.bf16.msra.mxu1 %v12343_v27  ;;  %12417 = vmatprep.subr.bf16.mxu0 %v18270_v21  ;;  %v8461_v27 = vld [vmem:[%s18307_s1 + $0x6c0] sm:$0xff] }
 0x1f0   :  { %12345 = vmatprep.subr.bf16.mxu1 %v18270_v21  ;;  %v12397_v50 = vpack.c.bf16 %v8462_v32, %v8461_v27 }
 0x1f2   :  { %12419 = vmatpush3.bf16.msra.mxu0 %v12418_v40  ;;  %v8466_v40 = vld [vmem:[%s18307_s1 + $0x6e8] sm:$0xff] }
 0x1f3   :  { %12347 = vmatpush3.bf16.msra.mxu1 %v12346_v38  ;;  %12420 = vmatprep.subr.bf16.mxu0 %v18270_v21  ;;  %v8465_v38 = vld [vmem:[%s18307_s1 + $0x6e0] sm:$0xff] }
 0x1f4   :  { %12348 = vmatprep.subr.bf16.mxu1 %v18270_v21 }
 0x1f6   :  { %12422 = vmatpush3.bf16.msra.mxu0 %v12421_v2  ;;  %v8467_v2 = vld [vmem:[%s18307_s1 + $0x6f0] sm:$0xff] }
 0x1f7   :  { %12350 = vmatpush3.bf16.msra.mxu1 %v12349_v52  ;;  %12423 = vmatprep.subr.bf16.mxu0 %v18270_v21  ;;  %v12403_v52 = vpack.c.bf16 %v8466_v40, %v8465_v38  ;;  %v12406_v46 = vpack.c.bf16 %v8468_v30, %v8467_v2 }
 0x1f8   :  { %12351 = vmatprep.subr.bf16.mxu1 %v18270_v21 }
 0x1fa   :  { %12425 = vmatpush3.bf16.msra.mxu0 %v12424_v57  ;;  %v8487_v57 = vld [vmem:[%s18307_s1 + $0x790] sm:$0xff] }
 0x1fb   :  { %12353 = vmatpush3.bf16.msra.mxu1 %v12352_v51  ;;  %12426 = vmatprep.subr.bf16.mxu0 %v18270_v21  ;;  %v12433_v51 = vpack.c.bf16 %v8486_v49, %v8485_v41  ;;  %v12436_v61 = vpack.c.bf16 %v8488_v58, %v8487_v57 }
 0x1fc   :  { %12354 = vmatprep.subr.bf16.mxu1 %v18270_v21 }
 0x1fe   :  { %12428 = vmatpush3.bf16.msra.mxu0 %v12427_v53  ;;  %v8492_v53 = vld [vmem:[%s18307_s1 + $0x7b8] sm:$0xff] }
 0x1ff   :  { %12356 = vmatpush3.bf16.msra.mxu1 %v12355_v55  ;;  %12429 = vmatprep.subr.bf16.mxu0 %v18270_v21  ;;  %v12439_v55 = vpack.c.bf16 %v8490_v42, %v8489_v13 }
 0x200   :  { %12357 = vmatprep.subr.bf16.mxu1 %v18270_v21 }
 0x202   :  { %12431 = vmatpush3.bf16.msra.mxu0 %v12430_v7  ;;  %v8496_v7 = vld [vmem:[%s18307_s1 + $0x7d8] sm:$0xff] }
 0x203   :  { %12359 = vmatpush3.bf16.msra.mxu1 %v12358_v6  ;;  %v8495_v6 = vld [vmem:[%s18307_s1 + $0x7d0] sm:$0xff] }
 0x204   :  { %12384 = vmatprep.subr.bf16.mxu1 %v18270_v21  ;;  %v12448_v4 = vpack.c.bf16 %v8496_v7, %v8495_v6 }
 0x205   :  { %10573 = vmatmul.mubr.f32.vlgmr.msra.gmra.mrb[44].mxu0 %v14566_v20  ;;  %v8460_v20 = vld [vmem:[%s18307_s1 + $0x6b8] sm:$0xff] }
 0x206   :  { %10468 = vmatmul.mubr.f32.vlgmr.msra.gmra.mrb[12].mxu1 %v14535_v10  ;;  %v8459_v10 = vld [vmem:[%s18307_s1 + $0x6b0] sm:$0xff] }
 0x207   :  { %12386 = vmatpush3.bf16.msra.mxu1 %v12385_v22  ;;  %10537 = vmatprep.mubr.msk.f32.mxu1 %vm13713_vm0, %v18268_v1  ;;  %v12394_v35 = vpack.c.bf16 %v8460_v20, %v8459_v10  ;;  %v8498_v22 = vld [vmem:[%s18307_s1 + $0x7e8] sm:$0xff]  ;;  %v8499_v10 = vld [vmem:[%s18307_s1 + $0x7f0] sm:$0xff]  ;;  %v8500_v20 = vld [vmem:[%s18307_s1 + $0x7f8] sm:$0xff] }
 0x208   :  { %12387 = vmatprep.subr.bf16.mxu1 %v18270_v21  ;;  %v12454_v27 = vpack.c.bf16 %v8500_v20, %v8499_v10  ;;  %v2138_v10 = vld [vmem:[%s18310_s5 + $0x28] sm:$0xff]  ;;  %v2305_v20 = vld [vmem:[%s18311_s30 + $0x20] sm:$0xff] }
 0x20b   :  { %12389 = vmatpush3.bf16.msra.mxu1 %v12388_v0 }
 0x20c   :  { %12390 = vmatprep.subr.bf16.mxu1 %v18270_v21 }
 0x20f   :  { %12392 = vmatpush3.bf16.msra.mxu1 %v12391_v37  ;;  %v12451_v37 = vpack.c.bf16 %v8498_v22, %v8497_v54  ;;  %v2303_v22 = vld [vmem:[%s18311_s30 + $0x10] sm:$0xff] }
 0x210   :  { %12393 = vmatprep.subr.bf16.mxu1 %v18270_v21 }
 0x213   :  { %12395 = vmatpush3.bf16.msra.mxu1 %v12394_v35 }
 0x214   :  { %12396 = vmatprep.subr.bf16.mxu1 %v18270_v21 }
 0x217   :  { %12398 = vmatpush3.bf16.msra.mxu1 %v12397_v50 }
 0x218   :  { %12399 = vmatprep.subr.bf16.mxu1 %v18270_v21  ;;  %v428_v47 = vpop.f32.mrb[0].mxu1  ;;  %v615_v59 = vpop.f32.mrb[32].mxu0 }
 0x219   :  { %v10084_v12 = vpop.f32.mrb[1].mxu1  ;;  %v10154_v3 = vpop.f32.mrb[33].mxu0 }
 0x21b   :  { %12401 = vmatpush3.bf16.msra.mxu1 %v12400_v24 }
 0x21c   :  { %12402 = vmatprep.subr.bf16.mxu1 %v18270_v21 }
 0x21f   :  { %12404 = vmatpush3.bf16.msra.mxu1 %v12403_v52 }
 0x220   :  { %12405 = vmatprep.subr.bf16.mxu1 %v18270_v21 }
 0x223   :  { %12407 = vmatpush3.bf16.msra.mxu1 %v12406_v46 }
 0x224   :  { %12432 = vmatprep.subr.bf16.mxu1 %v18270_v21 }
 0x226   :  { %10538 = vmatmul.mubr.f32.vlgmr.msra.gmra.mrb[14].mxu1 %v14597_v43  ;;  %v8491_v43 = vld [vmem:[%s18307_s1 + $0x7b0] sm:$0xff] }
 0x227   :  { %12434 = vmatpush3.bf16.msra.mxu1 %v12433_v51  ;;  %10607 = vmatprep.mubr.msk.f32.mxu1 %vm13713_vm0, %v18268_v1  ;;  %v12442_v8 = vpack.c.bf16 %v8492_v53, %v8491_v43  ;;  %v2134_v43 = vld [vmem:[%s18310_s5 + $0x8] sm:$0xff]  ;;  %v2301_v53 = vld [vmem:[%s18311_s30] sm:$0xff] }
 0x228   :  { %12435 = vmatprep.subr.bf16.mxu1 %v18270_v21 }
 0x22b   :  { %12437 = vmatpush3.bf16.msra.mxu1 %v12436_v61 }
 0x22c   :  { %12438 = vmatprep.subr.bf16.mxu1 %v18270_v21 }
 0x22f   :  { %12440 = vmatpush3.bf16.msra.mxu1 %v12439_v55  ;;  %v2133_v55 = vld [vmem:[%s18310_s5] sm:$0xff] }
 0x230   :  { %12441 = vmatprep.subr.bf16.mxu1 %v18270_v21 }
 0x233   :  { %12443 = vmatpush3.bf16.msra.mxu1 %v12442_v8  ;;  %v12456_v8 = vpack.c.bf16 %v2134_v43, %v2133_v55  ;;  %v8501_v43 = vld [vmem:[%s18312_s27] ss:$0 sm:$0xff] }
 0x234   :  { %12444 = vmatprep.subr.bf16.mxu1 %v18270_v21 }
 0x235   :  { %12457 = vmatprep.subr.bf16.mxu0 %v12456_v8 }
 0x236   :  { %12459 = vmatpush3.bf16.msra.mxu0 %v12456_v8 }
 0x237   :  { %12446 = vmatpush3.bf16.msra.mxu1 %v12445_v45  ;;  %v2136_v45 = vld [vmem:[%s18310_s5 + $0x18] sm:$0xff] }
 0x238   :  { %12447 = vmatprep.subr.bf16.mxu1 %v18270_v21  ;;  %v821_v63 = vpop.f32.mrb[34].mxu0  ;;  %v12460_v54 = vpack.c.bf16 %v2136_v45, %v2135_v39 }
 0x239   :  { %v513_v36 = vpop.f32.mrb[2].mxu1  ;;  %v10224_v25 = vpop.f32.mrb[35].mxu0 }
 0x23a   :  { %v514_v0 = vadd.f32 %v513_v36, %v428_v47  ;;  %v10119_v11 = vpop.f32.mrb[3].mxu1  ;;  %v2304_v36 = vld [vmem:[%s18311_s30 + $0x18] sm:$0xff]  ;;  %12461 = vmatprep.subr.bf16.mxu0 %v12460_v54 }
 0x23b   :  { %12449 = vmatpush3.bf16.msra.mxu1 %v12448_v4  ;;  %v12488_v4 = vpack.c.bf16 %v2302_v19, %v2301_v53  ;;  %12463 = vmatpush3.bf16.msra.mxu0 %v12460_v54  ;;  %v2145_v54 = vld [vmem:[%s18310_s5 + $0x60] sm:$0xff] }
 0x23c   :  { %12450 = vmatprep.subr.bf16.mxu1 %v18270_v21  ;;  %v619_v35 = vadd.f32 %v615_v59, %v514_v0 }
 0x23f   :  { %12452 = vmatpush3.bf16.msra.mxu1 %v12451_v37  ;;  %v12492_v37 = vpack.c.bf16 %v2304_v36, %v2303_v22 }
 0x240   :  { %12453 = vmatprep.subr.bf16.mxu1 %v18270_v21 }
 0x243   :  { %12455 = vmatpush3.bf16.msra.mxu1 %v12454_v27 }
 0x244   :  { %12489 = vmatprep.subr.bf16.mxu1 %v12488_v4 }
 0x246   :  { %10608 = vmatmul.mubr.f32.vlgmr.msra.gmra.mrb[16].mxu1 %v14618_v16 }
 0x247   :  { %12491 = vmatpush3.bf16.msra.mxu1 %v12488_v4  ;;  %v1981_v4 = vlaneseq }
 0x248   :  { %12493 = vmatprep.subr.bf16.mxu1 %v12492_v37 }
 0x249   :  { %v1982_v22 = vshrl.u32 %v1981_v4, 7 }
 0x24b   :  { %12495 = vmatpush3.bf16.msra.mxu1 %v12492_v37  ;;  %v2148_v37 = vld [vmem:[%s18310_s5 + $0x78] sm:$0xff] }
 0x258   :  { %v1027_v50 = vpop.f32.mrb[36].mxu0 }
 0x259   :  { %v718_v32 = vpop.f32.mrb[4].mxu1  ;;  %v10294_v24 = vpop.f32.mrb[37].mxu0 }
 0x25a   :  { %v722_v28 = vadd.f32 %v718_v32, %v619_v35  ;;  %v10189_v29 = vpop.f32.mrb[5].mxu1  ;;  %v2306_v35 = vld [vmem:[%s18311_s30 + $0x28] sm:$0xff]  ;;  %v2307_v24 = vld [vmem:[%s18311_s30 + $0x30] sm:$0xff] }
 0x25b   :  { %v2140_v29 = vld [vmem:[%s18310_s5 + $0x38] sm:$0xff] }
 0x25c   :  { %v825_v38 = vadd.f32 %v821_v63, %v722_v28  ;;  %v2137_v63 = vld [vmem:[%s18310_s5 + $0x20] sm:$0xff]  ;;  %v2139_v28 = vld [vmem:[%s18310_s5 + $0x30] sm:$0xff] }
 0x25d   :  { %v12464_v32 = vpack.c.bf16 %v2138_v10, %v2137_v63  ;;  %v2313_v63 = vld [vmem:[%s18311_s30 + $0x60] sm:$0xff]  ;;  %v1994_v10 = vsub.s32 1, %v1982_v22 }
 0x25f   :  { %12465 = vmatprep.subr.bf16.mxu0 %v12464_v32 }
 0x260   :  { %12467 = vmatpush3.bf16.msra.mxu0 %v12464_v32  ;;  %v2316_v32 = vld [vmem:[%s18311_s30 + $0x78] sm:$0xff] }
 0x278   :  { %v1241_v47 = vpop.f32.mrb[38].mxu0 }
 0x279   :  { %v924_v40 = vpop.f32.mrb[6].mxu1  ;;  %v10364_v52 = vpop.f32.mrb[39].mxu0 }
 0x27a   :  { %v928_v12 = vadd.f32 %v924_v40, %v825_v38  ;;  %v10259_v3 = vpop.f32.mrb[7].mxu1  ;;  %v2308_v38 = vld [vmem:[%s18311_s30 + $0x38] sm:$0xff]  ;;  %v12468_v40 = vpack.c.bf16 %v2140_v29, %v2139_v28  ;;  %v2309_v52 = vld [vmem:[%s18311_s30 + $0x40] sm:$0xff] }
 0x27b   :  { %v2142_v3 = vld [vmem:[%s18310_s5 + $0x48] sm:$0xff] }
 0x27c   :  { %v1031_v2 = vadd.f32 %v1027_v50, %v928_v12  ;;  %v12496_v50 = vpack.c.bf16 %v2306_v35, %v2305_v20  ;;  %v2141_v12 = vld [vmem:[%s18310_s5 + $0x40] sm:$0xff]  ;;  %12469 = vmatprep.subr.bf16.mxu0 %v12468_v40  ;;  %v1983_v20 = vsub.s32 0, %v1982_v22 }
 0x27d   :  { %12471 = vmatpush3.bf16.msra.mxu0 %v12468_v40  ;;  %v2470_v40 = vld [vmem:[%s18313_s10 + $0x8] sm:$0xff] }
 0x27e   :  { %12497 = vmatprep.subr.bf16.mxu1 %v12496_v50 }
 0x27f   :  { %12499 = vmatpush3.bf16.msra.mxu1 %v12496_v50 }
 0x298   :  { %v1447_v30 = vpop.f32.mrb[40].mxu0 }
 0x299   :  { %v1130_v59 = vpop.f32.mrb[8].mxu1  ;;  %v10434_v49 = vpop.f32.mrb[41].mxu0 }
 0x29a   :  { %v1134_v46 = vadd.f32 %v1130_v59, %v1031_v2  ;;  %v10329_v41 = vpop.f32.mrb[9].mxu1  ;;  %v2310_v2 = vld [vmem:[%s18311_s30 + $0x48] sm:$0xff]  ;;  %v12472_v59 = vpack.c.bf16 %v2142_v3, %v2141_v12  ;;  %v2311_v49 = vld [vmem:[%s18311_s30 + $0x50] sm:$0xff]  ;;  %v2005_v12 = vsub.s32 2, %v1982_v22 }
 0x29b   :  { %v2144_v41 = vld [vmem:[%s18310_s5 + $0x58] sm:$0xff] }
 0x29c   :  { %v1245_v51 = vadd.f32 %v1241_v47, %v1134_v46  ;;  %v12500_v47 = vpack.c.bf16 %v2308_v38, %v2307_v24  ;;  %v2143_v46 = vld [vmem:[%s18310_s5 + $0x50] sm:$0xff]  ;;  %12473 = vmatprep.subr.bf16.mxu0 %v12472_v59  ;;  %v2469_v38 = vld [vmem:[%s18313_s10] sm:$0xff] }
 0x29d   :  { %12475 = vmatpush3.bf16.msra.mxu0 %v12472_v59  ;;  %v2027_v59 = vsub.s32 4, %v1982_v22 }
 0x29e   :  { %12501 = vmatprep.subr.bf16.mxu1 %v12500_v47 }
 0x29f   :  { %12503 = vmatpush3.bf16.msra.mxu1 %v12500_v47  ;;  %v12520_v47 = vpack.c.bf16 %v2470_v40, %v2469_v38  ;;  %v2092_v38 = vld [vmem:[%s18314_s0 + $0x38] sm:$0xff] }
 0x2b8   :  { %v1653_v16 = vpop.f32.mrb[42].mxu0 }
 0x2b9   :  { %v1344_v57 = vpop.f32.mrb[10].mxu1  ;;  %v10504_v13 = vpop.f32.mrb[43].mxu0 }
 0x2ba   :  { %v1348_v58 = vadd.f32 %v1344_v57, %v1245_v51  ;;  %v10399_v61 = vpop.f32.mrb[11].mxu1  ;;  %v2312_v51 = vld [vmem:[%s18311_s30 + $0x58] sm:$0xff]  ;;  %v12476_v57 = vpack.c.bf16 %v2144_v41, %v2143_v46  ;;  %v2038_v46 = vsub.s32 5, %v1982_v22 }
 0x2bc   :  { %v1451_v42 = vadd.f32 %v1447_v30, %v1348_v58  ;;  %v12504_v30 = vpack.c.bf16 %v2310_v2, %v2309_v52  ;;  %12477 = vmatprep.subr.bf16.mxu0 %v12476_v57  ;;  %v2016_v52 = vsub.s32 3, %v1982_v22 }
 0x2bd   :  { %12479 = vmatpush3.bf16.msra.mxu0 %v12476_v57  ;;  %v2060_v57 = vsub.s32 7, %v1982_v22 }
 0x2be   :  { %12505 = vmatprep.subr.bf16.mxu1 %v12504_v30 }
 0x2bf   :  { %12507 = vmatpush3.bf16.msra.mxu1 %v12504_v30 }
 0x2d8   :  { %v1859_v7 = vpop.f32.mrb[44].mxu0 }
 0x2d9   :  { %v1550_v6 = vpop.f32.mrb[12].mxu1  ;;  %v10574_v25 = vpop.f32.mrb[45].mxu0 }
 0x2da   :  { %v1554_v0 = vadd.f32 %v1550_v6, %v1451_v42  ;;  %v10469_v11 = vpop.f32.mrb[13].mxu1  ;;  %v2147_v25 = vld [vmem:[%s18310_s5 + $0x70] sm:$0xff] }
 0x2db   :  { %v12484_v35 = vpack.c.bf16 %v2148_v37, %v2147_v25 }
 0x2dc   :  { %v1657_v27 = vadd.f32 %v1653_v16, %v1554_v0  ;;  %v12508_v16 = vpack.c.bf16 %v2312_v51, %v2311_v49  ;;  %v2314_v0 = vld [vmem:[%s18311_s30 + $0x68] sm:$0xff]  ;;  %v2049_v49 = vsub.s32 6, %v1982_v22  ;;  %v2089_v22 = vld [vmem:[%s18314_s0 + $0x20] sm:$0xff] }
 0x2dd   :  { %v12512_v11 = vpack.c.bf16 %v2314_v0, %v2313_v63 }
 0x2de   :  { %12509 = vmatprep.subr.bf16.mxu1 %v12508_v16 }
 0x2df   :  { %12511 = vmatpush3.bf16.msra.mxu1 %v12508_v16 }
 0x2e0   :  { %12513 = vmatprep.subr.bf16.mxu1 %v12512_v11 }
 0x2e3   :  { %12515 = vmatpush3.bf16.msra.mxu1 %v12512_v11  ;;  %v2474_v11 = vld [vmem:[%s18313_s10 + $0x28] sm:$0xff] }
 0x2f9   :  { %v1756_v58 = vpop.f32.mrb[14].mxu1 }
 0x2fa   :  { %v1760_v61 = vadd.f32 %v1756_v58, %v1657_v27  ;;  %v10539_v13 = vpop.f32.mrb[15].mxu1  ;;  %v2315_v27 = vld [vmem:[%s18311_s30 + $0x70] sm:$0xff] }
 0x2fb   :  { %v12516_v50 = vpack.c.bf16 %v2316_v32, %v2315_v27 }
 0x2fc   :  { %v1863_v42 = vadd.f32 %v1859_v7, %v1760_v61  ;;  %v2146_v7 = vld [vmem:[%s18310_s5 + $0x68] sm:$0xff]  ;;  %v2085_v61 = vld [vmem:[%s18314_s0] sm:$0xff] }
 0x2fd   :  { %v12480_v36 = vpack.c.bf16 %v2146_v7, %v2145_v54  ;;  %12517 = vmatprep.subr.bf16.mxu1 %v12516_v50 }
 0x2fe   :  { %12519 = vmatpush3.bf16.msra.mxu1 %v12516_v50 }
 0x2ff   :  { %12481 = vmatprep.subr.bf16.mxu0 %v12480_v36 }
 0x300   :  { %12483 = vmatpush3.bf16.msra.mxu0 %v12480_v36 }
 0x301   :  { %12485 = vmatprep.subr.bf16.mxu0 %v12484_v35 }
 0x304   :  { %12487 = vmatpush3.bf16.msra.mxu0 %v12484_v35  ;;  %v2091_v35 = vld [vmem:[%s18314_s0 + $0x30] sm:$0xff] }
 0x305   :  { %12521 = vmatprep.subr.bf16.mxu0 %v12520_v47 }
 0x319   :  { %v1962_v55 = vpop.f32.mrb[16].mxu1 }
 0x31a   :  { %v1966_v53 = vadd.f32 %v1962_v55, %v1863_v42  ;;  %v10609_v8 = vpop.f32.mrb[17].mxu1 }
 0x31b   :  { %v2086_v8 = vld [vmem:[%s18314_s0 + $0x8] sm:$0xff] }
 0x31c   :  { %v1974_v19 = vadd.f32 %v8501_v43, %v1966_v53 }
 0x31e   :  { %v8502_v39 = vmul.f32 -1.442695, %v1974_v19 }
 0x320   :  { %13355 = vpow2.f32 %v8502_v39  ;;  %v2087_v39 = vld [vmem:[%s18314_s0 + $0x10] sm:$0xff] }
 0x32a   :  { %v13356_v45 = vpop.eup %13355 }
 0x32b   :  { %v1978_v6 = vadd.f32 1.0, %v13356_v45 }
 0x32d   :  { %13357 = vrcp.f32 %v1978_v6 }
 0x337   :  { %v13358_v28 = vpop.eup %13357 }
 0x338   :  { %v1995_v29 = vrot.slane %v13358_v28, %v1994_v10  ;;  %v1984_v24 = vrot.slane %v13358_v28, %v1983_v20  ;;  %v2006_v3 = vrot.slane %v13358_v28, %v2005_v12  ;;  %v2017_v2 = vrot.slane %v13358_v28, %v2016_v52  ;;  %v2090_v10 = vld [vmem:[%s18314_s0 + $0x28] sm:$0xff] }
 0x339   :  { %v2028_v30 = vrot.slane %v13358_v28, %v2027_v59  ;;  %v2039_v41 = vrot.slane %v13358_v28, %v2038_v46  ;;  %v2050_v51 = vrot.slane %v13358_v28, %v2049_v49  ;;  %v2061_v16 = vrot.slane %v13358_v28, %v2060_v57  ;;  %v2476_v28 = vld [vmem:[%s18313_s10 + $0x38] sm:$0xff]  ;;  %v2094_v46 = vld [vmem:[%s18314_s0 + $0x48] sm:$0xff]  ;;  %v2095_v49 = vld [vmem:[%s18314_s0 + $0x50] sm:$0xff] }
 0x33a   :  { %1997 = vbcast.lane.b32.xlu1 %v1995_v29, 256  ;;  %1986 = vbcast.lane.b32.xlu0 %v1984_v24, 256 }
 0x33e   :  { %2001 = vbcast.lane.b32.xlu1 %v1995_v29, 264  ;;  %1990 = vbcast.lane.b32.xlu0 %v1984_v24, 264 }
 0x342   :  { %2012 = vbcast.lane.b32.xlu1 %v2006_v3, 264  ;;  %2008 = vbcast.lane.b32.xlu0 %v2006_v3, 256 }
 0x346   :  { %2023 = vbcast.lane.b32.xlu1 %v2017_v2, 264  ;;  %2019 = vbcast.lane.b32.xlu0 %v2017_v2, 256  ;;  %v2478_v2 = vld [vmem:[%s18313_s10 + $0x48] sm:$0xff] }
 0x34a   :  { %2034 = vbcast.lane.b32.xlu1 %v2028_v30, 264  ;;  %2030 = vbcast.lane.b32.xlu0 %v2028_v30, 256 }
 0x34e   :  { %2045 = vbcast.lane.b32.xlu1 %v2039_v41, 264  ;;  %2041 = vbcast.lane.b32.xlu0 %v2039_v41, 256 }
 0x352   :  { %2056 = vbcast.lane.b32.xlu1 %v2050_v51, 264  ;;  %2052 = vbcast.lane.b32.xlu0 %v2050_v51, 256 }
 0x356   :  { %2067 = vbcast.lane.b32.xlu1 %v2061_v16, 264  ;;  %2063 = vbcast.lane.b32.xlu0 %v2061_v16, 256 }
 0x3ac   :  { %v1998_v58 = vpop.permute.xlu1 %1997  ;;  %v1987_v13 = vpop.permute.xlu0 %1986 }
 0x3ad   :  { %v2069_v42 = vmul.f32 %v1987_v13, %v14172_v17  ;;  %v2071_v43 = vmul.f32 %v1998_v58, %v14169_v15  ;;  %v2471_v15 = vld [vmem:[%s18313_s10 + $0x10] sm:$0xff]  ;;  %v2472_v17 = vld [vmem:[%s18313_s10 + $0x18] sm:$0xff] }
 0x3ae   :  { %v12524_v63 = vpack.c.bf16 %v2472_v17, %v2471_v15  ;;  %v2480_v58 = vld [vmem:[%s18313_s10 + $0x58] sm:$0xff] }
 0x3af   :  { %v15483_v55 = vadd.f32 %v2085_v61, %v2069_v42  ;;  %v15504_v54 = vadd.f32 %v2087_v39, %v2071_v43  ;;  %v2096_v42 = vld [vmem:[%s18314_s0 + $0x58] sm:$0xff] }
 0x3b0   :  { %v2002_v53 = vpop.permute.xlu1 %2001  ;;  %v1991_v19 = vpop.permute.xlu0 %1990 }
 0x3b1   :  { %v2070_v45 = vmul.f32 %v1991_v19, %v14166_v9  ;;  %10642 = vmatprep.mubr.f32.mxu0 %v15483_v55  ;;  %10698 = vmatprep.mubr.f32.mxu1 %v15483_v55  ;;  %v2072_v6 = vmul.f32 %v2002_v53, %v14175_v18  ;;  %v2088_v9 = vld [vmem:[%s18314_s0 + $0x18] sm:$0xff]  ;;  %v2473_v18 = vld [vmem:[%s18313_s10 + $0x20] sm:$0xff] }
 0x3b2   :  { %v12528_v32 = vpack.c.bf16 %v2474_v11, %v2473_v18  ;;  %v2097_v53 = vld [vmem:[%s18314_s0 + $0x60] sm:$0xff] }
 0x3b3   :  { %v15502_v4 = vadd.f32 %v2086_v8, %v2070_v45  ;;  %v15523_v25 = vadd.f32 %v2088_v9, %v2072_v6  ;;  %v2482_v45 = vld [vmem:[%s18313_s10 + $0x68] sm:$0xff] }
 0x3b4   :  { %v2013_v7 = vpop.permute.xlu1 %2012  ;;  %v2009_v36 = vpop.permute.xlu0 %2008  ;;  %v2098_v6 = vld [vmem:[%s18314_s0 + $0x68] sm:$0xff] }
 0x3b5   :  { %v2073_v0 = vmul.f32 %v2009_v36, %v14181_v26  ;;  %10643 = vmatmul.mubr.f32.vlgmr.msra.gmra.mrb[46].mxu0 %v15502_v4  ;;  %10699 = vmatmul.mubr.f32.vlgmr.msra.gmra.mrb[18].mxu1 %v15502_v4  ;;  %v2074_v26 = vmul.f32 %v2013_v7, %v14198_v44  ;;  %v2475_v44 = vld [vmem:[%s18313_s10 + $0x30] sm:$0xff] }
 0x3b6   :  { %10645 = vmatprep.mubr.f32.mxu0 %v15504_v54  ;;  %10701 = vmatprep.mubr.f32.mxu1 %v15504_v54  ;;  %v12532_v3 = vpack.c.bf16 %v2476_v28, %v2475_v44  ;;  %v2099_v7 = vld [vmem:[%s18314_s0 + $0x70] sm:$0xff] }
 0x3b7   :  { %v15526_v37 = vadd.f32 %v2089_v22, %v2073_v0  ;;  %12523 = vmatpush3.bf16.msra.mxu0 %v12520_v47  ;;  %v15545_v29 = vadd.f32 %v2090_v10, %v2074_v26  ;;  %v2093_v47 = vld [vmem:[%s18314_s0 + $0x40] sm:$0xff]  ;;  %v2484_v0 = vld [vmem:[%s18313_s10 + $0x78] sm:$0xff] }
 0x3b8   :  { %v2024_v20 = vpop.permute.xlu1 %2023  ;;  %v2020_v27 = vpop.permute.xlu0 %2019  ;;  %12525 = vmatprep.subr.bf16.mxu0 %v12524_v63  ;;  %v2100_v26 = vld [vmem:[%s18314_s0 + $0x78] sm:$0xff] }
 0x3b9   :  { %v2075_v50 = vmul.f32 %v2020_v27, %v14218_v62  ;;  %10646 = vmatmul.mubr.f32.gmra.mrb[48].mxu0 %v15523_v25  ;;  %10702 = vmatmul.mubr.f32.gmra.mrb[20].mxu1 %v15523_v25  ;;  %v2076_v62 = vmul.f32 %v2024_v20, %v14231_v14  ;;  %v2477_v14 = vld [vmem:[%s18313_s10 + $0x40] sm:$0xff] }
 0x3ba   :  { %10648 = vmatprep.mubr.f32.mxu0 %v15526_v37  ;;  %10704 = vmatprep.mubr.f32.mxu1 %v15526_v37  ;;  %v12536_v57 = vpack.c.bf16 %v2478_v2, %v2477_v14 }
 0x3bb   :  { %v15548_v24 = vadd.f32 %v2091_v35, %v2075_v50  ;;  %12527 = vmatpush3.bf16.msra.mxu0 %v12524_v63  ;;  %v15567_v59 = vadd.f32 %v2092_v38, %v2076_v62  ;;  %v15673_v35 = vld [vmem:[%s18319_s11] ss:$0 sm:$0xff] }
 0x3bc   :  { %v2035_v40 = vpop.permute.xlu1 %2034  ;;  %v2031_v12 = vpop.permute.xlu0 %2030  ;;  %12529 = vmatprep.subr.bf16.mxu0 %v12528_v32 }
 0x3bd   :  { %v2077_v52 = vmul.f32 %v2031_v12, %v14245_v34  ;;  %10649 = vmatmul.mubr.f32.gmra.mrb[50].mxu0 %v15545_v29  ;;  %10705 = vmatmul.mubr.f32.gmra.mrb[22].mxu1 %v15545_v29  ;;  %v2078_v34 = vmul.f32 %v2035_v40, %v14257_v48  ;;  %v2479_v48 = vld [vmem:[%s18313_s10 + $0x50] sm:$0xff] }
 0x3be   :  { %10651 = vmatprep.mubr.f32.mxu0 %v15548_v24  ;;  %10707 = vmatprep.mubr.f32.mxu1 %v15548_v24  ;;  %v12540_v19 = vpack.c.bf16 %v2480_v58, %v2479_v48 }
 0x3bf   :  { %v15570_v30 = vadd.f32 %v2093_v47, %v2077_v52  ;;  %12531 = vmatpush3.bf16.msra.mxu0 %v12528_v32  ;;  %v15589_v61 = vadd.f32 %v2094_v46, %v2078_v34 }
 0x3c0   :  { %v2046_v41 = vpop.permute.xlu1 %2045  ;;  %v2042_v51 = vpop.permute.xlu0 %2041  ;;  %12533 = vmatprep.subr.bf16.mxu0 %v12532_v3 }
 0x3c1   :  { %v2079_v16 = vmul.f32 %v2042_v51, %v14301_v5  ;;  %10652 = vmatmul.mubr.f32.gmra.mrb[52].mxu0 %v15567_v59  ;;  %10708 = vmatmul.mubr.f32.gmra.mrb[24].mxu1 %v15567_v59  ;;  %v2080_v5 = vmul.f32 %v2046_v41, %v14333_v33  ;;  %v2481_v33 = vld [vmem:[%s18313_s10 + $0x60] sm:$0xff] }
 0x3c2   :  { %10654 = vmatprep.mubr.f32.mxu0 %v15570_v30  ;;  %10710 = vmatprep.mubr.f32.mxu1 %v15570_v30  ;;  %v12544_v36 = vpack.c.bf16 %v2482_v45, %v2481_v33 }
 0x3c3   :  { %v15592_v13 = vadd.f32 %v2095_v49, %v2079_v16  ;;  %12535 = vmatpush3.bf16.msra.mxu0 %v12532_v3  ;;  %v15611_v15 = vadd.f32 %v2096_v42, %v2080_v5 }
 0x3c4   :  { %v2057_v43 = vpop.permute.xlu1 %2056  ;;  %v2053_v8 = vpop.permute.xlu0 %2052  ;;  %12537 = vmatprep.subr.bf16.mxu0 %v12536_v57 }
 0x3c5   :  { %v2081_v39 = vmul.f32 %v2053_v8, %v14361_v60  ;;  %10655 = vmatmul.mubr.f32.gmra.mrb[54].mxu0 %v15589_v61  ;;  %10711 = vmatmul.mubr.f32.gmra.mrb[26].mxu1 %v15589_v61  ;;  %v2082_v60 = vmul.f32 %v2057_v43, %v14383_v23  ;;  %v2483_v23 = vld [vmem:[%s18313_s10 + $0x70] sm:$0xff] }
 0x3c6   :  { %10657 = vmatprep.mubr.f32.mxu0 %v15592_v13  ;;  %10713 = vmatprep.mubr.f32.mxu1 %v15592_v13  ;;  %v12548_v10 = vpack.c.bf16 %v2484_v0, %v2483_v23 }
 0x3c7   :  { %v15614_v17 = vadd.f32 %v2097_v53, %v2081_v39  ;;  %12539 = vmatpush3.bf16.msra.mxu0 %v12536_v57  ;;  %v15633_v18 = vadd.f32 %v2098_v6, %v2082_v60 }
 0x3c8   :  { %v2068_v9 = vpop.permute.xlu1 %2067  ;;  %v2064_v22 = vpop.permute.xlu0 %2063  ;;  %12541 = vmatprep.subr.bf16.mxu0 %v12540_v19 }
 0x3c9   :  { %v2083_v63 = vmul.f32 %v2064_v22, %v14400_v31  ;;  %10658 = vmatmul.mubr.f32.gmra.mrb[56].mxu0 %v15611_v15  ;;  %10714 = vmatmul.mubr.f32.gmra.mrb[28].mxu1 %v15611_v15  ;;  %18315 = vst [vmem:[#allocation2_spill] sm:$0xff] %v15633_v18  ;;  %v2084_v31 = vmul.f32 %v2068_v9, %v14437_v56  ;;  %v15668_v56 = vld [vmem:[%s18318_s28] ss:$0 sm:$0xff] }
 0x3ca   :  { %10660 = vmatprep.mubr.f32.mxu0 %v15614_v17  ;;  %10716 = vmatprep.mubr.f32.mxu1 %v15614_v17 }
 0x3cb   :  { %v15636_v11 = vadd.f32 %v2099_v7, %v2083_v63  ;;  %12543 = vmatpush3.bf16.msra.mxu0 %v12540_v19  ;;  %v15645_v20 = vadd.f32 %v2100_v26, %v2084_v31 }
 0x3cc   :  { %12545 = vmatprep.subr.bf16.mxu0 %v12544_v36 }
 0x3cd   :  { %18316 = vst [vmem:[#allocation3_spill] sm:$0xff] %v15636_v11  ;;  %10661 = vmatmul.mubr.f32.gmra.mrb[58].mxu0 %v15633_v18  ;;  %10717 = vmatmul.mubr.f32.gmra.mrb[30].mxu1 %v15633_v18  ;;  %18317 = vst [vmem:[#allocation4_spill] sm:$0xff] %v15645_v20 }
 0x3ce   :  { %10663 = vmatprep.mubr.f32.mxu0 %v15636_v11  ;;  %10719 = vmatprep.mubr.f32.mxu1 %v15636_v11 }
 0x3cf   :  { %12547 = vmatpush3.bf16.msra.mxu0 %v12544_v36 }
 0x3d0   :  { %12549 = vmatprep.subr.bf16.mxu0 %v12548_v10 }
 0x3d1   :  { %10664 = vmatmul.mubr.f32.gmra.mrb[60].mxu0 %v15645_v20  ;;  %10720 = vmatmul.mubr.f32.gmra.mrb[32].mxu1 %v15645_v20 }
 0x3d2   :  { %10754 = vmatprep.mubr.f32.mxu0 %v15483_v55 }
 0x3d3   :  { %12551 = vmatpush3.bf16.msra.mxu0 %v12548_v10 }
 0x3d6   :  { %10755 = vmatmul.mubr.f32.vlgmr.msra.gmra.mrb[62].mxu0 %v15502_v4 }
 0x3d7   :  { %10757 = vmatprep.mubr.f32.mxu0 %v15504_v54 }
 0x3da   :  { %10758 = vmatmul.mubr.f32.gmra.mrb[64].mxu0 %v15523_v25 }
 0x3db   :  { %10760 = vmatprep.mubr.f32.mxu0 %v15526_v37 }
 0x3de   :  { %10761 = vmatmul.mubr.f32.gmra.mrb[66].mxu0 %v15545_v29 }
 0x3df   :  { %10763 = vmatprep.mubr.f32.mxu0 %v15548_v24 }
 0x3e2   :  { %10764 = vmatmul.mubr.f32.gmra.mrb[68].mxu0 %v15567_v59 }
 0x3e3   :  { %10766 = vmatprep.mubr.f32.mxu0 %v15570_v30 }
 0x3e6   :  { %10767 = vmatmul.mubr.f32.gmra.mrb[70].mxu0 %v15589_v61 }
 0x3e7   :  { %10769 = vmatprep.mubr.f32.mxu0 %v15592_v13 }
 0x3ea   :  { %10770 = vmatmul.mubr.f32.gmra.mrb[72].mxu0 %v15611_v15 }
 0x3eb   :  { %10772 = vmatprep.mubr.f32.mxu0 %v15614_v17 }
 0x3ee   :  { %10773 = vmatmul.mubr.f32.gmra.mrb[74].mxu0 %v15633_v18 }
 0x3ef   :  { %10775 = vmatprep.mubr.f32.mxu0 %v15636_v11 }
 0x3f2   :  { %10776 = vmatmul.mubr.f32.gmra.mrb[76].mxu0 %v15645_v20 }
 0x488   :  { %v10644_v27 = vpop.f32.mrb[46].mxu0  ;;  %v10700_v32 = vpop.f32.mrb[18].mxu1 }
 0x489   :  { %v15676_v50 = vadd.f32 %v10644_v27, %v15668_v56  ;;  %v2396_v44 = vadd.f32 %v10700_v32, %v15673_v35  ;;  %v2222_v28 = vpop.f32.mrb[47].mxu0  ;;  %v2390_v62 = vpop.f32.mrb[19].mxu1 }
 0x48a   :  { %v2223_v38 = vadd.f32 %v15668_v56, %v2222_v28  ;;  %v2391_v40 = vadd.f32 %v15673_v35, %v2390_v62 }
 0x48c   :  { %v12552_v12 = vpack.c.bf16 %v2396_v44, %v2391_v40  ;;  %v10647_v3 = vpop.f32.mrb[48].mxu0  ;;  %v10703_v52 = vpop.f32.mrb[20].mxu1  ;;  %10810 = vmatprep.mubr.msk.f32.mxu1 %vm2637_vm8, %v2223_v38 }
 0x48d   :  { %v15689_v14 = vadd.f32 %v10647_v3, %v15668_v56  ;;  %v2406_v2 = vadd.f32 %v10703_v52, %v15673_v35  ;;  %v2232_v34 = vpop.f32.mrb[49].mxu0  ;;  %v2400_v46 = vpop.f32.mrb[21].mxu1 }
 0x48e   :  { %v15693_v41 = vadd.f32 %v15668_v56, %v2232_v34  ;;  %v2401_v49 = vadd.f32 %v15673_v35, %v2400_v46  ;;  %12554 = vmatprep.subr.msk.bf16.mxu1 %vm15683_vm9, %v12552_v12 }
 0x48f   :  { %12557 = vmatpush3.bf16.xpose.msk.msra.mxu1 %vm15683_vm9, %v12552_v12 }
 0x490   :  { %v12558_v51 = vpack.c.bf16 %v2406_v2, %v2401_v49  ;;  %v10650_v57 = vpop.f32.mrb[50].mxu0  ;;  %v10706_v16 = vpop.f32.mrb[22].mxu1 }
 0x491   :  { %v15701_v48 = vadd.f32 %v10650_v57, %v15668_v56  ;;  %v2416_v58 = vadd.f32 %v10706_v16, %v15673_v35  ;;  %v2242_v5 = vpop.f32.mrb[51].mxu0  ;;  %v2410_v42 = vpop.f32.mrb[23].mxu1 }
 0x492   :  { %v15705_v43 = vadd.f32 %v15668_v56, %v2242_v5  ;;  %v2411_v53 = vadd.f32 %v15673_v35, %v2410_v42  ;;  %12560 = vmatprep.subr.msk.bf16.mxu1 %vm15683_vm9, %v12558_v51 }
 0x494   :  { %v12564_v8 = vpack.c.bf16 %v2416_v58, %v2411_v53  ;;  %v10653_v19 = vpop.f32.mrb[52].mxu0  ;;  %v10709_v39 = vpop.f32.mrb[24].mxu1 }
 0x495   :  { %v15711_v33 = vadd.f32 %v10653_v19, %v15668_v56  ;;  %v2426_v45 = vadd.f32 %v10709_v39, %v15673_v35  ;;  %v2252_v60 = vpop.f32.mrb[53].mxu0  ;;  %v2420_v6 = vpop.f32.mrb[25].mxu1 }
 0x496   :  { %v15715_v9 = vadd.f32 %v15668_v56, %v2252_v60  ;;  %v2421_v7 = vadd.f32 %v15673_v35, %v2420_v6 }
 0x497   :  { %12563 = vmatpush3.bf16.xpose.msk.msra.mxu1 %vm15683_vm9, %v12558_v51 }
 0x498   :  { %v12570_v22 = vpack.c.bf16 %v2426_v45, %v2421_v7  ;;  %v10656_v36 = vpop.f32.mrb[54].mxu0  ;;  %v10712_v63 = vpop.f32.mrb[26].mxu1  ;;  %12566 = vmatprep.subr.msk.bf16.mxu1 %vm15683_vm9, %v12564_v8 }
 0x499   :  { %v15723_v23 = vadd.f32 %v10656_v36, %v15668_v56  ;;  %v2436_v0 = vadd.f32 %v10712_v63, %v15673_v35  ;;  %v2262_v31 = vpop.f32.mrb[55].mxu0  ;;  %v2430_v26 = vpop.f32.mrb[27].mxu1  ;;  %v8505_v36 = vld [vmem:[%s18243_s13] ss:$0 sm:$0xff] }
 0x49a   :  { %v15727_v10 = vadd.f32 %v15668_v56, %v2262_v31  ;;  %v2431_v27 = vadd.f32 %v15673_v35, %v2430_v26 }
 0x49c   :  { %v12576_v32 = vpack.c.bf16 %v2436_v0, %v2431_v27  ;;  %v10659_v44 = vpop.f32.mrb[56].mxu0  ;;  %v10715_v28 = vpop.f32.mrb[28].mxu1 }
 0x49d   :  { %v15731_v62 = vadd.f32 %v10659_v44, %v15668_v56  ;;  %v2446_v38 = vadd.f32 %v10715_v28, %v15673_v35  ;;  %v2272_v40 = vpop.f32.mrb[57].mxu0  ;;  %v2440_v12 = vpop.f32.mrb[29].mxu1 }
 0x49e   :  { %v15735_v3 = vadd.f32 %v15668_v56, %v2272_v40  ;;  %v2441_v52 = vadd.f32 %v15673_v35, %v2440_v12 }
 0x49f   :  { %12569 = vmatpush3.bf16.xpose.msk.msra.mxu1 %vm15683_vm9, %v12564_v8 }
 0x4a0   :  { %v12582_v2 = vpack.c.bf16 %v2446_v38, %v2441_v52  ;;  %v10662_v34 = vpop.f32.mrb[58].mxu0  ;;  %v10718_v46 = vpop.f32.mrb[30].mxu1  ;;  %12572 = vmatprep.subr.msk.bf16.mxu1 %vm15683_vm9, %v12570_v22 }
 0x4a1   :  { %v15743_v49 = vadd.f32 %v10662_v34, %v15668_v56  ;;  %v2456_v51 = vadd.f32 %v10718_v46, %v15673_v35  ;;  %v2282_v57 = vpop.f32.mrb[59].mxu0  ;;  %v2450_v16 = vpop.f32.mrb[31].mxu1 }
 0x4a2   :  { %v15747_v58 = vadd.f32 %v15668_v56, %v2282_v57  ;;  %v2451_v5 = vadd.f32 %v15673_v35, %v2450_v16 }
 0x4a4   :  { %v12588_v42 = vpack.c.bf16 %v2456_v51, %v2451_v5  ;;  %v10665_v53 = vpop.f32.mrb[60].mxu0  ;;  %v10721_v8 = vpop.f32.mrb[32].mxu1 }
 0x4a5   :  { %v15751_v19 = vadd.f32 %v10665_v53, %v15668_v56  ;;  %v2466_v39 = vadd.f32 %v10721_v8, %v15673_v35  ;;  %v2292_v45 = vpop.f32.mrb[61].mxu0  ;;  %v2460_v60 = vpop.f32.mrb[33].mxu1 }
 0x4a6   :  { %v15755_v6 = vadd.f32 %v15668_v56, %v2292_v45  ;;  %v2461_v7 = vadd.f32 %v15673_v35, %v2460_v60 }
 0x4a7   :  { %12575 = vmatpush3.bf16.xpose.msk.msra.mxu1 %vm15683_vm9, %v12570_v22 }
 0x4a8   :  { %v15763_v63 = vpack.c.bf16 %v2466_v39, %v2461_v7  ;;  %12578 = vmatprep.subr.msk.bf16.mxu1 %vm15683_vm9, %v12576_v32 }
 0x4a9   :  { %v10756_v0 = vpop.f32.mrb[62].mxu0 }
 0x4aa   :  { %v2564_v31 = vadd.f32 %v10756_v0, %v8505_v36  ;;  %v2558_v26 = vpop.f32.mrb[63].mxu0 }
 0x4ab   :  { %v2559_v27 = vadd.f32 %v8505_v36, %v2558_v26 }
 0x4ad   :  { %v12600_v56 = vpack.c.bf16 %v2564_v31, %v2559_v27  ;;  %v10759_v44 = vpop.f32.mrb[64].mxu0 }
 0x4ae   :  { %v2574_v28 = vadd.f32 %v10759_v44, %v8505_v36  ;;  %v2568_v35 = vpop.f32.mrb[65].mxu0  ;;  %v8557_v44 = vld [vmem:[%s18311_s30 + $0x88] sm:$0xff] }
 0x4af   :  { %v2569_v38 = vadd.f32 %v8505_v36, %v2568_v35  ;;  %12601 = vmatprep.subr.bf16.mxu0 %v12600_v56  ;;  %12581 = vmatpush3.bf16.xpose.msk.msra.mxu1 %vm15683_vm9, %v12576_v32 }
 0x4b0   :  { %12603 = vmatpush3.bf16.msra.mxu0 %v12600_v56  ;;  %12584 = vmatprep.subr.msk.bf16.mxu1 %vm15683_vm9, %v12582_v2  ;;  %v8556_v56 = vld [vmem:[%s18311_s30 + $0x80] sm:$0xff] }
 0x4b1   :  { %v12604_v22 = vpack.c.bf16 %v2574_v28, %v2569_v38  ;;  %v10762_v40 = vpop.f32.mrb[66].mxu0 }
 0x4b2   :  { %v2584_v12 = vadd.f32 %v10762_v40, %v8505_v36  ;;  %v2578_v52 = vpop.f32.mrb[67].mxu0 }
 0x4b3   :  { %v2579_v34 = vadd.f32 %v8505_v36, %v2578_v52  ;;  %12605 = vmatprep.subr.bf16.mxu0 %v12604_v22 }
 0x4b4   :  { %12607 = vmatpush3.bf16.msra.mxu0 %v12604_v22 }
 0x4b5   :  { %v12608_v46 = vpack.c.bf16 %v2584_v12, %v2579_v34  ;;  %v10765_v51 = vpop.f32.mrb[68].mxu0 }
 0x4b6   :  { %v2594_v57 = vadd.f32 %v10765_v51, %v8505_v36  ;;  %v2588_v16 = vpop.f32.mrb[69].mxu0  ;;  %v8558_v51 = vld [vmem:[%s18311_s30 + $0x90] sm:$0xff] }
 0x4b7   :  { %v2589_v5 = vadd.f32 %v8505_v36, %v2588_v16  ;;  %12609 = vmatprep.subr.bf16.mxu0 %v12608_v46  ;;  %12587 = vmatpush3.bf16.xpose.msk.msra.mxu1 %vm15683_vm9, %v12582_v2 }
 0x4b8   :  { %12611 = vmatpush3.bf16.msra.mxu0 %v12608_v46  ;;  %12590 = vmatprep.subr.msk.bf16.mxu1 %vm15683_vm9, %v12588_v42 }
 0x4b9   :  { %v12612_v32 = vpack.c.bf16 %v2594_v57, %v2589_v5  ;;  %v10768_v53 = vpop.f32.mrb[70].mxu0  ;;  %v8559_v57 = vld [vmem:[%s18311_s30 + $0x98] sm:$0xff] }
 0x4ba   :  { %v2604_v8 = vadd.f32 %v10768_v53, %v8505_v36  ;;  %v2598_v39 = vpop.f32.mrb[71].mxu0  ;;  %v12668_v16 = vpack.c.bf16 %v8559_v57, %v8558_v51  ;;  %v8563_v53 = vld [vmem:[%s18311_s30 + $0xb8] sm:$0xff]  ;;  %v2122_v51 = vld [vmem:[%s18244_s6 + $0x28] sm:$0xff]  ;;  %v2123_v57 = vld [vmem:[%s18244_s6 + $0x30] sm:$0xff] }
 0x4bb   :  { %v2599_v45 = vadd.f32 %v8505_v36, %v2598_v39  ;;  %12613 = vmatprep.subr.bf16.mxu0 %v12612_v32  ;;  %v8567_v39 = vld [vmem:[%s18311_s30 + $0xd8] sm:$0xff] }
 0x4bc   :  { %12615 = vmatpush3.bf16.msra.mxu0 %v12612_v32  ;;  %v8562_v32 = vld [vmem:[%s18311_s30 + $0xb0] sm:$0xff] }
 0x4bd   :  { %v12616_v60 = vpack.c.bf16 %v2604_v8, %v2599_v45  ;;  %v10771_v7 = vpop.f32.mrb[72].mxu0  ;;  %v8565_v8 = vld [vmem:[%s18311_s30 + $0xc8] sm:$0xff] }
 0x4be   :  { %v2614_v0 = vadd.f32 %v10771_v7, %v8505_v36  ;;  %v2608_v31 = vpop.f32.mrb[73].mxu0  ;;  %v8569_v45 = vld [vmem:[%s18311_s30 + $0xe8] sm:$0xff] }
 0x4bf   :  { %v2609_v26 = vadd.f32 %v8505_v36, %v2608_v31  ;;  %12617 = vmatprep.subr.bf16.mxu0 %v12616_v60  ;;  %12593 = vmatpush3.bf16.xpose.msk.msra.mxu1 %vm15683_vm9, %v12588_v42  ;;  %v12664_v42 = vpack.c.bf16 %v8557_v44, %v8556_v56 }
 0x4c0   :  { %12619 = vmatpush3.bf16.msra.mxu0 %v12616_v60  ;;  %12596 = vmatprep.subr.msk.bf16.mxu1 %vm15683_vm9, %v15763_v63  ;;  %v8571_v60 = vld [vmem:[%s18311_s30 + $0xf8] sm:$0xff] }
 0x4c1   :  { %v12620_v2 = vpack.c.bf16 %v2614_v0, %v2609_v26  ;;  %v10774_v27 = vpop.f32.mrb[74].mxu0 }
 0x4c2   :  { %v2624_v28 = vadd.f32 %v10774_v27, %v8505_v36  ;;  %v2618_v35 = vpop.f32.mrb[75].mxu0 }
 0x4c3   :  { %v2619_v38 = vadd.f32 %v8505_v36, %v2618_v35  ;;  %12621 = vmatprep.subr.bf16.mxu0 %v12620_v2 }
 0x4c4   :  { %12623 = vmatpush3.bf16.msra.mxu0 %v12620_v2  ;;  %v2119_v2 = vld [vmem:[%s18244_s6 + $0x10] sm:$0xff] }
 0x4c5   :  { %v12624_v22 = vpack.c.bf16 %v2624_v28, %v2619_v38  ;;  %v10777_v40 = vpop.f32.mrb[76].mxu0  ;;  %v2120_v38 = vld [vmem:[%s18244_s6 + $0x18] sm:$0xff] }
 0x4c6   :  { %v2634_v12 = vadd.f32 %v10777_v40, %v8505_v36  ;;  %v2628_v52 = vpop.f32.mrb[77].mxu0 }
 0x4c7   :  { %v2629_v34 = vadd.f32 %v8505_v36, %v2628_v52  ;;  %12625 = vmatprep.subr.bf16.mxu0 %v12624_v22  ;;  %12599 = vmatpush3.bf16.xpose.msk.msra.mxu1 %vm15683_vm9, %v15763_v63  ;;  %v8560_v36 = vld [vmem:[%s18311_s30 + $0xa0] sm:$0xff]  ;;  %v8561_v63 = vld [vmem:[%s18311_s30 + $0xa8] sm:$0xff] }
 0x4c8   :  { %12627 = vmatpush3.bf16.msra.mxu0 %v12624_v22  ;;  %12665 = vmatprep.subr.bf16.mxu1 %v12664_v42  ;;  %v12672_v5 = vpack.c.bf16 %v8561_v63, %v8560_v36 }
 0x4c9   :  { %v12628_v46 = vpack.c.bf16 %v2634_v12, %v2629_v34 }
 0x4cb   :  { %12629 = vmatprep.subr.bf16.mxu0 %v12628_v46 }
 0x4cc   :  { %12631 = vmatpush3.bf16.msra.mxu0 %v12628_v46 }
 0x4ce   :  { %10811 = vmatmul.mubr.msk.f32.vlgmr.msra.gmra.mrb[34].mxu1 %vm2637_vm8, %v15676_v50  ;;  %v12676_v50 = vpack.c.bf16 %v8563_v53, %v8562_v32 }
 0x4cf   :  { %10813 = vmatprep.mubr.msk.f32.mxu1 %vm2637_vm8, %v15693_v41  ;;  %12667 = vmatpush3.bf16.msra.mxu1 %v12664_v42  ;;  %v8564_v41 = vld [vmem:[%s18311_s30 + $0xc0] sm:$0xff] }
 0x4d0   :  { %12669 = vmatprep.subr.bf16.mxu1 %v12668_v16  ;;  %v2121_v42 = vld [vmem:[%s18244_s6 + $0x20] sm:$0xff] }
 0x4d2   :  { %10814 = vmatmul.mubr.msk.f32.gmra.mrb[36].mxu1 %vm2637_vm8, %v15689_v14  ;;  %v12680_v14 = vpack.c.bf16 %v8565_v8, %v8564_v41  ;;  %v2125_v41 = vld [vmem:[%s18244_s6 + $0x40] sm:$0xff] }
 0x4d3   :  { %10816 = vmatprep.mubr.msk.f32.mxu1 %vm2637_vm8, %v15705_v43  ;;  %12671 = vmatpush3.bf16.msra.mxu1 %v12668_v16  ;;  %v8566_v43 = vld [vmem:[%s18311_s30 + $0xd0] sm:$0xff] }
 0x4d4   :  { %12673 = vmatprep.subr.bf16.mxu1 %v12672_v5 }
 0x4d6   :  { %10817 = vmatmul.mubr.msk.f32.gmra.mrb[38].mxu1 %vm2637_vm8, %v15701_v48  ;;  %v12684_v48 = vpack.c.bf16 %v8567_v39, %v8566_v43 }
 0x4d7   :  { %10819 = vmatprep.mubr.msk.f32.mxu1 %vm2637_vm8, %v15715_v9  ;;  %12675 = vmatpush3.bf16.msra.mxu1 %v12672_v5  ;;  %v8568_v9 = vld [vmem:[%s18311_s30 + $0xe0] sm:$0xff] }
 0x4d8   :  { %12677 = vmatprep.subr.bf16.mxu1 %v12676_v50 }
 0x4da   :  { %10820 = vmatmul.mubr.msk.f32.gmra.mrb[40].mxu1 %vm2637_vm8, %v15711_v33  ;;  %v12688_v33 = vpack.c.bf16 %v8569_v45, %v8568_v9  ;;  %v2126_v45 = vld [vmem:[%s18244_s6 + $0x48] sm:$0xff] }
 0x4db   :  { %10822 = vmatprep.mubr.msk.f32.mxu1 %vm2637_vm8, %v15727_v10  ;;  %12679 = vmatpush3.bf16.msra.mxu1 %v12676_v50  ;;  %v8570_v10 = vld [vmem:[%s18311_s30 + $0xf0] sm:$0xff]  ;;  %v2124_v50 = vld [vmem:[%s18244_s6 + $0x38] sm:$0xff] }
 0x4dc   :  { %12681 = vmatprep.subr.bf16.mxu1 %v12680_v14 }
 0x4de   :  { %10823 = vmatmul.mubr.msk.f32.gmra.mrb[42].mxu1 %vm2637_vm8, %v15723_v23  ;;  %v12692_v23 = vpack.c.bf16 %v8571_v60, %v8570_v10 }
 0x4df   :  { %10825 = vmatprep.mubr.msk.f32.mxu1 %vm2637_vm8, %v15735_v3  ;;  %12683 = vmatpush3.bf16.msra.mxu1 %v12680_v14  ;;  %v2118_v3 = vld [vmem:[%s18244_s6 + $0x8] sm:$0xff] }
 0x4e0   :  { %12685 = vmatprep.subr.bf16.mxu1 %v12684_v48 }
 0x4e2   :  { %10826 = vmatmul.mubr.msk.f32.gmra.mrb[44].mxu1 %vm2637_vm8, %v15731_v62 }
 0x4e3   :  { %10828 = vmatprep.mubr.msk.f32.mxu1 %vm2637_vm8, %v15747_v58  ;;  %12687 = vmatpush3.bf16.msra.mxu1 %v12684_v48 }
 0x4e4   :  { %12689 = vmatprep.subr.bf16.mxu1 %v12688_v33 }
 0x4e6   :  { %10829 = vmatmul.mubr.msk.f32.gmra.mrb[46].mxu1 %vm2637_vm8, %v15743_v49 }
 0x4e7   :  { %10831 = vmatprep.mubr.msk.f32.mxu1 %vm2637_vm8, %v15755_v6  ;;  %12691 = vmatpush3.bf16.msra.mxu1 %v12688_v33  ;;  %v2127_v33 = vld [vmem:[%s18244_s6 + $0x50] sm:$0xff] }
 0x4e8   :  { %12693 = vmatprep.subr.bf16.mxu1 %v12692_v23 }
 0x4ea   :  { %10832 = vmatmul.mubr.msk.f32.gmra.mrb[48].mxu1 %vm2637_vm8, %v15751_v19  ;;  %v2117_v19 = vld [vmem:[%s18244_s6] sm:$0xff] }
 0x4eb   :  { %12695 = vmatpush3.bf16.msra.mxu1 %v12692_v23  ;;  %10978 = vmatprep.mubr.f32.mxu1 %v15483_v55 }
 0x4ee   :  { %10979 = vmatmul.mubr.f32.vlgmr.msra.gmra.mrb[50].mxu1 %v15502_v4 }
 0x4ef   :  { %10981 = vmatprep.mubr.f32.mxu1 %v15504_v54 }
 0x4f2   :  { %10982 = vmatmul.mubr.f32.gmra.mrb[52].mxu1 %v15523_v25 }
 0x4f3   :  { %10984 = vmatprep.mubr.f32.mxu1 %v15526_v37 }
 0x4f6   :  { %10985 = vmatmul.mubr.f32.gmra.mrb[54].mxu1 %v15545_v29 }
 0x4f7   :  { %10987 = vmatprep.mubr.f32.mxu1 %v15548_v24 }
 0x4fa   :  { %10988 = vmatmul.mubr.f32.gmra.mrb[56].mxu1 %v15567_v59 }
 0x4fb   :  { %10990 = vmatprep.mubr.f32.mxu1 %v15570_v30 }
 0x4fe   :  { %10991 = vmatmul.mubr.f32.gmra.mrb[58].mxu1 %v15589_v61 }
 0x4ff   :  { %10993 = vmatprep.mubr.f32.mxu1 %v15592_v13 }
 0x502   :  { %10994 = vmatmul.mubr.f32.gmra.mrb[60].mxu1 %v15611_v15 }
 0x503   :  { %10996 = vmatprep.mubr.f32.mxu1 %v15614_v17 }
 0x506   :  { %10997 = vmatmul.mubr.f32.gmra.mrb[62].mxu1 %v15633_v18 }
 0x507   :  { %10999 = vmatprep.mubr.f32.mxu1 %v15636_v11 }
 0x50a   :  { %11000 = vmatmul.mubr.f32.gmra.mrb[64].mxu1 %v15645_v20 }
 0x5a1   :  { %v10812_v62 = vpop.f32.mrb[34].mxu1 }
 0x5a2   :  { %v2880_v49 = vmul.f32 0.17677669, %v10812_v62  ;;  %v2800_v58 = vpop.f32.mrb[35].mxu1 }
 0x5a3   :  { %v2879_v6 = vmul.f32 0.17677669, %v2800_v58  ;;  %v2128_v58 = vld [vmem:[%s18244_s6 + $0x58] sm:$0xff] }
 0x5a4   :  { %v15883_v7 = vadd.f32 %v2880_v49, %v2118_v3 }
 0x5a5   :  { %v10815_v0 = vpop.f32.mrb[36].mxu1  ;;  %v15885_v31 = vadd.f32 %v2879_v6, %v2117_v19  ;;  %v2129_v19 = vld [vmem:[%s18244_s6 + $0x60] sm:$0xff] }
 0x5a6   :  { %2913 = vmax.xlane.f32.xlu1 %v15883_v7  ;;  %v2810_v26 = vpop.f32.mrb[37].mxu1  ;;  %v2882_v56 = vmul.f32 0.17677669, %v10815_v0 }
 0x5a7   :  { %v2881_v27 = vmul.f32 0.17677669, %v2810_v26  ;;  %2911 = vmax.xlane.f32.xlu0 %v15885_v31 }
 0x5a8   :  { %v15901_v52 = vadd.f32 %v2882_v56, %v2120_v38 }
 0x5a9   :  { %v10818_v44 = vpop.f32.mrb[38].mxu1  ;;  %v15892_v28 = vadd.f32 %v2881_v27, %v2119_v2 }
 0x5aa   :  { %v2820_v35 = vpop.f32.mrb[39].mxu1  ;;  %v2884_v40 = vmul.f32 0.17677669, %v10818_v44  ;;  %v2130_v44 = vld [vmem:[%s18244_s6 + $0x68] sm:$0xff] }
 0x5ab   :  { %v2883_v22 = vmul.f32 0.17677669, %v2820_v35  ;;  %2915 = vmax.xlane.f32.xlu0 %v15892_v28  ;;  %v2131_v35 = vld [vmem:[%s18244_s6 + $0x70] sm:$0xff] }
 0x5ac   :  { %v15913_v5 = vadd.f32 %v2884_v40, %v2122_v51 }
 0x5ad   :  { %v10821_v12 = vpop.f32.mrb[40].mxu1  ;;  %v15903_v34 = vadd.f32 %v2883_v22, %v2121_v42  ;;  %v8573_v42 = vld [vmem:[%s18319_s11 + $0x1] ss:$0 sm:$0xff] }
 0x5ae   :  { %v2830_v46 = vpop.f32.mrb[41].mxu1  ;;  %v2886_v36 = vmul.f32 0.17677669, %v10821_v12 }
 0x5af   :  { %v2885_v16 = vmul.f32 0.17677669, %v2830_v46  ;;  %2917 = vmax.xlane.f32.xlu0 %v15901_v52  ;;  %2919 = vmax.xlane.f32.xlu1 %v15903_v34 }
 0x5b0   :  { %v15925_v39 = vadd.f32 %v2886_v36, %v2124_v50 }
 0x5b1   :  { %v10824_v63 = vpop.f32.mrb[42].mxu1  ;;  %v15915_v32 = vadd.f32 %v2885_v16, %v2123_v57  ;;  %v2132_v16 = vld [vmem:[%s18244_s6 + $0x78] sm:$0xff] }
 0x5b2   :  { %v2840_v53 = vpop.f32.mrb[43].mxu1  ;;  %v2888_v14 = vmul.f32 0.17677669, %v10824_v63 }
 0x5b3   :  { %v2887_v8 = vmul.f32 0.17677669, %v2840_v53  ;;  %2921 = vmax.xlane.f32.xlu0 %v15913_v5  ;;  %2923 = vmax.xlane.f32.xlu1 %v15915_v32 }
 0x5b4   :  { %v15937_v62 = vadd.f32 %v2888_v14, %v2126_v45 }
 0x5b5   :  { %v10827_v43 = vpop.f32.mrb[44].mxu1  ;;  %v15927_v48 = vadd.f32 %v2887_v8, %v2125_v41 }
 0x5b6   :  { %v2850_v9 = vpop.f32.mrb[45].mxu1  ;;  %v2890_v60 = vmul.f32 0.17677669, %v10827_v43 }
 0x5b7   :  { %v2889_v10 = vmul.f32 0.17677669, %v2850_v9  ;;  %2925 = vmax.xlane.f32.xlu0 %v15925_v39  ;;  %2927 = vmax.xlane.f32.xlu1 %v15927_v48 }
 0x5b8   :  { %v15949_v2 = vadd.f32 %v2890_v60, %v2128_v58 }
 0x5b9   :  { %v10830_v23 = vpop.f32.mrb[46].mxu1  ;;  %v15939_v3 = vadd.f32 %v2889_v10, %v2127_v33 }
 0x5ba   :  { %v2860_v49 = vpop.f32.mrb[47].mxu1  ;;  %v2892_v0 = vmul.f32 0.17677669, %v10830_v23 }
 0x5bb   :  { %v2891_v6 = vmul.f32 0.17677669, %v2860_v49  ;;  %2929 = vmax.xlane.f32.xlu0 %v15937_v62  ;;  %2931 = vmax.xlane.f32.xlu1 %v15939_v3 }
 0x5bc   :  { %v15964_v12 = vadd.f32 %v2892_v0, %v2130_v44 }
 0x5bd   :  { %v10833_v26 = vpop.f32.mrb[48].mxu1  ;;  %v15951_v27 = vadd.f32 %v2891_v6, %v2129_v19 }
 0x5be   :  { %v2870_v56 = vpop.f32.mrb[49].mxu1  ;;  %v2894_v22 = vmul.f32 0.17677669, %v10833_v26 }
 0x5bf   :  { %v2893_v38 = vmul.f32 0.17677669, %v2870_v56  ;;  %2933 = vmax.xlane.f32.xlu0 %v15949_v2  ;;  %2935 = vmax.xlane.f32.xlu1 %v15951_v27 }
 0x5c0   :  { %v15973_v50 = vadd.f32 %v2894_v22, %v2132_v16 }
 0x5c1   :  { %v10980_v40 = vpop.f32.mrb[50].mxu1  ;;  %v15966_v46 = vadd.f32 %v2893_v38, %v2131_v35 }
 0x5c2   :  { %v3471_v51 = vadd.f32 %v10980_v40, %v8573_v42  ;;  %v3465_v57 = vpop.f32.mrb[51].mxu1 }
 0x5c3   :  { %v3466_v36 = vadd.f32 %v8573_v42, %v3465_v57  ;;  %2937 = vmax.xlane.f32.xlu0 %v15964_v12  ;;  %2939 = vmax.xlane.f32.xlu1 %v15966_v46 }
 0x5c5   :  { %v12728_v63 = vpack.c.bf16 %v3471_v51, %v3466_v36  ;;  %v10983_v53 = vpop.f32.mrb[52].mxu1 }
 0x5c6   :  { %v3481_v41 = vadd.f32 %v10983_v53, %v8573_v42  ;;  %v3475_v8 = vpop.f32.mrb[53].mxu1 }
 0x5c7   :  { %v3476_v14 = vadd.f32 %v8573_v42, %v3475_v8  ;;  %2941 = vmax.xlane.f32.xlu0 %v15973_v50  ;;  %12730 = vmatprep.subr.msk.bf16.mxu1 %vm15683_vm9, %v12728_v63 }
 0x5c8   :  { %12733 = vmatpush3.bf16.xpose.msk.msra.mxu1 %vm15683_vm9, %v12728_v63 }
 0x5c9   :  { %v12734_v43 = vpack.c.bf16 %v3481_v41, %v3476_v14  ;;  %v10986_v9 = vpop.f32.mrb[54].mxu1 }
 0x5ca   :  { %v3491_v45 = vadd.f32 %v10986_v9, %v8573_v42  ;;  %v3485_v33 = vpop.f32.mrb[55].mxu1 }
 0x5cb   :  { %v3486_v10 = vadd.f32 %v8573_v42, %v3485_v33  ;;  %12736 = vmatprep.subr.msk.bf16.mxu1 %vm15683_vm9, %v12734_v43 }
 0x5cd   :  { %v12740_v60 = vpack.c.bf16 %v3491_v45, %v3486_v10  ;;  %v10989_v23 = vpop.f32.mrb[56].mxu1 }
 0x5ce   :  { %v3501_v49 = vadd.f32 %v10989_v23, %v8573_v42  ;;  %v3495_v58 = vpop.f32.mrb[57].mxu1 }
 0x5cf   :  { %v3496_v19 = vadd.f32 %v8573_v42, %v3495_v58 }
 0x5d0   :  { %12739 = vmatpush3.bf16.xpose.msk.msra.mxu1 %vm15683_vm9, %v12734_v43 }
 0x5d1   :  { %v12746_v6 = vpack.c.bf16 %v3501_v49, %v3496_v19  ;;  %v10992_v0 = vpop.f32.mrb[58].mxu1  ;;  %12742 = vmatprep.subr.msk.bf16.mxu1 %vm15683_vm9, %v12740_v60 }
 0x5d2   :  { %v3511_v26 = vadd.f32 %v10992_v0, %v8573_v42  ;;  %v3505_v56 = vpop.f32.mrb[59].mxu1 }
 0x5d3   :  { %v3506_v44 = vadd.f32 %v8573_v42, %v3505_v56 }
 0x5d5   :  { %v12752_v35 = vpack.c.bf16 %v3511_v26, %v3506_v44  ;;  %v10995_v38 = vpop.f32.mrb[60].mxu1 }
 0x5d6   :  { %v3521_v22 = vadd.f32 %v10995_v38, %v8573_v42  ;;  %v3515_v40 = vpop.f32.mrb[61].mxu1 }
 0x5d7   :  { %v3516_v51 = vadd.f32 %v8573_v42, %v3515_v40 }
 0x5d8   :  { %12745 = vmatpush3.bf16.xpose.msk.msra.mxu1 %vm15683_vm9, %v12740_v60 }
 0x5d9   :  { %v12758_v57 = vpack.c.bf16 %v3521_v22, %v3516_v51  ;;  %v10998_v16 = vpop.f32.mrb[62].mxu1  ;;  %12748 = vmatprep.subr.msk.bf16.mxu1 %vm15683_vm9, %v12746_v6 }
 0x5da   :  { %v3531_v36 = vadd.f32 %v10998_v16, %v8573_v42  ;;  %v3525_v63 = vpop.f32.mrb[63].mxu1 }
 0x5db   :  { %v3526_v53 = vadd.f32 %v8573_v42, %v3525_v63 }
 0x5dd   :  { %v12764_v41 = vpack.c.bf16 %v3531_v36, %v3526_v53  ;;  %v11001_v8 = vpop.f32.mrb[64].mxu1 }
 0x5de   :  { %v3541_v14 = vadd.f32 %v11001_v8, %v8573_v42  ;;  %v3535_v43 = vpop.f32.mrb[65].mxu1 }
 0x5df   :  { %v3536_v9 = vadd.f32 %v8573_v42, %v3535_v43 }
 0x5e0   :  { %12751 = vmatpush3.bf16.xpose.msk.msra.mxu1 %vm15683_vm9, %v12746_v6 }
 0x5e1   :  { %v12770_v45 = vpack.c.bf16 %v3541_v14, %v3536_v9  ;;  %12754 = vmatprep.subr.msk.bf16.mxu1 %vm15683_vm9, %v12752_v35 }
 0x5e8   :  { %12757 = vmatpush3.bf16.xpose.msk.msra.mxu1 %vm15683_vm9, %v12752_v35 }
 0x5e9   :  { %12760 = vmatprep.subr.msk.bf16.mxu1 %vm15683_vm9, %v12758_v57 }
 0x5f0   :  { %12763 = vmatpush3.bf16.xpose.msk.msra.mxu1 %vm15683_vm9, %v12758_v57 }
 0x5f1   :  { %12766 = vmatprep.subr.msk.bf16.mxu1 %vm15683_vm9, %v12764_v41 }
 0x5f8   :  { %12769 = vmatpush3.bf16.xpose.msk.msra.mxu1 %vm15683_vm9, %v12764_v41 }
 0x5f9   :  { %12772 = vmatprep.subr.msk.bf16.mxu1 %vm15683_vm9, %v12770_v45 }
 0x600   :  { %12775 = vmatpush3.bf16.xpose.msk.msra.mxu1 %vm15683_vm9, %v12770_v45 }
 0x633   :  { %v2914_v42 = vpop.xlane.xlu1 %2913 }
 0x634   :  { %v2944_v33 = vsub.f32 %v15883_v7, %v2914_v42  ;;  %v2912_v10 = vpop.xlane.xlu0 %2911 }
 0x635   :  { %v2943_v60 = vsub.f32 %v15885_v31, %v2912_v10 }
 0x636   :  { %v2961_v23 = vmul.f32 1.442695, %v2944_v33 }
 0x637   :  { %v2959_v49 = vmul.f32 1.442695, %v2943_v60 }
 0x638   :  { %13359 = vpow2.f32 %v2961_v23  ;;  %v2916_v58 = vpop.xlane.xlu0 %2915 }
 0x639   :  { %13361 = vpow2.f32 %v2959_v49  ;;  %v2945_v19 = vsub.f32 %v15892_v28, %v2916_v58 }
 0x63b   :  { %v2963_v6 = vmul.f32 1.442695, %v2945_v19 }
 0x63c   :  { %v2918_v0 = vpop.xlane.xlu0 %2917  ;;  %v2920_v26 = vpop.xlane.xlu1 %2919 }
 0x63d   :  { %13363 = vpow2.f32 %v2963_v6  ;;  %v2946_v56 = vsub.f32 %v15901_v52, %v2918_v0  ;;  %v2947_v44 = vsub.f32 %v15903_v34, %v2920_v26 }
 0x63f   :  { %v2965_v35 = vmul.f32 1.442695, %v2946_v56  ;;  %v2967_v7 = vmul.f32 1.442695, %v2947_v44 }
 0x640   :  { %v2922_v38 = vpop.xlane.xlu0 %2921  ;;  %v2924_v22 = vpop.xlane.xlu1 %2923 }
 0x641   :  { %13365 = vpow2.f32 %v2965_v35  ;;  %v2948_v31 = vsub.f32 %v15913_v5, %v2922_v38  ;;  %v2949_v40 = vsub.f32 %v15915_v32, %v2924_v22 }
 0x642   :  { %v16015_v51 = vpop.eup %13359  ;;  %13367 = vpow2.f32 %v2967_v7 }
 0x643   :  { %v16017_v28 = vpop.eup %13361  ;;  %v2969_v57 = vmul.f32 1.442695, %v2948_v31  ;;  %v2971_v16 = vmul.f32 1.442695, %v2949_v40  ;;  %2993 = vadd.xlane.f32.xlu0 %v16015_v51 }
 0x644   :  { %v2926_v52 = vpop.xlane.xlu0 %2925  ;;  %v2928_v34 = vpop.xlane.xlu1 %2927  ;;  %2991 = vadd.xlane.f32.xlu1 %v16017_v28 }
 0x645   :  { %13369 = vpow2.f32 %v2969_v57  ;;  %v2950_v36 = vsub.f32 %v15925_v39, %v2926_v52  ;;  %v2951_v5 = vsub.f32 %v15927_v48, %v2928_v34  ;;  %v8538_v57 = vld [vmem:[%s18310_s5 + $0x80] sm:$0xff] }
 0x646   :  { %13371 = vpow2.f32 %v2971_v16  ;;  %v8539_v16 = vld [vmem:[%s18310_s5 + $0x88] sm:$0xff] }
 0x647   :  { %v16023_v32 = vpop.eup %13363  ;;  %v2973_v63 = vmul.f32 1.442695, %v2950_v36  ;;  %v2975_v53 = vmul.f32 1.442695, %v2951_v5  ;;  %v12632_v52 = vpack.c.bf16 %v8539_v16, %v8538_v57  ;;  %v8546_v16 = vld [vmem:[%s18310_s5 + $0xc0] sm:$0xff] }
 0x648   :  { %v2930_v41 = vpop.xlane.xlu0 %2929  ;;  %v2932_v8 = vpop.xlane.xlu1 %2931  ;;  %2995 = vadd.xlane.f32.xlu1 %v16023_v32 }
 0x649   :  { %13373 = vpow2.f32 %v2973_v63  ;;  %v2952_v14 = vsub.f32 %v15937_v62, %v2930_v41  ;;  %v2953_v43 = vsub.f32 %v15939_v3, %v2932_v8  ;;  %12633 = vmatprep.subr.bf16.mxu0 %v12632_v52  ;;  %v8540_v8 = vld [vmem:[%s18310_s5 + $0x90] sm:$0xff] }
 0x64a   :  { %13375 = vpow2.f32 %v2975_v53 }
 0x64b   :  { %v16028_v9 = vpop.eup %13365  ;;  %v2977_v39 = vmul.f32 1.442695, %v2952_v14  ;;  %v2979_v45 = vmul.f32 1.442695, %v2953_v43  ;;  %v8541_v14 = vld [vmem:[%s18310_s5 + $0x98] sm:$0xff] }
 0x64c   :  { %v16030_v48 = vpop.eup %13367  ;;  %v2934_v42 = vpop.xlane.xlu0 %2933  ;;  %2997 = vadd.xlane.f32.xlu0 %v16028_v9 }
 0x64d   :  { %v2936_v33 = vpop.xlane.xlu1 %2935  ;;  %13377 = vpow2.f32 %v2977_v39  ;;  %v2954_v10 = vsub.f32 %v15949_v2, %v2934_v42  ;;  %2999 = vadd.xlane.f32.xlu1 %v16030_v48 }
 0x64e   :  { %v2955_v60 = vsub.f32 %v15951_v27, %v2936_v33  ;;  %13379 = vpow2.f32 %v2979_v45 }
 0x64f   :  { %v16036_v62 = vpop.eup %13369  ;;  %v2981_v3 = vmul.f32 1.442695, %v2954_v10  ;;  %v12636_v10 = vpack.c.bf16 %v8541_v14, %v8540_v8  ;;  %v8549_v8 = vld [vmem:[%s18310_s5 + $0xd8] sm:$0xff] }
 0x650   :  { %v2983_v23 = vmul.f32 1.442695, %v2955_v60  ;;  %v16038_v49 = vpop.eup %13371  ;;  %v2938_v58 = vpop.xlane.xlu0 %2937  ;;  %3001 = vadd.xlane.f32.xlu0 %v16036_v62  ;;  %v8542_v60 = vld [vmem:[%s18310_s5 + $0xa0] sm:$0xff] }
 0x651   :  { %v2940_v19 = vpop.xlane.xlu1 %2939  ;;  %13381 = vpow2.f32 %v2981_v3  ;;  %v2956_v6 = vsub.f32 %v15964_v12, %v2938_v58  ;;  %3003 = vadd.xlane.f32.xlu1 %v16038_v49  ;;  %v8543_v3 = vld [vmem:[%s18310_s5 + $0xa8] sm:$0xff] }
 0x652   :  { %v2957_v2 = vsub.f32 %v15966_v46, %v2940_v19  ;;  %13383 = vpow2.f32 %v2983_v23 }
 0x653   :  { %v16044_v27 = vpop.eup %13373  ;;  %v2985_v0 = vmul.f32 1.442695, %v2956_v6  ;;  %v8544_v6 = vld [vmem:[%s18310_s5 + $0xb0] sm:$0xff] }
 0x654   :  { %v2987_v26 = vmul.f32 1.442695, %v2957_v2  ;;  %v16046_v56 = vpop.eup %13375  ;;  %3005 = vadd.xlane.f32.xlu0 %v16044_v27  ;;  %v2942_v44 = vpop.xlane.xlu0 %2941  ;;  %v8545_v2 = vld [vmem:[%s18310_s5 + $0xb8] sm:$0xff] }
 0x655   :  { %13385 = vpow2.f32 %v2985_v0  ;;  %v2958_v35 = vsub.f32 %v15973_v50, %v2942_v44  ;;  %3007 = vadd.xlane.f32.xlu1 %v16046_v56  ;;  %v12644_v57 = vpack.c.bf16 %v8545_v2, %v8544_v6 }
 0x656   :  { %13387 = vpow2.f32 %v2987_v26 }
 0x657   :  { %v16051_v12 = vpop.eup %13377  ;;  %v2989_v7 = vmul.f32 1.442695, %v2958_v35 }
 0x658   :  { %v16053_v46 = vpop.eup %13379  ;;  %3009 = vadd.xlane.f32.xlu0 %v16051_v12 }
 0x659   :  { %13389 = vpow2.f32 %v2989_v7  ;;  %3011 = vadd.xlane.f32.xlu1 %v16053_v46 }
 0x65b   :  { %v16057_v38 = vpop.eup %13381 }
 0x65c   :  { %v16059_v22 = vpop.eup %13383  ;;  %3013 = vadd.xlane.f32.xlu0 %v16057_v38 }
 0x65d   :  { %3015 = vadd.xlane.f32.xlu1 %v16059_v22 }
 0x65f   :  { %v16063_v50 = vpop.eup %13385 }
 0x660   :  { %v16065_v31 = vpop.eup %13387  ;;  %3017 = vadd.xlane.f32.xlu0 %v16063_v50 }
 0x661   :  { %3019 = vadd.xlane.f32.xlu1 %v16065_v31 }
 0x663   :  { %v16069_v40 = vpop.eup %13389 }
 0x664   :  { %3021 = vadd.xlane.f32.xlu0 %v16069_v40 }
 0x6d0   :  { %v2994_v34 = vpop.xlane.xlu0 %2993 }
 0x6d1   :  { %13391 = vrcp.f32 %v2994_v34  ;;  %v2992_v36 = vpop.xlane.xlu1 %2991 }
 0x6d2   :  { %13393 = vrcp.f32 %v2992_v36 }
 0x6d5   :  { %v2996_v5 = vpop.xlane.xlu1 %2995 }
 0x6d6   :  { %13395 = vrcp.f32 %v2996_v5 }
 0x6d9   :  { %v2998_v63 = vpop.xlane.xlu0 %2997 }
 0x6da   :  { %13397 = vrcp.f32 %v2998_v63  ;;  %v3000_v53 = vpop.xlane.xlu1 %2999 }
 0x6db   :  { %v13392_v41 = vpop.eup %13391  ;;  %13399 = vrcp.f32 %v3000_v53 }
 0x6dc   :  { %v13394_v43 = vpop.eup %13393  ;;  %v3040_v33 = vmul.f32 %v13392_v41, %v16015_v51  ;;  %v12640_v51 = vpack.c.bf16 %v8543_v3, %v8542_v60  ;;  %v8548_v41 = vld [vmem:[%s18310_s5 + $0xd0] sm:$0xff] }
 0x6dd   :  { %v3002_v39 = vpop.xlane.xlu0 %3001  ;;  %v3039_v45 = vmul.f32 %v13394_v43, %v16017_v28 }
 0x6de   :  { %13401 = vrcp.f32 %v3002_v39  ;;  %v3004_v42 = vpop.xlane.xlu1 %3003 }
 0x6df   :  { %13403 = vrcp.f32 %v3004_v42  ;;  %10866 = vmatprep.mubr.f32.mxu0 %v3039_v45  ;;  %v12652_v42 = vpack.c.bf16 %v8549_v8, %v8548_v41  ;;  %v8584_v41 = vld [vmem:[%s18313_s10 + $0xd0] sm:$0xff]  ;;  %v8585_v8 = vld [vmem:[%s18313_s10 + $0xd8] sm:$0xff] }
 0x6e0   :  { %v13396_v23 = vpop.eup %13395  ;;  %10867 = vmatmul.mubr.f32.vlgmr.msra.gmra.mrb[78].mxu0 %v3040_v33  ;;  %v8550_v33 = vld [vmem:[%s18310_s5 + $0xe0] sm:$0xff] }
 0x6e1   :  { %v3006_v58 = vpop.xlane.xlu0 %3005  ;;  %v3041_v28 = vmul.f32 %v13396_v23, %v16023_v32  ;;  %12635 = vmatpush3.bf16.msra.mxu0 %v12632_v52  ;;  %v8547_v52 = vld [vmem:[%s18310_s5 + $0xc8] sm:$0xff] }
 0x6e2   :  { %13405 = vrcp.f32 %v3006_v58  ;;  %v3008_v19 = vpop.xlane.xlu1 %3007  ;;  %12637 = vmatprep.subr.bf16.mxu0 %v12636_v10  ;;  %v12648_v53 = vpack.c.bf16 %v8547_v52, %v8546_v16  ;;  %v8576_v16 = vld [vmem:[%s18313_s10 + $0x90] sm:$0xff]  ;;  %v8578_v52 = vld [vmem:[%s18313_s10 + $0xa0] sm:$0xff] }
 0x6e3   :  { %13407 = vrcp.f32 %v3008_v19  ;;  %10869 = vmatprep.mubr.f32.mxu0 %v3041_v28  ;;  %v8552_v28 = vld [vmem:[%s18310_s5 + $0xf0] sm:$0xff]  ;;  %v8553_v19 = vld [vmem:[%s18310_s5 + $0xf8] sm:$0xff] }
 0x6e4   :  { %v13398_v0 = vpop.eup %13397 }
 0x6e5   :  { %v13400_v26 = vpop.eup %13399  ;;  %v3010_v44 = vpop.xlane.xlu0 %3009  ;;  %v3042_v32 = vmul.f32 %v13398_v0, %v16028_v9  ;;  %12639 = vmatpush3.bf16.msra.mxu0 %v12636_v10  ;;  %v8551_v10 = vld [vmem:[%s18310_s5 + $0xe8] sm:$0xff]  ;;  %v8574_v0 = vld [vmem:[%s18313_s10 + $0x80] sm:$0xff] }
 0x6e6   :  { %13409 = vrcp.f32 %v3010_v44  ;;  %v3012_v35 = vpop.xlane.xlu1 %3011  ;;  %v3043_v7 = vmul.f32 %v13400_v26, %v16030_v48  ;;  %12641 = vmatprep.subr.bf16.mxu0 %v12640_v51  ;;  %v12656_v58 = vpack.c.bf16 %v8551_v10, %v8550_v33  ;;  %v8575_v26 = vld [vmem:[%s18313_s10 + $0x88] sm:$0xff]  ;;  %v8660_v33 = vld [vmem:[%s18310_s5 + $0x100] sm:$0xff] }
 0x6e7   :  { %13411 = vrcp.f32 %v3012_v35  ;;  %10870 = vmatmul.mubr.f32.gmra.mrb[80].mxu0 %v3042_v32  ;;  %v8661_v10 = vld [vmem:[%s18310_s5 + $0x108] sm:$0xff] }
 0x6e8   :  { %v13402_v34 = vpop.eup %13401  ;;  %10872 = vmatprep.mubr.f32.mxu0 %v3043_v7 }
 0x6e9   :  { %v13404_v9 = vpop.eup %13403  ;;  %v3014_v36 = vpop.xlane.xlu0 %3013  ;;  %v3044_v5 = vmul.f32 %v13402_v34, %v16036_v62  ;;  %12643 = vmatpush3.bf16.msra.mxu0 %v12640_v51 }
 0x6ea   :  { %13413 = vrcp.f32 %v3014_v36  ;;  %v3016_v48 = vpop.xlane.xlu1 %3015  ;;  %v3045_v63 = vmul.f32 %v13404_v9, %v16038_v49  ;;  %12645 = vmatprep.subr.bf16.mxu0 %v12644_v57  ;;  %v8580_v9 = vld [vmem:[%s18313_s10 + $0xb0] sm:$0xff]  ;;  %v8581_v36 = vld [vmem:[%s18313_s10 + $0xb8] sm:$0xff] }
 0x6eb   :  { %13415 = vrcp.f32 %v3016_v48  ;;  %10873 = vmatmul.mubr.f32.gmra.mrb[82].mxu0 %v3044_v5  ;;  %v12708_v5 = vpack.c.bf16 %v8581_v36, %v8580_v9  ;;  %v8582_v48 = vld [vmem:[%s18313_s10 + $0xc0] sm:$0xff] }
 0x6ec   :  { %v13406_v14 = vpop.eup %13405  ;;  %10875 = vmatprep.mubr.f32.mxu0 %v3045_v63  ;;  %v8583_v63 = vld [vmem:[%s18313_s10 + $0xc8] sm:$0xff] }
 0x6ed   :  { %v13408_v62 = vpop.eup %13407  ;;  %v3018_v43 = vpop.xlane.xlu0 %3017  ;;  %v3046_v39 = vmul.f32 %v13406_v14, %v16044_v27  ;;  %12647 = vmatpush3.bf16.msra.mxu0 %v12644_v57  ;;  %v12716_v14 = vpack.c.bf16 %v8585_v8, %v8584_v41  ;;  %v8667_v41 = vld [vmem:[%s18310_s5 + $0x138] sm:$0xff] }
 0x6ee   :  { %13417 = vrcp.f32 %v3018_v43  ;;  %v3020_v49 = vpop.xlane.xlu1 %3019  ;;  %v3047_v45 = vmul.f32 %v13408_v62, %v16046_v56  ;;  %12649 = vmatprep.subr.bf16.mxu0 %v12648_v53  ;;  %v8586_v62 = vld [vmem:[%s18313_s10 + $0xe0] sm:$0xff]  ;;  %v8587_v43 = vld [vmem:[%s18313_s10 + $0xe8] sm:$0xff] }
 0x6ef   :  { %13419 = vrcp.f32 %v3020_v49  ;;  %10876 = vmatmul.mubr.f32.gmra.mrb[84].mxu0 %v3046_v39  ;;  %v12720_v39 = vpack.c.bf16 %v8587_v43, %v8586_v62  ;;  %v8588_v49 = vld [vmem:[%s18313_s10 + $0xf0] sm:$0xff] }
 0x6f0   :  { %v13410_v60 = vpop.eup %13409  ;;  %10878 = vmatprep.mubr.f32.mxu0 %v3047_v45  ;;  %v8589_v45 = vld [vmem:[%s18313_s10 + $0xf8] sm:$0xff] }
 0x6f1   :  { %v13412_v27 = vpop.eup %13411  ;;  %v3022_v3 = vpop.xlane.xlu0 %3021  ;;  %v3048_v23 = vmul.f32 %v13410_v60, %v16051_v12  ;;  %12651 = vmatpush3.bf16.msra.mxu0 %v12648_v53  ;;  %v12712_v53 = vpack.c.bf16 %v8583_v63, %v8582_v48  ;;  %v12824_v60 = vpack.c.bf16 %v8661_v10, %v8660_v33 }
 0x6f2   :  { %13421 = vrcp.f32 %v3022_v3  ;;  %v3049_v56 = vmul.f32 %v13412_v27, %v16053_v46  ;;  %12653 = vmatprep.subr.bf16.mxu0 %v12652_v42  ;;  %v12660_v46 = vpack.c.bf16 %v8553_v19, %v8552_v28 }
 0x6f3   :  { %10879 = vmatmul.mubr.f32.gmra.mrb[86].mxu0 %v3048_v23  ;;  %12825 = vmatprep.subr.bf16.mxu1 %v12824_v60 }
 0x6f4   :  { %v13414_v51 = vpop.eup %13413  ;;  %10881 = vmatprep.mubr.f32.mxu0 %v3049_v56 }
 0x6f5   :  { %v13416_v6 = vpop.eup %13415  ;;  %v3050_v12 = vmul.f32 %v13414_v51, %v16057_v38  ;;  %12655 = vmatpush3.bf16.msra.mxu0 %v12652_v42  ;;  %v12724_v42 = vpack.c.bf16 %v8589_v45, %v8588_v49  ;;  %v8668_v49 = vld [vmem:[%s18310_s5 + $0x140] sm:$0xff]  ;;  %v8669_v45 = vld [vmem:[%s18310_s5 + $0x148] sm:$0xff] }
 0x6f6   :  { %v3051_v2 = vmul.f32 %v13416_v6, %v16059_v22  ;;  %12657 = vmatprep.subr.bf16.mxu0 %v12656_v58  ;;  %v12696_v22 = vpack.c.bf16 %v8575_v26, %v8574_v0 }
 0x6f7   :  { %10882 = vmatmul.mubr.f32.gmra.mrb[88].mxu0 %v3050_v12 }
 0x6f8   :  { %v13418_v44 = vpop.eup %13417  ;;  %10884 = vmatprep.mubr.f32.mxu0 %v3051_v2 }
 0x6f9   :  { %v13420_v32 = vpop.eup %13419  ;;  %v3052_v35 = vmul.f32 %v13418_v44, %v16063_v50  ;;  %12659 = vmatpush3.bf16.msra.mxu0 %v12656_v58  ;;  %v8577_v50 = vld [vmem:[%s18313_s10 + $0x98] sm:$0xff] }
 0x6fa   :  { %v3053_v38 = vmul.f32 %v13420_v32, %v16065_v31  ;;  %12661 = vmatprep.subr.bf16.mxu0 %v12660_v46  ;;  %v12700_v31 = vpack.c.bf16 %v8577_v50, %v8576_v16 }
 0x6fb   :  { %10885 = vmatmul.mubr.f32.gmra.mrb[90].mxu0 %v3052_v35  ;;  %v16257_v35 = vld [vmem:[%s18318_s28 + $0x1] ss:$0 sm:$0xff] }
 0x6fc   :  { %v13422_v7 = vpop.eup %13421  ;;  %10887 = vmatprep.mubr.f32.mxu0 %v3053_v38 }
 0x6fd   :  { %v3054_v57 = vmul.f32 %v13422_v7, %v16069_v40  ;;  %12663 = vmatpush3.bf16.msra.mxu0 %v12660_v46  ;;  %v8579_v40 = vld [vmem:[%s18313_s10 + $0xa8] sm:$0xff]  ;;  %v8663_v7 = vld [vmem:[%s18310_s5 + $0x118] sm:$0xff] }
 0x6fe   :  { %12697 = vmatprep.subr.bf16.mxu0 %v12696_v22  ;;  %v12704_v34 = vpack.c.bf16 %v8579_v40, %v8578_v52  ;;  %v8664_v40 = vld [vmem:[%s18310_s5 + $0x120] sm:$0xff] }
 0x6ff   :  { %10888 = vmatmul.mubr.f32.gmra.mrb[92].mxu0 %v3054_v57 }
 0x700   :  { %10922 = vmatprep.mubr.f32.mxu0 %v15483_v55 }
 0x703   :  { %10923 = vmatmul.mubr.f32.vlgmr.msra.gmra.mrb[94].mxu0 %v15502_v4 }
 0x704   :  { %10925 = vmatprep.mubr.f32.mxu0 %v15504_v54  ;;  %12699 = vmatpush3.bf16.msra.mxu0 %v12696_v22  ;;  %v8662_v22 = vld [vmem:[%s18310_s5 + $0x110] sm:$0xff] }
 0x705   :  { %12701 = vmatprep.subr.bf16.mxu0 %v12700_v31 }
 0x707   :  { %10926 = vmatmul.mubr.f32.gmra.mrb[96].mxu0 %v15523_v25 }
 0x708   :  { %10928 = vmatprep.mubr.f32.mxu0 %v15526_v37  ;;  %12703 = vmatpush3.bf16.msra.mxu0 %v12700_v31  ;;  %v12828_v31 = vpack.c.bf16 %v8663_v7, %v8662_v22  ;;  %v8670_v22 = vld [vmem:[%s18310_s5 + $0x150] sm:$0xff]  ;;  %v8671_v7 = vld [vmem:[%s18310_s5 + $0x158] sm:$0xff] }
 0x709   :  { %12705 = vmatprep.subr.bf16.mxu0 %v12704_v34 }
 0x70b   :  { %10929 = vmatmul.mubr.f32.gmra.mrb[98].mxu0 %v15545_v29 }
 0x70c   :  { %10931 = vmatprep.mubr.f32.mxu0 %v15548_v24  ;;  %12707 = vmatpush3.bf16.msra.mxu0 %v12704_v34  ;;  %v8665_v34 = vld [vmem:[%s18310_s5 + $0x128] sm:$0xff] }
 0x70d   :  { %12709 = vmatprep.subr.bf16.mxu0 %v12708_v5  ;;  %v12832_v48 = vpack.c.bf16 %v8665_v34, %v8664_v40  ;;  %v8672_v40 = vld [vmem:[%s18310_s5 + $0x160] sm:$0xff]  ;;  %v8673_v34 = vld [vmem:[%s18310_s5 + $0x168] sm:$0xff] }
 0x70f   :  { %10932 = vmatmul.mubr.f32.gmra.mrb[100].mxu0 %v15567_v59 }
 0x710   :  { %10934 = vmatprep.mubr.f32.mxu0 %v15570_v30  ;;  %12711 = vmatpush3.bf16.msra.mxu0 %v12708_v5 }
 0x711   :  { %12713 = vmatprep.subr.bf16.mxu0 %v12712_v53 }
 0x713   :  { %10935 = vmatmul.mubr.f32.gmra.mrb[102].mxu0 %v15589_v61 }
 0x714   :  { %10937 = vmatprep.mubr.f32.mxu0 %v15592_v13  ;;  %12715 = vmatpush3.bf16.msra.mxu0 %v12712_v53  ;;  %v8666_v53 = vld [vmem:[%s18310_s5 + $0x130] sm:$0xff] }
 0x715   :  { %12717 = vmatprep.subr.bf16.mxu0 %v12716_v14  ;;  %v12836_v43 = vpack.c.bf16 %v8667_v41, %v8666_v53  ;;  %v8674_v53 = vld [vmem:[%s18310_s5 + $0x170] sm:$0xff]  ;;  %v8675_v41 = vld [vmem:[%s18310_s5 + $0x178] sm:$0xff] }
 0x717   :  { %10938 = vmatmul.mubr.f32.gmra.mrb[104].mxu0 %v15611_v15 }
 0x718   :  { %10940 = vmatprep.mubr.f32.mxu0 %v15614_v17  ;;  %12719 = vmatpush3.bf16.msra.mxu0 %v12716_v14 }
 0x719   :  { %12721 = vmatprep.subr.bf16.mxu0 %v12720_v39 }
 0x71b   :  { %10941 = vmatmul.mubr.f32.gmra.mrb[106].mxu0 %v15633_v18 }
 0x71c   :  { %10943 = vmatprep.mubr.f32.mxu0 %v15636_v11  ;;  %12723 = vmatpush3.bf16.msra.mxu0 %v12720_v39 }
 0x71d   :  { %12725 = vmatprep.subr.bf16.mxu0 %v12724_v42 }
 0x71f   :  { %10944 = vmatmul.mubr.f32.gmra.mrb[108].mxu0 %v15645_v20 }
 0x720   :  { %12727 = vmatpush3.bf16.msra.mxu0 %v12724_v42  ;;  %11034 = vmatprep.mubr.f32.mxu0 %v15483_v55 }
 0x723   :  { %11035 = vmatmul.mubr.f32.vlgmr.msra.gmra.mrb[110].mxu0 %v15502_v4 }
 0x724   :  { %11037 = vmatprep.mubr.f32.mxu0 %v15504_v54 }
 0x727   :  { %11038 = vmatmul.mubr.f32.gmra.mrb[112].mxu0 %v15523_v25 }
 0x728   :  { %11040 = vmatprep.mubr.f32.mxu0 %v15526_v37 }
 0x72b   :  { %11041 = vmatmul.mubr.f32.gmra.mrb[114].mxu0 %v15545_v29 }
 0x72c   :  { %11043 = vmatprep.mubr.f32.mxu0 %v15548_v24 }
 0x72f   :  { %11044 = vmatmul.mubr.f32.gmra.mrb[116].mxu0 %v15567_v59 }
 0x730   :  { %11046 = vmatprep.mubr.f32.mxu0 %v15570_v30 }
 0x733   :  { %11047 = vmatmul.mubr.f32.gmra.mrb[118].mxu0 %v15589_v61 }
 0x734   :  { %11049 = vmatprep.mubr.f32.mxu0 %v15592_v13 }
 0x737   :  { %11050 = vmatmul.mubr.f32.gmra.mrb[120].mxu0 %v15611_v15 }
 0x738   :  { %11052 = vmatprep.mubr.f32.mxu0 %v15614_v17 }
 0x73b   :  { %11053 = vmatmul.mubr.f32.gmra.mrb[122].mxu0 %v15633_v18 }
 0x73c   :  { %11055 = vmatprep.mubr.f32.mxu0 %v15636_v11 }
 0x73f   :  { %11056 = vmatmul.mubr.f32.gmra.mrb[124].mxu0 %v15645_v20 }
 0x7b3   :  { %v16222_v27 = vpop.f32.mrb[78].mxu0 }
 0x7b4   :  { %18322 = vst [vmem:[#allocation5_spill] sm:$0xff] %v16222_v27  ;;  %v16224_v3 = vpop.f32.mrb[79].mxu0 }
 0x7b5   :  { %18323 = vst [vmem:[#allocation6_spill] sm:$0xff] %v16224_v3 }
 0x7ba   :  { %v16226_v23 = vpop.f32.mrb[80].mxu0 }
 0x7bb   :  { %18324 = vst [vmem:[#allocation7_spill] sm:$0xff] %v16226_v23  ;;  %v16228_v56 = vpop.f32.mrb[81].mxu0 }
 0x7bc   :  { %18325 = vst [vmem:[#allocation8_spill] sm:$0xff] %v16228_v56 }
 0x7be   :  { %v16230_v58 = vpop.f32.mrb[82].mxu0 }
 0x7bf   :  { %18326 = vst [vmem:[#allocation9_spill] sm:$0xff] %v16230_v58  ;;  %v16232_v28 = vpop.f32.mrb[83].mxu0 }
 0x7c0   :  { %18327 = vst [vmem:[#allocation10_spill] sm:$0xff] %v16232_v28 }
 0x7c2   :  { %v16234_v19 = vpop.f32.mrb[84].mxu0 }
 0x7c3   :  { %18328 = vst [vmem:[#allocation11_spill] sm:$0xff] %v16234_v19  ;;  %v16236_v51 = vpop.f32.mrb[85].mxu0 }
 0x7c4   :  { %18329 = vst [vmem:[#allocation12_spill] sm:$0xff] %v16236_v51 }
 0x7c6   :  { %v16238_v6 = vpop.f32.mrb[86].mxu0 }
 0x7c7   :  { %18330 = vst [vmem:[#allocation13_spill] sm:$0xff] %v16238_v6  ;;  %v16240_v12 = vpop.f32.mrb[87].mxu0 }
 0x7c8   :  { %18331 = vst [vmem:[#allocation14_spill] sm:$0xff] %v16240_v12 }
 0x7ca   :  { %v16242_v2 = vpop.f32.mrb[88].mxu0 }
 0x7cb   :  { %18332 = vst [vmem:[#allocation15_spill] sm:$0xff] %v16242_v2  ;;  %v16244_v46 = vpop.f32.mrb[89].mxu0 }
 0x7cc   :  { %18333 = vst [vmem:[#allocation16_spill] sm:$0xff] %v16244_v46 }
 0x7ce   :  { %v16246_v0 = vpop.f32.mrb[90].mxu0 }
 0x7cf   :  { %18334 = vst [vmem:[#allocation17_spill] sm:$0xff] %v16246_v0  ;;  %v16248_v26 = vpop.f32.mrb[91].mxu0 }
 0x7d0   :  { %18335 = vst [vmem:[#allocation18_spill] sm:$0xff] %v16248_v26  ;;  %v16566_v26 = vld [vmem:[%s18244_s6 + $0x78] sm:$0xff] }
 0x7d1   :  { %18352 = vst [vmem:[#allocation35_spill] sm:$0xff] %v16566_v26 }
 0x7d2   :  { %v16250_v44 = vpop.f32.mrb[92].mxu0 }
 0x7d3   :  { %18336 = vst [vmem:[#allocation19_spill] sm:$0xff] %v16250_v44  ;;  %v16252_v32 = vpop.f32.mrb[93].mxu0 }
 0x7d4   :  { %18337 = vst [vmem:[#allocation20_spill] sm:$0xff] %v16252_v32 }
 0x7d6   :  { %v10924_v38 = vpop.f32.mrb[94].mxu0 }
 0x7d7   :  { %v3295_v57 = vpop.f32.mrb[95].mxu0  ;;  %v3301_v50 = vadd.f32 %v10924_v38, %v16257_v35 }
 0x7d8   :  { %v3296_v16 = vadd.f32 %v16257_v35, %v3295_v57 }
 0x7da   :  { %v10927_v52 = vpop.f32.mrb[96].mxu0  ;;  %11090 = vmatprep.mubr.msk.f32.mxu1 %vm2637_vm8, %v3296_v16 }
 0x7db   :  { %v3305_v9 = vpop.f32.mrb[97].mxu0  ;;  %11091 = vmatmul.mubr.msk.f32.vlgmr.msra.gmra.mrb[66].mxu1 %vm2637_vm8, %v3301_v50  ;;  %v3311_v5 = vadd.f32 %v10927_v52, %v16257_v35 }
 0x7dc   :  { %v3306_v36 = vadd.f32 %v16257_v35, %v3305_v9  ;;  %12827 = vmatpush3.bf16.msra.mxu1 %v12824_v60  ;;  %v12840_v60 = vpack.c.bf16 %v8669_v45, %v8668_v49  ;;  %v8678_v49 = vld [vmem:[%s18311_s30 + $0x100] sm:$0xff]  ;;  %v8679_v45 = vld [vmem:[%s18311_s30 + $0x108] sm:$0xff] }
 0x7dd   :  { %12829 = vmatprep.subr.bf16.mxu1 %v12828_v31 }
 0x7de   :  { %v10930_v63 = vpop.f32.mrb[98].mxu0  ;;  %11093 = vmatprep.mubr.msk.f32.mxu1 %vm2637_vm8, %v3306_v36 }
 0x7df   :  { %v3315_v8 = vpop.f32.mrb[99].mxu0  ;;  %11094 = vmatmul.mubr.msk.f32.gmra.mrb[68].mxu1 %vm2637_vm8, %v3311_v5  ;;  %v3321_v62 = vadd.f32 %v10930_v63, %v16257_v35 }
 0x7e0   :  { %v3316_v14 = vadd.f32 %v16257_v35, %v3315_v8  ;;  %12831 = vmatpush3.bf16.msra.mxu1 %v12828_v31  ;;  %v12844_v31 = vpack.c.bf16 %v8671_v7, %v8670_v22 }
 0x7e1   :  { %12833 = vmatprep.subr.bf16.mxu1 %v12832_v48 }
 0x7e2   :  { %v10933_v39 = vpop.f32.mrb[100].mxu0  ;;  %11096 = vmatprep.mubr.msk.f32.mxu1 %vm2637_vm8, %v3316_v14 }
 0x7e3   :  { %v3325_v42 = vpop.f32.mrb[101].mxu0  ;;  %11097 = vmatmul.mubr.msk.f32.gmra.mrb[70].mxu1 %vm2637_vm8, %v3321_v62  ;;  %v3331_v10 = vadd.f32 %v10933_v39, %v16257_v35 }
 0x7e4   :  { %v3326_v33 = vadd.f32 %v16257_v35, %v3325_v42  ;;  %12835 = vmatpush3.bf16.msra.mxu1 %v12832_v48  ;;  %v12848_v48 = vpack.c.bf16 %v8673_v34, %v8672_v40 }
 0x7e5   :  { %12837 = vmatprep.subr.bf16.mxu1 %v12836_v43 }
 0x7e6   :  { %v10936_v38 = vpop.f32.mrb[102].mxu0  ;;  %11099 = vmatprep.mubr.msk.f32.mxu1 %vm2637_vm8, %v3326_v33 }
 0x7e7   :  { %v3335_v57 = vpop.f32.mrb[103].mxu0  ;;  %11100 = vmatmul.mubr.msk.f32.gmra.mrb[72].mxu1 %vm2637_vm8, %v3331_v10  ;;  %v3341_v50 = vadd.f32 %v10936_v38, %v16257_v35  ;;  %v16339_v10 = vld [vmem:[%s18243_s13 + $0x1] ss:$0 sm:$0xff]  ;;  %v12856_v38 = vpack.c.bf16 %v8679_v45, %v8678_v49 }
 0x7e8   :  { %v3336_v16 = vadd.f32 %v16257_v35, %v3335_v57  ;;  %12839 = vmatpush3.bf16.msra.mxu1 %v12836_v43  ;;  %v12852_v43 = vpack.c.bf16 %v8675_v41, %v8674_v53 }
 0x7e9   :  { %12841 = vmatprep.subr.bf16.mxu1 %v12840_v60 }
 0x7ea   :  { %v10939_v52 = vpop.f32.mrb[104].mxu0  ;;  %11102 = vmatprep.mubr.msk.f32.mxu1 %vm2637_vm8, %v3336_v16  ;;  %v8680_v16 = vld [vmem:[%s18311_s30 + $0x110] sm:$0xff] }
 0x7eb   :  { %v3345_v9 = vpop.f32.mrb[105].mxu0  ;;  %11103 = vmatmul.mubr.msk.f32.gmra.mrb[74].mxu1 %vm2637_vm8, %v3341_v50  ;;  %v3351_v5 = vadd.f32 %v10939_v52, %v16257_v35  ;;  %v8681_v50 = vld [vmem:[%s18311_s30 + $0x118] sm:$0xff] }
 0x7ec   :  { %v3346_v36 = vadd.f32 %v16257_v35, %v3345_v9  ;;  %12843 = vmatpush3.bf16.msra.mxu1 %v12840_v60  ;;  %v12860_v40 = vpack.c.bf16 %v8681_v50, %v8680_v16 }
 0x7ed   :  { %12845 = vmatprep.subr.bf16.mxu1 %v12844_v31 }
 0x7ee   :  { %v10942_v63 = vpop.f32.mrb[106].mxu0  ;;  %11105 = vmatprep.mubr.msk.f32.mxu1 %vm2637_vm8, %v3346_v36  ;;  %v8682_v36 = vld [vmem:[%s18311_s30 + $0x120] sm:$0xff] }
 0x7ef   :  { %v3355_v8 = vpop.f32.mrb[107].mxu0  ;;  %11106 = vmatmul.mubr.msk.f32.gmra.mrb[76].mxu1 %vm2637_vm8, %v3351_v5  ;;  %v3361_v62 = vadd.f32 %v10942_v63, %v16257_v35  ;;  %v8683_v5 = vld [vmem:[%s18311_s30 + $0x128] sm:$0xff] }
 0x7f0   :  { %v3356_v14 = vadd.f32 %v16257_v35, %v3355_v8  ;;  %12847 = vmatpush3.bf16.msra.mxu1 %v12844_v31  ;;  %v12864_v41 = vpack.c.bf16 %v8683_v5, %v8682_v36 }
 0x7f1   :  { %12849 = vmatprep.subr.bf16.mxu1 %v12848_v48 }
 0x7f2   :  { %v10945_v39 = vpop.f32.mrb[108].mxu0  ;;  %11108 = vmatprep.mubr.msk.f32.mxu1 %vm2637_vm8, %v3356_v14 }
 0x7f3   :  { %v3365_v42 = vpop.f32.mrb[109].mxu0  ;;  %11109 = vmatmul.mubr.msk.f32.gmra.mrb[78].mxu1 %vm2637_vm8, %v3361_v62  ;;  %v3371_v60 = vadd.f32 %v10945_v39, %v16257_v35  ;;  %v8684_v62 = vld [vmem:[%s18311_s30 + $0x130] sm:$0xff] }
 0x7f4   :  { %v3366_v33 = vadd.f32 %v16257_v35, %v3365_v42  ;;  %12851 = vmatpush3.bf16.msra.mxu1 %v12848_v48 }
 0x7f5   :  { %12853 = vmatprep.subr.bf16.mxu1 %v12852_v43 }
 0x7f6   :  { %v11036_v22 = vpop.f32.mrb[110].mxu0  ;;  %11111 = vmatprep.mubr.msk.f32.mxu1 %vm2637_vm8, %v3366_v33 }
 0x7f7   :  { %v3641_v7 = vadd.f32 %v11036_v22, %v16339_v10  ;;  %v3635_v57 = vpop.f32.mrb[111].mxu0  ;;  %11112 = vmatmul.mubr.msk.f32.gmra.mrb[80].mxu1 %vm2637_vm8, %v3371_v60  ;;  %v8687_v22 = vld [vmem:[%s18311_s30 + $0x148] sm:$0xff] }
 0x7f8   :  { %v3636_v35 = vadd.f32 %v16339_v10, %v3635_v57  ;;  %12855 = vmatpush3.bf16.msra.mxu1 %v12852_v43  ;;  %11266 = vmatprep.mubr.f32.mxu1 %v15483_v55  ;;  %v8685_v43 = vld [vmem:[%s18311_s30 + $0x138] sm:$0xff] }
 0x7f9   :  { %12857 = vmatprep.subr.bf16.mxu1 %v12856_v38  ;;  %v12868_v42 = vpack.c.bf16 %v8685_v43, %v8684_v62 }
 0x7fa   :  { %v12776_v31 = vpack.c.bf16 %v3641_v7, %v3636_v35  ;;  %v11039_v52 = vpop.f32.mrb[112].mxu0 }
 0x7fb   :  { %v3651_v34 = vadd.f32 %v11039_v52, %v16339_v10  ;;  %v3645_v9 = vpop.f32.mrb[113].mxu0  ;;  %11267 = vmatmul.mubr.f32.vlgmr.msra.gmra.mrb[82].mxu1 %v15502_v4  ;;  %v8688_v52 = vld [vmem:[%s18311_s30 + $0x150] sm:$0xff] }
 0x7fc   :  { %v3646_v48 = vadd.f32 %v16339_v10, %v3645_v9  ;;  %12777 = vmatprep.subr.bf16.mxu0 %v12776_v31  ;;  %11269 = vmatprep.mubr.f32.mxu1 %v15504_v54 }
 0x7fd   :  { %12859 = vmatpush3.bf16.msra.mxu1 %v12856_v38  ;;  %12779 = vmatpush3.bf16.msra.mxu0 %v12776_v31  ;;  %v8686_v38 = vld [vmem:[%s18311_s30 + $0x140] sm:$0xff] }
 0x7fe   :  { %v12780_v63 = vpack.c.bf16 %v3651_v34, %v3646_v48  ;;  %v11042_v53 = vpop.f32.mrb[114].mxu0  ;;  %12861 = vmatprep.subr.bf16.mxu1 %v12860_v40  ;;  %v12872_v50 = vpack.c.bf16 %v8687_v22, %v8686_v38 }
 0x7ff   :  { %v3661_v8 = vadd.f32 %v11042_v53, %v16339_v10  ;;  %v3655_v14 = vpop.f32.mrb[115].mxu0  ;;  %11270 = vmatmul.mubr.f32.gmra.mrb[84].mxu1 %v15523_v25  ;;  %v8690_v53 = vld [vmem:[%s18311_s30 + $0x160] sm:$0xff] }
 0x800   :  { %v3656_v39 = vadd.f32 %v16339_v10, %v3655_v14  ;;  %12781 = vmatprep.subr.bf16.mxu0 %v12780_v63  ;;  %11272 = vmatprep.mubr.f32.mxu1 %v15526_v37 }
 0x801   :  { %12863 = vmatpush3.bf16.msra.mxu1 %v12860_v40  ;;  %12783 = vmatpush3.bf16.msra.mxu0 %v12780_v63  ;;  %v8689_v40 = vld [vmem:[%s18311_s30 + $0x158] sm:$0xff] }
 0x802   :  { %v12784_v49 = vpack.c.bf16 %v3661_v8, %v3656_v39  ;;  %v11045_v45 = vpop.f32.mrb[116].mxu0  ;;  %12865 = vmatprep.subr.bf16.mxu1 %v12864_v41  ;;  %v12876_v5 = vpack.c.bf16 %v8689_v40, %v8688_v52  ;;  %v16437_v40 = vld [vmem:[%s18244_s6 + $0x8] sm:$0xff] }
 0x803   :  { %v3671_v33 = vadd.f32 %v11045_v45, %v16339_v10  ;;  %v3665_v60 = vpop.f32.mrb[117].mxu0  ;;  %11273 = vmatmul.mubr.f32.gmra.mrb[86].mxu1 %v15545_v29  ;;  %v8692_v45 = vld [vmem:[%s18311_s30 + $0x170] sm:$0xff]  ;;  %18338 = vst [vmem:[#allocation21_spill] sm:$0xff] %v16437_v40 }
 0x804   :  { %v3666_v7 = vadd.f32 %v16339_v10, %v3665_v60  ;;  %12785 = vmatprep.subr.bf16.mxu0 %v12784_v49  ;;  %11275 = vmatprep.mubr.f32.mxu1 %v15548_v24 }
 0x805   :  { %12867 = vmatpush3.bf16.msra.mxu1 %v12864_v41  ;;  %12787 = vmatpush3.bf16.msra.mxu0 %v12784_v49  ;;  %v8691_v41 = vld [vmem:[%s18311_s30 + $0x168] sm:$0xff] }
 0x806   :  { %v12788_v57 = vpack.c.bf16 %v3671_v33, %v3666_v7  ;;  %v11048_v16 = vpop.f32.mrb[118].mxu0  ;;  %12869 = vmatprep.subr.bf16.mxu1 %v12868_v42  ;;  %v12880_v43 = vpack.c.bf16 %v8691_v41, %v8690_v53  ;;  %v16455_v41 = vld [vmem:[%s18244_s6 + $0x18] sm:$0xff] }
 0x807   :  { %v3681_v35 = vadd.f32 %v11048_v16, %v16339_v10  ;;  %v3675_v31 = vpop.f32.mrb[119].mxu0  ;;  %11276 = vmatmul.mubr.f32.gmra.mrb[88].mxu1 %v15567_v59  ;;  %18340 = vst [vmem:[#allocation23_spill] sm:$0xff] %v16455_v41 }
 0x808   :  { %v3676_v34 = vadd.f32 %v16339_v10, %v3675_v31  ;;  %12789 = vmatprep.subr.bf16.mxu0 %v12788_v57  ;;  %11278 = vmatprep.mubr.f32.mxu1 %v15570_v30 }
 0x809   :  { %12871 = vmatpush3.bf16.msra.mxu1 %v12868_v42  ;;  %12791 = vmatpush3.bf16.msra.mxu0 %v12788_v57  ;;  %v8693_v42 = vld [vmem:[%s18311_s30 + $0x178] sm:$0xff] }
 0x80a   :  { %v12792_v9 = vpack.c.bf16 %v3681_v35, %v3676_v34  ;;  %v11051_v36 = vpop.f32.mrb[120].mxu0  ;;  %12873 = vmatprep.subr.bf16.mxu1 %v12872_v50  ;;  %v12884_v22 = vpack.c.bf16 %v8693_v42, %v8692_v45  ;;  %v16473_v42 = vld [vmem:[%s18244_s6 + $0x28] sm:$0xff] }
 0x80b   :  { %v3691_v48 = vadd.f32 %v11051_v36, %v16339_v10  ;;  %v3685_v63 = vpop.f32.mrb[121].mxu0  ;;  %11279 = vmatmul.mubr.f32.gmra.mrb[90].mxu1 %v15589_v61  ;;  %v16445_v36 = vld [vmem:[%s18244_s6] sm:$0xff]  ;;  %18342 = vst [vmem:[#allocation25_spill] sm:$0xff] %v16473_v42 }
 0x80c   :  { %v3686_v8 = vadd.f32 %v16339_v10, %v3685_v63  ;;  %12793 = vmatprep.subr.bf16.mxu0 %v12792_v9  ;;  %11281 = vmatprep.mubr.f32.mxu1 %v15592_v13  ;;  %18339 = vst [vmem:[#allocation22_spill] sm:$0xff] %v16445_v36 }
 0x80d   :  { %12875 = vmatpush3.bf16.msra.mxu1 %v12872_v50  ;;  %12795 = vmatpush3.bf16.msra.mxu0 %v12792_v9 }
 0x80e   :  { %v12796_v14 = vpack.c.bf16 %v3691_v48, %v3686_v8  ;;  %v11054_v62 = vpop.f32.mrb[122].mxu0  ;;  %12877 = vmatprep.subr.bf16.mxu1 %v12876_v5 }
 0x80f   :  { %v3701_v39 = vadd.f32 %v11054_v62, %v16339_v10  ;;  %v3695_v49 = vpop.f32.mrb[123].mxu0  ;;  %11282 = vmatmul.mubr.f32.gmra.mrb[92].mxu1 %v15611_v15  ;;  %v16463_v62 = vld [vmem:[%s18244_s6 + $0x10] sm:$0xff] }
 0x810   :  { %v3696_v33 = vadd.f32 %v16339_v10, %v3695_v49  ;;  %12797 = vmatprep.subr.bf16.mxu0 %v12796_v14  ;;  %11284 = vmatprep.mubr.f32.mxu1 %v15614_v17  ;;  %18341 = vst [vmem:[#allocation24_spill] sm:$0xff] %v16463_v62 }
 0x811   :  { %12879 = vmatpush3.bf16.msra.mxu1 %v12876_v5  ;;  %12799 = vmatpush3.bf16.msra.mxu0 %v12796_v14 }
 0x812   :  { %v12800_v60 = vpack.c.bf16 %v3701_v39, %v3696_v33  ;;  %v11057_v38 = vpop.f32.mrb[124].mxu0  ;;  %12881 = vmatprep.subr.bf16.mxu1 %v12880_v43 }
 0x813   :  { %v3711_v7 = vadd.f32 %v11057_v38, %v16339_v10  ;;  %v3705_v57 = vpop.f32.mrb[125].mxu0  ;;  %11285 = vmatmul.mubr.f32.gmra.mrb[94].mxu1 %v15633_v18  ;;  %v16481_v38 = vld [vmem:[%s18244_s6 + $0x20] sm:$0xff] }
 0x814   :  { %v3706_v16 = vadd.f32 %v16339_v10, %v3705_v57  ;;  %12801 = vmatprep.subr.bf16.mxu0 %v12800_v60  ;;  %11287 = vmatprep.mubr.f32.mxu1 %v15636_v11  ;;  %18343 = vst [vmem:[#allocation26_spill] sm:$0xff] %v16481_v38 }
 0x815   :  { %12883 = vmatpush3.bf16.msra.mxu1 %v12880_v43  ;;  %12803 = vmatpush3.bf16.msra.mxu0 %v12800_v60 }
 0x816   :  { %v12804_v50 = vpack.c.bf16 %v3711_v7, %v3706_v16  ;;  %12885 = vmatprep.subr.bf16.mxu1 %v12884_v22 }
 0x817   :  { %11288 = vmatmul.mubr.f32.gmra.mrb[96].mxu1 %v15645_v20 }
 0x818   :  { %12805 = vmatprep.subr.bf16.mxu0 %v12804_v50  ;;  %11322 = vmatprep.mubr.f32.mxu1 %v15483_v55 }
 0x819   :  { %12887 = vmatpush3.bf16.msra.mxu1 %v12884_v22  ;;  %12807 = vmatpush3.bf16.msra.mxu0 %v12804_v50  ;;  %v16491_v50 = vld [vmem:[%s18244_s6 + $0x38] sm:$0xff] }
 0x81a   :  { %18344 = vst [vmem:[#allocation27_spill] sm:$0xff] %v16491_v50 }
 0x81c   :  { %11323 = vmatmul.mubr.f32.vlgmr.msra.gmra.mrb[98].mxu1 %v15502_v4 }
 0x81d   :  { %11325 = vmatprep.mubr.f32.mxu1 %v15504_v54 }
 0x820   :  { %11326 = vmatmul.mubr.f32.gmra.mrb[100].mxu1 %v15523_v25 }
 0x821   :  { %11328 = vmatprep.mubr.f32.mxu1 %v15526_v37 }
 0x824   :  { %11329 = vmatmul.mubr.f32.gmra.mrb[102].mxu1 %v15545_v29 }
 0x825   :  { %11331 = vmatprep.mubr.f32.mxu1 %v15548_v24 }
 0x828   :  { %11332 = vmatmul.mubr.f32.gmra.mrb[104].mxu1 %v15567_v59 }
 0x829   :  { %11334 = vmatprep.mubr.f32.mxu1 %v15570_v30 }
 0x82c   :  { %11335 = vmatmul.mubr.f32.gmra.mrb[106].mxu1 %v15589_v61 }
 0x82d   :  { %11337 = vmatprep.mubr.f32.mxu1 %v15592_v13 }
 0x830   :  { %11338 = vmatmul.mubr.f32.gmra.mrb[108].mxu1 %v15611_v15 }
 0x831   :  { %11340 = vmatprep.mubr.f32.mxu1 %v15614_v17 }
 0x834   :  { %11341 = vmatmul.mubr.f32.gmra.mrb[110].mxu1 %v15633_v18 }
 0x835   :  { %11343 = vmatprep.mubr.f32.mxu1 %v15636_v11 }
 0x838   :  { %11344 = vmatmul.mubr.f32.gmra.mrb[112].mxu1 %v15645_v20 }
 0x8ae   :  { %v11092_v10 = vpop.f32.mrb[66].mxu1 }
 0x8af   :  { %v3956_v35 = vmul.f32 0.17677669, %v11092_v10  ;;  %v3876_v31 = vpop.f32.mrb[67].mxu1 }
 0x8b0   :  { %v3955_v52 = vmul.f32 0.17677669, %v3876_v31  ;;  %v16499_v31 = vld [vmem:[%s18244_s6 + $0x30] sm:$0xff] }
 0x8b1   :  { %v16440_v34 = vadd.f32 %v16437_v40, %v3956_v35  ;;  %18345 = vst [vmem:[#allocation28_spill] sm:$0xff] %v16499_v31 }
 0x8b2   :  { %v11095_v9 = vpop.f32.mrb[68].mxu1  ;;  %v16448_v5 = vadd.f32 %v16445_v36, %v3955_v52 }
 0x8b3   :  { %v3958_v48 = vmul.f32 0.17677669, %v11095_v9  ;;  %3989 = vmax.xlane.f32.xlu0 %v16440_v34  ;;  %v3886_v63 = vpop.f32.mrb[69].mxu1 }
 0x8b4   :  { %v3957_v53 = vmul.f32 0.17677669, %v3886_v63  ;;  %3987 = vmax.xlane.f32.xlu1 %v16448_v5 }
 0x8b5   :  { %v16458_v8 = vadd.f32 %v16455_v41, %v3958_v48 }
 0x8b6   :  { %v11098_v14 = vpop.f32.mrb[70].mxu1  ;;  %v16466_v43 = vadd.f32 %v16463_v62, %v3957_v53  ;;  %v16509_v53 = vld [vmem:[%s18244_s6 + $0x48] sm:$0xff] }
 0x8b7   :  { %v3960_v39 = vmul.f32 0.17677669, %v11098_v14  ;;  %3993 = vmax.xlane.f32.xlu0 %v16458_v8  ;;  %v3896_v49 = vpop.f32.mrb[71].mxu1  ;;  %18346 = vst [vmem:[#allocation29_spill] sm:$0xff] %v16509_v53 }
 0x8b8   :  { %v3959_v45 = vmul.f32 0.17677669, %v3896_v49  ;;  %3991 = vmax.xlane.f32.xlu1 %v16466_v43  ;;  %v16517_v49 = vld [vmem:[%s18244_s6 + $0x40] sm:$0xff] }
 0x8b9   :  { %v16476_v33 = vadd.f32 %v16473_v42, %v3960_v39  ;;  %18347 = vst [vmem:[#allocation30_spill] sm:$0xff] %v16517_v49 }
 0x8ba   :  { %v11101_v60 = vpop.f32.mrb[72].mxu1  ;;  %v16484_v22 = vadd.f32 %v16481_v38, %v3959_v45 }
 0x8bb   :  { %v3962_v7 = vmul.f32 0.17677669, %v11101_v60  ;;  %3997 = vmax.xlane.f32.xlu0 %v16476_v33  ;;  %v3906_v57 = vpop.f32.mrb[73].mxu1 }
 0x8bc   :  { %v3961_v16 = vmul.f32 0.17677669, %v3906_v57  ;;  %3995 = vmax.xlane.f32.xlu1 %v16484_v22 }
 0x8bd   :  { %v16494_v10 = vadd.f32 %v16491_v50, %v3962_v7 }
 0x8be   :  { %v11104_v35 = vpop.f32.mrb[74].mxu1  ;;  %v16502_v52 = vadd.f32 %v16499_v31, %v3961_v16  ;;  %v16527_v16 = vld [vmem:[%s18244_s6 + $0x58] sm:$0xff] }
 0x8bf   :  { %v3964_v9 = vmul.f32 0.17677669, %v11104_v35  ;;  %4001 = vmax.xlane.f32.xlu0 %v16494_v10  ;;  %v3916_v48 = vpop.f32.mrb[75].mxu1  ;;  %18348 = vst [vmem:[#allocation31_spill] sm:$0xff] %v16527_v16 }
 0x8c0   :  { %v3963_v63 = vmul.f32 0.17677669, %v3916_v48  ;;  %3999 = vmax.xlane.f32.xlu1 %v16502_v52  ;;  %v16535_v48 = vld [vmem:[%s18244_s6 + $0x50] sm:$0xff] }
 0x8c1   :  { %v16512_v14 = vadd.f32 %v16509_v53, %v3964_v9  ;;  %18349 = vst [vmem:[#allocation32_spill] sm:$0xff] %v16535_v48 }
 0x8c2   :  { %v11107_v39 = vpop.f32.mrb[76].mxu1  ;;  %v16520_v45 = vadd.f32 %v16517_v49, %v3963_v63 }
 0x8c3   :  { %v3966_v60 = vmul.f32 0.17677669, %v11107_v39  ;;  %4005 = vmax.xlane.f32.xlu0 %v16512_v14  ;;  %v3926_v7 = vpop.f32.mrb[77].mxu1 }
 0x8c4   :  { %v3965_v57 = vmul.f32 0.17677669, %v3926_v7  ;;  %4003 = vmax.xlane.f32.xlu1 %v16520_v45 }
 0x8c5   :  { %v16530_v35 = vadd.f32 %v16527_v16, %v3966_v60  ;;  %v16545_v60 = vld [vmem:[%s18244_s6 + $0x68] sm:$0xff] }
 0x8c6   :  { %v11110_v9 = vpop.f32.mrb[78].mxu1  ;;  %v16538_v63 = vadd.f32 %v16535_v48, %v3965_v57  ;;  %18350 = vst [vmem:[#allocation33_spill] sm:$0xff] %v16545_v60  ;;  %v16553_v57 = vld [vmem:[%s18244_s6 + $0x60] sm:$0xff] }
 0x8c7   :  { %v3968_v39 = vmul.f32 0.17677669, %v11110_v9  ;;  %4009 = vmax.xlane.f32.xlu0 %v16530_v35  ;;  %v3936_v7 = vpop.f32.mrb[79].mxu1  ;;  %18351 = vst [vmem:[#allocation34_spill] sm:$0xff] %v16553_v57 }
 0x8c8   :  { %v3967_v1 = vmul.f32 0.17677669, %v3936_v7  ;;  %4007 = vmax.xlane.f32.xlu1 %v16538_v63 }
 0x8c9   :  { %v16548_v21 = vadd.f32 %v16545_v60, %v3968_v39  ;;  %v8677_v39 = vld [vmem:[%s18318_s28 + $0x2] ss:$0 sm:$0xff] }
 0x8ca   :  { %v11113_v44 = vpop.f32.mrb[80].mxu1  ;;  %v16556_v9 = vadd.f32 %v16553_v57, %v3967_v1 }
 0x8cb   :  { %v3970_v7 = vmul.f32 0.17677669, %v11113_v44  ;;  %4013 = vmax.xlane.f32.xlu0 %v16548_v21  ;;  %v3946_v32 = vpop.f32.mrb[81].mxu1  ;;  %v16574_v44 = vld [vmem:[%s18244_s6 + $0x70] sm:$0xff] }
 0x8cc   :  { %v3969_v0 = vmul.f32 0.17677669, %v3946_v32  ;;  %4011 = vmax.xlane.f32.xlu1 %v16556_v9  ;;  %18353 = vst [vmem:[#allocation36_spill] sm:$0xff] %v16574_v44 }
 0x8cd   :  { %v16569_v2 = vadd.f32 %v16566_v26, %v3970_v7 }
 0x8ce   :  { %v11268_v1 = vpop.f32.mrb[82].mxu1  ;;  %v16577_v32 = vadd.f32 %v16574_v44, %v3969_v0 }
 0x8cf   :  { %v16579_v46 = vadd.f32 %v11268_v1, %v8677_v39  ;;  %4017 = vmax.xlane.f32.xlu0 %v16569_v2  ;;  %v4758_v6 = vpop.f32.mrb[83].mxu1 }
 0x8d0   :  { %v4759_v12 = vadd.f32 %v8677_v39, %v4758_v6  ;;  %4015 = vmax.xlane.f32.xlu1 %v16577_v32 }
 0x8d2   :  { %v11271_v19 = vpop.f32.mrb[84].mxu1  ;;  %11434 = vmatprep.mubr.msk.f32.mxu1 %vm2637_vm8, %v4759_v12 }
 0x8d3   :  { %v16584_v7 = vadd.f32 %v11271_v19, %v8677_v39  ;;  %v4768_v51 = vpop.f32.mrb[85].mxu1 }
 0x8d4   :  { %v16586_v58 = vadd.f32 %v8677_v39, %v4768_v51 }
 0x8d6   :  { %v11274_v28 = vpop.f32.mrb[86].mxu1 }
 0x8d7   :  { %v16588_v23 = vadd.f32 %v11274_v28, %v8677_v39  ;;  %v4778_v0 = vpop.f32.mrb[87].mxu1 }
 0x8d8   :  { %v16590_v1 = vadd.f32 %v8677_v39, %v4778_v0 }
 0x8da   :  { %v11277_v56 = vpop.f32.mrb[88].mxu1 }
 0x8db   :  { %v16592_v27 = vadd.f32 %v11277_v56, %v8677_v39  ;;  %v4788_v6 = vpop.f32.mrb[89].mxu1 }
 0x8dc   :  { %v16594_v3 = vadd.f32 %v8677_v39, %v4788_v6 }
 0x8de   :  { %v11280_v44 = vpop.f32.mrb[90].mxu1 }
 0x8df   :  { %v16596_v26 = vadd.f32 %v11280_v44, %v8677_v39  ;;  %v4798_v19 = vpop.f32.mrb[91].mxu1 }
 0x8e0   :  { %v16598_v12 = vadd.f32 %v8677_v39, %v4798_v19  ;;  %v8695_v19 = vld [vmem:[%s18319_s11 + $0x2] ss:$0 sm:$0xff] }
 0x8e2   :  { %v11283_v51 = vpop.f32.mrb[92].mxu1 }
 0x8e3   :  { %v16600_v57 = vadd.f32 %v11283_v51, %v8677_v39  ;;  %v4808_v28 = vpop.f32.mrb[93].mxu1 }
 0x8e4   :  { %v16602_v60 = vadd.f32 %v8677_v39, %v4808_v28 }
 0x8e6   :  { %v11286_v0 = vpop.f32.mrb[94].mxu1 }
 0x8e7   :  { %v16604_v48 = vadd.f32 %v11286_v0, %v8677_v39  ;;  %v4818_v56 = vpop.f32.mrb[95].mxu1 }
 0x8e8   :  { %v16606_v16 = vadd.f32 %v8677_v39, %v4818_v56 }
 0x8ea   :  { %v11289_v6 = vpop.f32.mrb[96].mxu1 }
 0x8eb   :  { %v16608_v49 = vadd.f32 %v11289_v6, %v8677_v39  ;;  %v4828_v44 = vpop.f32.mrb[97].mxu1 }
 0x8ec   :  { %v16610_v53 = vadd.f32 %v8677_v39, %v4828_v44 }
 0x8ef   :  { %v11324_v51 = vpop.f32.mrb[98].mxu1 }
 0x8f0   :  { %v4934_v31 = vadd.f32 %v11324_v51, %v8695_v19  ;;  %v4928_v28 = vpop.f32.mrb[99].mxu1 }
 0x8f1   :  { %v4929_v50 = vadd.f32 %v8695_v19, %v4928_v28 }
 0x8f3   :  { %v12920_v38 = vpack.c.bf16 %v4934_v31, %v4929_v50  ;;  %v11327_v0 = vpop.f32.mrb[100].mxu1 }
 0x8f4   :  { %v4944_v42 = vadd.f32 %v11327_v0, %v8695_v19  ;;  %v4938_v62 = vpop.f32.mrb[101].mxu1 }
 0x8f5   :  { %v4939_v56 = vadd.f32 %v8695_v19, %v4938_v62  ;;  %12922 = vmatprep.subr.msk.bf16.mxu1 %vm15683_vm9, %v12920_v38 }
 0x8f6   :  { %12925 = vmatpush3.bf16.xpose.msk.msra.mxu1 %vm15683_vm9, %v12920_v38 }
 0x8f7   :  { %v12926_v39 = vpack.c.bf16 %v4944_v42, %v4939_v56  ;;  %v11330_v6 = vpop.f32.mrb[102].mxu1 }
 0x8f8   :  { %v4954_v44 = vadd.f32 %v11330_v6, %v8695_v19  ;;  %v4948_v41 = vpop.f32.mrb[103].mxu1 }
 0x8f9   :  { %v4949_v36 = vadd.f32 %v8695_v19, %v4948_v41  ;;  %12928 = vmatprep.subr.msk.bf16.mxu1 %vm15683_vm9, %v12926_v39 }
 0x8fb   :  { %v12932_v51 = vpack.c.bf16 %v4954_v44, %v4949_v36  ;;  %v11333_v50 = vpop.f32.mrb[104].mxu1 }
 0x8fc   :  { %v4964_v31 = vadd.f32 %v11333_v50, %v8695_v19  ;;  %v4958_v28 = vpop.f32.mrb[105].mxu1 }
 0x8fd   :  { %v4959_v0 = vadd.f32 %v8695_v19, %v4958_v28 }
 0x8fe   :  { %12931 = vmatpush3.bf16.xpose.msk.msra.mxu1 %vm15683_vm9, %v12926_v39 }
 0x8ff   :  { %v12938_v62 = vpack.c.bf16 %v4964_v31, %v4959_v0  ;;  %v11336_v40 = vpop.f32.mrb[106].mxu1  ;;  %12934 = vmatprep.subr.msk.bf16.mxu1 %vm15683_vm9, %v12932_v51 }
 0x900   :  { %v4974_v42 = vadd.f32 %v11336_v40, %v8695_v19  ;;  %v4968_v38 = vpop.f32.mrb[107].mxu1 }
 0x901   :  { %v4969_v56 = vadd.f32 %v8695_v19, %v4968_v38 }
 0x903   :  { %v12944_v41 = vpack.c.bf16 %v4974_v42, %v4969_v56  ;;  %v11339_v6 = vpop.f32.mrb[108].mxu1 }
 0x904   :  { %v4984_v20 = vadd.f32 %v11339_v6, %v8695_v19  ;;  %v4978_v11 = vpop.f32.mrb[109].mxu1  ;;  %v8771_v6 = vld [vmem:[%s18310_s5 + $0x1a8] sm:$0xff] }
 0x905   :  { %v4979_v36 = vadd.f32 %v8695_v19, %v4978_v11 }
 0x906   :  { %12937 = vmatpush3.bf16.xpose.msk.msra.mxu1 %vm15683_vm9, %v12932_v51  ;;  %v8768_v51 = vld [vmem:[%s18310_s5 + $0x190] sm:$0xff] }
 0x907   :  { %v12950_v44 = vpack.c.bf16 %v4984_v20, %v4979_v36  ;;  %v11342_v50 = vpop.f32.mrb[110].mxu1  ;;  %12940 = vmatprep.subr.msk.bf16.mxu1 %vm15683_vm9, %v12938_v62  ;;  %v8767_v20 = vld [vmem:[%s18310_s5 + $0x188] sm:$0xff] }
 0x908   :  { %v4994_v39 = vadd.f32 %v11342_v50, %v8695_v19  ;;  %v4988_v31 = vpop.f32.mrb[111].mxu1  ;;  %v8773_v50 = vld [vmem:[%s18310_s5 + $0x1b8] sm:$0xff] }
 0x909   :  { %v4989_v28 = vadd.f32 %v8695_v19, %v4988_v31  ;;  %v8776_v31 = vld [vmem:[%s18310_s5 + $0x1d0] sm:$0xff] }
 0x90b   :  { %v12956_v0 = vpack.c.bf16 %v4994_v39, %v4989_v28  ;;  %v11345_v40 = vpop.f32.mrb[112].mxu1  ;;  %v8775_v39 = vld [vmem:[%s18310_s5 + $0x1c8] sm:$0xff]  ;;  %v8777_v28 = vld [vmem:[%s18310_s5 + $0x1d8] sm:$0xff] }
 0x90c   :  { %v5004_v18 = vadd.f32 %v11345_v40, %v8695_v19  ;;  %v4998_v38 = vpop.f32.mrb[113].mxu1 }
 0x90d   :  { %v4999_v42 = vadd.f32 %v8695_v19, %v4998_v38  ;;  %v13028_v38 = vpack.c.bf16 %v8777_v28, %v8776_v31 }
 0x90e   :  { %12943 = vmatpush3.bf16.xpose.msk.msra.mxu1 %vm15683_vm9, %v12938_v62  ;;  %v8769_v62 = vld [vmem:[%s18310_s5 + $0x198] sm:$0xff] }
 0x90f   :  { %v12962_v11 = vpack.c.bf16 %v5004_v18, %v4999_v42  ;;  %12946 = vmatprep.subr.msk.bf16.mxu1 %vm15683_vm9, %v12944_v41  ;;  %v8766_v18 = vld [vmem:[%s18310_s5 + $0x180] sm:$0xff]  ;;  %v13012_v56 = vpack.c.bf16 %v8769_v62, %v8768_v51 }
 0x910   :  { %v13008_v19 = vpack.c.bf16 %v8767_v20, %v8766_v18  ;;  %v8778_v18 = vld [vmem:[%s18310_s5 + $0x1e0] sm:$0xff] }
 0x916   :  { %12949 = vmatpush3.bf16.xpose.msk.msra.mxu1 %vm15683_vm9, %v12944_v41  ;;  %v8770_v41 = vld [vmem:[%s18310_s5 + $0x1a0] sm:$0xff] }
 0x917   :  { %12952 = vmatprep.subr.msk.bf16.mxu1 %vm15683_vm9, %v12950_v44  ;;  %v13016_v36 = vpack.c.bf16 %v8771_v6, %v8770_v41 }
 0x91e   :  { %12955 = vmatpush3.bf16.xpose.msk.msra.mxu1 %vm15683_vm9, %v12950_v44  ;;  %v8772_v44 = vld [vmem:[%s18310_s5 + $0x1b0] sm:$0xff] }
 0x91f   :  { %12958 = vmatprep.subr.msk.bf16.mxu1 %vm15683_vm9, %v12956_v0 }
 0x926   :  { %12961 = vmatpush3.bf16.xpose.msk.msra.mxu1 %vm15683_vm9, %v12956_v0 }
 0x927   :  { %12964 = vmatprep.subr.msk.bf16.mxu1 %vm15683_vm9, %v12962_v11 }
 0x92e   :  { %12967 = vmatpush3.bf16.xpose.msk.msra.mxu1 %vm15683_vm9, %v12962_v11 }
 0x92f   :  { %13009 = vmatprep.subr.bf16.mxu1 %v13008_v19 }
 0x935   :  { %11435 = vmatmul.mubr.msk.f32.vlgmr.msra.gmra.mrb[114].mxu1 %vm2637_vm8, %v16579_v46  ;;  %v8774_v46 = vld [vmem:[%s18310_s5 + $0x1c0] sm:$0xff] }
 0x936   :  { %11437 = vmatprep.mubr.msk.f32.mxu1 %vm2637_vm8, %v16586_v58  ;;  %13011 = vmatpush3.bf16.msra.mxu1 %v13008_v19  ;;  %v13020_v58 = vpack.c.bf16 %v8773_v50, %v8772_v44 }
 0x937   :  { %13013 = vmatprep.subr.bf16.mxu1 %v13012_v56 }
 0x939   :  { %11438 = vmatmul.mubr.msk.f32.gmra.mrb[116].mxu1 %vm2637_vm8, %v16584_v7  ;;  %v13024_v7 = vpack.c.bf16 %v8775_v39, %v8774_v46 }
 0x93a   :  { %11440 = vmatprep.mubr.msk.f32.mxu1 %vm2637_vm8, %v16590_v1  ;;  %13015 = vmatpush3.bf16.msra.mxu1 %v13012_v56 }
 0x93b   :  { %13017 = vmatprep.subr.bf16.mxu1 %v13016_v36 }
 0x93d   :  { %11441 = vmatmul.mubr.msk.f32.gmra.mrb[118].mxu1 %vm2637_vm8, %v16588_v23 }
 0x93e   :  { %11443 = vmatprep.mubr.msk.f32.mxu1 %vm2637_vm8, %v16594_v3  ;;  %13019 = vmatpush3.bf16.msra.mxu1 %v13016_v36 }
 0x93f   :  { %13021 = vmatprep.subr.bf16.mxu1 %v13020_v58 }
 0x940   :  { %v3990_v1 = vpop.xlane.xlu0 %3989 }
 0x941   :  { %v4020_v0 = vsub.f32 %v16440_v34, %v3990_v1  ;;  %11444 = vmatmul.mubr.msk.f32.gmra.mrb[120].mxu1 %vm2637_vm8, %v16592_v27  ;;  %v3988_v23 = vpop.xlane.xlu1 %3987  ;;  %v8779_v27 = vld [vmem:[%s18310_s5 + $0x1e8] sm:$0xff] }
 0x942   :  { %v4019_v3 = vsub.f32 %v16448_v5, %v3988_v23  ;;  %11446 = vmatprep.mubr.msk.f32.mxu1 %vm2637_vm8, %v16598_v12  ;;  %13023 = vmatpush3.bf16.msra.mxu1 %v13020_v58  ;;  %v13032_v19 = vpack.c.bf16 %v8779_v27, %v8778_v18 }
 0x943   :  { %v4037_v40 = vmul.f32 1.442695, %v4020_v0  ;;  %13025 = vmatprep.subr.bf16.mxu1 %v13024_v7 }
 0x944   :  { %v4035_v42 = vmul.f32 1.442695, %v4019_v3  ;;  %v3994_v11 = vpop.xlane.xlu0 %3993 }
 0x945   :  { %13423 = vpow2.f32 %v4037_v40  ;;  %v4022_v34 = vsub.f32 %v16458_v8, %v3994_v11  ;;  %11447 = vmatmul.mubr.msk.f32.gmra.mrb[122].mxu1 %vm2637_vm8, %v16596_v26  ;;  %v3992_v5 = vpop.xlane.xlu1 %3991  ;;  %v8780_v8 = vld [vmem:[%s18310_s5 + $0x1f0] sm:$0xff]  ;;  %v8781_v26 = vld [vmem:[%s18310_s5 + $0x1f8] sm:$0xff] }
 0x946   :  { %13425 = vpow2.f32 %v4035_v42  ;;  %v4021_v12 = vsub.f32 %v16466_v43, %v3992_v5  ;;  %11449 = vmatprep.mubr.msk.f32.mxu1 %vm2637_vm8, %v16602_v60  ;;  %13027 = vmatpush3.bf16.msra.mxu1 %v13024_v7  ;;  %v13036_v6 = vpack.c.bf16 %v8781_v26, %v8780_v8 }
 0x947   :  { %v4041_v20 = vmul.f32 1.442695, %v4022_v34  ;;  %13029 = vmatprep.subr.bf16.mxu1 %v13028_v38 }
 0x948   :  { %v4039_v51 = vmul.f32 1.442695, %v4021_v12  ;;  %v3998_v62 = vpop.xlane.xlu0 %3997 }
 0x949   :  { %13427 = vpow2.f32 %v4041_v20  ;;  %v4024_v43 = vsub.f32 %v16476_v33, %v3998_v62  ;;  %11450 = vmatmul.mubr.msk.f32.gmra.mrb[124].mxu1 %vm2637_vm8, %v16600_v57  ;;  %v3996_v60 = vpop.xlane.xlu1 %3995  ;;  %v8802_v33 = vld [vmem:[%s18313_s10 + $0x180] sm:$0xff]  ;;  %v8803_v57 = vld [vmem:[%s18313_s10 + $0x188] sm:$0xff] }
 0x94a   :  { %13429 = vpow2.f32 %v4039_v51  ;;  %v4023_v56 = vsub.f32 %v16484_v22, %v3996_v60  ;;  %11452 = vmatprep.mubr.msk.f32.mxu1 %vm2637_vm8, %v16606_v16  ;;  %13031 = vmatpush3.bf16.msra.mxu1 %v13028_v38  ;;  %v13072_v39 = vpack.c.bf16 %v8803_v57, %v8802_v33 }
 0x94b   :  { %v4045_v41 = vmul.f32 1.442695, %v4024_v43  ;;  %13033 = vmatprep.subr.bf16.mxu1 %v13032_v19 }
 0x94c   :  { %v4043_v36 = vmul.f32 1.442695, %v4023_v56  ;;  %v4002_v44 = vpop.xlane.xlu0 %4001 }
 0x94d   :  { %13431 = vpow2.f32 %v4045_v41  ;;  %v4026_v22 = vsub.f32 %v16494_v10, %v4002_v44  ;;  %11453 = vmatmul.mubr.msk.f32.gmra.mrb[126].mxu1 %vm2637_vm8, %v16604_v48  ;;  %v4000_v16 = vpop.xlane.xlu1 %3999  ;;  %v8804_v48 = vld [vmem:[%s18313_s10 + $0x190] sm:$0xff] }
 0x94e   :  { %13433 = vpow2.f32 %v4043_v36  ;;  %v4025_v50 = vsub.f32 %v16502_v52, %v4000_v16  ;;  %11455 = vmatprep.mubr.msk.f32.mxu1 %vm2637_vm8, %v16610_v53  ;;  %13035 = vmatpush3.bf16.msra.mxu1 %v13032_v19  ;;  %v8805_v52 = vld [vmem:[%s18313_s10 + $0x198] sm:$0xff]  ;;  %v8808_v19 = vld [vmem:[%s18313_s10 + $0x1b0] sm:$0xff] }
 0x94f   :  { %v16737_v58 = vpop.eup %13423  ;;  %v4049_v46 = vmul.f32 1.442695, %v4026_v22  ;;  %13037 = vmatprep.subr.bf16.mxu1 %v13036_v6  ;;  %v13076_v3 = vpack.c.bf16 %v8805_v52, %v8804_v48  ;;  %v8814_v48 = vld [vmem:[%s18313_s10 + $0x1e0] sm:$0xff]  ;;  %v8815_v52 = vld [vmem:[%s18313_s10 + $0x1e8] sm:$0xff] }
 0x950   :  { %v16739_v7 = vpop.eup %13425  ;;  %v4047_v1 = vmul.f32 1.442695, %v4025_v50  ;;  %v4006_v10 = vpop.xlane.xlu0 %4005  ;;  %4069 = vadd.xlane.f32.xlu0 %v16737_v58 }
 0x951   :  { %13435 = vpow2.f32 %v4049_v46  ;;  %v4028_v53 = vsub.f32 %v16512_v14, %v4006_v10  ;;  %11456 = vmatmul.mubr.msk.f32.gmra.mrb[128].mxu1 %vm2637_vm8, %v16608_v49  ;;  %v4004_v31 = vpop.xlane.xlu1 %4003  ;;  %4067 = vadd.xlane.f32.xlu1 %v16739_v7  ;;  %v8806_v49 = vld [vmem:[%s18313_s10 + $0x1a0] sm:$0xff] }
 0x952   :  { %13437 = vpow2.f32 %v4047_v1  ;;  %v4027_v28 = vsub.f32 %v16520_v45, %v4004_v31  ;;  %13039 = vmatpush3.bf16.msra.mxu1 %v13036_v6  ;;  %11578 = vmatprep.mubr.f32.mxu1 %v15483_v55  ;;  %v8807_v45 = vld [vmem:[%s18313_s10 + $0x1a8] sm:$0xff]  ;;  %v8810_v6 = vld [vmem:[%s18313_s10 + $0x1c0] sm:$0xff]  ;;  %v13096_v31 = vpack.c.bf16 %v8815_v52, %v8814_v48 }
 0x953   :  { %v16754_v0 = vpop.eup %13427  ;;  %v4053_v23 = vmul.f32 1.442695, %v4028_v53  ;;  %13073 = vmatprep.subr.bf16.mxu1 %v13072_v39  ;;  %v13080_v5 = vpack.c.bf16 %v8807_v45, %v8806_v49  ;;  %v18354_v45 = vld [vmem:[#allocation2_spill] sm:$0xff] }
 0x954   :  { %v16756_v40 = vpop.eup %13429  ;;  %v4051_v14 = vmul.f32 1.442695, %v4027_v28  ;;  %v4010_v38 = vpop.xlane.xlu0 %4009  ;;  %4073 = vadd.xlane.f32.xlu0 %v16754_v0 }
 0x955   :  { %13439 = vpow2.f32 %v4053_v23  ;;  %v4030_v42 = vsub.f32 %v16530_v35, %v4010_v38  ;;  %11579 = vmatmul.mubr.f32.vlgmr.msra.gmra.mrb[130].mxu1 %v15502_v4  ;;  %v4008_v11 = vpop.xlane.xlu1 %4007  ;;  %4071 = vadd.xlane.f32.xlu1 %v16756_v40  ;;  %v8816_v23 = vld [vmem:[%s18313_s10 + $0x1f0] sm:$0xff] }
 0x956   :  { %13441 = vpow2.f32 %v4051_v14  ;;  %v4029_v18 = vsub.f32 %v16538_v63, %v4008_v11  ;;  %11581 = vmatprep.mubr.f32.mxu1 %v15504_v54  ;;  %13075 = vmatpush3.bf16.msra.mxu1 %v13072_v39  ;;  %v8809_v63 = vld [vmem:[%s18313_s10 + $0x1b8] sm:$0xff]  ;;  %v18356_v11 = vld [vmem:[#allocation4_spill] sm:$0xff] }
 0x957   :  { %v16770_v27 = vpop.eup %13431  ;;  %v4057_v34 = vmul.f32 1.442695, %v4030_v42  ;;  %13077 = vmatprep.subr.bf16.mxu1 %v13076_v3  ;;  %v13084_v60 = vpack.c.bf16 %v8809_v63, %v8808_v19  ;;  %v8813_v39 = vld [vmem:[%s18313_s10 + $0x1d8] sm:$0xff]  ;;  %v18355_v42 = vld [vmem:[#allocation3_spill] sm:$0xff] }
 0x958   :  { %v16772_v12 = vpop.eup %13433  ;;  %v4055_v20 = vmul.f32 1.442695, %v4029_v18  ;;  %v4014_v35 = vpop.xlane.xlu0 %4013  ;;  %4077 = vadd.xlane.f32.xlu0 %v16770_v27 }
 0x959   :  { %13443 = vpow2.f32 %v4057_v34  ;;  %v4032_v51 = vsub.f32 %v16548_v21, %v4014_v35  ;;  %11582 = vmatmul.mubr.f32.gmra.mrb[132].mxu1 %v15523_v25  ;;  %v4012_v62 = vpop.xlane.xlu1 %4011  ;;  %4075 = vadd.xlane.f32.xlu1 %v16772_v12 }
 0x95a   :  { %13445 = vpow2.f32 %v4055_v20  ;;  %v4031_v8 = vsub.f32 %v16556_v9, %v4012_v62  ;;  %11584 = vmatprep.mubr.f32.mxu1 %v15526_v37  ;;  %13079 = vmatpush3.bf16.msra.mxu1 %v13076_v3  ;;  %v8811_v9 = vld [vmem:[%s18313_s10 + $0x1c8] sm:$0xff]  ;;  %v8817_v3 = vld [vmem:[%s18313_s10 + $0x1f8] sm:$0xff] }
 0x95b   :  { %v16786_v26 = vpop.eup %13435  ;;  %v4061_v43 = vmul.f32 1.442695, %v4032_v51  ;;  %13081 = vmatprep.subr.bf16.mxu1 %v13080_v5  ;;  %v13088_v16 = vpack.c.bf16 %v8811_v9, %v8810_v6  ;;  %v13100_v38 = vpack.c.bf16 %v8817_v3, %v8816_v23 }
 0x95c   :  { %v16788_v56 = vpop.eup %13437  ;;  %v4059_v41 = vmul.f32 1.442695, %v4031_v8  ;;  %4081 = vadd.xlane.f32.xlu0 %v16786_v26  ;;  %v4018_v21 = vpop.xlane.xlu0 %4017 }
 0x95d   :  { %13447 = vpow2.f32 %v4061_v43  ;;  %v4034_v36 = vsub.f32 %v16569_v2, %v4018_v21  ;;  %11585 = vmatmul.mubr.f32.gmra.mrb[134].mxu1 %v15545_v29  ;;  %4079 = vadd.xlane.f32.xlu1 %v16788_v56  ;;  %v4016_v44 = vpop.xlane.xlu1 %4015  ;;  %v8812_v2 = vld [vmem:[%s18313_s10 + $0x1d0] sm:$0xff] }
 0x95e   :  { %13449 = vpow2.f32 %v4059_v41  ;;  %11587 = vmatprep.mubr.f32.mxu1 %v15548_v24  ;;  %13083 = vmatpush3.bf16.msra.mxu1 %v13080_v5  ;;  %v4033_v33 = vsub.f32 %v16577_v32, %v4016_v44  ;;  %v13092_v1 = vpack.c.bf16 %v8813_v39, %v8812_v2 }
 0x95f   :  { %v16802_v57 = vpop.eup %13439  ;;  %v4065_v22 = vmul.f32 1.442695, %v4034_v36  ;;  %13085 = vmatprep.subr.bf16.mxu1 %v13084_v60 }
 0x960   :  { %v16804_v50 = vpop.eup %13441  ;;  %v4063_v46 = vmul.f32 1.442695, %v4033_v33  ;;  %4085 = vadd.xlane.f32.xlu0 %v16802_v57 }
 0x961   :  { %13451 = vpow2.f32 %v4065_v22  ;;  %11588 = vmatmul.mubr.f32.gmra.mrb[136].mxu1 %v15567_v59  ;;  %4083 = vadd.xlane.f32.xlu1 %v16804_v50 }
 0x962   :  { %13453 = vpow2.f32 %v4063_v46  ;;  %11590 = vmatprep.mubr.f32.mxu1 %v15570_v30  ;;  %13087 = vmatpush3.bf16.msra.mxu1 %v13084_v60 }
 0x963   :  { %v16816_v32 = vpop.eup %13443  ;;  %13089 = vmatprep.subr.bf16.mxu1 %v13088_v16 }
 0x964   :  { %v16818_v10 = vpop.eup %13445  ;;  %4089 = vadd.xlane.f32.xlu0 %v16816_v32 }
 0x965   :  { %11591 = vmatmul.mubr.f32.gmra.mrb[138].mxu1 %v15589_v61  ;;  %4087 = vadd.xlane.f32.xlu1 %v16818_v10 }
 0x966   :  { %11593 = vmatprep.mubr.f32.mxu1 %v15592_v13  ;;  %13091 = vmatpush3.bf16.msra.mxu1 %v13088_v16 }
 0x967   :  { %v16830_v53 = vpop.eup %13447  ;;  %13093 = vmatprep.subr.bf16.mxu1 %v13092_v1 }
 0x968   :  { %v16832_v28 = vpop.eup %13449  ;;  %4093 = vadd.xlane.f32.xlu0 %v16830_v53 }
 0x969   :  { %11594 = vmatmul.mubr.f32.gmra.mrb[140].mxu1 %v15611_v15  ;;  %4091 = vadd.xlane.f32.xlu1 %v16832_v28 }
 0x96a   :  { %11596 = vmatprep.mubr.f32.mxu1 %v15614_v17  ;;  %13095 = vmatpush3.bf16.msra.mxu1 %v13092_v1 }
 0x96b   :  { %v16844_v14 = vpop.eup %13451  ;;  %13097 = vmatprep.subr.bf16.mxu1 %v13096_v31 }
 0x96c   :  { %v16846_v49 = vpop.eup %13453  ;;  %4097 = vadd.xlane.f32.xlu0 %v16844_v14 }
 0x96d   :  { %11597 = vmatmul.mubr.f32.gmra.mrb[142].mxu1 %v18354_v45  ;;  %4095 = vadd.xlane.f32.xlu1 %v16846_v49 }
 0x96e   :  { %11599 = vmatprep.mubr.f32.mxu1 %v18355_v42  ;;  %13099 = vmatpush3.bf16.msra.mxu1 %v13096_v31 }
 0x96f   :  { %13101 = vmatprep.subr.bf16.mxu1 %v13100_v38 }
 0x971   :  { %11600 = vmatmul.mubr.f32.gmra.mrb[144].mxu1 %v18356_v11 }
 0x972   :  { %13103 = vmatpush3.bf16.msra.mxu1 %v13100_v38  ;;  %11690 = vmatprep.mubr.f32.mxu1 %v15483_v55 }
 0x975   :  { %11691 = vmatmul.mubr.f32.vlgmr.msra.gmra.mrb[146].mxu1 %v15502_v4 }
 0x976   :  { %11693 = vmatprep.mubr.f32.mxu1 %v15504_v54 }
 0x979   :  { %11694 = vmatmul.mubr.f32.gmra.mrb[148].mxu1 %v15523_v25 }
 0x97a   :  { %11696 = vmatprep.mubr.f32.mxu1 %v15526_v37 }
 0x97d   :  { %11697 = vmatmul.mubr.f32.gmra.mrb[150].mxu1 %v15545_v29 }
 0x97e   :  { %11699 = vmatprep.mubr.f32.mxu1 %v15548_v24 }
 0x981   :  { %11700 = vmatmul.mubr.f32.gmra.mrb[152].mxu1 %v15567_v59 }
 0x982   :  { %11702 = vmatprep.mubr.f32.mxu1 %v15570_v30 }
 0x985   :  { %11703 = vmatmul.mubr.f32.gmra.mrb[154].mxu1 %v15589_v61 }
 0x986   :  { %11705 = vmatprep.mubr.f32.mxu1 %v15592_v13 }
 0x989   :  { %11706 = vmatmul.mubr.f32.gmra.mrb[156].mxu1 %v15611_v15 }
 0x98a   :  { %11708 = vmatprep.mubr.f32.mxu1 %v15614_v17 }
 0x98d   :  { %11709 = vmatmul.mubr.f32.gmra.mrb[158].mxu1 %v18354_v45 }
 0x98e   :  { %11711 = vmatprep.mubr.f32.mxu1 %v18355_v42 }
 0x991   :  { %11712 = vmatmul.mubr.f32.gmra.mrb[160].mxu1 %v18356_v11 }
 0x9dd   :  { %v4070_v18 = vpop.xlane.xlu0 %4069 }
 0x9de   :  { %13455 = vrcp.f32 %v4070_v18  ;;  %v4068_v34 = vpop.xlane.xlu1 %4067 }
 0x9df   :  { %13457 = vrcp.f32 %v4068_v34 }
 0x9e1   :  { %v4074_v5 = vpop.xlane.xlu0 %4073 }
 0x9e2   :  { %13459 = vrcp.f32 %v4074_v5  ;;  %v4072_v20 = vpop.xlane.xlu1 %4071 }
 0x9e3   :  { %13461 = vrcp.f32 %v4072_v20 }
 0x9e5   :  { %v4078_v35 = vpop.xlane.xlu0 %4077 }
 0x9e6   :  { %13463 = vrcp.f32 %v4078_v35  ;;  %v4076_v19 = vpop.xlane.xlu1 %4075 }
 0x9e7   :  { %13465 = vrcp.f32 %v4076_v19 }
 0x9e8   :  { %v13456_v63 = vpop.eup %13455 }
 0x9e9   :  { %v13458_v51 = vpop.eup %13457  ;;  %v4082_v62 = vpop.xlane.xlu0 %4081  ;;  %v4116_v60 = vmul.f32 %v13456_v63, %v16737_v58 }
 0x9ea   :  { %13467 = vrcp.f32 %v4082_v62  ;;  %v4080_v8 = vpop.xlane.xlu1 %4079  ;;  %v4115_v43 = vmul.f32 %v13458_v51, %v16739_v7 }
 0x9eb   :  { %13469 = vrcp.f32 %v4080_v8  ;;  %v18357_v8 = vld [vmem:[#allocation21_spill] sm:$0xff] }
 0x9ec   :  { %v13460_v41 = vpop.eup %13459  ;;  %11146 = vmatprep.mubr.f32.mxu0 %v4115_v43 }
 0x9ed   :  { %v13462_v21 = vpop.eup %13461  ;;  %v4086_v6 = vpop.xlane.xlu0 %4085  ;;  %11147 = vmatmul.mubr.f32.vlgmr.msra.gmra.mrb[126].mxu0 %v4116_v60  ;;  %v4118_v44 = vmul.f32 %v13460_v41, %v16754_v0  ;;  %v18358_v60 = vld [vmem:[#allocation22_spill] sm:$0xff] }
 0x9ee   :  { %13471 = vrcp.f32 %v4086_v6  ;;  %v4084_v9 = vpop.xlane.xlu1 %4083  ;;  %v4117_v36 = vmul.f32 %v13462_v21, %v16756_v40 }
 0x9ef   :  { %13473 = vrcp.f32 %v4084_v9 }
 0x9f0   :  { %v13464_v33 = vpop.eup %13463  ;;  %11149 = vmatprep.mubr.f32.mxu0 %v4117_v36  ;;  %v18360_v36 = vld [vmem:[#allocation24_spill] sm:$0xff] }
 0x9f1   :  { %v13466_v22 = vpop.eup %13465  ;;  %v4090_v16 = vpop.xlane.xlu0 %4089  ;;  %11150 = vmatmul.mubr.f32.gmra.mrb[128].mxu0 %v4118_v44  ;;  %v4120_v46 = vmul.f32 %v13464_v33, %v16770_v27 }
 0x9f2   :  { %13475 = vrcp.f32 %v4090_v16  ;;  %v4088_v7 = vpop.xlane.xlu1 %4087  ;;  %v4119_v58 = vmul.f32 %v13466_v22, %v16772_v12 }
 0x9f3   :  { %13477 = vrcp.f32 %v4088_v7  ;;  %v18361_v7 = vld [vmem:[#allocation25_spill] sm:$0xff] }
 0x9f4   :  { %v13468_v2 = vpop.eup %13467  ;;  %11152 = vmatprep.mubr.f32.mxu0 %v4119_v58 }
 0x9f5   :  { %v13470_v39 = vpop.eup %13469  ;;  %v4094_v1 = vpop.xlane.xlu0 %4093  ;;  %11153 = vmatmul.mubr.f32.gmra.mrb[130].mxu0 %v4120_v46  ;;  %v4122_v48 = vmul.f32 %v13468_v2, %v16786_v26  ;;  %v18362_v2 = vld [vmem:[#allocation26_spill] sm:$0xff] }
 0x9f6   :  { %13479 = vrcp.f32 %v4094_v1  ;;  %v4092_v40 = vpop.xlane.xlu1 %4091  ;;  %v4121_v0 = vmul.f32 %v13470_v39, %v16788_v56 }
 0x9f7   :  { %13481 = vrcp.f32 %v4092_v40 }
 0x9f8   :  { %v13472_v52 = vpop.eup %13471  ;;  %11155 = vmatprep.mubr.f32.mxu0 %v4121_v0 }
 0x9f9   :  { %v13474_v31 = vpop.eup %13473  ;;  %v4098_v23 = vpop.xlane.xlu0 %4097  ;;  %11156 = vmatmul.mubr.f32.gmra.mrb[132].mxu0 %v4122_v48  ;;  %v4124_v3 = vmul.f32 %v13472_v52, %v16802_v57  ;;  %v18363_v48 = vld [vmem:[#allocation27_spill] sm:$0xff] }
 0x9fa   :  { %13483 = vrcp.f32 %v4098_v23  ;;  %v4096_v12 = vpop.xlane.xlu1 %4095  ;;  %v4123_v27 = vmul.f32 %v13474_v31, %v16804_v50  ;;  %v18364_v23 = vld [vmem:[#allocation28_spill] sm:$0xff] }
 0x9fb   :  { %13485 = vrcp.f32 %v4096_v12 }
 0x9fc   :  { %v13476_v38 = vpop.eup %13475  ;;  %11158 = vmatprep.mubr.f32.mxu0 %v4123_v27 }
 0x9fd   :  { %v13478_v18 = vpop.eup %13477  ;;  %11159 = vmatmul.mubr.f32.gmra.mrb[134].mxu0 %v4124_v3  ;;  %v4126_v26 = vmul.f32 %v13476_v38, %v16816_v32 }
 0x9fe   :  { %v4125_v56 = vmul.f32 %v13478_v18, %v16818_v10  ;;  %v18365_v18 = vld [vmem:[#allocation29_spill] sm:$0xff] }
 0xa00   :  { %v13480_v34 = vpop.eup %13479  ;;  %11161 = vmatprep.mubr.f32.mxu0 %v4125_v56 }
 0xa01   :  { %v13482_v5 = vpop.eup %13481  ;;  %11162 = vmatmul.mubr.f32.gmra.mrb[136].mxu0 %v4126_v26  ;;  %v4128_v35 = vmul.f32 %v13480_v34, %v16830_v53  ;;  %v18366_v34 = vld [vmem:[#allocation30_spill] sm:$0xff] }
 0xa02   :  { %v4127_v20 = vmul.f32 %v13482_v5, %v16832_v28 }
 0xa04   :  { %v13484_v50 = vpop.eup %13483  ;;  %11164 = vmatprep.mubr.f32.mxu0 %v4127_v20 }
 0xa05   :  { %v13486_v19 = vpop.eup %13485  ;;  %11165 = vmatmul.mubr.f32.gmra.mrb[138].mxu0 %v4128_v35  ;;  %v4130_v63 = vmul.f32 %v13484_v50, %v16844_v14  ;;  %v18359_v14 = vld [vmem:[#allocation23_spill] sm:$0xff] }
 0xa06   :  { %v4129_v57 = vmul.f32 %v13486_v19, %v16846_v49  ;;  %v18367_v19 = vld [vmem:[#allocation31_spill] sm:$0xff] }
 0xa08   :  { %v11436_v51 = vpop.f32.mrb[114].mxu1  ;;  %11167 = vmatprep.mubr.f32.mxu0 %v4129_v57 }
 0xa09   :  { %v5419_v10 = vmul.f32 0.17677669, %v11436_v51  ;;  %v5339_v32 = vpop.f32.mrb[115].mxu1  ;;  %11168 = vmatmul.mubr.f32.gmra.mrb[140].mxu0 %v4130_v63  ;;  %v18368_v51 = vld [vmem:[#allocation32_spill] sm:$0xff] }
 0xa0a   :  { %v5418_v62 = vmul.f32 0.17677669, %v5339_v32 }
 0xa0b   :  { %v16886_v43 = vadd.f32 %v18357_v8, %v5419_v10 }
 0xa0c   :  { %v11439_v28 = vpop.f32.mrb[116].mxu1  ;;  %v16889_v53 = vadd.f32 %v18358_v60, %v5418_v62 }
 0xa0d   :  { %v5421_v41 = vmul.f32 0.17677669, %v11439_v28  ;;  %5452 = vmax.xlane.f32.xlu0 %v16886_v43  ;;  %v5349_v21 = vpop.f32.mrb[117].mxu1  ;;  %v18369_v28 = vld [vmem:[#allocation33_spill] sm:$0xff] }
 0xa0e   :  { %v5420_v49 = vmul.f32 0.17677669, %v5349_v21  ;;  %5450 = vmax.xlane.f32.xlu1 %v16889_v53  ;;  %v18370_v21 = vld [vmem:[#allocation34_spill] sm:$0xff] }
 0xa0f   :  { %v16894_v6 = vadd.f32 %v18359_v14, %v5421_v41 }
 0xa10   :  { %v11442_v9 = vpop.f32.mrb[118].mxu1  ;;  %v16897_v44 = vadd.f32 %v18360_v36, %v5420_v49 }
 0xa11   :  { %v5423_v33 = vmul.f32 0.17677669, %v11442_v9  ;;  %5456 = vmax.xlane.f32.xlu0 %v16894_v6  ;;  %v5359_v22 = vpop.f32.mrb[119].mxu1 }
 0xa12   :  { %v5422_v16 = vmul.f32 0.17677669, %v5359_v22  ;;  %5454 = vmax.xlane.f32.xlu1 %v16897_v44  ;;  %v18371_v22 = vld [vmem:[#allocation35_spill] sm:$0xff] }
 0xa13   :  { %v16902_v58 = vadd.f32 %v18361_v7, %v5423_v33  ;;  %v8783_v33 = vld [vmem:[%s18318_s28 + $0x3] ss:$0 sm:$0xff] }
 0xa14   :  { %v11445_v46 = vpop.f32.mrb[120].mxu1  ;;  %v16905_v39 = vadd.f32 %v18362_v2, %v5422_v16 }
 0xa15   :  { %v5425_v1 = vmul.f32 0.17677669, %v11445_v46  ;;  %5460 = vmax.xlane.f32.xlu0 %v16902_v58  ;;  %v5369_v40 = vpop.f32.mrb[121].mxu1  ;;  %v18372_v46 = vld [vmem:[#allocation36_spill] sm:$0xff] }
 0xa16   :  { %v5424_v0 = vmul.f32 0.17677669, %v5369_v40  ;;  %5458 = vmax.xlane.f32.xlu1 %v16905_v39 }
 0xa17   :  { %v16910_v52 = vadd.f32 %v18363_v48, %v5425_v1  ;;  %v8625_v48 = vld [vmem:[%s18245_s14 + $0x28] sm:$0xff] }
 0xa18   :  { %v11448_v31 = vpop.f32.mrb[122].mxu1  ;;  %v16913_v12 = vadd.f32 %v18364_v23, %v5424_v0  ;;  %v8624_v0 = vld [vmem:[%s18245_s14 + $0x20] sm:$0xff] }
 0xa19   :  { %v5427_v27 = vmul.f32 0.17677669, %v11448_v31  ;;  %5464 = vmax.xlane.f32.xlu0 %v16910_v52  ;;  %v5379_v3 = vpop.f32.mrb[123].mxu1  ;;  %v12808_v31 = vpack.c.bf16 %v8625_v48, %v8624_v0 }
 0xa1a   :  { %v5426_v38 = vmul.f32 0.17677669, %v5379_v3  ;;  %5462 = vmax.xlane.f32.xlu1 %v16913_v12 }
 0xa1b   :  { %v16918_v56 = vadd.f32 %v18365_v18, %v5427_v27  ;;  %12809 = vmatprep.subr.bf16.mxu0 %v12808_v31 }
 0xa1c   :  { %v11451_v26 = vpop.f32.mrb[124].mxu1  ;;  %v16921_v5 = vadd.f32 %v18366_v34, %v5426_v38  ;;  %12811 = vmatpush3.bf16.msra.mxu0 %v12808_v31  ;;  %v3200_v31 = vld [vmem:[%s18245_s14] sm:$0xff] }
 0xa1d   :  { %v5429_v20 = vmul.f32 0.17677669, %v11451_v26  ;;  %5468 = vmax.xlane.f32.xlu0 %v16918_v56  ;;  %v5389_v35 = vpop.f32.mrb[125].mxu1 }
 0xa1e   :  { %v5428_v50 = vmul.f32 0.17677669, %v5389_v35  ;;  %5466 = vmax.xlane.f32.xlu1 %v16921_v5 }
 0xa1f   :  { %v16926_v57 = vadd.f32 %v18367_v19, %v5429_v20 }
 0xa20   :  { %v11454_v63 = vpop.f32.mrb[126].mxu1  ;;  %v16929_v10 = vadd.f32 %v18368_v51, %v5428_v50 }
 0xa21   :  { %v5431_v32 = vmul.f32 0.17677669, %v11454_v63  ;;  %5472 = vmax.xlane.f32.xlu0 %v16926_v57  ;;  %v5399_v62 = vpop.f32.mrb[127].mxu1 }
 0xa22   :  { %v5430_v8 = vmul.f32 0.17677669, %v5399_v62  ;;  %5470 = vmax.xlane.f32.xlu1 %v16929_v10  ;;  %v8627_v62 = vld [vmem:[%s18245_s14 + $0x38] sm:$0xff] }
 0xa23   :  { %v16934_v60 = vadd.f32 %v18369_v28, %v5431_v32  ;;  %v8626_v32 = vld [vmem:[%s18245_s14 + $0x30] sm:$0xff] }
 0xa24   :  { %v11457_v41 = vpop.f32.mrb[128].mxu1  ;;  %v16937_v49 = vadd.f32 %v18370_v21, %v5430_v8 }
 0xa25   :  { %v5433_v14 = vmul.f32 0.17677669, %v11457_v41  ;;  %5476 = vmax.xlane.f32.xlu0 %v16934_v60  ;;  %v5409_v9 = vpop.f32.mrb[129].mxu1  ;;  %v12812_v41 = vpack.c.bf16 %v8627_v62, %v8626_v32 }
 0xa26   :  { %v5432_v36 = vmul.f32 0.17677669, %v5409_v9  ;;  %5474 = vmax.xlane.f32.xlu1 %v16937_v49 }
 0xa27   :  { %v16945_v16 = vadd.f32 %v18371_v22, %v5433_v14  ;;  %12813 = vmatprep.subr.bf16.mxu0 %v12812_v41 }
 0xa28   :  { %v11580_v7 = vpop.f32.mrb[130].mxu1  ;;  %v16948_v2 = vadd.f32 %v18372_v46, %v5432_v36  ;;  %12815 = vmatpush3.bf16.msra.mxu0 %v12812_v41 }
 0xa29   :  { %v16950_v1 = vadd.f32 %v11580_v7, %v8783_v33  ;;  %5480 = vmax.xlane.f32.xlu0 %v16945_v16  ;;  %v16953_v40 = vpop.f32.mrb[131].mxu1 }
 0xa2a   :  { %5478 = vmax.xlane.f32.xlu1 %v16948_v2 }
 0xa2c   :  { %v11583_v23 = vpop.f32.mrb[132].mxu1 }
 0xa2d   :  { %v16962_v27 = vadd.f32 %v11583_v23, %v8783_v33  ;;  %v6054_v3 = vpop.f32.mrb[133].mxu1  ;;  %v3201_v23 = vld [vmem:[%s18245_s14 + $0x8] sm:$0xff] }
 0xa2e   :  { %v16964_v38 = vadd.f32 %v8783_v33, %v6054_v3 }
 0xa30   :  { %v11586_v18 = vpop.f32.mrb[134].mxu1 }
 0xa31   :  { %v16966_v26 = vadd.f32 %v11586_v18, %v8783_v33  ;;  %v6064_v34 = vpop.f32.mrb[135].mxu1  ;;  %v16998_v18 = vpack.c.bf16 %v3201_v23, %v3200_v31 }
 0xa32   :  { %v16968_v20 = vadd.f32 %v8783_v33, %v6064_v34 }
 0xa33   :  { %12817 = vmatprep.subr.bf16.mxu0 %v16998_v18 }
 0xa34   :  { %v11589_v35 = vpop.f32.mrb[136].mxu1 }
 0xa35   :  { %v16970_v50 = vadd.f32 %v11589_v35, %v8783_v33  ;;  %v6074_v19 = vpop.f32.mrb[137].mxu1 }
 0xa36   :  { %v16972_v63 = vadd.f32 %v8783_v33, %v6074_v19 }
 0xa38   :  { %v11592_v51 = vpop.f32.mrb[138].mxu1 }
 0xa39   :  { %v16980_v8 = vadd.f32 %v11592_v51, %v8783_v33  ;;  %v6084_v28 = vpop.f32.mrb[139].mxu1  ;;  %v8819_v51 = vld [vmem:[%s18243_s13 + $0x3] ss:$0 sm:$0xff] }
 0xa3a   :  { %v16982_v21 = vadd.f32 %v8783_v33, %v6084_v28 }
 0xa3c   :  { %v11595_v14 = vpop.f32.mrb[140].mxu1 }
 0xa3d   :  { %v16984_v9 = vadd.f32 %v11595_v14, %v8783_v33  ;;  %v6094_v36 = vpop.f32.mrb[141].mxu1 }
 0xa3e   :  { %v16986_v22 = vadd.f32 %v8783_v33, %v6094_v36 }
 0xa3f   :  { %18373 = vst [vmem:[#allocation2_spill] sm:$0xff] %v16984_v9 }
 0xa40   :  { %v11598_v7 = vpop.f32.mrb[142].mxu1 }
 0xa41   :  { %v16988_v46 = vadd.f32 %v11598_v7, %v8783_v33  ;;  %v6104_v0 = vpop.f32.mrb[143].mxu1 }
 0xa42   :  { %v16990_v48 = vadd.f32 %v8783_v33, %v6104_v0 }
 0xa43   :  { %18374 = vst [vmem:[#allocation3_spill] sm:$0xff] %v16988_v46 }
 0xa44   :  { %18375 = vst [vmem:[#allocation4_spill] sm:$0xff] %v16990_v48  ;;  %v11601_v3 = vpop.f32.mrb[144].mxu1 }
 0xa45   :  { %v17000_v34 = vadd.f32 %v11601_v3, %v8783_v33  ;;  %v6114_v35 = vpop.f32.mrb[145].mxu1 }
 0xa46   :  { %v17002_v19 = vadd.f32 %v8783_v33, %v6114_v35  ;;  %v18394_v47 = vld [vmem:[#allocation2_spill] sm:$0xff] }
 0xa47   :  { %18376 = vst [vmem:[#allocation21_spill] sm:$0xff] %v17000_v34 }
 0xa48   :  { %18377 = vst [vmem:[#allocation22_spill] sm:$0xff] %v17002_v19  ;;  %v11692_v32 = vpop.f32.mrb[146].mxu1 }
 0xa49   :  { %v6390_v62 = vadd.f32 %v11692_v32, %v8819_v51  ;;  %v6384_v28 = vpop.f32.mrb[147].mxu1 }
 0xa4a   :  { %v6385_v41 = vadd.f32 %v8819_v51, %v6384_v28 }
 0xa4c   :  { %v13152_v14 = vpack.c.bf16 %v6390_v62, %v6385_v41  ;;  %v11695_v36 = vpop.f32.mrb[148].mxu1 }
 0xa4d   :  { %v6400_v7 = vadd.f32 %v11695_v36, %v8819_v51  ;;  %v6394_v0 = vpop.f32.mrb[149].mxu1 }
 0xa4e   :  { %v6395_v31 = vadd.f32 %v8819_v51, %v6394_v0  ;;  %13153 = vmatprep.subr.bf16.mxu1 %v13152_v14 }
 0xa4f   :  { %13155 = vmatpush3.bf16.msra.mxu1 %v13152_v14 }
 0xa50   :  { %v13156_v23 = vpack.c.bf16 %v6400_v7, %v6395_v31  ;;  %v11698_v33 = vpop.f32.mrb[150].mxu1 }
 0xa51   :  { %v6410_v3 = vadd.f32 %v11698_v33, %v8819_v51  ;;  %v6404_v35 = vpop.f32.mrb[151].mxu1 }
 0xa52   :  { %v6405_v34 = vadd.f32 %v8819_v51, %v6404_v35  ;;  %13157 = vmatprep.subr.bf16.mxu1 %v13156_v23 }
 0xa53   :  { %13159 = vmatpush3.bf16.msra.mxu1 %v13156_v23 }
 0xa54   :  { %v13160_v19 = vpack.c.bf16 %v6410_v3, %v6405_v34  ;;  %v11701_v46 = vpop.f32.mrb[152].mxu1 }
 0xa55   :  { %v6420_v48 = vadd.f32 %v11701_v46, %v8819_v51  ;;  %v6414_v32 = vpop.f32.mrb[153].mxu1 }
 0xa56   :  { %v6415_v9 = vadd.f32 %v8819_v51, %v6414_v32  ;;  %13161 = vmatprep.subr.bf16.mxu1 %v13160_v19 }
 0xa57   :  { %13163 = vmatpush3.bf16.msra.mxu1 %v13160_v19 }
 0xa58   :  { %v13164_v62 = vpack.c.bf16 %v6420_v48, %v6415_v9  ;;  %v11704_v28 = vpop.f32.mrb[154].mxu1 }
 0xa59   :  { %v6430_v41 = vadd.f32 %v11704_v28, %v8819_v51  ;;  %v6424_v36 = vpop.f32.mrb[155].mxu1 }
 0xa5a   :  { %v6425_v0 = vadd.f32 %v8819_v51, %v6424_v36  ;;  %13165 = vmatprep.subr.bf16.mxu1 %v13164_v62 }
 0xa5b   :  { %13167 = vmatpush3.bf16.msra.mxu1 %v13164_v62 }
 0xa5c   :  { %v13168_v14 = vpack.c.bf16 %v6430_v41, %v6425_v0  ;;  %v11707_v7 = vpop.f32.mrb[156].mxu1 }
 0xa5d   :  { %v6440_v31 = vadd.f32 %v11707_v7, %v8819_v51  ;;  %v6434_v33 = vpop.f32.mrb[157].mxu1 }
 0xa5e   :  { %v6435_v35 = vadd.f32 %v8819_v51, %v6434_v33  ;;  %13169 = vmatprep.subr.bf16.mxu1 %v13168_v14 }
 0xa5f   :  { %13171 = vmatpush3.bf16.msra.mxu1 %v13168_v14 }
 0xa60   :  { %v13172_v34 = vpack.c.bf16 %v6440_v31, %v6435_v35  ;;  %v11710_v46 = vpop.f32.mrb[158].mxu1 }
 0xa61   :  { %v6450_v23 = vadd.f32 %v11710_v46, %v8819_v51  ;;  %v6444_v3 = vpop.f32.mrb[159].mxu1 }
 0xa62   :  { %v6445_v32 = vadd.f32 %v8819_v51, %v6444_v3  ;;  %13173 = vmatprep.subr.bf16.mxu1 %v13172_v34 }
 0xa63   :  { %13175 = vmatpush3.bf16.msra.mxu1 %v13172_v34 }
 0xa64   :  { %v13176_v9 = vpack.c.bf16 %v6450_v23, %v6445_v32  ;;  %v11713_v48 = vpop.f32.mrb[160].mxu1 }
 0xa65   :  { %v6460_v19 = vadd.f32 %v11713_v48, %v8819_v51  ;;  %v6454_v28 = vpop.f32.mrb[161].mxu1 }
 0xa66   :  { %v6455_v36 = vadd.f32 %v8819_v51, %v6454_v28  ;;  %13177 = vmatprep.subr.bf16.mxu1 %v13176_v9 }
 0xa67   :  { %13179 = vmatpush3.bf16.msra.mxu1 %v13176_v9 }
 0xa68   :  { %v13180_v62 = vpack.c.bf16 %v6460_v19, %v6455_v36 }
 0xa6a   :  { %13181 = vmatprep.subr.bf16.mxu1 %v13180_v62 }
 0xa6b   :  { %13183 = vmatpush3.bf16.msra.mxu1 %v13180_v62 }
 0xa9a   :  { %v5453_v41 = vpop.xlane.xlu0 %5452 }
 0xa9b   :  { %v5483_v0 = vsub.f32 %v16886_v43, %v5453_v41  ;;  %v5451_v14 = vpop.xlane.xlu1 %5450 }
 0xa9c   :  { %v5482_v7 = vsub.f32 %v16889_v53, %v5451_v14 }
 0xa9d   :  { %v5500_v31 = vmul.f32 1.442695, %v5483_v0 }
 0xa9e   :  { %v5498_v33 = vmul.f32 1.442695, %v5482_v7  ;;  %v5457_v35 = vpop.xlane.xlu0 %5456 }
 0xa9f   :  { %13487 = vpow2.f32 %v5500_v31  ;;  %v5485_v34 = vsub.f32 %v16894_v6, %v5457_v35  ;;  %v5455_v46 = vpop.xlane.xlu1 %5454 }
 0xaa0   :  { %13489 = vpow2.f32 %v5498_v33  ;;  %v5484_v51 = vsub.f32 %v16897_v44, %v5455_v46 }
 0xaa1   :  { %v5504_v23 = vmul.f32 1.442695, %v5485_v34 }
 0xaa2   :  { %v5502_v3 = vmul.f32 1.442695, %v5484_v51  ;;  %v5461_v32 = vpop.xlane.xlu0 %5460 }
 0xaa3   :  { %13491 = vpow2.f32 %v5504_v23  ;;  %v5487_v9 = vsub.f32 %v16902_v58, %v5461_v32  ;;  %v5459_v43 = vpop.xlane.xlu1 %5458 }
 0xaa4   :  { %13493 = vpow2.f32 %v5502_v3  ;;  %v5486_v53 = vsub.f32 %v16905_v39, %v5459_v43 }
 0xaa5   :  { %v5508_v48 = vmul.f32 1.442695, %v5487_v9 }
 0xaa6   :  { %v5506_v19 = vmul.f32 1.442695, %v5486_v53  ;;  %v5465_v28 = vpop.xlane.xlu0 %5464 }
 0xaa7   :  { %13495 = vpow2.f32 %v5508_v48  ;;  %v5489_v6 = vsub.f32 %v16910_v52, %v5465_v28  ;;  %v5463_v36 = vpop.xlane.xlu1 %5462 }
 0xaa8   :  { %13497 = vpow2.f32 %v5506_v19  ;;  %v5488_v44 = vsub.f32 %v16913_v12, %v5463_v36 }
 0xaa9   :  { %v17016_v62 = vpop.eup %13487  ;;  %v5512_v41 = vmul.f32 1.442695, %v5489_v6 }
 0xaaa   :  { %v17018_v0 = vpop.eup %13489  ;;  %v5510_v58 = vmul.f32 1.442695, %v5488_v44  ;;  %v5469_v14 = vpop.xlane.xlu0 %5468  ;;  %5532 = vadd.xlane.f32.xlu0 %v17016_v62 }
 0xaab   :  { %13499 = vpow2.f32 %v5512_v41  ;;  %v5491_v39 = vsub.f32 %v16918_v56, %v5469_v14  ;;  %5530 = vadd.xlane.f32.xlu1 %v17018_v0  ;;  %v5467_v7 = vpop.xlane.xlu1 %5466 }
 0xaac   :  { %13501 = vpow2.f32 %v5510_v58  ;;  %v5490_v52 = vsub.f32 %v16921_v5, %v5467_v7  ;;  %v3203_v7 = vld [vmem:[%s18245_s14 + $0x18] sm:$0xff] }
 0xaad   :  { %v17024_v31 = vpop.eup %13491  ;;  %v5516_v12 = vmul.f32 1.442695, %v5491_v39 }
 0xaae   :  { %v17026_v33 = vpop.eup %13493  ;;  %v5514_v35 = vmul.f32 1.442695, %v5490_v52  ;;  %v5473_v34 = vpop.xlane.xlu0 %5472  ;;  %5536 = vadd.xlane.f32.xlu0 %v17024_v31 }
 0xaaf   :  { %13503 = vpow2.f32 %v5516_v12  ;;  %v5493_v46 = vsub.f32 %v16926_v57, %v5473_v34  ;;  %5534 = vadd.xlane.f32.xlu1 %v17026_v33  ;;  %v5471_v56 = vpop.xlane.xlu1 %5470 }
 0xab0   :  { %13505 = vpow2.f32 %v5514_v35  ;;  %v5492_v51 = vsub.f32 %v16929_v10, %v5471_v56  ;;  %v8696_v56 = vld [vmem:[%s18313_s10 + $0x100] sm:$0xff] }
 0xab1   :  { %v17032_v23 = vpop.eup %13495  ;;  %v5520_v5 = vmul.f32 1.442695, %v5493_v46 }
 0xab2   :  { %v17034_v3 = vpop.eup %13497  ;;  %v5518_v32 = vmul.f32 1.442695, %v5492_v51  ;;  %v5477_v9 = vpop.xlane.xlu0 %5476  ;;  %5540 = vadd.xlane.f32.xlu0 %v17032_v23  ;;  %v8697_v51 = vld [vmem:[%s18313_s10 + $0x108] sm:$0xff] }
 0xab3   :  { %13507 = vpow2.f32 %v5520_v5  ;;  %v5495_v43 = vsub.f32 %v16934_v60, %v5477_v9  ;;  %5538 = vadd.xlane.f32.xlu1 %v17034_v3  ;;  %v5475_v57 = vpop.xlane.xlu1 %5474 }
 0xab4   :  { %13509 = vpow2.f32 %v5518_v32  ;;  %v5494_v53 = vsub.f32 %v16937_v49, %v5475_v57 }
 0xab5   :  { %v17040_v48 = vpop.eup %13499  ;;  %v5524_v10 = vmul.f32 1.442695, %v5495_v43  ;;  %v12888_v43 = vpack.c.bf16 %v8697_v51, %v8696_v56  ;;  %v8700_v51 = vld [vmem:[%s18313_s10 + $0x120] sm:$0xff] }
 0xab6   :  { %v17042_v19 = vpop.eup %13501  ;;  %v5522_v28 = vmul.f32 1.442695, %v5494_v53  ;;  %5544 = vadd.xlane.f32.xlu0 %v17040_v48  ;;  %v5481_v6 = vpop.xlane.xlu0 %5480 }
 0xab7   :  { %13511 = vpow2.f32 %v5524_v10  ;;  %v5497_v36 = vsub.f32 %v16945_v16, %v5481_v6  ;;  %5542 = vadd.xlane.f32.xlu1 %v17042_v19  ;;  %v5479_v60 = vpop.xlane.xlu1 %5478 }
 0xab8   :  { %13513 = vpow2.f32 %v5522_v28  ;;  %v5496_v44 = vsub.f32 %v16948_v2, %v5479_v60  ;;  %v3202_v2 = vld [vmem:[%s18245_s14 + $0x10] sm:$0xff] }
 0xab9   :  { %v17048_v41 = vpop.eup %13503  ;;  %v5528_v49 = vmul.f32 1.442695, %v5497_v36  ;;  %v12820_v34 = vpack.c.bf16 %v3203_v7, %v3202_v2 }
 0xaba   :  { %v17050_v58 = vpop.eup %13505  ;;  %v5526_v14 = vmul.f32 1.442695, %v5496_v44  ;;  %5548 = vadd.xlane.f32.xlu0 %v17048_v41 }
 0xabb   :  { %13515 = vpow2.f32 %v5528_v49  ;;  %5546 = vadd.xlane.f32.xlu1 %v17050_v58 }
 0xabc   :  { %13517 = vpow2.f32 %v5526_v14 }
 0xabd   :  { %v17054_v39 = vpop.eup %13507 }
 0xabe   :  { %v17056_v16 = vpop.eup %13509  ;;  %5552 = vadd.xlane.f32.xlu0 %v17054_v39 }
 0xabf   :  { %5550 = vadd.xlane.f32.xlu1 %v17056_v16 }
 0xac0   :  { %v11148_v52 = vpop.f32.mrb[126].mxu0 }
 0xac1   :  { %v17066_v12 = vpop.eup %13511  ;;  %v4197_v35 = vpop.f32.mrb[127].mxu0 }
 0xac2   :  { %v17068_v46 = vpop.eup %13513  ;;  %5556 = vadd.xlane.f32.xlu0 %v17066_v12  ;;  %11178 = vmatprep.mubr.msk.f32.mxu0 %vm2637_vm8, %v4197_v35  ;;  %v8699_v35 = vld [vmem:[%s18313_s10 + $0x118] sm:$0xff] }
 0xac3   :  { %5554 = vadd.xlane.f32.xlu1 %v17068_v46  ;;  %11179 = vmatmul.mubr.msk.f32.vlgmr.msra.gmra.mrb[142].mxu0 %vm2637_vm8, %v11148_v52  ;;  %v8698_v52 = vld [vmem:[%s18313_s10 + $0x110] sm:$0xff] }
 0xac4   :  { %v11151_v5 = vpop.f32.mrb[128].mxu0  ;;  %12819 = vmatpush3.bf16.msra.mxu0 %v16998_v18  ;;  %v12892_v56 = vpack.c.bf16 %v8699_v35, %v8698_v52  ;;  %v8707_v52 = vld [vmem:[%s18313_s10 + $0x158] sm:$0xff]  ;;  %v18385_v35 = vld [vmem:[#allocation11_spill] sm:$0xff] }
 0xac5   :  { %v17081_v32 = vpop.eup %13515  ;;  %v4207_v9 = vpop.f32.mrb[129].mxu0  ;;  %12821 = vmatprep.subr.bf16.mxu0 %v12820_v34 }
 0xac6   :  { %v17083_v57 = vpop.eup %13517  ;;  %5560 = vadd.xlane.f32.xlu0 %v17081_v32  ;;  %11181 = vmatprep.mubr.msk.f32.mxu0 %vm2637_vm8, %v4207_v9  ;;  %v18379_v9 = vld [vmem:[#allocation5_spill] sm:$0xff] }
 0xac7   :  { %5558 = vadd.xlane.f32.xlu1 %v17083_v57  ;;  %11182 = vmatmul.mubr.msk.f32.gmra.mrb[144].mxu0 %vm2637_vm8, %v11151_v5  ;;  %v8701_v5 = vld [vmem:[%s18313_s10 + $0x128] sm:$0xff] }
 0xac8   :  { %v11154_v53 = vpop.f32.mrb[130].mxu0  ;;  %12823 = vmatpush3.bf16.msra.mxu0 %v12820_v34  ;;  %v18378_v34 = vld [vmem:[#allocation6_spill] sm:$0xff] }
 0xac9   :  { %v4217_v10 = vpop.f32.mrb[131].mxu0  ;;  %12889 = vmatprep.subr.bf16.mxu0 %v12888_v43 }
 0xaca   :  { %11184 = vmatprep.mubr.msk.f32.mxu0 %vm2637_vm8, %v4217_v10  ;;  %v12896_v10 = vpack.c.bf16 %v8701_v5, %v8700_v51  ;;  %v8708_v51 = vld [vmem:[%s18313_s10 + $0x160] sm:$0xff]  ;;  %v8709_v5 = vld [vmem:[%s18313_s10 + $0x168] sm:$0xff] }
 0xacb   :  { %11185 = vmatmul.mubr.msk.f32.gmra.mrb[146].mxu0 %vm2637_vm8, %v11154_v53  ;;  %v18380_v53 = vld [vmem:[#allocation8_spill] sm:$0xff] }
 0xacc   :  { %v11157_v18 = vpop.f32.mrb[132].mxu0 }
 0xacd   :  { %v4227_v28 = vpop.f32.mrb[133].mxu0 }
 0xace   :  { %11187 = vmatprep.mubr.msk.f32.mxu0 %vm2637_vm8, %v4227_v28  ;;  %v8703_v28 = vld [vmem:[%s18313_s10 + $0x138] sm:$0xff] }
 0xacf   :  { %11188 = vmatmul.mubr.msk.f32.gmra.mrb[148].mxu0 %vm2637_vm8, %v11157_v18  ;;  %v8702_v18 = vld [vmem:[%s18313_s10 + $0x130] sm:$0xff] }
 0xad0   :  { %v11160_v6 = vpop.f32.mrb[134].mxu0 }
 0xad1   :  { %v4237_v36 = vpop.f32.mrb[135].mxu0 }
 0xad2   :  { %11190 = vmatprep.mubr.msk.f32.mxu0 %vm2637_vm8, %v4237_v36  ;;  %v18382_v36 = vld [vmem:[#allocation10_spill] sm:$0xff] }
 0xad3   :  { %11191 = vmatmul.mubr.msk.f32.gmra.mrb[150].mxu0 %vm2637_vm8, %v11160_v6  ;;  %v18381_v6 = vld [vmem:[#allocation7_spill] sm:$0xff] }
 0xad4   :  { %v11163_v60 = vpop.f32.mrb[136].mxu0 }
 0xad5   :  { %v4247_v44 = vpop.f32.mrb[137].mxu0 }
 0xad6   :  { %11193 = vmatprep.mubr.msk.f32.mxu0 %vm2637_vm8, %v4247_v44  ;;  %v8705_v44 = vld [vmem:[%s18313_s10 + $0x148] sm:$0xff] }
 0xad7   :  { %11194 = vmatmul.mubr.msk.f32.gmra.mrb[152].mxu0 %vm2637_vm8, %v11163_v60  ;;  %v12900_v60 = vpack.c.bf16 %v8703_v28, %v8702_v18  ;;  %v8710_v18 = vld [vmem:[%s18313_s10 + $0x170] sm:$0xff]  ;;  %v8711_v28 = vld [vmem:[%s18313_s10 + $0x178] sm:$0xff] }
 0xad8   :  { %v11166_v49 = vpop.f32.mrb[138].mxu0 }
 0xad9   :  { %v4257_v14 = vpop.f32.mrb[139].mxu0 }
 0xada   :  { %11196 = vmatprep.mubr.msk.f32.mxu0 %vm2637_vm8, %v4257_v14  ;;  %v18384_v14 = vld [vmem:[#allocation12_spill] sm:$0xff] }
 0xadb   :  { %11197 = vmatmul.mubr.msk.f32.gmra.mrb[154].mxu0 %vm2637_vm8, %v11166_v49  ;;  %v18383_v49 = vld [vmem:[#allocation9_spill] sm:$0xff] }
 0xadc   :  { %v11169_v2 = vpop.f32.mrb[140].mxu0 }
 0xadd   :  { %v4267_v7 = vpop.f32.mrb[141].mxu0 }
 0xade   :  { %11199 = vmatprep.mubr.msk.f32.mxu0 %vm2637_vm8, %v4267_v7  ;;  %v8706_v7 = vld [vmem:[%s18313_s10 + $0x150] sm:$0xff] }
 0xadf   :  { %11200 = vmatmul.mubr.msk.f32.gmra.mrb[156].mxu0 %vm2637_vm8, %v11169_v2 }
 0xae0   :  { %11210 = vmatprep.mubr.msk.f32.mxu0 %vm2637_vm8, %v18378_v34  ;;  %v18386_v34 = vld [vmem:[#allocation14_spill] sm:$0xff] }
 0xae3   :  { %11211 = vmatmul.mubr.msk.f32.vlgmr.msra.gmra.mrb[142].mxu0 %vm2637_vm8, %v18379_v9  ;;  %v18387_v9 = vld [vmem:[#allocation13_spill] sm:$0xff] }
 0xae4   :  { %11213 = vmatprep.mubr.msk.f32.mxu0 %vm2637_vm8, %v18380_v53  ;;  %12891 = vmatpush3.bf16.msra.mxu0 %v12888_v43  ;;  %v8704_v43 = vld [vmem:[%s18313_s10 + $0x140] sm:$0xff]  ;;  %v18388_v53 = vld [vmem:[#allocation16_spill] sm:$0xff] }
 0xae5   :  { %12893 = vmatprep.subr.bf16.mxu0 %v12892_v56  ;;  %v12904_v2 = vpack.c.bf16 %v8705_v44, %v8704_v43  ;;  %v18391_v43 = vld [vmem:[#allocation17_spill] sm:$0xff]  ;;  %v18392_v44 = vld [vmem:[#allocation20_spill] sm:$0xff] }
 0xae7   :  { %11214 = vmatmul.mubr.msk.f32.gmra.mrb[144].mxu0 %vm2637_vm8, %v18381_v6  ;;  %v18389_v6 = vld [vmem:[#allocation15_spill] sm:$0xff] }
 0xae8   :  { %11216 = vmatprep.mubr.msk.f32.mxu0 %vm2637_vm8, %v18382_v36  ;;  %12895 = vmatpush3.bf16.msra.mxu0 %v12892_v56  ;;  %v12908_v56 = vpack.c.bf16 %v8707_v52, %v8706_v7  ;;  %v18390_v36 = vld [vmem:[#allocation18_spill] sm:$0xff] }
 0xae9   :  { %12897 = vmatprep.subr.bf16.mxu0 %v12896_v10  ;;  %v17195_v52 = vld [vmem:[%s18243_s13 + $0x2] ss:$0 sm:$0xff] }
 0xaeb   :  { %11217 = vmatmul.mubr.msk.f32.gmra.mrb[146].mxu0 %vm2637_vm8, %v18383_v49  ;;  %v18393_v49 = vld [vmem:[#allocation19_spill] sm:$0xff] }
 0xaec   :  { %11219 = vmatprep.mubr.msk.f32.mxu0 %vm2637_vm8, %v18384_v14  ;;  %12899 = vmatpush3.bf16.msra.mxu0 %v12896_v10  ;;  %v12912_v10 = vpack.c.bf16 %v8709_v5, %v8708_v51 }
 0xaed   :  { %12901 = vmatprep.subr.bf16.mxu0 %v12900_v60 }
 0xaef   :  { %11220 = vmatmul.mubr.msk.f32.gmra.mrb[148].mxu0 %vm2637_vm8, %v18385_v35 }
 0xaf0   :  { %11222 = vmatprep.mubr.msk.f32.mxu0 %vm2637_vm8, %v18386_v34  ;;  %12903 = vmatpush3.bf16.msra.mxu0 %v12900_v60  ;;  %v12916_v60 = vpack.c.bf16 %v8711_v28, %v8710_v18 }
 0xaf1   :  { %12905 = vmatprep.subr.bf16.mxu0 %v12904_v2 }
 0xaf3   :  { %11223 = vmatmul.mubr.msk.f32.gmra.mrb[150].mxu0 %vm2637_vm8, %v18387_v9 }
 0xaf4   :  { %11225 = vmatprep.mubr.msk.f32.mxu0 %vm2637_vm8, %v18388_v53  ;;  %12907 = vmatpush3.bf16.msra.mxu0 %v12904_v2 }
 0xaf5   :  { %12909 = vmatprep.subr.bf16.mxu0 %v12908_v56 }
 0xaf7   :  { %11226 = vmatmul.mubr.msk.f32.gmra.mrb[152].mxu0 %vm2637_vm8, %v18389_v6 }
 0xaf8   :  { %11228 = vmatprep.mubr.msk.f32.mxu0 %vm2637_vm8, %v18390_v36  ;;  %12911 = vmatpush3.bf16.msra.mxu0 %v12908_v56 }
 0xaf9   :  { %12913 = vmatprep.subr.bf16.mxu0 %v12912_v10 }
 0xafb   :  { %11229 = vmatmul.mubr.msk.f32.gmra.mrb[154].mxu0 %vm2637_vm8, %v18391_v43 }
 0xafc   :  { %11231 = vmatprep.mubr.msk.f32.mxu0 %vm2637_vm8, %v18392_v44  ;;  %12915 = vmatpush3.bf16.msra.mxu0 %v12912_v10 }
 0xafd   :  { %12917 = vmatprep.subr.bf16.mxu0 %v12916_v60 }
 0xaff   :  { %11232 = vmatmul.mubr.msk.f32.gmra.mrb[156].mxu0 %vm2637_vm8, %v18393_v49 }
 0xb00   :  { %12919 = vmatpush3.bf16.msra.mxu0 %v12916_v60  ;;  %11378 = vmatprep.mubr.f32.mxu0 %v15483_v55 }
 0xb03   :  { %11379 = vmatmul.mubr.f32.vlgmr.msra.gmra.mrb[158].mxu0 %v15502_v4 }
 0xb04   :  { %11381 = vmatprep.mubr.f32.mxu0 %v15504_v54 }
 0xb07   :  { %11382 = vmatmul.mubr.f32.gmra.mrb[160].mxu0 %v15523_v25 }
 0xb08   :  { %11384 = vmatprep.mubr.f32.mxu0 %v15526_v37 }
 0xb0b   :  { %11385 = vmatmul.mubr.f32.gmra.mrb[162].mxu0 %v15545_v29 }
 0xb0c   :  { %11387 = vmatprep.mubr.f32.mxu0 %v15548_v24 }
 0xb0f   :  { %11388 = vmatmul.mubr.f32.gmra.mrb[164].mxu0 %v15567_v59 }
 0xb10   :  { %11390 = vmatprep.mubr.f32.mxu0 %v15570_v30 }
 0xb13   :  { %11391 = vmatmul.mubr.f32.gmra.mrb[166].mxu0 %v15589_v61 }
 0xb14   :  { %11393 = vmatprep.mubr.f32.mxu0 %v15592_v13 }
 0xb17   :  { %11394 = vmatmul.mubr.f32.gmra.mrb[168].mxu0 %v15611_v15 }
 0xb18   :  { %11396 = vmatprep.mubr.f32.mxu0 %v15614_v17 }
 0xb1b   :  { %11397 = vmatmul.mubr.f32.gmra.mrb[170].mxu0 %v18354_v45 }
 0xb1c   :  { %11399 = vmatprep.mubr.f32.mxu0 %v18355_v42 }
 0xb1f   :  { %11400 = vmatmul.mubr.f32.gmra.mrb[172].mxu0 %v18356_v11 }
 0xb37   :  { %v5533_v18 = vpop.xlane.xlu0 %5532 }
 0xb38   :  { %v5531_v14 = vpop.xlane.xlu1 %5530 }
 0xb39   :  { %13519 = vrcp.f32 %v5531_v14 }
 0xb3a   :  { %13521 = vrcp.f32 %v5533_v18 }
 0xb3b   :  { %v5537_v49 = vpop.xlane.xlu0 %5536 }
 0xb3c   :  { %v5535_v36 = vpop.xlane.xlu1 %5534 }
 0xb3d   :  { %13523 = vrcp.f32 %v5535_v36  ;;  %v8746_v36 = vld [vmem:[%s18245_s14 + $0x40] sm:$0xff] }
 0xb3e   :  { %13525 = vrcp.f32 %v5537_v49 }
 0xb43   :  { %v13520_v2 = vpop.eup %13519 }
 0xb44   :  { %v5578_v7 = vmul.f32 %v13520_v2, %v17018_v0 }
 0xb46   :  { %11490 = vmatprep.mubr.f32.mxu0 %v5578_v7 }
 0xbd6   :  { %v11380_v35 = vpop.f32.mrb[158].mxu0 }
 0xbd7   :  { %v5104_v34 = vadd.f32 %v11380_v35, %v17195_v52  ;;  %v5098_v56 = vpop.f32.mrb[159].mxu0 }
 0xbd8   :  { %v5099_v51 = vadd.f32 %v17195_v52, %v5098_v56  ;;  %v5539_v56 = vpop.xlane.xlu1 %5538 }
 0xbd9   :  { %13527 = vrcp.f32 %v5539_v56 }
 0xbda   :  { %v12968_v5 = vpack.c.bf16 %v5104_v34, %v5099_v51  ;;  %v11383_v9 = vpop.f32.mrb[160].mxu0 }
 0xbdb   :  { %v5114_v53 = vadd.f32 %v11383_v9, %v17195_v52  ;;  %v5108_v10 = vpop.f32.mrb[161].mxu0 }
 0xbdc   :  { %v5109_v0 = vadd.f32 %v17195_v52, %v5108_v10  ;;  %12969 = vmatprep.subr.bf16.mxu0 %v12968_v5  ;;  %v5541_v10 = vpop.xlane.xlu0 %5540 }
 0xbdd   :  { %12971 = vmatpush3.bf16.msra.mxu0 %v12968_v5  ;;  %13529 = vrcp.f32 %v5541_v10 }
 0xbde   :  { %v12972_v28 = vpack.c.bf16 %v5114_v53, %v5109_v0  ;;  %v11386_v6 = vpop.f32.mrb[162].mxu0 }
 0xbdf   :  { %v5124_v60 = vadd.f32 %v11386_v6, %v17195_v52  ;;  %v5118_v43 = vpop.f32.mrb[163].mxu0 }
 0xbe0   :  { %v5119_v44 = vadd.f32 %v17195_v52, %v5118_v43  ;;  %12973 = vmatprep.subr.bf16.mxu0 %v12972_v28 }
 0xbe1   :  { %12975 = vmatpush3.bf16.msra.mxu0 %v12972_v28 }
 0xbe2   :  { %v12976_v14 = vpack.c.bf16 %v5124_v60, %v5119_v44  ;;  %v11389_v2 = vpop.f32.mrb[164].mxu0  ;;  %v5543_v60 = vpop.xlane.xlu1 %5542 }
 0xbe3   :  { %v5134_v7 = vadd.f32 %v11389_v2, %v17195_v52  ;;  %v5128_v35 = vpop.f32.mrb[165].mxu0  ;;  %13531 = vrcp.f32 %v5543_v60 }
 0xbe4   :  { %v5129_v34 = vadd.f32 %v17195_v52, %v5128_v35  ;;  %12977 = vmatprep.subr.bf16.mxu0 %v12976_v14 }
 0xbe5   :  { %12979 = vmatpush3.bf16.msra.mxu0 %v12976_v14  ;;  %v5545_v14 = vpop.xlane.xlu0 %5544 }
 0xbe6   :  { %v12980_v51 = vpack.c.bf16 %v5134_v7, %v5129_v34  ;;  %v11392_v5 = vpop.f32.mrb[166].mxu0  ;;  %13533 = vrcp.f32 %v5545_v14 }
 0xbe7   :  { %v5144_v9 = vadd.f32 %v11392_v5, %v17195_v52  ;;  %v5138_v53 = vpop.f32.mrb[167].mxu0 }
 0xbe8   :  { %v5139_v0 = vadd.f32 %v17195_v52, %v5138_v53  ;;  %12981 = vmatprep.subr.bf16.mxu0 %v12980_v51 }
 0xbe9   :  { %12983 = vmatpush3.bf16.msra.mxu0 %v12980_v51 }
 0xbea   :  { %v12984_v28 = vpack.c.bf16 %v5144_v9, %v5139_v0  ;;  %v11395_v6 = vpop.f32.mrb[168].mxu0  ;;  %v5547_v9 = vpop.xlane.xlu1 %5546 }
 0xbeb   :  { %v5154_v43 = vadd.f32 %v11395_v6, %v17195_v52  ;;  %v5148_v44 = vpop.f32.mrb[169].mxu0  ;;  %13535 = vrcp.f32 %v5547_v9 }
 0xbec   :  { %v5149_v2 = vadd.f32 %v17195_v52, %v5148_v44  ;;  %12985 = vmatprep.subr.bf16.mxu0 %v12984_v28 }
 0xbed   :  { %12987 = vmatpush3.bf16.msra.mxu0 %v12984_v28  ;;  %v8747_v28 = vld [vmem:[%s18245_s14 + $0x48] sm:$0xff] }
 0xbee   :  { %v12988_v7 = vpack.c.bf16 %v5154_v43, %v5149_v2  ;;  %v11398_v35 = vpop.f32.mrb[170].mxu0  ;;  %v5549_v43 = vpop.xlane.xlu0 %5548  ;;  %v13000_v56 = vpack.c.bf16 %v8747_v28, %v8746_v36 }
 0xbef   :  { %v5164_v34 = vadd.f32 %v11398_v35, %v17195_v52  ;;  %v5158_v5 = vpop.f32.mrb[171].mxu0  ;;  %v13522_v2 = vpop.eup %13521  ;;  %v8748_v35 = vld [vmem:[%s18245_s14 + $0x50] sm:$0xff]  ;;  %13537 = vrcp.f32 %v5549_v43 }
 0xbf0   :  { %v5159_v51 = vadd.f32 %v17195_v52, %v5158_v5  ;;  %12989 = vmatprep.subr.bf16.mxu0 %v12988_v7  ;;  %v13524_v5 = vpop.eup %13523  ;;  %v5579_v10 = vmul.f32 %v13522_v2, %v17016_v62 }
 0xbf1   :  { %12991 = vmatpush3.bf16.msra.mxu0 %v12988_v7  ;;  %v5551_v7 = vpop.xlane.xlu1 %5550 }
 0xbf2   :  { %v12992_v53 = vpack.c.bf16 %v5164_v34, %v5159_v51  ;;  %v11401_v0 = vpop.f32.mrb[172].mxu0  ;;  %v8749_v34 = vld [vmem:[%s18245_s14 + $0x58] sm:$0xff]  ;;  %v13526_v51 = vpop.eup %13525  ;;  %13539 = vrcp.f32 %v5551_v7 }
 0xbf3   :  { %v5174_v6 = vadd.f32 %v11401_v0, %v17195_v52  ;;  %v5168_v18 = vpop.f32.mrb[173].mxu0  ;;  %v13004_v60 = vpack.c.bf16 %v8749_v34, %v8748_v35  ;;  %v13528_v0 = vpop.eup %13527 }
 0xbf4   :  { %v5169_v44 = vadd.f32 %v17195_v52, %v5168_v18  ;;  %12993 = vmatprep.subr.bf16.mxu0 %v12992_v53  ;;  %v5553_v52 = vpop.xlane.xlu0 %5552  ;;  %v5581_v18 = vmul.f32 %v13526_v51, %v17024_v31  ;;  %v13530_v14 = vpop.eup %13529  ;;  %v5582_v9 = vmul.f32 %v13528_v0, %v17034_v3 }
 0xbf5   :  { %12995 = vmatpush3.bf16.msra.mxu0 %v12992_v53  ;;  %v5580_v53 = vmul.f32 %v13524_v5, %v17026_v33  ;;  %v13532_v36 = vpop.eup %13531  ;;  %13541 = vrcp.f32 %v5553_v52  ;;  %v5583_v33 = vmul.f32 %v13530_v14, %v17032_v23 }
 0xbf6   :  { %v12996_v49 = vpack.c.bf16 %v5174_v6, %v5169_v44  ;;  %v5555_v6 = vpop.xlane.xlu1 %5554  ;;  %v13534_v28 = vpop.eup %13533  ;;  %v5584_v44 = vmul.f32 %v13532_v36, %v17042_v19 }
 0xbf7   :  { %13543 = vrcp.f32 %v5555_v6  ;;  %v5585_v3 = vmul.f32 %v13534_v28, %v17040_v48  ;;  %v8788_v6 = vld [vmem:[%s18311_s30 + $0x1a0] sm:$0xff] }
 0xbf8   :  { %12997 = vmatprep.subr.bf16.mxu0 %v12996_v49  ;;  %v5557_v62 = vpop.xlane.xlu0 %5556 }
 0xbf9   :  { %12999 = vmatpush3.bf16.msra.mxu0 %v12996_v49  ;;  %v13536_v49 = vpop.eup %13535  ;;  %13545 = vrcp.f32 %v5557_v62  ;;  %v8790_v62 = vld [vmem:[%s18311_s30 + $0x1b0] sm:$0xff] }
 0xbfa   :  { %13001 = vmatprep.subr.bf16.mxu0 %v13000_v56  ;;  %v5559_v43 = vpop.xlane.xlu1 %5558  ;;  %v5586_v2 = vmul.f32 %v13536_v49, %v17050_v58  ;;  %v8792_v49 = vld [vmem:[%s18311_s30 + $0x1c0] sm:$0xff] }
 0xbfb   :  { %13547 = vrcp.f32 %v5559_v43 }
 0xbfc   :  { %11491 = vmatmul.mubr.f32.vlgmr.msra.gmra.mrb[174].mxu0 %v5579_v10  ;;  %v5561_v31 = vpop.xlane.xlu0 %5560 }
 0xbfd   :  { %11493 = vmatprep.mubr.f32.mxu0 %v5580_v53  ;;  %13003 = vmatpush3.bf16.msra.mxu0 %v13000_v56  ;;  %v13538_v56 = vpop.eup %13537  ;;  %13549 = vrcp.f32 %v5561_v31  ;;  %v8793_v31 = vld [vmem:[%s18311_s30 + $0x1c8] sm:$0xff] }
 0xbfe   :  { %13005 = vmatprep.subr.bf16.mxu0 %v13004_v60  ;;  %v13540_v7 = vpop.eup %13539  ;;  %v5587_v23 = vmul.f32 %v13538_v56, %v17048_v41 }
 0xbff   :  { %v13542_v35 = vpop.eup %13541  ;;  %v5588_v19 = vmul.f32 %v13540_v7, %v17056_v16  ;;  %v8785_v16 = vld [vmem:[%s18311_s30 + $0x188] sm:$0xff]  ;;  %v8794_v7 = vld [vmem:[%s18311_s30 + $0x1d0] sm:$0xff] }
 0xc00   :  { %11494 = vmatmul.mubr.f32.gmra.mrb[176].mxu0 %v5581_v18  ;;  %v5589_v5 = vmul.f32 %v13542_v35, %v17054_v39  ;;  %v8784_v39 = vld [vmem:[%s18311_s30 + $0x180] sm:$0xff]  ;;  %v8789_v18 = vld [vmem:[%s18311_s30 + $0x1a8] sm:$0xff] }
 0xc01   :  { %11496 = vmatprep.mubr.f32.mxu0 %v5582_v9  ;;  %13007 = vmatpush3.bf16.msra.mxu0 %v13004_v60  ;;  %v13544_v34 = vpop.eup %13543  ;;  %v13048_v36 = vpack.c.bf16 %v8789_v18, %v8788_v6 }
 0xc02   :  { %v5590_v48 = vmul.f32 %v13544_v34, %v17068_v46  ;;  %v13040_v46 = vpack.c.bf16 %v8785_v16, %v8784_v39 }
 0xc03   :  { %v13546_v52 = vpop.eup %13545 }
 0xc04   :  { %11497 = vmatmul.mubr.f32.gmra.mrb[178].mxu0 %v5583_v33  ;;  %v5591_v58 = vmul.f32 %v13546_v52, %v17066_v12  ;;  %13041 = vmatprep.subr.bf16.mxu0 %v13040_v46  ;;  %v8786_v12 = vld [vmem:[%s18311_s30 + $0x190] sm:$0xff]  ;;  %v8791_v33 = vld [vmem:[%s18311_s30 + $0x1b8] sm:$0xff]  ;;  %v8797_v52 = vld [vmem:[%s18311_s30 + $0x1e8] sm:$0xff] }
 0xc05   :  { %11499 = vmatprep.mubr.f32.mxu0 %v5584_v44  ;;  %v13548_v10 = vpop.eup %13547  ;;  %v13052_v44 = vpack.c.bf16 %v8791_v33, %v8790_v62 }
 0xc06   :  { %v5592_v51 = vmul.f32 %v13548_v10, %v17083_v57  ;;  %v8787_v57 = vld [vmem:[%s18311_s30 + $0x198] sm:$0xff] }
 0xc07   :  { %v13550_v60 = vpop.eup %13549  ;;  %v13044_v0 = vpack.c.bf16 %v8787_v57, %v8786_v12  ;;  %v13695_v57 = vld [vmem:[%s18318_s28 + $0x3] ss:$0 sm:$0xff] }
 0xc08   :  { %11500 = vmatmul.mubr.f32.gmra.mrb[180].mxu0 %v5585_v3  ;;  %v5593_v41 = vmul.f32 %v13550_v60, %v17081_v32  ;;  %v8798_v60 = vld [vmem:[%s18311_s30 + $0x1f0] sm:$0xff] }
 0xc09   :  { %11502 = vmatprep.mubr.f32.mxu0 %v5586_v2  ;;  %v13056_v2 = vpack.c.bf16 %v8793_v31, %v8792_v49 }
 0xc0c   :  { %11503 = vmatmul.mubr.f32.gmra.mrb[182].mxu0 %v5587_v23  ;;  %v8795_v23 = vld [vmem:[%s18311_s30 + $0x1d8] sm:$0xff] }
 0xc0d   :  { %11505 = vmatprep.mubr.f32.mxu0 %v5588_v19  ;;  %v13060_v34 = vpack.c.bf16 %v8795_v23, %v8794_v7 }
 0xc10   :  { %11506 = vmatmul.mubr.f32.gmra.mrb[184].mxu0 %v5589_v5  ;;  %v8796_v5 = vld [vmem:[%s18311_s30 + $0x1e0] sm:$0xff] }
 0xc11   :  { %11508 = vmatprep.mubr.f32.mxu0 %v5590_v48 }
 0xc14   :  { %11509 = vmatmul.mubr.f32.gmra.mrb[186].mxu0 %v5591_v58  ;;  %v13064_v58 = vpack.c.bf16 %v8797_v52, %v8796_v5 }
 0xc15   :  { %11511 = vmatprep.mubr.f32.mxu0 %v5592_v51  ;;  %v8799_v51 = vld [vmem:[%s18311_s30 + $0x1f8] sm:$0xff] }
 0xc16   :  { %v13068_v16 = vpack.c.bf16 %v8799_v51, %v8798_v60 }
 0xc18   :  { %11512 = vmatmul.mubr.f32.gmra.mrb[188].mxu0 %v5593_v41 }
 0xccf   :  { %v11492_v32 = vpop.f32.mrb[174].mxu0 }
 0xcd0   :  { %v5660_v53 = vpop.f32.mrb[175].mxu0 }
 0xcd1   :  { %11522 = vmatprep.mubr.msk.f32.mxu0 %vm2637_vm8, %v5660_v53  ;;  %v8801_v53 = vld [vmem:[%s18319_s11 + $0x3] ss:$0 sm:$0xff] }
 0xcd2   :  { %11523 = vmatmul.mubr.msk.f32.vlgmr.msra.gmra.mrb[142].mxu0 %vm2637_vm8, %v11492_v32  ;;  %v6045_v32 = vadd.f32 %v13695_v57, %v16953_v40 }
 0xcd3   :  { %v11495_v14 = vpop.f32.mrb[176].mxu0  ;;  %13043 = vmatpush3.bf16.msra.mxu0 %v13040_v46 }
 0xcd4   :  { %v5670_v9 = vpop.f32.mrb[177].mxu0  ;;  %13045 = vmatprep.subr.bf16.mxu0 %v13044_v0 }
 0xcd5   :  { %11525 = vmatprep.mubr.msk.f32.mxu0 %vm2637_vm8, %v5670_v9 }
 0xcd6   :  { %11526 = vmatmul.mubr.msk.f32.gmra.mrb[144].mxu0 %vm2637_vm8, %v11495_v14 }
 0xcd7   :  { %v11498_v28 = vpop.f32.mrb[178].mxu0  ;;  %13047 = vmatpush3.bf16.msra.mxu0 %v13044_v0 }
 0xcd8   :  { %v5680_v43 = vpop.f32.mrb[179].mxu0  ;;  %13049 = vmatprep.subr.bf16.mxu0 %v13048_v36 }
 0xcd9   :  { %11528 = vmatprep.mubr.msk.f32.mxu0 %vm2637_vm8, %v5680_v43 }
 0xcda   :  { %11529 = vmatmul.mubr.msk.f32.gmra.mrb[146].mxu0 %vm2637_vm8, %v11498_v28 }
 0xcdb   :  { %v11501_v3 = vpop.f32.mrb[180].mxu0  ;;  %13051 = vmatpush3.bf16.msra.mxu0 %v13048_v36 }
 0xcdc   :  { %v5690_v56 = vpop.f32.mrb[181].mxu0  ;;  %13053 = vmatprep.subr.bf16.mxu0 %v13052_v44 }
 0xcdd   :  { %11531 = vmatprep.mubr.msk.f32.mxu0 %vm2637_vm8, %v5690_v56 }
 0xcde   :  { %11532 = vmatmul.mubr.msk.f32.gmra.mrb[148].mxu0 %vm2637_vm8, %v11501_v3 }
 0xcdf   :  { %v11504_v35 = vpop.f32.mrb[182].mxu0  ;;  %13055 = vmatpush3.bf16.msra.mxu0 %v13052_v44 }
 0xce0   :  { %v5700_v19 = vpop.f32.mrb[183].mxu0  ;;  %13057 = vmatprep.subr.bf16.mxu0 %v13056_v2 }
 0xce1   :  { %11534 = vmatprep.mubr.msk.f32.mxu0 %vm2637_vm8, %v5700_v19 }
 0xce2   :  { %11535 = vmatmul.mubr.msk.f32.gmra.mrb[150].mxu0 %vm2637_vm8, %v11504_v35 }
 0xce3   :  { %v11507_v48 = vpop.f32.mrb[184].mxu0  ;;  %13059 = vmatpush3.bf16.msra.mxu0 %v13056_v2 }
 0xce4   :  { %v5710_v10 = vpop.f32.mrb[185].mxu0  ;;  %13061 = vmatprep.subr.bf16.mxu0 %v13060_v34 }
 0xce5   :  { %11537 = vmatprep.mubr.msk.f32.mxu0 %vm2637_vm8, %v5710_v10 }
 0xce6   :  { %11538 = vmatmul.mubr.msk.f32.gmra.mrb[152].mxu0 %vm2637_vm8, %v11507_v48 }
 0xce7   :  { %v11510_v41 = vpop.f32.mrb[186].mxu0  ;;  %13063 = vmatpush3.bf16.msra.mxu0 %v13060_v34 }
 0xce8   :  { %v5720_v39 = vpop.f32.mrb[187].mxu0  ;;  %13065 = vmatprep.subr.bf16.mxu0 %v13064_v58 }
 0xce9   :  { %11540 = vmatprep.mubr.msk.f32.mxu0 %vm2637_vm8, %v5720_v39 }
 0xcea   :  { %11541 = vmatmul.mubr.msk.f32.gmra.mrb[154].mxu0 %vm2637_vm8, %v11510_v41 }
 0xceb   :  { %v11513_v46 = vpop.f32.mrb[188].mxu0  ;;  %13067 = vmatpush3.bf16.msra.mxu0 %v13064_v58 }
 0xcec   :  { %v5730_v12 = vpop.f32.mrb[189].mxu0  ;;  %13069 = vmatprep.subr.bf16.mxu0 %v13068_v16 }
 0xced   :  { %11543 = vmatprep.mubr.msk.f32.mxu0 %vm2637_vm8, %v5730_v12 }
 0xcee   :  { %11544 = vmatmul.mubr.msk.f32.gmra.mrb[156].mxu0 %vm2637_vm8, %v11513_v46 }
 0xcef   :  { %13071 = vmatpush3.bf16.msra.mxu0 %v13068_v16  ;;  %11634 = vmatprep.mubr.f32.mxu0 %v15483_v55 }
 0xcf2   :  { %11635 = vmatmul.mubr.f32.vlgmr.msra.gmra.mrb[190].mxu0 %v15502_v4 }
 0xcf3   :  { %11637 = vmatprep.mubr.f32.mxu0 %v15504_v54 }
 0xcf6   :  { %11638 = vmatmul.mubr.f32.gmra.mrb[192].mxu0 %v15523_v25 }
 0xcf7   :  { %11640 = vmatprep.mubr.f32.mxu0 %v15526_v37 }
 0xcfa   :  { %11641 = vmatmul.mubr.f32.gmra.mrb[194].mxu0 %v15545_v29 }
 0xcfb   :  { %11643 = vmatprep.mubr.f32.mxu0 %v15548_v24 }
 0xcfe   :  { %11644 = vmatmul.mubr.f32.gmra.mrb[196].mxu0 %v15567_v59 }
 0xcff   :  { %11646 = vmatprep.mubr.f32.mxu0 %v15570_v30 }
 0xd02   :  { %11647 = vmatmul.mubr.f32.gmra.mrb[198].mxu0 %v15589_v61 }
 0xd03   :  { %11649 = vmatprep.mubr.f32.mxu0 %v15592_v13 }
 0xd06   :  { %11650 = vmatmul.mubr.f32.gmra.mrb[200].mxu0 %v15611_v15 }
 0xd07   :  { %11652 = vmatprep.mubr.f32.mxu0 %v15614_v17 }
 0xd0a   :  { %11653 = vmatmul.mubr.f32.gmra.mrb[202].mxu0 %v18354_v45 }
 0xd0b   :  { %11655 = vmatprep.mubr.f32.mxu0 %v18355_v42 }
 0xd0e   :  { %11656 = vmatmul.mubr.f32.gmra.mrb[204].mxu0 %v18356_v11 }
 0xd0f   :  { %11746 = vmatprep.mubr.msk.f32.mxu0 %vm2637_vm8, %v6045_v32 }
 0xdc5   :  { %v11636_v0 = vpop.f32.mrb[190].mxu0 }
 0xdc6   :  { %v6220_v6 = vadd.f32 %v11636_v0, %v8801_v53  ;;  %v6214_v18 = vpop.f32.mrb[191].mxu0 }
 0xdc7   :  { %v6215_v14 = vadd.f32 %v8801_v53, %v6214_v18 }
 0xdc9   :  { %v13104_v9 = vpack.c.bf16 %v6220_v6, %v6215_v14  ;;  %v11639_v36 = vpop.f32.mrb[192].mxu0 }
 0xdca   :  { %v6230_v62 = vadd.f32 %v11639_v36, %v8801_v53  ;;  %v6224_v33 = vpop.f32.mrb[193].mxu0 }
 0xdcb   :  { %v6225_v28 = vadd.f32 %v8801_v53, %v6224_v33  ;;  %13106 = vmatprep.subr.msk.bf16.mxu0 %vm15683_vm9, %v13104_v9 }
 0xdcc   :  { %13109 = vmatpush3.bf16.xpose.msk.msra.mxu0 %vm15683_vm9, %v13104_v9 }
 0xdcd   :  { %v13110_v40 = vpack.c.bf16 %v6230_v62, %v6225_v28  ;;  %v11642_v43 = vpop.f32.mrb[194].mxu0 }
 0xdce   :  { %v6240_v44 = vadd.f32 %v11642_v43, %v8801_v53  ;;  %v6234_v49 = vpop.f32.mrb[195].mxu0 }
 0xdcf   :  { %v6235_v31 = vadd.f32 %v8801_v53, %v6234_v49  ;;  %13112 = vmatprep.subr.msk.bf16.mxu0 %vm15683_vm9, %v13110_v40 }
 0xdd1   :  { %v13116_v3 = vpack.c.bf16 %v6240_v44, %v6235_v31  ;;  %v11645_v56 = vpop.f32.mrb[196].mxu0  ;;  %v13699_v44 = vld [vmem:[%s18244_s6 + $0x10] sm:$0xff] }
 0xdd2   :  { %v6250_v2 = vadd.f32 %v11645_v56, %v8801_v53  ;;  %v6244_v7 = vpop.f32.mrb[197].mxu0 }
 0xdd3   :  { %v6245_v23 = vadd.f32 %v8801_v53, %v6244_v7  ;;  %v13700_v7 = vld [vmem:[%s18244_s6 + $0x28] sm:$0xff] }
 0xdd4   :  { %13115 = vmatpush3.bf16.xpose.msk.msra.mxu0 %vm15683_vm9, %v13110_v40  ;;  %v13698_v40 = vld [vmem:[%s18244_s6 + $0x18] sm:$0xff] }
 0xdd5   :  { %v13122_v35 = vpack.c.bf16 %v6250_v2, %v6245_v23  ;;  %v11648_v19 = vpop.f32.mrb[198].mxu0  ;;  %13118 = vmatprep.subr.msk.bf16.mxu0 %vm15683_vm9, %v13116_v3 }
 0xdd6   :  { %v6260_v34 = vadd.f32 %v11648_v19, %v8801_v53  ;;  %v6254_v5 = vpop.f32.mrb[199].mxu0 }
 0xdd7   :  { %v6255_v52 = vadd.f32 %v8801_v53, %v6254_v5 }
 0xdd9   :  { %v13128_v48 = vpack.c.bf16 %v6260_v34, %v6255_v52  ;;  %v11651_v10 = vpop.f32.mrb[200].mxu0 }
 0xdda   :  { %v6270_v58 = vadd.f32 %v11651_v10, %v8801_v53  ;;  %v6264_v60 = vpop.f32.mrb[201].mxu0  ;;  %v13702_v10 = vld [vmem:[%s18244_s6 + $0x38] sm:$0xff] }
 0xddb   :  { %v6265_v51 = vadd.f32 %v8801_v53, %v6264_v60  ;;  %v13703_v60 = vld [vmem:[%s18244_s6 + $0x30] sm:$0xff] }
 0xddc   :  { %13121 = vmatpush3.bf16.xpose.msk.msra.mxu0 %vm15683_vm9, %v13116_v3 }
 0xddd   :  { %v13134_v41 = vpack.c.bf16 %v6270_v58, %v6265_v51  ;;  %v11654_v39 = vpop.f32.mrb[202].mxu0  ;;  %13124 = vmatprep.subr.msk.bf16.mxu0 %vm15683_vm9, %v13122_v35 }
 0xdde   :  { %v6280_v16 = vadd.f32 %v11654_v39, %v8801_v53  ;;  %v6274_v46 = vpop.f32.mrb[203].mxu0 }
 0xddf   :  { %v6275_v12 = vadd.f32 %v8801_v53, %v6274_v46 }
 0xde1   :  { %v13140_v57 = vpack.c.bf16 %v6280_v16, %v6275_v12  ;;  %v11657_v32 = vpop.f32.mrb[204].mxu0  ;;  %v13704_v12 = vld [vmem:[%s18244_s6 + $0x48] sm:$0xff] }
 0xde2   :  { %v6290_v0 = vadd.f32 %v11657_v32, %v8801_v53  ;;  %v6284_v6 = vpop.f32.mrb[205].mxu0  ;;  %v13705_v32 = vld [vmem:[%s18244_s6 + $0x40] sm:$0xff] }
 0xde3   :  { %v6285_v18 = vadd.f32 %v8801_v53, %v6284_v6  ;;  %v13697_v53 = vld [vmem:[%s18244_s6] sm:$0xff] }
 0xde4   :  { %13127 = vmatpush3.bf16.xpose.msk.msra.mxu0 %vm15683_vm9, %v13122_v35  ;;  %v13701_v35 = vld [vmem:[%s18244_s6 + $0x20] sm:$0xff] }
 0xde5   :  { %v13146_v14 = vpack.c.bf16 %v6290_v0, %v6285_v18  ;;  %13130 = vmatprep.subr.msk.bf16.mxu0 %vm15683_vm9, %v13128_v48 }
 0xdec   :  { %13133 = vmatpush3.bf16.xpose.msk.msra.mxu0 %vm15683_vm9, %v13128_v48 }
 0xded   :  { %13136 = vmatprep.subr.msk.bf16.mxu0 %vm15683_vm9, %v13134_v41 }
 0xdf4   :  { %13139 = vmatpush3.bf16.xpose.msk.msra.mxu0 %vm15683_vm9, %v13134_v41 }
 0xdf5   :  { %13142 = vmatprep.subr.msk.bf16.mxu0 %vm15683_vm9, %v13140_v57 }
 0xdfc   :  { %13145 = vmatpush3.bf16.xpose.msk.msra.mxu0 %vm15683_vm9, %v13140_v57 }
 0xdfd   :  { %13148 = vmatprep.subr.msk.bf16.mxu0 %vm15683_vm9, %v13146_v14 }
 0xe04   :  { %13151 = vmatpush3.bf16.xpose.msk.msra.mxu0 %vm15683_vm9, %v13146_v14 }
 0xe0b   :  { %11747 = vmatmul.mubr.msk.f32.vlgmr.msra.gmra.mrb[206].mxu0 %vm2637_vm8, %v16950_v1  ;;  %v18395_v1 = vld [vmem:[#allocation4_spill] sm:$0xff] }
 0xe0c   :  { %11749 = vmatprep.mubr.msk.f32.mxu0 %vm2637_vm8, %v16964_v38  ;;  %v18397_v38 = vld [vmem:[#allocation22_spill] sm:$0xff] }
 0xe0f   :  { %11750 = vmatmul.mubr.msk.f32.gmra.mrb[208].mxu0 %vm2637_vm8, %v16962_v27  ;;  %v18396_v27 = vld [vmem:[#allocation3_spill] sm:$0xff] }
 0xe10   :  { %11752 = vmatprep.mubr.msk.f32.mxu0 %vm2637_vm8, %v16968_v20 }
 0xe13   :  { %11753 = vmatmul.mubr.msk.f32.gmra.mrb[210].mxu0 %vm2637_vm8, %v16966_v26  ;;  %v18398_v26 = vld [vmem:[#allocation21_spill] sm:$0xff] }
 0xe14   :  { %11755 = vmatprep.mubr.msk.f32.mxu0 %vm2637_vm8, %v16972_v63 }
 0xe17   :  { %11756 = vmatmul.mubr.msk.f32.gmra.mrb[212].mxu0 %vm2637_vm8, %v16970_v50 }
 0xe18   :  { %11758 = vmatprep.mubr.msk.f32.mxu0 %vm2637_vm8, %v16982_v21  ;;  %v13696_v21 = vld [vmem:[%s18244_s6 + $0x8] sm:$0xff] }
 0xe1b   :  { %11759 = vmatmul.mubr.msk.f32.gmra.mrb[214].mxu0 %vm2637_vm8, %v16980_v8 }
 0xe1c   :  { %11761 = vmatprep.mubr.msk.f32.mxu0 %vm2637_vm8, %v16986_v22 }
 0xe1f   :  { %11762 = vmatmul.mubr.msk.f32.gmra.mrb[216].mxu0 %vm2637_vm8, %v18394_v47 }
 0xe20   :  { %11764 = vmatprep.mubr.msk.f32.mxu0 %vm2637_vm8, %v18395_v1  ;;  %v13706_v1 = vld [vmem:[%s18244_s6 + $0x58] sm:$0xff] }
 0xe23   :  { %11765 = vmatmul.mubr.msk.f32.gmra.mrb[218].mxu0 %vm2637_vm8, %v18396_v27 }
 0xe24   :  { %11767 = vmatprep.mubr.msk.f32.mxu0 %vm2637_vm8, %v18397_v38  ;;  %v13707_v38 = vld [vmem:[%s18244_s6 + $0x50] sm:$0xff] }
 0xe27   :  { %11768 = vmatmul.mubr.msk.f32.gmra.mrb[220].mxu0 %vm2637_vm8, %v18398_v26 }
 0xede   :  { %v11748_v20 = vpop.f32.mrb[206].mxu0 }
 0xedf   :  { %v6705_v50 = vmul.f32 0.17677669, %v11748_v20  ;;  %v6625_v63 = vpop.f32.mrb[207].mxu0 }
 0xee0   :  { %v6704_v8 = vmul.f32 0.17677669, %v6625_v63 }
 0xee1   :  { %v17393_v22 = vadd.f32 %v13696_v21, %v6705_v50  ;;  %v13708_v21 = vld [vmem:[%s18244_s6 + $0x68] sm:$0xff] }
 0xee2   :  { %v17398_v9 = vadd.f32 %v13697_v53, %v6704_v8  ;;  %v11751_v36 = vpop.f32.mrb[208].mxu0 }
 0xee3   :  { %v6707_v62 = vmul.f32 0.17677669, %v11751_v36  ;;  %6738 = vmax.xlane.f32.xlu0 %v17393_v22  ;;  %v6635_v33 = vpop.f32.mrb[209].mxu0  ;;  %v13709_v36 = vld [vmem:[%s18244_s6 + $0x60] sm:$0xff] }
 0xee4   :  { %v6706_v28 = vmul.f32 0.17677669, %v6635_v33  ;;  %6736 = vmax.xlane.f32.xlu1 %v17398_v9 }
 0xee5   :  { %v17405_v43 = vadd.f32 %v13698_v40, %v6707_v62 }
 0xee6   :  { %v17410_v49 = vadd.f32 %v13699_v44, %v6706_v28  ;;  %v11754_v31 = vpop.f32.mrb[210].mxu0 }
 0xee7   :  { %v6709_v3 = vmul.f32 0.17677669, %v11754_v31  ;;  %6742 = vmax.xlane.f32.xlu0 %v17405_v43  ;;  %v6645_v56 = vpop.f32.mrb[211].mxu0  ;;  %v13710_v31 = vld [vmem:[%s18244_s6 + $0x78] sm:$0xff] }
 0xee8   :  { %v6708_v2 = vmul.f32 0.17677669, %v6645_v56  ;;  %6740 = vmax.xlane.f32.xlu1 %v17410_v49  ;;  %v13711_v56 = vld [vmem:[%s18244_s6 + $0x70] sm:$0xff] }
 0xee9   :  { %v17417_v23 = vadd.f32 %v13700_v7, %v6709_v3 }
 0xeea   :  { %v17422_v19 = vadd.f32 %v13701_v35, %v6708_v2  ;;  %v11757_v34 = vpop.f32.mrb[212].mxu0 }
 0xeeb   :  { %v6711_v5 = vmul.f32 0.17677669, %v11757_v34  ;;  %6746 = vmax.xlane.f32.xlu0 %v17417_v23  ;;  %v6655_v52 = vpop.f32.mrb[213].mxu0 }
 0xeec   :  { %v6710_v48 = vmul.f32 0.17677669, %v6655_v52  ;;  %6744 = vmax.xlane.f32.xlu1 %v17422_v19 }
 0xeed   :  { %v17429_v58 = vadd.f32 %v13702_v10, %v6711_v5 }
 0xeee   :  { %v17434_v51 = vadd.f32 %v13703_v60, %v6710_v48  ;;  %v11760_v41 = vpop.f32.mrb[214].mxu0 }
 0xeef   :  { %v6713_v39 = vmul.f32 0.17677669, %v11760_v41  ;;  %6750 = vmax.xlane.f32.xlu0 %v17429_v58  ;;  %v6665_v16 = vpop.f32.mrb[215].mxu0 }
 0xef0   :  { %v6712_v46 = vmul.f32 0.17677669, %v6665_v16  ;;  %6748 = vmax.xlane.f32.xlu1 %v17434_v51 }
 0xef1   :  { %v17441_v57 = vadd.f32 %v13704_v12, %v6713_v39 }
 0xef2   :  { %v17446_v0 = vadd.f32 %v13705_v32, %v6712_v46  ;;  %v11763_v6 = vpop.f32.mrb[216].mxu0 }
 0xef3   :  { %v6715_v18 = vmul.f32 0.17677669, %v11763_v6  ;;  %6754 = vmax.xlane.f32.xlu0 %v17441_v57  ;;  %v6675_v14 = vpop.f32.mrb[217].mxu0 }
 0xef4   :  { %v6714_v47 = vmul.f32 0.17677669, %v6675_v14  ;;  %6752 = vmax.xlane.f32.xlu1 %v17446_v0 }
 0xef5   :  { %v17453_v27 = vadd.f32 %v13706_v1, %v6715_v18 }
 0xef6   :  { %v17458_v26 = vadd.f32 %v13707_v38, %v6714_v47  ;;  %v11766_v20 = vpop.f32.mrb[218].mxu0 }
 0xef7   :  { %v6717_v50 = vmul.f32 0.17677669, %v11766_v20  ;;  %6758 = vmax.xlane.f32.xlu0 %v17453_v27  ;;  %v6685_v63 = vpop.f32.mrb[219].mxu0 }
 0xef8   :  { %v6716_v8 = vmul.f32 0.17677669, %v6685_v63  ;;  %6756 = vmax.xlane.f32.xlu1 %v17458_v26 }
 0xef9   :  { %v17465_v53 = vadd.f32 %v13708_v21, %v6717_v50 }
 0xefa   :  { %v17470_v62 = vadd.f32 %v13709_v36, %v6716_v8  ;;  %v11769_v33 = vpop.f32.mrb[220].mxu0 }
 0xefb   :  { %v6719_v28 = vmul.f32 0.17677669, %v11769_v33  ;;  %6762 = vmax.xlane.f32.xlu0 %v17465_v53  ;;  %v6695_v40 = vpop.f32.mrb[221].mxu0 }
 0xefc   :  { %v6718_v44 = vmul.f32 0.17677669, %v6695_v40  ;;  %6760 = vmax.xlane.f32.xlu1 %v17470_v62 }
 0xefd   :  { %v17477_v3 = vadd.f32 %v13710_v31, %v6719_v28 }
 0xefe   :  { %v17482_v2 = vadd.f32 %v13711_v56, %v6718_v44 }
 0xeff   :  { %6766 = vmax.xlane.f32.xlu0 %v17477_v3 }
 0xf00   :  { %6764 = vmax.xlane.f32.xlu1 %v17482_v2 }
 0xf70   :  { %v6739_v7 = vpop.xlane.xlu0 %6738 }
 0xf71   :  { %v6769_v35 = vsub.f32 %v17393_v22, %v6739_v7  ;;  %v6737_v34 = vpop.xlane.xlu1 %6736 }
 0xf72   :  { %v6768_v5 = vsub.f32 %v17398_v9, %v6737_v34 }
 0xf73   :  { %v6786_v52 = vmul.f32 1.442695, %v6769_v35 }
 0xf74   :  { %v6784_v48 = vmul.f32 1.442695, %v6768_v5  ;;  %v6743_v10 = vpop.xlane.xlu0 %6742 }
 0xf75   :  { %13551 = vpow2.f32 %v6786_v52  ;;  %v6771_v60 = vsub.f32 %v17405_v43, %v6743_v10  ;;  %v6741_v41 = vpop.xlane.xlu1 %6740 }
 0xf76   :  { %13553 = vpow2.f32 %v6784_v48  ;;  %v6770_v39 = vsub.f32 %v17410_v49, %v6741_v41 }
 0xf77   :  { %v6790_v16 = vmul.f32 1.442695, %v6771_v60 }
 0xf78   :  { %v6788_v46 = vmul.f32 1.442695, %v6770_v39  ;;  %v6747_v12 = vpop.xlane.xlu0 %6746 }
 0xf79   :  { %13555 = vpow2.f32 %v6790_v16  ;;  %v6773_v32 = vsub.f32 %v17417_v23, %v6747_v12  ;;  %v6745_v22 = vpop.xlane.xlu1 %6744 }
 0xf7a   :  { %13557 = vpow2.f32 %v6788_v46  ;;  %v6772_v9 = vsub.f32 %v17422_v19, %v6745_v22 }
 0xf7b   :  { %v6794_v6 = vmul.f32 1.442695, %v6773_v32 }
 0xf7c   :  { %v6792_v18 = vmul.f32 1.442695, %v6772_v9  ;;  %v6751_v14 = vpop.xlane.xlu0 %6750 }
 0xf7d   :  { %13559 = vpow2.f32 %v6794_v6  ;;  %v6775_v43 = vsub.f32 %v17429_v58, %v6751_v14  ;;  %v6749_v47 = vpop.xlane.xlu1 %6748  ;;  %v8852_v6 = vld [vmem:[%s18245_s14 + $0x60] sm:$0xff]  ;;  %v8854_v14 = vld [vmem:[%s18245_s14 + $0x70] sm:$0xff] }
 0xf7e   :  { %13561 = vpow2.f32 %v6792_v18  ;;  %v6774_v49 = vsub.f32 %v17434_v51, %v6749_v47  ;;  %v8853_v18 = vld [vmem:[%s18245_s14 + $0x68] sm:$0xff]  ;;  %v8855_v47 = vld [vmem:[%s18245_s14 + $0x78] sm:$0xff] }
 0xf7f   :  { %v17494_v1 = vpop.eup %13551  ;;  %v6798_v38 = vmul.f32 1.442695, %v6775_v43  ;;  %v13184_v43 = vpack.c.bf16 %v8853_v18, %v8852_v6 }
 0xf80   :  { %v17496_v20 = vpop.eup %13553  ;;  %v6796_v23 = vmul.f32 1.442695, %v6774_v49  ;;  %v6755_v50 = vpop.xlane.xlu0 %6754  ;;  %6818 = vadd.xlane.f32.xlu0 %v17494_v1  ;;  %v13188_v49 = vpack.c.bf16 %v8855_v47, %v8854_v14 }
 0xf81   :  { %13563 = vpow2.f32 %v6798_v38  ;;  %v6777_v19 = vsub.f32 %v17441_v57, %v6755_v50  ;;  %v6753_v63 = vpop.xlane.xlu1 %6752  ;;  %6816 = vadd.xlane.f32.xlu1 %v17496_v20  ;;  %13185 = vmatprep.subr.bf16.mxu0 %v13184_v43  ;;  %v18399_v38 = vmov 0.0|0.0  }
 0xf82   :  { %13565 = vpow2.f32 %v6796_v23  ;;  %v6776_v58 = vsub.f32 %v17446_v0, %v6753_v63  ;;  %13187 = vmatpush3.bf16.msra.mxu0 %v13184_v43 }
 0xf83   :  { %v17502_v8 = vpop.eup %13555  ;;  %v6802_v51 = vmul.f32 1.442695, %v6777_v19  ;;  %13189 = vmatprep.subr.bf16.mxu0 %v13188_v49 }
 0xf84   :  { %v17504_v21 = vpop.eup %13557  ;;  %v6800_v36 = vmul.f32 1.442695, %v6776_v58  ;;  %v6759_v33 = vpop.xlane.xlu0 %6758  ;;  %6822 = vadd.xlane.f32.xlu0 %v17502_v8 }
 0xf85   :  { %13567 = vpow2.f32 %v6802_v51  ;;  %v6779_v28 = vsub.f32 %v17453_v27, %v6759_v33  ;;  %v6757_v40 = vpop.xlane.xlu1 %6756  ;;  %6820 = vadd.xlane.f32.xlu1 %v17504_v21 }
 0xf86   :  { %13569 = vpow2.f32 %v6800_v36  ;;  %v6778_v57 = vsub.f32 %v17458_v26, %v6757_v40  ;;  %13191 = vmatpush3.bf16.msra.mxu0 %v13188_v49 }
 0xf87   :  { %v17510_v44 = vpop.eup %13559  ;;  %v6806_v0 = vmul.f32 1.442695, %v6779_v28  ;;  %13256 = vmatprep.subr.bf16.mxu0 %v18399_v38 }
 0xf88   :  { %v17512_v31 = vpop.eup %13561  ;;  %v6804_v56 = vmul.f32 1.442695, %v6778_v57  ;;  %v6763_v7 = vpop.xlane.xlu0 %6762  ;;  %6826 = vadd.xlane.f32.xlu0 %v17510_v44 }
 0xf89   :  { %13571 = vpow2.f32 %v6806_v0  ;;  %v6781_v35 = vsub.f32 %v17465_v53, %v6763_v7  ;;  %v6761_v34 = vpop.xlane.xlu1 %6760  ;;  %6824 = vadd.xlane.f32.xlu1 %v17512_v31 }
 0xf8a   :  { %13573 = vpow2.f32 %v6804_v56  ;;  %v6780_v27 = vsub.f32 %v17470_v62, %v6761_v34 }
 0xf8b   :  { %v17518_v5 = vpop.eup %13563  ;;  %v6810_v26 = vmul.f32 1.442695, %v6781_v35 }
 0xf8c   :  { %v17520_v52 = vpop.eup %13565  ;;  %v6808_v48 = vmul.f32 1.442695, %v6780_v27  ;;  %6830 = vadd.xlane.f32.xlu0 %v17518_v5  ;;  %v6767_v10 = vpop.xlane.xlu0 %6766 }
 0xf8d   :  { %13575 = vpow2.f32 %v6810_v26  ;;  %v6783_v60 = vsub.f32 %v17477_v3, %v6767_v10  ;;  %6828 = vadd.xlane.f32.xlu1 %v17520_v52  ;;  %v6765_v53 = vpop.xlane.xlu1 %6764 }
 0xf8e   :  { %13577 = vpow2.f32 %v6808_v48  ;;  %v6782_v41 = vsub.f32 %v17482_v2, %v6765_v53 }
 0xf8f   :  { %v17526_v39 = vpop.eup %13567  ;;  %v6814_v62 = vmul.f32 1.442695, %v6783_v60 }
 0xf90   :  { %v17528_v16 = vpop.eup %13569  ;;  %v6812_v46 = vmul.f32 1.442695, %v6782_v41  ;;  %6834 = vadd.xlane.f32.xlu0 %v17526_v39 }
 0xf91   :  { %13579 = vpow2.f32 %v6814_v62  ;;  %6832 = vadd.xlane.f32.xlu1 %v17528_v16 }
 0xf92   :  { %13581 = vpow2.f32 %v6812_v46 }
 0xf93   :  { %v17532_v12 = vpop.eup %13571 }
 0xf94   :  { %v17534_v3 = vpop.eup %13573  ;;  %6838 = vadd.xlane.f32.xlu0 %v17532_v12 }
 0xf95   :  { %6836 = vadd.xlane.f32.xlu1 %v17534_v3 }
 0xf97   :  { %v17538_v2 = vpop.eup %13575 }
 0xf98   :  { %v17540_v32 = vpop.eup %13577  ;;  %6842 = vadd.xlane.f32.xlu0 %v17538_v2 }
 0xf99   :  { %6840 = vadd.xlane.f32.xlu1 %v17540_v32 }
 0xf9b   :  { %v17544_v22 = vpop.eup %13579 }
 0xf9c   :  { %v17546_v9 = vpop.eup %13581  ;;  %6846 = vadd.xlane.f32.xlu0 %v17544_v22 }
 0xf9d   :  { %6844 = vadd.xlane.f32.xlu1 %v17546_v9 }
0x100d   :  { %v6819_v23 = vpop.xlane.xlu0 %6818 }
0x100e   :  { %13583 = vrcp.f32 %v6819_v23  ;;  %v6817_v50 = vpop.xlane.xlu1 %6816 }
0x100f   :  { %13585 = vrcp.f32 %v6817_v50 }
0x1011   :  { %v6823_v19 = vpop.xlane.xlu0 %6822 }
0x1012   :  { %13587 = vrcp.f32 %v6823_v19  ;;  %v6821_v63 = vpop.xlane.xlu1 %6820 }
0x1013   :  { %13589 = vrcp.f32 %v6821_v63 }
0x1015   :  { %v6827_v58 = vpop.xlane.xlu0 %6826 }
0x1016   :  { %13591 = vrcp.f32 %v6827_v58  ;;  %v6825_v51 = vpop.xlane.xlu1 %6824 }
0x1017   :  { %13593 = vrcp.f32 %v6825_v51 }
0x1018   :  { %v13584_v36 = vpop.eup %13583 }
0x1019   :  { %v13586_v33 = vpop.eup %13585  ;;  %v6831_v28 = vpop.xlane.xlu0 %6830  ;;  %v6865_v0 = vmul.f32 %v13584_v36, %v17494_v1 }
0x101a   :  { %13595 = vrcp.f32 %v6831_v28  ;;  %v6829_v40 = vpop.xlane.xlu1 %6828  ;;  %v6864_v57 = vmul.f32 %v13586_v33, %v17496_v20 }
0x101b   :  { %13597 = vrcp.f32 %v6829_v40 }
0x101c   :  { %v13588_v56 = vpop.eup %13587  ;;  %11802 = vmatprep.mubr.f32.mxu1 %v6864_v57 }
0x101d   :  { %v13590_v7 = vpop.eup %13589  ;;  %v6835_v35 = vpop.xlane.xlu0 %6834  ;;  %11803 = vmatmul.mubr.f32.vlgmr.msra.gmra.mrb[162].mxu1 %v6865_v0  ;;  %v6867_v26 = vmul.f32 %v13588_v56, %v17502_v8 }
0x101e   :  { %13599 = vrcp.f32 %v6835_v35  ;;  %v6833_v34 = vpop.xlane.xlu1 %6832  ;;  %v6866_v27 = vmul.f32 %v13590_v7, %v17504_v21 }
0x101f   :  { %13601 = vrcp.f32 %v6833_v34 }
0x1020   :  { %v13592_v48 = vpop.eup %13591  ;;  %11805 = vmatprep.mubr.f32.mxu1 %v6866_v27 }
0x1021   :  { %v13594_v10 = vpop.eup %13593  ;;  %v6839_v60 = vpop.xlane.xlu0 %6838  ;;  %11806 = vmatmul.mubr.f32.gmra.mrb[164].mxu1 %v6867_v26  ;;  %v6869_v53 = vmul.f32 %v13592_v48, %v17510_v44  ;;  %v18400_v26 = vmov 0.0   ;;  %v8872_v48 = vld [vmem:[%s18246_s15] ss:$0 sm:$0xff] }
0x1022   :  { %13603 = vrcp.f32 %v6839_v60  ;;  %v6837_v1 = vpop.xlane.xlu1 %6836  ;;  %v6868_v20 = vmul.f32 %v13594_v10, %v17512_v31 }
0x1023   :  { %13605 = vrcp.f32 %v6837_v1 }
0x1024   :  { %v13596_v41 = vpop.eup %13595  ;;  %11808 = vmatprep.mubr.f32.mxu1 %v6868_v20 }
0x1025   :  { %v13598_v62 = vpop.eup %13597  ;;  %v6843_v46 = vpop.xlane.xlu0 %6842  ;;  %11809 = vmatmul.mubr.f32.gmra.mrb[166].mxu1 %v6869_v53  ;;  %v6871_v6 = vmul.f32 %v13596_v41, %v17518_v5 }
0x1026   :  { %13607 = vrcp.f32 %v6843_v46  ;;  %v6841_v21 = vpop.xlane.xlu1 %6840  ;;  %v6870_v8 = vmul.f32 %v13598_v62, %v17520_v52 }
0x1027   :  { %13609 = vrcp.f32 %v6841_v21 }
0x1028   :  { %v13600_v18 = vpop.eup %13599  ;;  %11811 = vmatprep.mubr.f32.mxu1 %v6870_v8 }
0x1029   :  { %v13602_v14 = vpop.eup %13601  ;;  %v6847_v43 = vpop.xlane.xlu0 %6846  ;;  %11812 = vmatmul.mubr.f32.gmra.mrb[168].mxu1 %v6871_v6  ;;  %v6873_v47 = vmul.f32 %v13600_v18, %v17526_v39 }
0x102a   :  { %13611 = vrcp.f32 %v6847_v43  ;;  %v6845_v31 = vpop.xlane.xlu1 %6844  ;;  %v6872_v44 = vmul.f32 %v13602_v14, %v17528_v16 }
0x102b   :  { %13613 = vrcp.f32 %v6845_v31 }
0x102c   :  { %v13604_v49 = vpop.eup %13603  ;;  %11814 = vmatprep.mubr.f32.mxu1 %v6872_v44 }
0x102d   :  { %v13606_v23 = vpop.eup %13605  ;;  %11815 = vmatmul.mubr.f32.gmra.mrb[170].mxu1 %v6873_v47  ;;  %v6875_v5 = vmul.f32 %v13604_v49, %v17532_v12 }
0x102e   :  { %v6874_v52 = vmul.f32 %v13606_v23, %v17534_v3 }
0x1030   :  { %v13608_v50 = vpop.eup %13607  ;;  %11817 = vmatprep.mubr.f32.mxu1 %v6874_v52 }
0x1031   :  { %v13610_v19 = vpop.eup %13609  ;;  %11818 = vmatmul.mubr.f32.gmra.mrb[172].mxu1 %v6875_v5  ;;  %v6877_v58 = vmul.f32 %v13608_v50, %v17538_v2 }
0x1032   :  { %v6876_v63 = vmul.f32 %v13610_v19, %v17540_v32 }
0x1034   :  { %v13612_v16 = vpop.eup %13611  ;;  %11820 = vmatprep.mubr.f32.mxu1 %v6876_v63 }
0x1035   :  { %v13614_v51 = vpop.eup %13613  ;;  %11821 = vmatmul.mubr.f32.gmra.mrb[174].mxu1 %v6877_v58  ;;  %v6879_v36 = vmul.f32 %v13612_v16, %v17544_v22 }
0x1036   :  { %v6878_v39 = vmul.f32 %v13614_v51, %v17546_v9 }
0x1038   :  { %11823 = vmatprep.mubr.f32.mxu1 %v6878_v39 }
0x1039   :  { %11824 = vmatmul.mubr.f32.gmra.mrb[176].mxu1 %v6879_v36 }
0x10f0   :  { %v11804_v3 = vpop.f32.mrb[162].mxu1 }
0x10f1   :  { %v6946_v12 = vpop.f32.mrb[163].mxu1 }
0x10f2   :  { %11834 = vmatprep.mubr.msk.f32.mxu0 %vm2637_vm8, %v6946_v12 }
0x10f3   :  { %11835 = vmatmul.mubr.msk.f32.vlgmr.msra.gmra.mrb[142].mxu0 %vm2637_vm8, %v11804_v3 }
0x10f4   :  { %v11807_v33 = vpop.f32.mrb[164].mxu1 }
0x10f5   :  { %v6956_v32 = vpop.f32.mrb[165].mxu1 }
0x10f6   :  { %11837 = vmatprep.mubr.msk.f32.mxu0 %vm2637_vm8, %v6956_v32 }
0x10f7   :  { %11838 = vmatmul.mubr.msk.f32.gmra.mrb[144].mxu0 %vm2637_vm8, %v11807_v33 }
0x10f8   :  { %v11810_v2 = vpop.f32.mrb[166].mxu1 }
0x10f9   :  { %v6966_v28 = vpop.f32.mrb[167].mxu1 }
0x10fa   :  { %11840 = vmatprep.mubr.msk.f32.mxu0 %vm2637_vm8, %v6966_v28 }
0x10fb   :  { %11841 = vmatmul.mubr.msk.f32.gmra.mrb[146].mxu0 %vm2637_vm8, %v11810_v2 }
0x10fc   :  { %v11813_v22 = vpop.f32.mrb[168].mxu1 }
0x10fd   :  { %v6976_v9 = vpop.f32.mrb[169].mxu1 }
0x10fe   :  { %11843 = vmatprep.mubr.msk.f32.mxu0 %vm2637_vm8, %v6976_v9 }
0x10ff   :  { %11844 = vmatmul.mubr.msk.f32.gmra.mrb[148].mxu0 %vm2637_vm8, %v11813_v22 }
0x1100   :  { %v11816_v40 = vpop.f32.mrb[170].mxu1 }
0x1101   :  { %v6986_v57 = vpop.f32.mrb[171].mxu1 }
0x1102   :  { %11846 = vmatprep.mubr.msk.f32.mxu0 %vm2637_vm8, %v6986_v57  ;;  %v7505_v57 = vld [vmem:[%s18247_s18 + $0x20] sm:$0xff] }
0x1103   :  { %11847 = vmatmul.mubr.msk.f32.gmra.mrb[150].mxu0 %vm2637_vm8, %v11816_v40 }
0x1104   :  { %v11819_v0 = vpop.f32.mrb[172].mxu1 }
0x1105   :  { %v6996_v56 = vpop.f32.mrb[173].mxu1 }
0x1106   :  { %11849 = vmatprep.mubr.msk.f32.mxu0 %vm2637_vm8, %v6996_v56 }
0x1107   :  { %11850 = vmatmul.mubr.msk.f32.gmra.mrb[152].mxu0 %vm2637_vm8, %v11819_v0  ;;  %v7506_v0 = vld [vmem:[%s18247_s18 + $0x28] sm:$0xff] }
0x1108   :  { %v11822_v7 = vpop.f32.mrb[174].mxu1  ;;  %v13200_v56 = vpack.c.bf16 %v7506_v0, %v7505_v57 }
0x1109   :  { %v7006_v35 = vpop.f32.mrb[175].mxu1 }
0x110a   :  { %11852 = vmatprep.mubr.msk.f32.mxu0 %vm2637_vm8, %v7006_v35 }
0x110b   :  { %11853 = vmatmul.mubr.msk.f32.gmra.mrb[154].mxu0 %vm2637_vm8, %v11822_v7 }
0x110c   :  { %v11825_v34 = vpop.f32.mrb[176].mxu1 }
0x110d   :  { %v7016_v27 = vpop.f32.mrb[177].mxu1 }
0x110e   :  { %11855 = vmatprep.mubr.msk.f32.mxu0 %vm2637_vm8, %v7016_v27 }
0x110f   :  { %11856 = vmatmul.mubr.msk.f32.gmra.mrb[156].mxu0 %vm2637_vm8, %v11825_v34 }
0x1110   :  { %12002 = vmatprep.mubr.msk.f32.mxu0 %vm13713_vm0, %v18400_v26 }
0x11c6   :  { %v11836_v10 = vpop.f32.mrb[142].mxu0 }
0x11c7   :  { %v7247_v60 = vadd.f32 %v11836_v10, %v8872_v48  ;;  %v7144_v1 = vpop.f32.mrb[143].mxu0 }
0x11c8   :  { %v7246_v20 = vadd.f32 %v8872_v48, %v7144_v1 }
0x11c9   :  { %v17601_v53 = vadd.f32 %v7247_v60, %v15502_v4 }
0x11ca   :  { %v17604_v41 = vadd.f32 %v7246_v20, %v15483_v55  ;;  %v11839_v62 = vpop.f32.mrb[144].mxu0 }
0x11cb   :  { %v7249_v46 = vadd.f32 %v11839_v62, %v8872_v48  ;;  %7282 = vadd.xlane.f32.xlu0 %v17601_v53  ;;  %v7154_v21 = vpop.f32.mrb[145].mxu0 }
0x11cc   :  { %v7248_v8 = vadd.f32 %v8872_v48, %v7154_v21  ;;  %7280 = vadd.xlane.f32.xlu1 %v17604_v41 }
0x11cd   :  { %v17609_v6 = vadd.f32 %v7249_v46, %v15523_v25 }
0x11ce   :  { %v17612_v18 = vadd.f32 %v7248_v8, %v15504_v54  ;;  %v11842_v14 = vpop.f32.mrb[146].mxu0 }
0x11cf   :  { %v7251_v4 = vadd.f32 %v11842_v14, %v8872_v48  ;;  %7286 = vadd.xlane.f32.xlu0 %v17609_v6  ;;  %v7164_v55 = vpop.f32.mrb[147].mxu0 }
0x11d0   :  { %v7250_v43 = vadd.f32 %v8872_v48, %v7164_v55  ;;  %7284 = vadd.xlane.f32.xlu1 %v17612_v18 }
0x11d1   :  { %v17617_v31 = vadd.f32 %v7251_v4, %v15545_v29 }
0x11d2   :  { %v17620_v44 = vadd.f32 %v7250_v43, %v15526_v37  ;;  %v11845_v47 = vpop.f32.mrb[148].mxu0 }
0x11d3   :  { %v7253_v25 = vadd.f32 %v11845_v47, %v8872_v48  ;;  %7290 = vadd.xlane.f32.xlu0 %v17617_v31  ;;  %v7174_v54 = vpop.f32.mrb[149].mxu0 }
0x11d4   :  { %v7252_v49 = vadd.f32 %v8872_v48, %v7174_v54  ;;  %7288 = vadd.xlane.f32.xlu1 %v17620_v44 }
0x11d5   :  { %v17625_v23 = vadd.f32 %v7253_v25, %v15567_v59 }
0x11d6   :  { %v17628_v52 = vadd.f32 %v7252_v49, %v15548_v24  ;;  %v11848_v5 = vpop.f32.mrb[150].mxu0 }
0x11d7   :  { %v7255_v29 = vadd.f32 %v11848_v5, %v8872_v48  ;;  %7294 = vadd.xlane.f32.xlu0 %v17625_v23  ;;  %v7184_v37 = vpop.f32.mrb[151].mxu0 }
0x11d8   :  { %v7254_v50 = vadd.f32 %v8872_v48, %v7184_v37  ;;  %7292 = vadd.xlane.f32.xlu1 %v17628_v52 }
0x11d9   :  { %v17633_v19 = vadd.f32 %v7255_v29, %v15589_v61 }
0x11da   :  { %v17636_v63 = vadd.f32 %v7254_v50, %v15570_v30  ;;  %v11851_v58 = vpop.f32.mrb[152].mxu0 }
0x11db   :  { %v7257_v59 = vadd.f32 %v11851_v58, %v8872_v48  ;;  %7298 = vadd.xlane.f32.xlu0 %v17633_v19  ;;  %v7194_v24 = vpop.f32.mrb[153].mxu0 }
0x11dc   :  { %v7256_v16 = vadd.f32 %v8872_v48, %v7194_v24  ;;  %7296 = vadd.xlane.f32.xlu1 %v17636_v63 }
0x11dd   :  { %v17641_v51 = vadd.f32 %v7257_v59, %v15611_v15 }
0x11de   :  { %v17644_v39 = vadd.f32 %v7256_v16, %v15592_v13  ;;  %v11854_v36 = vpop.f32.mrb[154].mxu0 }
0x11df   :  { %v7259_v61 = vadd.f32 %v11854_v36, %v8872_v48  ;;  %7302 = vadd.xlane.f32.xlu0 %v17641_v51  ;;  %v7204_v30 = vpop.f32.mrb[155].mxu0 }
0x11e0   :  { %v7258_v3 = vadd.f32 %v8872_v48, %v7204_v30  ;;  %7300 = vadd.xlane.f32.xlu1 %v17644_v39 }
0x11e1   :  { %v17649_v12 = vadd.f32 %v7259_v61, %v18354_v45  ;;  %v7502_v45 = vld [vmem:[%s18247_s18 + $0x8] sm:$0xff] }
0x11e2   :  { %v17652_v33 = vadd.f32 %v7258_v3, %v15614_v17  ;;  %v11857_v32 = vpop.f32.mrb[156].mxu0  ;;  %v7501_v17 = vld [vmem:[%s18247_s18] sm:$0xff] }
0x11e3   :  { %v7261_v15 = vadd.f32 %v11857_v32, %v8872_v48  ;;  %7306 = vadd.xlane.f32.xlu0 %v17649_v12  ;;  %v7214_v13 = vpop.f32.mrb[157].mxu0  ;;  %v13192_v9 = vpack.c.bf16 %v7502_v45, %v7501_v17 }
0x11e4   :  { %v7260_v2 = vadd.f32 %v8872_v48, %v7214_v13  ;;  %7304 = vadd.xlane.f32.xlu1 %v17652_v33 }
0x11e5   :  { %v17657_v28 = vadd.f32 %v7261_v15, %v18356_v11  ;;  %v7503_v11 = vld [vmem:[%s18247_s18 + $0x10] sm:$0xff]  ;;  %13193 = vmatprep.subr.bf16.mxu1 %v13192_v9 }
0x11e6   :  { %v17660_v22 = vadd.f32 %v7260_v2, %v18355_v42  ;;  %v7504_v42 = vld [vmem:[%s18247_s18 + $0x18] sm:$0xff]  ;;  %13195 = vmatpush3.bf16.msra.mxu1 %v13192_v9 }
0x11e7   :  { %7310 = vadd.xlane.f32.xlu0 %v17657_v28  ;;  %v13196_v40 = vpack.c.bf16 %v7504_v42, %v7503_v11 }
0x11e8   :  { %7308 = vadd.xlane.f32.xlu1 %v17660_v22 }
0x11e9   :  { %13197 = vmatprep.subr.bf16.mxu1 %v13196_v40 }
0x11ea   :  { %13199 = vmatpush3.bf16.msra.mxu1 %v13196_v40 }
0x11eb   :  { %13201 = vmatprep.subr.bf16.mxu1 %v13200_v56 }
0x11ee   :  { %13203 = vmatpush3.bf16.msra.mxu1 %v13200_v56 }
0x1258   :  { %v7283_v7 = vpop.xlane.xlu0 %7282 }
0x1259   :  { %v7314_v35 = vmul.f32 0.0078125, %v7283_v7  ;;  %v7281_v34 = vpop.xlane.xlu1 %7280 }
0x125a   :  { %v7313_v27 = vmul.f32 0.0078125, %v7281_v34 }
0x125b   :  { %v17683_v48 = vsub.f32 %v17601_v53, %v7314_v35 }
0x125c   :  { %v17686_v10 = vsub.f32 %v17604_v41, %v7313_v27  ;;  %v7287_v60 = vpop.xlane.xlu0 %7286 }
0x125d   :  { %v7316_v1 = vmul.f32 0.0078125, %v7287_v60  ;;  %v7285_v20 = vpop.xlane.xlu1 %7284  ;;  %v7346_v62 = vmul.f32 %v17683_v48, %v17683_v48  ;;  %v7507_v60 = vld [vmem:[%s18247_s18 + $0x30] sm:$0xff] }
0x125e   :  { %v7315_v46 = vmul.f32 0.0078125, %v7285_v20  ;;  %v7345_v21 = vmul.f32 %v17686_v10, %v17686_v10  ;;  %v7510_v20 = vld [vmem:[%s18247_s18 + $0x48] sm:$0xff] }
0x125f   :  { %v17693_v8 = vsub.f32 %v17609_v6, %v7316_v1  ;;  %7363 = vadd.xlane.f32.xlu0 %v7346_v62 }
0x1260   :  { %v17696_v53 = vsub.f32 %v17612_v18, %v7315_v46  ;;  %v7291_v14 = vpop.xlane.xlu0 %7290  ;;  %7361 = vadd.xlane.f32.xlu1 %v7345_v21  ;;  %v7511_v46 = vld [vmem:[%s18247_s18 + $0x50] sm:$0xff]  ;;  %v7512_v21 = vld [vmem:[%s18247_s18 + $0x58] sm:$0xff] }
0x1261   :  { %v7318_v41 = vmul.f32 0.0078125, %v7291_v14  ;;  %v7289_v4 = vpop.xlane.xlu1 %7288  ;;  %v7348_v55 = vmul.f32 %v17693_v8, %v17693_v8  ;;  %v13212_v14 = vpack.c.bf16 %v7512_v21, %v7511_v46 }
0x1262   :  { %v7317_v43 = vmul.f32 0.0078125, %v7289_v4  ;;  %v7347_v47 = vmul.f32 %v17696_v53, %v17696_v53  ;;  %v7514_v4 = vld [vmem:[%s18247_s18 + $0x68] sm:$0xff] }
0x1263   :  { %v17703_v25 = vsub.f32 %v17617_v31, %v7318_v41  ;;  %7367 = vadd.xlane.f32.xlu0 %v7348_v55  ;;  %v7513_v41 = vld [vmem:[%s18247_s18 + $0x60] sm:$0xff] }
0x1264   :  { %v17706_v6 = vsub.f32 %v17620_v44, %v7317_v43  ;;  %v7295_v18 = vpop.xlane.xlu0 %7294  ;;  %7365 = vadd.xlane.f32.xlu1 %v7347_v47  ;;  %v13216_v55 = vpack.c.bf16 %v7514_v4, %v7513_v41  ;;  %v7515_v43 = vld [vmem:[%s18247_s18 + $0x70] sm:$0xff]  ;;  %v7516_v47 = vld [vmem:[%s18247_s18 + $0x78] sm:$0xff] }
0x1265   :  { %v7320_v54 = vmul.f32 0.0078125, %v7295_v18  ;;  %v7293_v49 = vpop.xlane.xlu1 %7292  ;;  %v7350_v5 = vmul.f32 %v17703_v25, %v17703_v25  ;;  %v13220_v18 = vpack.c.bf16 %v7516_v47, %v7515_v43 }
0x1266   :  { %v7319_v29 = vmul.f32 0.0078125, %v7293_v49  ;;  %v7349_v37 = vmul.f32 %v17706_v6, %v17706_v6  ;;  %v7686_v49 = vld [vmem:[%s18248_s20 + $0x8] sm:$0xff] }
0x1267   :  { %v17713_v50 = vsub.f32 %v17625_v23, %v7320_v54  ;;  %7371 = vadd.xlane.f32.xlu0 %v7350_v5  ;;  %v7685_v54 = vld [vmem:[%s18248_s20] sm:$0xff] }
0x1268   :  { %v17716_v31 = vsub.f32 %v17628_v52, %v7319_v29  ;;  %v7299_v44 = vpop.xlane.xlu0 %7298  ;;  %7369 = vadd.xlane.f32.xlu1 %v7349_v37  ;;  %v17798_v5 = vpack.c.bf16 %v7686_v49, %v7685_v54 }
0x1269   :  { %v7322_v58 = vmul.f32 0.0078125, %v7299_v44  ;;  %v7297_v59 = vpop.xlane.xlu1 %7296  ;;  %v7352_v24 = vmul.f32 %v17713_v50, %v17713_v50 }
0x126a   :  { %v7321_v16 = vmul.f32 0.0078125, %v7297_v59  ;;  %v7351_v36 = vmul.f32 %v17716_v31, %v17716_v31 }
0x126b   :  { %v17723_v61 = vsub.f32 %v17633_v19, %v7322_v58  ;;  %7375 = vadd.xlane.f32.xlu0 %v7352_v24 }
0x126c   :  { %v17726_v23 = vsub.f32 %v17636_v63, %v7321_v16  ;;  %v7303_v52 = vpop.xlane.xlu0 %7302  ;;  %7373 = vadd.xlane.f32.xlu1 %v7351_v36 }
0x126d   :  { %v7324_v30 = vmul.f32 0.0078125, %v7303_v52  ;;  %v7301_v3 = vpop.xlane.xlu1 %7300  ;;  %v7354_v32 = vmul.f32 %v17723_v61, %v17723_v61 }
0x126e   :  { %v7323_v15 = vmul.f32 0.0078125, %v7301_v3  ;;  %v7353_v13 = vmul.f32 %v17726_v23, %v17726_v23 }
0x126f   :  { %v17733_v2 = vsub.f32 %v17641_v51, %v7324_v30  ;;  %7379 = vadd.xlane.f32.xlu0 %v7354_v32 }
0x1270   :  { %v17736_v19 = vsub.f32 %v17644_v39, %v7323_v15  ;;  %v7307_v63 = vpop.xlane.xlu0 %7306  ;;  %7377 = vadd.xlane.f32.xlu1 %v7353_v13 }
0x1271   :  { %v7326_v17 = vmul.f32 0.0078125, %v7307_v63  ;;  %v7305_v45 = vpop.xlane.xlu1 %7304  ;;  %v7356_v11 = vmul.f32 %v17733_v2, %v17733_v2 }
0x1272   :  { %v7325_v9 = vmul.f32 0.0078125, %v7305_v45  ;;  %v7355_v42 = vmul.f32 %v17736_v19, %v17736_v19 }
0x1273   :  { %v17743_v40 = vsub.f32 %v17649_v12, %v7326_v17  ;;  %7383 = vadd.xlane.f32.xlu0 %v7356_v11 }
0x1274   :  { %v17746_v51 = vsub.f32 %v17652_v33, %v7325_v9  ;;  %v7311_v39 = vpop.xlane.xlu0 %7310  ;;  %7381 = vadd.xlane.f32.xlu1 %v7355_v42 }
0x1275   :  { %v7328_v57 = vmul.f32 0.0078125, %v7311_v39  ;;  %v7309_v0 = vpop.xlane.xlu1 %7308  ;;  %v7358_v56 = vmul.f32 %v17743_v40, %v17743_v40 }
0x1276   :  { %v7327_v7 = vmul.f32 0.0078125, %v7309_v0  ;;  %v7357_v35 = vmul.f32 %v17746_v51, %v17746_v51 }
0x1277   :  { %v17753_v34 = vsub.f32 %v17657_v28, %v7328_v57  ;;  %7387 = vadd.xlane.f32.xlu0 %v7358_v56  ;;  %v7508_v28 = vld [vmem:[%s18247_s18 + $0x38] sm:$0xff] }
0x1278   :  { %v17756_v12 = vsub.f32 %v17660_v22, %v7327_v7  ;;  %7385 = vadd.xlane.f32.xlu1 %v7357_v35  ;;  %v7509_v22 = vld [vmem:[%s18247_s18 + $0x40] sm:$0xff]  ;;  %v13204_v1 = vpack.c.bf16 %v7508_v28, %v7507_v60 }
0x1279   :  { %v7360_v33 = vmul.f32 %v17753_v34, %v17753_v34  ;;  %v13208_v62 = vpack.c.bf16 %v7510_v20, %v7509_v22  ;;  %v17804_v7 = vld [vmem:[%s18249_s16] ss:$0 sm:$0xff]  ;;  %v7687_v20 = vld [vmem:[%s18248_s20 + $0x10] sm:$0xff] }
0x127a   :  { %v7359_v27 = vmul.f32 %v17756_v12, %v17756_v12  ;;  %13205 = vmatprep.subr.bf16.mxu1 %v13204_v1 }
0x127b   :  { %7391 = vadd.xlane.f32.xlu0 %v7360_v33  ;;  %13207 = vmatpush3.bf16.msra.mxu1 %v13204_v1 }
0x127c   :  { %7389 = vadd.xlane.f32.xlu1 %v7359_v27  ;;  %13209 = vmatprep.subr.bf16.mxu1 %v13208_v62 }
0x127f   :  { %13211 = vmatpush3.bf16.msra.mxu1 %v13208_v62  ;;  %v7688_v62 = vld [vmem:[%s18248_s20 + $0x18] sm:$0xff] }
0x1280   :  { %13213 = vmatprep.subr.bf16.mxu1 %v13212_v14 }
0x1283   :  { %13215 = vmatpush3.bf16.msra.mxu1 %v13212_v14 }
0x1284   :  { %13217 = vmatprep.subr.bf16.mxu1 %v13216_v55 }
0x1287   :  { %13219 = vmatpush3.bf16.msra.mxu1 %v13216_v55 }
0x1288   :  { %13221 = vmatprep.subr.bf16.mxu1 %v13220_v18 }
0x128b   :  { %13223 = vmatpush3.bf16.msra.mxu1 %v13220_v18  ;;  %v13228_v18 = vpack.c.bf16 %v7688_v62, %v7687_v20 }
0x128c   :  { %13225 = vmatprep.subr.bf16.mxu1 %v17798_v5 }
0x12ec   :  { %v7364_v29 = vpop.xlane.xlu0 %7363 }
0x12ed   :  { %v7394_v37 = vmul.f32 0.0078125, %v7364_v29  ;;  %v7362_v44 = vpop.xlane.xlu1 %7361 }
0x12ee   :  { %v7393_v58 = vmul.f32 0.0078125, %v7362_v44  ;;  %v7689_v44 = vld [vmem:[%s18248_s20 + $0x20] sm:$0xff] }
0x12ef   :  { %v7410_v59 = vadd.f32 1e-05, %v7394_v37 }
0x12f0   :  { %v7409_v24 = vadd.f32 1e-05, %v7393_v58  ;;  %v7368_v16 = vpop.xlane.xlu0 %7367  ;;  %v7690_v58 = vld [vmem:[%s18248_s20 + $0x28] sm:$0xff] }
0x12f1   :  { %13615 = vrsqrt.f32 %v7410_v59  ;;  %v7396_v36 = vmul.f32 0.0078125, %v7368_v16  ;;  %v7366_v52 = vpop.xlane.xlu1 %7365 }
0x12f2   :  { %13617 = vrsqrt.f32 %v7409_v24  ;;  %v7395_v30 = vmul.f32 0.0078125, %v7366_v52 }
0x12f3   :  { %v7412_v3 = vadd.f32 1e-05, %v7396_v36 }
0x12f4   :  { %v7411_v32 = vadd.f32 1e-05, %v7395_v30  ;;  %v7372_v15 = vpop.xlane.xlu0 %7371 }
0x12f5   :  { %13619 = vrsqrt.f32 %v7412_v3  ;;  %v7398_v13 = vmul.f32 0.0078125, %v7372_v15  ;;  %v7370_v63 = vpop.xlane.xlu1 %7369  ;;  %v13232_v15 = vpack.c.bf16 %v7690_v58, %v7689_v44  ;;  %v7695_v44 = vld [vmem:[%s18248_s20 + $0x50] sm:$0xff] }
0x12f6   :  { %13621 = vrsqrt.f32 %v7411_v32  ;;  %v7397_v17 = vmul.f32 0.0078125, %v7370_v63 }
0x12f7   :  { %v7414_v45 = vadd.f32 1e-05, %v7398_v13 }
0x12f8   :  { %v7413_v11 = vadd.f32 1e-05, %v7397_v17  ;;  %v7376_v9 = vpop.xlane.xlu0 %7375 }
0x12f9   :  { %13623 = vrsqrt.f32 %v7414_v45  ;;  %v7400_v42 = vmul.f32 0.0078125, %v7376_v9  ;;  %v7374_v39 = vpop.xlane.xlu1 %7373  ;;  %v7692_v9 = vld [vmem:[%s18248_s20 + $0x38] sm:$0xff] }
0x12fa   :  { %13625 = vrsqrt.f32 %v7413_v11  ;;  %v7399_v57 = vmul.f32 0.0078125, %v7374_v39  ;;  %v7691_v11 = vld [vmem:[%s18248_s20 + $0x30] sm:$0xff] }
0x12fb   :  { %v13616_v0 = vpop.eup %13615  ;;  %v7416_v56 = vadd.f32 1e-05, %v7400_v42 }
0x12fc   :  { %v13618_v35 = vpop.eup %13617  ;;  %v7442_v33 = vmul.f32 %v13616_v0, %v17683_v48  ;;  %v7415_v27 = vadd.f32 1e-05, %v7399_v57  ;;  %v7380_v60 = vpop.xlane.xlu0 %7379  ;;  %v17817_v48 = vld [vmem:[%s18250_s17] ss:$0 sm:$0xff] }
0x12fd   :  { %13627 = vrsqrt.f32 %v7416_v56  ;;  %v7402_v28 = vmul.f32 0.0078125, %v7380_v60  ;;  %v7378_v22 = vpop.xlane.xlu1 %7377  ;;  %v7441_v1 = vmul.f32 %v13618_v35, %v17686_v10 }
0x12fe   :  { %13629 = vrsqrt.f32 %v7415_v27  ;;  %v7401_v46 = vmul.f32 0.0078125, %v7378_v22  ;;  %v7464_v21 = vmul.f32 %v17804_v7, %v7442_v33  ;;  %v13236_v27 = vpack.c.bf16 %v7692_v9, %v7691_v11 }
0x12ff   :  { %v13620_v14 = vpop.eup %13619  ;;  %v7418_v41 = vadd.f32 1e-05, %v7402_v28  ;;  %v7463_v10 = vmul.f32 %v17804_v7, %v7441_v1 }
0x1300   :  { %v13622_v4 = vpop.eup %13621  ;;  %v7417_v55 = vadd.f32 1e-05, %v7401_v46  ;;  %v7384_v43 = vpop.xlane.xlu0 %7383  ;;  %v7444_v47 = vmul.f32 %v13620_v14, %v17693_v8  ;;  %v17833_v8 = vadd.f32 %v17817_v48, %v7464_v21 }
0x1301   :  { %13631 = vrsqrt.f32 %v7418_v41  ;;  %v7404_v54 = vmul.f32 0.0078125, %v7384_v43  ;;  %v7382_v49 = vpop.xlane.xlu1 %7381  ;;  %v17823_v29 = vadd.f32 %v17817_v48, %v7463_v10  ;;  %v7443_v37 = vmul.f32 %v13622_v4, %v17696_v53  ;;  %v7693_v41 = vld [vmem:[%s18248_s20 + $0x40] sm:$0xff] }
0x1302   :  { %13633 = vrsqrt.f32 %v7417_v55  ;;  %v7403_v59 = vmul.f32 0.0078125, %v7382_v49  ;;  %v7466_v24 = vmul.f32 %v17804_v7, %v7444_v47 }
0x1303   :  { %v13624_v16 = vpop.eup %13623  ;;  %v7420_v36 = vadd.f32 1e-05, %v7404_v54  ;;  %11890 = vmatprep.mubr.f32.mxu1 %v17823_v29  ;;  %v7465_v53 = vmul.f32 %v17804_v7, %v7443_v37 }
0x1304   :  { %v13626_v52 = vpop.eup %13625  ;;  %v7419_v30 = vadd.f32 1e-05, %v7403_v59  ;;  %v7388_v3 = vpop.xlane.xlu0 %7387  ;;  %11891 = vmatmul.mubr.f32.vlgmr.msra.gmra.mrb[178].mxu1 %v17833_v8  ;;  %v7446_v32 = vmul.f32 %v13624_v16, %v17703_v25  ;;  %v17852_v42 = vadd.f32 %v17817_v48, %v7466_v24 }
0x1305   :  { %13635 = vrsqrt.f32 %v7420_v36  ;;  %v7406_v13 = vmul.f32 0.0078125, %v7388_v3  ;;  %v7386_v63 = vpop.xlane.xlu1 %7385  ;;  %v17841_v17 = vadd.f32 %v17817_v48, %v7465_v53  ;;  %v7445_v45 = vmul.f32 %v13626_v52, %v17706_v6  ;;  %13227 = vmatpush3.bf16.msra.mxu1 %v17798_v5 }
0x1306   :  { %13637 = vrsqrt.f32 %v7419_v30  ;;  %v7405_v25 = vmul.f32 0.0078125, %v7386_v63  ;;  %v7468_v39 = vmul.f32 %v17804_v7, %v7446_v32  ;;  %13229 = vmatprep.subr.bf16.mxu1 %v13228_v18 }
0x1307   :  { %v13628_v57 = vpop.eup %13627  ;;  %v7422_v6 = vadd.f32 1e-05, %v7406_v13  ;;  %11893 = vmatprep.mubr.f32.mxu1 %v17841_v17  ;;  %v7467_v5 = vmul.f32 %v17804_v7, %v7445_v45 }
0x1308   :  { %v13630_v0 = vpop.eup %13629  ;;  %v7421_v56 = vadd.f32 1e-05, %v7405_v25  ;;  %v7392_v35 = vpop.xlane.xlu0 %7391  ;;  %11894 = vmatmul.mubr.f32.gmra.mrb[180].mxu1 %v17852_v42  ;;  %v7448_v33 = vmul.f32 %v13628_v57, %v17713_v50  ;;  %v17864_v62 = vadd.f32 %v17817_v48, %v7468_v39 }
0x1309   :  { %13639 = vrsqrt.f32 %v7422_v6  ;;  %v7408_v60 = vmul.f32 0.0078125, %v7392_v35  ;;  %v7390_v28 = vpop.xlane.xlu1 %7389  ;;  %v17860_v22 = vadd.f32 %v17817_v48, %v7467_v5  ;;  %v7447_v1 = vmul.f32 %v13630_v0, %v17716_v31  ;;  %13231 = vmatpush3.bf16.msra.mxu1 %v13228_v18  ;;  %v7694_v31 = vld [vmem:[%s18248_s20 + $0x48] sm:$0xff] }
0x130a   :  { %13641 = vrsqrt.f32 %v7421_v56  ;;  %v7407_v20 = vmul.f32 0.0078125, %v7390_v28  ;;  %v7470_v46 = vmul.f32 %v17804_v7, %v7448_v33  ;;  %13233 = vmatprep.subr.bf16.mxu1 %v13232_v15  ;;  %v13240_v49 = vpack.c.bf16 %v7694_v31, %v7693_v41 }
0x130b   :  { %v13632_v21 = vpop.eup %13631  ;;  %v7424_v50 = vadd.f32 1e-05, %v7408_v60  ;;  %11896 = vmatprep.mubr.f32.mxu1 %v17860_v22  ;;  %v7469_v14 = vmul.f32 %v17804_v7, %v7447_v1 }
0x130c   :  { %v13634_v10 = vpop.eup %13633  ;;  %v7423_v4 = vadd.f32 1e-05, %v7407_v20  ;;  %11897 = vmatmul.mubr.f32.gmra.mrb[182].mxu1 %v17864_v62  ;;  %v7450_v55 = vmul.f32 %v13632_v21, %v17723_v61  ;;  %v17882_v18 = vadd.f32 %v17817_v48, %v7470_v46 }
0x130d   :  { %13643 = vrsqrt.f32 %v7424_v50  ;;  %v17878_v43 = vadd.f32 %v17817_v48, %v7469_v14  ;;  %v7449_v47 = vmul.f32 %v13634_v10, %v17726_v23  ;;  %13235 = vmatpush3.bf16.msra.mxu1 %v13232_v15  ;;  %v7696_v23 = vld [vmem:[%s18248_s20 + $0x58] sm:$0xff] }
0x130e   :  { %13645 = vrsqrt.f32 %v7423_v4  ;;  %v7472_v54 = vmul.f32 %v17804_v7, %v7450_v55  ;;  %13237 = vmatprep.subr.bf16.mxu1 %v13236_v27  ;;  %v13244_v52 = vpack.c.bf16 %v7696_v23, %v7695_v44 }
0x130f   :  { %v13636_v37 = vpop.eup %13635  ;;  %11899 = vmatprep.mubr.f32.mxu1 %v17878_v43  ;;  %v7471_v61 = vmul.f32 %v17804_v7, %v7449_v47 }
0x1310   :  { %v13638_v58 = vpop.eup %13637  ;;  %11900 = vmatmul.mubr.f32.gmra.mrb[184].mxu1 %v17882_v18  ;;  %v7452_v59 = vmul.f32 %v13636_v37, %v17733_v2  ;;  %v17900_v36 = vadd.f32 %v17817_v48, %v7472_v54  ;;  %v7697_v2 = vld [vmem:[%s18248_s20 + $0x60] sm:$0xff] }
0x1311   :  { %v17896_v24 = vadd.f32 %v17817_v48, %v7471_v61  ;;  %v7451_v16 = vmul.f32 %v13638_v58, %v17736_v19  ;;  %13239 = vmatpush3.bf16.msra.mxu1 %v13236_v27  ;;  %v7698_v19 = vld [vmem:[%s18248_s20 + $0x68] sm:$0xff] }
0x1312   :  { %v7474_v53 = vmul.f32 %v17804_v7, %v7452_v59  ;;  %13241 = vmatprep.subr.bf16.mxu1 %v13240_v49  ;;  %v13248_v9 = vpack.c.bf16 %v7698_v19, %v7697_v2 }
0x1313   :  { %v13640_v30 = vpop.eup %13639  ;;  %11902 = vmatprep.mubr.f32.mxu1 %v17896_v24  ;;  %v7473_v3 = vmul.f32 %v17804_v7, %v7451_v16 }
0x1314   :  { %v13642_v32 = vpop.eup %13641  ;;  %11903 = vmatmul.mubr.f32.gmra.mrb[186].mxu1 %v17900_v36  ;;  %v7454_v15 = vmul.f32 %v13640_v30, %v17743_v40  ;;  %v17918_v45 = vadd.f32 %v17817_v48, %v7474_v53 }
0x1315   :  { %v17914_v13 = vadd.f32 %v17817_v48, %v7473_v3  ;;  %v7453_v63 = vmul.f32 %v13642_v32, %v17746_v51  ;;  %13243 = vmatpush3.bf16.msra.mxu1 %v13240_v49 }
0x1316   :  { %v7476_v11 = vmul.f32 %v17804_v7, %v7454_v15  ;;  %13245 = vmatprep.subr.bf16.mxu1 %v13244_v52 }
0x1317   :  { %v13644_v25 = vpop.eup %13643  ;;  %11905 = vmatprep.mubr.f32.mxu1 %v17914_v13  ;;  %v7475_v39 = vmul.f32 %v17804_v7, %v7453_v63 }
0x1318   :  { %v13646_v57 = vpop.eup %13645  ;;  %11906 = vmatmul.mubr.f32.gmra.mrb[188].mxu1 %v17918_v45  ;;  %v7456_v40 = vmul.f32 %v13644_v25, %v17753_v34  ;;  %v17930_v5 = vadd.f32 %v17817_v48, %v7476_v11 }
0x1319   :  { %v17926_v51 = vadd.f32 %v17817_v48, %v7475_v39  ;;  %v7455_v6 = vmul.f32 %v13646_v57, %v17756_v12  ;;  %13247 = vmatpush3.bf16.msra.mxu1 %v13244_v52  ;;  %v7699_v12 = vld [vmem:[%s18248_s20 + $0x70] sm:$0xff] }
0x131a   :  { %v7478_v0 = vmul.f32 %v17804_v7, %v7456_v40  ;;  %13249 = vmatprep.subr.bf16.mxu1 %v13248_v9 }
0x131b   :  { %11908 = vmatprep.mubr.f32.mxu1 %v17926_v51  ;;  %v7477_v56 = vmul.f32 %v17804_v7, %v7455_v6  ;;  %v7700_v7 = vld [vmem:[%s18248_s20 + $0x78] sm:$0xff] }
0x131c   :  { %11909 = vmatmul.mubr.f32.gmra.mrb[190].mxu1 %v17930_v5  ;;  %v17940_v35 = vadd.f32 %v17817_v48, %v7478_v0  ;;  %v13252_v33 = vpack.c.bf16 %v7700_v7, %v7699_v12 }
0x131d   :  { %v17937_v34 = vadd.f32 %v17817_v48, %v7477_v56  ;;  %13251 = vmatpush3.bf16.msra.mxu1 %v13248_v9  ;;  %v8875_v48 = vld [vmem:[%s18251_s19] ss:$0 sm:$0xff] }
0x131e   :  { %13253 = vmatprep.subr.bf16.mxu1 %v13252_v33 }
0x131f   :  { %11911 = vmatprep.mubr.f32.mxu1 %v17937_v34 }
0x1320   :  { %11912 = vmatmul.mubr.f32.gmra.mrb[192].mxu1 %v17940_v35 }
0x1321   :  { %13255 = vmatpush3.bf16.msra.mxu1 %v13252_v33 }
0x1322   :  { %13280 = vmatprep.subr.bf16.mxu1 %v18399_v38 }
0x13d7   :  { %v11892_v27 = vpop.f32.mrb[178].mxu1 }
0x13d8   :  { %v7596_v60 = vadd.f32 %v11892_v27, %v8875_v48  ;;  %v7590_v28 = vpop.f32.mrb[179].mxu1 }
0x13d9   :  { %v7591_v1 = vadd.f32 %v8875_v48, %v7590_v28 }
0x13da   :  { %v7670_v21 = vmax.f32 %v7596_v60, 0.0 }
0x13db   :  { %v7669_v20 = vmax.f32 %v7591_v1, 0.0  ;;  %v11895_v46 = vpop.f32.mrb[180].mxu1  ;;  %v8876_v1 = vld [vmem:[%s18252_s21] ss:$0 sm:$0xff] }
0x13dc   :  { %v7606_v50 = vadd.f32 %v11895_v46, %v8875_v48  ;;  %v7600_v14 = vpop.f32.mrb[181].mxu1 }
0x13dd   :  { %v7601_v41 = vadd.f32 %v8875_v48, %v7600_v14  ;;  %11946 = vmatprep.mubr.f32.mxu1 %v7669_v20 }
0x13de   :  { %11947 = vmatmul.mubr.f32.vlgmr.msra.gmra.mrb[194].mxu1 %v7670_v21  ;;  %v7672_v4 = vmax.f32 %v7606_v50, 0.0 }
0x13df   :  { %v7671_v31 = vmax.f32 %v7601_v41, 0.0  ;;  %v11898_v10 = vpop.f32.mrb[182].mxu1 }
0x13e0   :  { %v7616_v55 = vadd.f32 %v11898_v10, %v8875_v48  ;;  %v7610_v47 = vpop.f32.mrb[183].mxu1 }
0x13e1   :  { %v7611_v54 = vadd.f32 %v8875_v48, %v7610_v47  ;;  %11949 = vmatprep.mubr.f32.mxu1 %v7671_v31 }
0x13e2   :  { %11950 = vmatmul.mubr.f32.gmra.mrb[196].mxu1 %v7672_v4  ;;  %v7674_v61 = vmax.f32 %v7616_v55, 0.0 }
0x13e3   :  { %v7673_v49 = vmax.f32 %v7611_v54, 0.0  ;;  %v11901_v37 = vpop.f32.mrb[184].mxu1 }
0x13e4   :  { %v7626_v44 = vadd.f32 %v11901_v37, %v8875_v48  ;;  %v7620_v23 = vpop.f32.mrb[185].mxu1 }
0x13e5   :  { %v7621_v58 = vadd.f32 %v8875_v48, %v7620_v23  ;;  %11952 = vmatprep.mubr.f32.mxu1 %v7673_v49 }
0x13e6   :  { %11953 = vmatmul.mubr.f32.gmra.mrb[198].mxu1 %v7674_v61  ;;  %v7676_v53 = vmax.f32 %v7626_v44, 0.0 }
0x13e7   :  { %v7675_v59 = vmax.f32 %v7621_v58, 0.0  ;;  %v11904_v16 = vpop.f32.mrb[186].mxu1 }
0x13e8   :  { %v7636_v52 = vadd.f32 %v11904_v16, %v8875_v48  ;;  %v7630_v30 = vpop.f32.mrb[187].mxu1 }
0x13e9   :  { %v7631_v3 = vadd.f32 %v8875_v48, %v7630_v30  ;;  %11955 = vmatprep.mubr.f32.mxu1 %v7675_v59 }
0x13ea   :  { %11956 = vmatmul.mubr.f32.gmra.mrb[200].mxu1 %v7676_v53  ;;  %v7678_v32 = vmax.f32 %v7636_v52, 0.0 }
0x13eb   :  { %v7677_v2 = vmax.f32 %v7631_v3, 0.0  ;;  %v11907_v19 = vpop.f32.mrb[188].mxu1 }
0x13ec   :  { %v7646_v15 = vadd.f32 %v11907_v19, %v8875_v48  ;;  %v7640_v63 = vpop.f32.mrb[189].mxu1 }
0x13ed   :  { %v7641_v11 = vadd.f32 %v8875_v48, %v7640_v63  ;;  %11958 = vmatprep.mubr.f32.mxu1 %v7677_v2 }
0x13ee   :  { %11959 = vmatmul.mubr.f32.gmra.mrb[202].mxu1 %v7678_v32  ;;  %v7680_v39 = vmax.f32 %v7646_v15, 0.0 }
0x13ef   :  { %v7679_v9 = vmax.f32 %v7641_v11, 0.0  ;;  %v11910_v25 = vpop.f32.mrb[190].mxu1 }
0x13f0   :  { %v7656_v57 = vadd.f32 %v11910_v25, %v8875_v48  ;;  %v7650_v40 = vpop.f32.mrb[191].mxu1 }
0x13f1   :  { %v7651_v6 = vadd.f32 %v8875_v48, %v7650_v40  ;;  %11961 = vmatprep.mubr.f32.mxu1 %v7679_v9 }
0x13f2   :  { %11962 = vmatmul.mubr.f32.gmra.mrb[204].mxu1 %v7680_v39  ;;  %v7682_v12 = vmax.f32 %v7656_v57, 0.0 }
0x13f3   :  { %v7681_v0 = vmax.f32 %v7651_v6, 0.0  ;;  %v11913_v56 = vpop.f32.mrb[192].mxu1 }
0x13f4   :  { %v7666_v7 = vadd.f32 %v11913_v56, %v8875_v48  ;;  %v7660_v33 = vpop.f32.mrb[193].mxu1 }
0x13f5   :  { %v7661_v27 = vadd.f32 %v8875_v48, %v7660_v33  ;;  %11964 = vmatprep.mubr.f32.mxu1 %v7681_v0 }
0x13f6   :  { %11965 = vmatmul.mubr.f32.gmra.mrb[206].mxu1 %v7682_v12  ;;  %v7684_v28 = vmax.f32 %v7666_v7, 0.0 }
0x13f7   :  { %v7683_v60 = vmax.f32 %v7661_v27, 0.0 }
0x13f9   :  { %11967 = vmatprep.mubr.f32.mxu1 %v7683_v60 }
0x13fa   :  { %11968 = vmatmul.mubr.f32.gmra.mrb[208].mxu1 %v7684_v28 }
0x13fb   :  { %12037 = vmatprep.mubr.msk.f32.mxu1 %vm13713_vm0, %v18400_v26 }
0x14b1   :  { %v11948_v20 = vpop.f32.mrb[194].mxu1 }
0x14b2   :  { %v7780_v46 = vadd.f32 %v11948_v20, %v8876_v1  ;;  %v7774_v21 = vpop.f32.mrb[195].mxu1 }
0x14b3   :  { %v7775_v50 = vadd.f32 %v8876_v1, %v7774_v21 }
0x14b4   :  { %v17960_v14 = vadd.f32 %v7780_v46, %v17833_v8 }
0x14b5   :  { %v17963_v48 = vadd.f32 %v7775_v50, %v17823_v29  ;;  %v11951_v41 = vpop.f32.mrb[196].mxu1 }
0x14b6   :  { %v7790_v31 = vadd.f32 %v11951_v41, %v8876_v1  ;;  %7873 = vadd.xlane.f32.xlu0 %v17960_v14  ;;  %v7784_v10 = vpop.f32.mrb[197].mxu1 }
0x14b7   :  { %v7785_v26 = vadd.f32 %v8876_v1, %v7784_v10  ;;  %7871 = vadd.xlane.f32.xlu1 %v17963_v48 }
0x14b8   :  { %v17968_v4 = vadd.f32 %v7790_v31, %v17852_v42 }
0x14b9   :  { %v17971_v55 = vadd.f32 %v7785_v26, %v17841_v17  ;;  %v11954_v47 = vpop.f32.mrb[198].mxu1 }
0x14ba   :  { %v7800_v8 = vadd.f32 %v11954_v47, %v8876_v1  ;;  %7877 = vadd.xlane.f32.xlu0 %v17968_v4  ;;  %v7794_v29 = vpop.f32.mrb[199].mxu1 }
0x14bb   :  { %v7795_v54 = vadd.f32 %v8876_v1, %v7794_v29  ;;  %7875 = vadd.xlane.f32.xlu1 %v17971_v55 }
0x14bc   :  { %v17976_v49 = vadd.f32 %v7800_v8, %v17864_v62 }
0x14bd   :  { %v17979_v37 = vadd.f32 %v7795_v54, %v17860_v22  ;;  %v11957_v61 = vpop.f32.mrb[200].mxu1 }
0x14be   :  { %v7810_v42 = vadd.f32 %v11957_v61, %v8876_v1  ;;  %7881 = vadd.xlane.f32.xlu0 %v17976_v49  ;;  %v7804_v17 = vpop.f32.mrb[201].mxu1 }
0x14bf   :  { %v7805_v44 = vadd.f32 %v8876_v1, %v7804_v17  ;;  %7879 = vadd.xlane.f32.xlu1 %v17979_v37 }
0x14c0   :  { %v17984_v23 = vadd.f32 %v7810_v42, %v17882_v18 }
0x14c1   :  { %v17987_v58 = vadd.f32 %v7805_v44, %v17878_v43  ;;  %v11960_v59 = vpop.f32.mrb[202].mxu1 }
0x14c2   :  { %v7820_v62 = vadd.f32 %v11960_v59, %v8876_v1  ;;  %7885 = vadd.xlane.f32.xlu0 %v17984_v23  ;;  %v7814_v22 = vpop.f32.mrb[203].mxu1 }
0x14c3   :  { %v7815_v16 = vadd.f32 %v8876_v1, %v7814_v22  ;;  %7883 = vadd.xlane.f32.xlu1 %v17987_v58 }
0x14c4   :  { %v17992_v53 = vadd.f32 %v7820_v62, %v17900_v36 }
0x14c5   :  { %v17995_v52 = vadd.f32 %v7815_v16, %v17896_v24  ;;  %v11963_v30 = vpop.f32.mrb[204].mxu1 }
0x14c6   :  { %v7830_v18 = vadd.f32 %v11963_v30, %v8876_v1  ;;  %7889 = vadd.xlane.f32.xlu0 %v17992_v53  ;;  %v7824_v43 = vpop.f32.mrb[205].mxu1 }
0x14c7   :  { %v7825_v3 = vadd.f32 %v8876_v1, %v7824_v43  ;;  %7887 = vadd.xlane.f32.xlu1 %v17995_v52 }
0x14c8   :  { %v18000_v2 = vadd.f32 %v7830_v18, %v17918_v45 }
0x14c9   :  { %v18003_v19 = vadd.f32 %v7825_v3, %v17914_v13  ;;  %v11966_v32 = vpop.f32.mrb[206].mxu1 }
0x14ca   :  { %v7840_v36 = vadd.f32 %v11966_v32, %v8876_v1  ;;  %7893 = vadd.xlane.f32.xlu0 %v18000_v2  ;;  %v7834_v24 = vpop.f32.mrb[207].mxu1 }
0x14cb   :  { %v7835_v15 = vadd.f32 %v8876_v1, %v7834_v24  ;;  %7891 = vadd.xlane.f32.xlu1 %v18003_v19 }
0x14cc   :  { %v18008_v63 = vadd.f32 %v7840_v36, %v17930_v5 }
0x14cd   :  { %v18011_v11 = vadd.f32 %v7835_v15, %v17926_v51  ;;  %v11969_v9 = vpop.f32.mrb[208].mxu1 }
0x14ce   :  { %v7850_v45 = vadd.f32 %v11969_v9, %v8876_v1  ;;  %7897 = vadd.xlane.f32.xlu0 %v18008_v63  ;;  %v7844_v13 = vpop.f32.mrb[209].mxu1 }
0x14cf   :  { %v7845_v25 = vadd.f32 %v8876_v1, %v7844_v13  ;;  %7895 = vadd.xlane.f32.xlu1 %v18011_v11 }
0x14d0   :  { %v18016_v39 = vadd.f32 %v7850_v45, %v17940_v35 }
0x14d1   :  { %v18019_v57 = vadd.f32 %v7845_v25, %v17937_v34 }
0x14d2   :  { %7901 = vadd.xlane.f32.xlu0 %v18016_v39 }
0x14d3   :  { %7899 = vadd.xlane.f32.xlu1 %v18019_v57 }
0x1543   :  { %v7874_v51 = vpop.xlane.xlu0 %7873 }
0x1544   :  { %v7904_v5 = vmul.f32 0.0078125, %v7874_v51  ;;  %v7872_v40 = vpop.xlane.xlu1 %7871 }
0x1545   :  { %v7903_v6 = vmul.f32 0.0078125, %v7872_v40 }
0x1546   :  { %v18024_v0 = vsub.f32 %v17960_v14, %v7904_v5 }
0x1547   :  { %v18027_v56 = vsub.f32 %v17963_v48, %v7903_v6  ;;  %v7878_v12 = vpop.xlane.xlu0 %7877  ;;  %v8162_v6 = vld [vmem:[%s18253_s24] sm:$0xff] }
0x1548   :  { %v7906_v35 = vmul.f32 0.0078125, %v7878_v12  ;;  %v7876_v7 = vpop.xlane.xlu1 %7875  ;;  %v7936_v34 = vmul.f32 %v18024_v0, %v18024_v0 }
0x1549   :  { %v7905_v33 = vmul.f32 0.0078125, %v7876_v7  ;;  %v7935_v27 = vmul.f32 %v18027_v56, %v18027_v56 }
0x154a   :  { %v18034_v60 = vsub.f32 %v17968_v4, %v7906_v35  ;;  %7953 = vadd.xlane.f32.xlu0 %v7936_v34  ;;  %v8165_v35 = vld [vmem:[%s18253_s24 + $0x18] sm:$0xff]  ;;  %v8166_v34 = vld [vmem:[%s18253_s24 + $0x20] sm:$0xff] }
0x154b   :  { %v18037_v28 = vsub.f32 %v17971_v55, %v7905_v33  ;;  %v7882_v1 = vpop.xlane.xlu0 %7881  ;;  %7951 = vadd.xlane.f32.xlu1 %v7935_v27  ;;  %v8167_v33 = vld [vmem:[%s18253_s24 + $0x28] sm:$0xff] }
0x154c   :  { %v7908_v20 = vmul.f32 0.0078125, %v7882_v1  ;;  %v7880_v46 = vpop.xlane.xlu1 %7879  ;;  %v7938_v21 = vmul.f32 %v18034_v60, %v18034_v60  ;;  %v13287_v27 = vpack.c.bf16 %v8167_v33, %v8166_v34  ;;  %v8168_v1 = vld [vmem:[%s18253_s24 + $0x30] sm:$0xff] }
0x154d   :  { %v7907_v50 = vmul.f32 0.0078125, %v7880_v46  ;;  %v7937_v14 = vmul.f32 %v18037_v28, %v18037_v28 }
0x154e   :  { %v18044_v48 = vsub.f32 %v17976_v49, %v7908_v20  ;;  %7957 = vadd.xlane.f32.xlu0 %v7938_v21  ;;  %v8169_v20 = vld [vmem:[%s18253_s24 + $0x38] sm:$0xff]  ;;  %v8170_v21 = vld [vmem:[%s18253_s24 + $0x40] sm:$0xff] }
0x154f   :  { %v18047_v41 = vsub.f32 %v17979_v37, %v7907_v50  ;;  %v7886_v31 = vpop.xlane.xlu0 %7885  ;;  %7955 = vadd.xlane.f32.xlu1 %v7937_v14  ;;  %v13290_v46 = vpack.c.bf16 %v8169_v20, %v8168_v1  ;;  %v8171_v50 = vld [vmem:[%s18253_s24 + $0x48] sm:$0xff]  ;;  %v18168_v1 = vld [vmem:[%s18255_s23] ss:$0 sm:$0xff] }
0x1550   :  { %v7910_v10 = vmul.f32 0.0078125, %v7886_v31  ;;  %v7884_v26 = vpop.xlane.xlu1 %7883  ;;  %v7940_v4 = vmul.f32 %v18044_v48, %v18044_v48  ;;  %v13293_v14 = vpack.c.bf16 %v8171_v50, %v8170_v21  ;;  %v8172_v31 = vld [vmem:[%s18253_s24 + $0x50] sm:$0xff] }
0x1551   :  { %v7909_v55 = vmul.f32 0.0078125, %v7884_v26  ;;  %v7939_v47 = vmul.f32 %v18047_v41, %v18047_v41 }
0x1552   :  { %v18054_v8 = vsub.f32 %v17984_v23, %v7910_v10  ;;  %7961 = vadd.xlane.f32.xlu0 %v7940_v4  ;;  %v8173_v10 = vld [vmem:[%s18253_s24 + $0x58] sm:$0xff]  ;;  %v8174_v4 = vld [vmem:[%s18253_s24 + $0x60] sm:$0xff] }
0x1553   :  { %v18057_v29 = vsub.f32 %v17987_v58, %v7909_v55  ;;  %v7890_v54 = vpop.xlane.xlu0 %7889  ;;  %7959 = vadd.xlane.f32.xlu1 %v7939_v47  ;;  %v13296_v26 = vpack.c.bf16 %v8173_v10, %v8172_v31  ;;  %v8175_v55 = vld [vmem:[%s18253_s24 + $0x68] sm:$0xff] }
0x1554   :  { %v7912_v49 = vmul.f32 0.0078125, %v7890_v54  ;;  %v7888_v37 = vpop.xlane.xlu1 %7887  ;;  %v7942_v61 = vmul.f32 %v18054_v8, %v18054_v8  ;;  %v13299_v47 = vpack.c.bf16 %v8175_v55, %v8174_v4  ;;  %v8176_v54 = vld [vmem:[%s18253_s24 + $0x70] sm:$0xff] }
0x1555   :  { %v7911_v42 = vmul.f32 0.0078125, %v7888_v37  ;;  %v7941_v17 = vmul.f32 %v18057_v29, %v18057_v29 }
0x1556   :  { %v18064_v44 = vsub.f32 %v17992_v53, %v7912_v49  ;;  %7965 = vadd.xlane.f32.xlu0 %v7942_v61  ;;  %v8177_v49 = vld [vmem:[%s18253_s24 + $0x78] sm:$0xff] }
0x1557   :  { %v18067_v23 = vsub.f32 %v17995_v52, %v7911_v42  ;;  %v7894_v58 = vpop.xlane.xlu0 %7893  ;;  %7963 = vadd.xlane.f32.xlu1 %v7941_v17  ;;  %v13302_v37 = vpack.c.bf16 %v8177_v49, %v8176_v54 }
0x1558   :  { %v7914_v59 = vmul.f32 0.0078125, %v7894_v58  ;;  %v7892_v62 = vpop.xlane.xlu1 %7891  ;;  %v7944_v22 = vmul.f32 %v18064_v44, %v18064_v44 }
0x1559   :  { %v7913_v16 = vmul.f32 0.0078125, %v7892_v62  ;;  %v7943_v30 = vmul.f32 %v18067_v23, %v18067_v23 }
0x155a   :  { %v18074_v18 = vsub.f32 %v18000_v2, %v7914_v59  ;;  %7969 = vadd.xlane.f32.xlu0 %v7944_v22 }
0x155b   :  { %v18077_v53 = vsub.f32 %v18003_v19, %v7913_v16  ;;  %v7898_v52 = vpop.xlane.xlu0 %7897  ;;  %7967 = vadd.xlane.f32.xlu1 %v7943_v30 }
0x155c   :  { %v7916_v43 = vmul.f32 0.0078125, %v7898_v52  ;;  %v7896_v3 = vpop.xlane.xlu1 %7895  ;;  %v7946_v32 = vmul.f32 %v18074_v18, %v18074_v18 }
0x155d   :  { %v7915_v36 = vmul.f32 0.0078125, %v7896_v3  ;;  %v7945_v24 = vmul.f32 %v18077_v53, %v18077_v53 }
0x155e   :  { %v18084_v15 = vsub.f32 %v18008_v63, %v7916_v43  ;;  %7973 = vadd.xlane.f32.xlu0 %v7946_v32 }
0x155f   :  { %v18087_v2 = vsub.f32 %v18011_v11, %v7915_v36  ;;  %v7902_v19 = vpop.xlane.xlu0 %7901  ;;  %7971 = vadd.xlane.f32.xlu1 %v7945_v24 }
0x1560   :  { %v7918_v9 = vmul.f32 0.0078125, %v7902_v19  ;;  %v7900_v45 = vpop.xlane.xlu1 %7899  ;;  %v7948_v13 = vmul.f32 %v18084_v15, %v18084_v15 }
0x1561   :  { %v7917_v25 = vmul.f32 0.0078125, %v7900_v45  ;;  %v7947_v51 = vmul.f32 %v18087_v2, %v18087_v2 }
0x1562   :  { %v18094_v5 = vsub.f32 %v18016_v39, %v7918_v9  ;;  %7977 = vadd.xlane.f32.xlu0 %v7948_v13  ;;  %v8163_v39 = vld [vmem:[%s18253_s24 + $0x8] sm:$0xff] }
0x1563   :  { %v18097_v63 = vsub.f32 %v18019_v57, %v7917_v25  ;;  %7975 = vadd.xlane.f32.xlu1 %v7947_v51  ;;  %v8164_v57 = vld [vmem:[%s18253_s24 + $0x10] sm:$0xff]  ;;  %v13281_v12 = vpack.c.bf16 %v8163_v39, %v8162_v6  ;;  %v18161_v39 = vld [vmem:[%s18254_s22] ss:$0 sm:$0xff] }
0x1564   :  { %v7950_v11 = vmul.f32 %v18094_v5, %v18094_v5  ;;  %v13284_v7 = vpack.c.bf16 %v8165_v35, %v8164_v57 }
0x1565   :  { %v7949_v40 = vmul.f32 %v18097_v63, %v18097_v63  ;;  %13282 = vmatpush3.bf16.msra.mxu1 %v13281_v12 }
0x1566   :  { %7981 = vadd.xlane.f32.xlu0 %v7950_v11  ;;  %13283 = vmatprep.subr.bf16.mxu1 %v18399_v38 }
0x1567   :  { %7979 = vadd.xlane.f32.xlu1 %v7949_v40 }
0x1569   :  { %13285 = vmatpush3.bf16.msra.mxu1 %v13284_v7 }
0x156a   :  { %13286 = vmatprep.subr.bf16.mxu1 %v18399_v38 }
0x156d   :  { %13288 = vmatpush3.bf16.msra.mxu1 %v13287_v27 }
0x156e   :  { %13289 = vmatprep.subr.bf16.mxu1 %v18399_v38 }
0x1571   :  { %13291 = vmatpush3.bf16.msra.mxu1 %v13290_v46 }
0x1572   :  { %13292 = vmatprep.subr.bf16.mxu1 %v18399_v38 }
0x1575   :  { %13294 = vmatpush3.bf16.msra.mxu1 %v13293_v14 }
0x1576   :  { %13295 = vmatprep.subr.bf16.mxu1 %v18399_v38 }
0x1579   :  { %13297 = vmatpush3.bf16.msra.mxu1 %v13296_v26 }
0x157a   :  { %13298 = vmatprep.subr.bf16.mxu1 %v18399_v38 }
0x157d   :  { %13300 = vmatpush3.bf16.msra.mxu1 %v13299_v47 }
0x157e   :  { %13301 = vmatprep.subr.bf16.mxu1 %v18399_v38 }
0x1581   :  { %13303 = vmatpush3.bf16.msra.mxu1 %v13302_v37 }
0x15d7   :  { %v7954_v61 = vpop.xlane.xlu0 %7953 }
0x15d8   :  { %v7984_v42 = vmul.f32 0.0078125, %v7954_v61  ;;  %v7952_v17 = vpop.xlane.xlu1 %7951 }
0x15d9   :  { %v7983_v58 = vmul.f32 0.0078125, %v7952_v17 }
0x15da   :  { %v8000_v59 = vadd.f32 1e-05, %v7984_v42 }
0x15db   :  { %v7999_v62 = vadd.f32 1e-05, %v7983_v58  ;;  %v7958_v22 = vpop.xlane.xlu0 %7957 }
0x15dc   :  { %13647 = vrsqrt.f32 %v8000_v59  ;;  %v7986_v16 = vmul.f32 0.0078125, %v7958_v22  ;;  %v7956_v30 = vpop.xlane.xlu1 %7955 }
0x15dd   :  { %13649 = vrsqrt.f32 %v7999_v62  ;;  %v7985_v52 = vmul.f32 0.0078125, %v7956_v30 }
0x15de   :  { %v8002_v43 = vadd.f32 1e-05, %v7986_v16 }
0x15df   :  { %v8001_v3 = vadd.f32 1e-05, %v7985_v52  ;;  %v7962_v32 = vpop.xlane.xlu0 %7961 }
0x15e0   :  { %13651 = vrsqrt.f32 %v8002_v43  ;;  %v7988_v36 = vmul.f32 0.0078125, %v7962_v32  ;;  %v7960_v24 = vpop.xlane.xlu1 %7959 }
0x15e1   :  { %13653 = vrsqrt.f32 %v8001_v3  ;;  %v7987_v19 = vmul.f32 0.0078125, %v7960_v24 }
0x15e2   :  { %v8004_v9 = vadd.f32 1e-05, %v7988_v36 }
0x15e3   :  { %v8003_v45 = vadd.f32 1e-05, %v7987_v19  ;;  %v7966_v13 = vpop.xlane.xlu0 %7965 }
0x15e4   :  { %13655 = vrsqrt.f32 %v8004_v9  ;;  %v7990_v25 = vmul.f32 0.0078125, %v7966_v13  ;;  %v7964_v51 = vpop.xlane.xlu1 %7963 }
0x15e5   :  { %13657 = vrsqrt.f32 %v8003_v45  ;;  %v7989_v11 = vmul.f32 0.0078125, %v7964_v51 }
0x15e6   :  { %v13648_v40 = vpop.eup %13647  ;;  %v8006_v6 = vadd.f32 1e-05, %v7990_v25 }
0x15e7   :  { %v13650_v57 = vpop.eup %13649  ;;  %v8032_v12 = vmul.f32 %v13648_v40, %v18024_v0  ;;  %v8005_v35 = vadd.f32 1e-05, %v7989_v11  ;;  %v7970_v7 = vpop.xlane.xlu0 %7969 }
0x15e8   :  { %v8031_v34 = vmul.f32 %v13650_v57, %v18027_v56  ;;  %13659 = vrsqrt.f32 %v8006_v6  ;;  %v7992_v33 = vmul.f32 0.0078125, %v7970_v7  ;;  %v7968_v27 = vpop.xlane.xlu1 %7967 }
0x15e9   :  { %13661 = vrsqrt.f32 %v8005_v35  ;;  %v7991_v20 = vmul.f32 0.0078125, %v7968_v27  ;;  %v8054_v46 = vmul.f32 %v18161_v39, %v8032_v12 }
0x15ea   :  { %v13652_v21 = vpop.eup %13651  ;;  %v8008_v50 = vadd.f32 1e-05, %v7992_v33  ;;  %v8053_v0 = vmul.f32 %v18161_v39, %v8031_v34 }
0x15eb   :  { %v13654_v14 = vpop.eup %13653  ;;  %v8034_v31 = vmul.f32 %v13652_v21, %v18034_v60  ;;  %v8007_v56 = vadd.f32 1e-05, %v7991_v20  ;;  %v7974_v10 = vpop.xlane.xlu0 %7973  ;;  %v8076_v26 = vadd.f32 %v18168_v1, %v8054_v46 }
0x15ec   :  { %v8033_v4 = vmul.f32 %v13654_v14, %v18037_v28  ;;  %13663 = vrsqrt.f32 %v8008_v50  ;;  %v7994_v55 = vmul.f32 0.0078125, %v7974_v10  ;;  %v7972_v47 = vpop.xlane.xlu1 %7971  ;;  %v8075_v54 = vadd.f32 %v18168_v1, %v8053_v0 }
0x15ed   :  { %13665 = vrsqrt.f32 %v8007_v56  ;;  %v7993_v49 = vmul.f32 0.0078125, %v7972_v47  ;;  %v8056_v37 = vmul.f32 %v18161_v39, %v8034_v31 }
0x15ee   :  { %v13656_v61 = vpop.eup %13655  ;;  %v8010_v42 = vadd.f32 1e-05, %v7994_v55  ;;  %v13257_v17 = vpack.c.bf16 %v8076_v26, %v8075_v54  ;;  %v8055_v60 = vmul.f32 %v18161_v39, %v8033_v4 }
0x15ef   :  { %v13658_v58 = vpop.eup %13657  ;;  %v8036_v59 = vmul.f32 %v13656_v61, %v18044_v48  ;;  %v8009_v62 = vadd.f32 1e-05, %v7993_v49  ;;  %v7978_v22 = vpop.xlane.xlu0 %7977  ;;  %v8078_v28 = vadd.f32 %v18168_v1, %v8056_v37 }
0x15f0   :  { %v8035_v16 = vmul.f32 %v13658_v58, %v18047_v41  ;;  %13667 = vrsqrt.f32 %v8010_v42  ;;  %v7996_v30 = vmul.f32 0.0078125, %v7978_v22  ;;  %13258 = vmatpush3.bf16.msra.mxu0 %v13257_v17  ;;  %v7976_v52 = vpop.xlane.xlu1 %7975  ;;  %v8077_v43 = vadd.f32 %v18168_v1, %v8055_v60 }
0x15f1   :  { %13669 = vrsqrt.f32 %v8009_v62  ;;  %v7995_v3 = vmul.f32 0.0078125, %v7976_v52  ;;  %13259 = vmatprep.subr.bf16.mxu0 %v18399_v38  ;;  %v8058_v32 = vmul.f32 %v18161_v39, %v8036_v59 }
0x15f2   :  { %v13660_v36 = vpop.eup %13659  ;;  %v8012_v48 = vadd.f32 1e-05, %v7996_v30  ;;  %v13260_v24 = vpack.c.bf16 %v8078_v28, %v8077_v43  ;;  %v8057_v19 = vmul.f32 %v18161_v39, %v8035_v16 }
0x15f3   :  { %v13662_v9 = vpop.eup %13661  ;;  %v8038_v41 = vmul.f32 %v13660_v36, %v18054_v8  ;;  %v8011_v45 = vadd.f32 1e-05, %v7995_v3  ;;  %v7982_v13 = vpop.xlane.xlu0 %7981  ;;  %v8080_v25 = vadd.f32 %v18168_v1, %v8058_v32 }
0x15f4   :  { %v8037_v51 = vmul.f32 %v13662_v9, %v18057_v29  ;;  %13671 = vrsqrt.f32 %v8012_v48  ;;  %v7998_v11 = vmul.f32 0.0078125, %v7982_v13  ;;  %13261 = vmatpush3.bf16.msra.mxu0 %v13260_v24  ;;  %v7980_v40 = vpop.xlane.xlu1 %7979  ;;  %v8079_v6 = vadd.f32 %v18168_v1, %v8057_v19 }
0x15f5   :  { %13673 = vrsqrt.f32 %v8011_v45  ;;  %v7997_v57 = vmul.f32 0.0078125, %v7980_v40  ;;  %13262 = vmatprep.subr.bf16.mxu0 %v18399_v38  ;;  %v8060_v12 = vmul.f32 %v18161_v39, %v8038_v41 }
0x15f6   :  { %v13664_v35 = vpop.eup %13663  ;;  %v8014_v8 = vadd.f32 1e-05, %v7998_v11  ;;  %v13263_v7 = vpack.c.bf16 %v8080_v25, %v8079_v6  ;;  %v8059_v34 = vmul.f32 %v18161_v39, %v8037_v51 }
0x15f7   :  { %v13666_v33 = vpop.eup %13665  ;;  %v8040_v29 = vmul.f32 %v13664_v35, %v18064_v44  ;;  %v8013_v27 = vadd.f32 1e-05, %v7997_v57  ;;  %v8082_v20 = vadd.f32 %v18168_v1, %v8060_v12 }
0x15f8   :  { %v8039_v46 = vmul.f32 %v13666_v33, %v18067_v23  ;;  %13675 = vrsqrt.f32 %v8014_v8  ;;  %13264 = vmatpush3.bf16.msra.mxu0 %v13263_v7  ;;  %v8081_v21 = vadd.f32 %v18168_v1, %v8059_v34 }
0x15f9   :  { %13677 = vrsqrt.f32 %v8013_v27  ;;  %13265 = vmatprep.subr.bf16.mxu0 %v18399_v38  ;;  %v8062_v50 = vmul.f32 %v18161_v39, %v8040_v29 }
0x15fa   :  { %v13668_v0 = vpop.eup %13667  ;;  %v13266_v14 = vpack.c.bf16 %v8082_v20, %v8081_v21  ;;  %v8061_v31 = vmul.f32 %v18161_v39, %v8039_v46 }
0x15fb   :  { %v13670_v56 = vpop.eup %13669  ;;  %v8042_v44 = vmul.f32 %v13668_v0, %v18074_v18  ;;  %v8084_v10 = vadd.f32 %v18168_v1, %v8062_v50 }
0x15fc   :  { %v8041_v23 = vmul.f32 %v13670_v56, %v18077_v53  ;;  %13267 = vmatpush3.bf16.msra.mxu0 %v13266_v14  ;;  %v8083_v26 = vadd.f32 %v18168_v1, %v8061_v31 }
0x15fd   :  { %13268 = vmatprep.subr.bf16.mxu0 %v18399_v38  ;;  %v8064_v4 = vmul.f32 %v18161_v39, %v8042_v44 }
0x15fe   :  { %v13672_v55 = vpop.eup %13671  ;;  %v13269_v47 = vpack.c.bf16 %v8084_v10, %v8083_v26  ;;  %v8063_v54 = vmul.f32 %v18161_v39, %v8041_v23 }
0x15ff   :  { %v13674_v49 = vpop.eup %13673  ;;  %v8044_v37 = vmul.f32 %v13672_v55, %v18084_v15  ;;  %v8086_v18 = vadd.f32 %v18168_v1, %v8064_v4 }
0x1600   :  { %v8043_v61 = vmul.f32 %v13674_v49, %v18087_v2  ;;  %13270 = vmatpush3.bf16.msra.mxu0 %v13269_v47  ;;  %v8085_v53 = vadd.f32 %v18168_v1, %v8063_v54 }
0x1601   :  { %13271 = vmatprep.subr.bf16.mxu0 %v18399_v38  ;;  %v8066_v42 = vmul.f32 %v18161_v39, %v8044_v37 }
0x1602   :  { %v13676_v17 = vpop.eup %13675  ;;  %v13272_v60 = vpack.c.bf16 %v8086_v18, %v8085_v53  ;;  %v8065_v58 = vmul.f32 %v18161_v39, %v8043_v61 }
0x1603   :  { %v13678_v59 = vpop.eup %13677  ;;  %v8046_v62 = vmul.f32 %v13676_v17, %v18094_v5  ;;  %v8088_v15 = vadd.f32 %v18168_v1, %v8066_v42 }
0x1604   :  { %v8045_v22 = vmul.f32 %v13678_v59, %v18097_v63  ;;  %13273 = vmatpush3.bf16.msra.mxu0 %v13272_v60  ;;  %v8087_v2 = vadd.f32 %v18168_v1, %v8065_v58  ;;  %v8091_v63 = vld [vmem:[%s18256_s7] sm:$0xff] }
0x1605   :  { %13274 = vmatprep.subr.bf16.mxu0 %v18399_v38  ;;  %v8068_v28 = vmul.f32 %v18161_v39, %v8046_v62 }
0x1606   :  { %v13275_v16 = vpack.c.bf16 %v8088_v15, %v8087_v2  ;;  %v8067_v30 = vmul.f32 %v18161_v39, %v8045_v22  ;;  %v8879_v39 = vld [vmem:[%s18257_s25] ss:$0 sm:$0xff] }
0x1607   :  { %v8090_v52 = vadd.f32 %v18168_v1, %v8068_v28 }
0x1608   :  { %13276 = vmatpush3.bf16.msra.mxu0 %v13275_v16  ;;  %v8089_v43 = vadd.f32 %v18168_v1, %v8067_v30 }
0x1609   :  { %13277 = vmatprep.subr.bf16.mxu0 %v18399_v38 }
0x160a   :  { %v13278_v5 = vpack.c.bf16 %v8090_v52, %v8089_v43 }
0x160c   :  { %13279 = vmatpush3.bf16.msra.mxu0 %v13278_v5 }
0x160f   :  { %12003 = vmatmul.mubr.f32.vlgmr.msra.gmra.mrb[222].mxu0 %v8091_v63 }
0x16e2   :  { %v8158_v3 = vpop.f32.mrb[222].mxu0 }
0x16e3   :  { %v12004_v32 = vpop.f32.mrb[223].mxu0  ;;  %12038 = vmatmul.mubr.f32.vlgmr.msra.gmra.mrb[210].mxu1 %v8158_v3 }
0x17b6   :  { %v8251_v36 = vpop.f32.mrb[210].mxu1 }
0x17b7   :  { %v8252_v48 = vadd.f32 %v8879_v39, %v8251_v36  ;;  %v12039_v24 = vpop.f32.mrb[211].mxu1 }
0x17b9   :  { %8255 = vst [vmem:[%s18258_s26] sm:$0xff] %v8252_v48 }

</bundles_post_ra>
